<compile_context>
chip_gen: v5e
topology: v5e:2x2
jax: 0.10.0
libtpu: 0.0.40
codegen_flags: <defaults>
</compile_context>

<pallas_src>
import functools

import jax
import jax.numpy as jnp
import numpy as np
from jax.experimental import pallas as pl
from jax.experimental.pallas import tpu as pltpu

SK = 3  # dynamic (small) kernel size, fixed by the module


def _round_up(a, m):
    return (a + m - 1) // m * m


def _cdiv(a, b):
    return -(-a // b)


def _conv_attn_kernel(slab_ref, x2_ref, wk_ref, wa2_ref, ba_ref, out_ref,
                      col_ref, acc_ref, *, tap_offsets, group_sizes, pdim_p, Ltp):
    """Fused per-(batch, row-tile) kernel.

    slab_ref: (1, 1, pdim_p, F)        bf16 zero-padded x1 row-band (rows flattened)
    x2_ref  : (1, 1, C2, Ltp)          bf16 untouched channels of the same row-band
    wk_ref  : (1, n_groups, dim, TGp)  bf16 per-batch folded weights  aggr1 @ (LK + dyn-dw)
    wa2_ref : (dim, C2)                bf16 aggregation weight, x2 part
    ba_ref  : (dim, 1)                 f32 aggregation bias
    out_ref : (1, 1, dim, Ltp)         f32 output row-band (junk lanes cropped outside)
    col_ref : (2, TGp, Ltp)            bf16 double-buffered per-group im2col scratch
    acc_ref : (dim, Ltp)               f32 accumulator
    """
    # Seed the accumulator with the x2 half of the 1x1 aggregation (+ bias).
    # Independent of the conv -> overlaps the first im2col build, and the
    # epilogue is just a cast + store.
    acc_ref[...] = (jnp.dot(wa2_ref[...], x2_ref[0, 0],
                            preferred_element_type=jnp.float32) + ba_ref[...])

    # Large-kernel conv (dynamic depthwise + x1-aggregation folded into the
    # weights).  Taps are processed in groups so each MXU dot has a contraction
    # close to the MXU depth; the im2col scratch is double-buffered so the next
    # group's sublane-aligned copies overlap the current group's dot.
    t0 = 0
    for g, gsz in enumerate(group_sizes):
        s = g & 1
        rows = gsz * pdim_p
        for tl in range(gsz):
            off = tap_offsets[t0 + tl]
            col_ref[s, tl * pdim_p:(tl + 1) * pdim_p, :] = (
                slab_ref[0, 0, :, off:off + Ltp])
        # Ragged last group uses only the rows it wrote (never reads stale VMEM).
        acc_ref[...] += jnp.dot(wk_ref[0, g, :, :rows], col_ref[s, :rows, :],
                                preferred_element_type=jnp.float32)
        t0 += gsz

    out_ref[0, 0] = acc_ref[...].astype(out_ref.dtype)


def conv_attn_wrapper_forward(x, lk_filter, params, tile_rows=None,
                              vmem_budget_bytes=40 << 20, max_contract=256):
    """x: (B, dim, H, W) f32 NCHW, lk_filter: (pdim, pdim, K, K) f32.

    max_contract: per-dot contraction target (256 fills the v6e/v7x MXU; use 128
    on v5e).  vmem_budget_bytes drives the row-tile size; the default leaves
    comfortable headroom even on v7x's 64 MiB VMEM.
    """
    B, dim, H, W = x.shape
    pdim = params["pdim"]
    C2 = dim - pdim
    assert C2 > 0, "dim must be > pdim"
    K = lk_filter.shape[-1]
    assert K % 2 == 1 and K >= SK
    pad = K // 2
    Wp = W + 2 * pad

    pdim_p = _round_up(pdim, 8)                          # sublane-aligned channel block
    n_taps = K * K
    TG = max(1, min(max_contract // pdim_p, n_taps))     # taps per MXU dot
    TGp = TG * pdim_p
    n_groups = _cdiv(n_taps, TG)
    group_sizes = tuple(min(TG, n_taps - g * TG) for g in range(n_groups))
    s_max = (K - 1) * Wp + (K - 1)                       # max tap offset in the slab

    def vmem_bytes(th):
        lt = _round_up(th * Wp, 128)
        f = _round_up(max((th + K - 1) * Wp, s_max + lt), 128)
        return (2 * pdim_p * f * 2                 # slab (double-buffered, bf16)
                + 2 * C2 * lt * 2                  # x2
                + 2 * n_groups * dim * TGp * 2     # folded weights
                + 2 * dim * lt * 4                 # output block (f32)
                + 2 * TGp * lt * 2                 # im2col scratch (double-buffered)
                + dim * lt * 4)                    # accumulator

    # ---- row-tile size: largest band that fits the VMEM budget ----
    if tile_rows is not None:
        TH = max(1, min(tile_rows, H))
    else:
        TH = min(H, 64)
        while TH > 1 and vmem_bytes(TH) > vmem_budget_bytes:
            TH -= 1
    if B * _cdiv(H, TH) < 2 and H > 1:                   # keep both v7x TCs busy at B=1
        TH = _cdiv(H, 2)
    n_tiles = _cdiv(H, TH)
    Ht = n_tiles * TH
    R_slab = TH + K - 1
    Lt = TH * Wp
    Ltp = _round_up(Lt, 128)                             # lane-dense output length
    F = _round_up(max(R_slab * Wp, s_max + Ltp), 128)    # F >= s_max + Ltp (no OOB reads)

    x1 = x[:, :pdim]
    x2 = x[:, pdim:]

    # ---------- dwc_proj (tiny: global pool + two 1x1 convs on 1x1 features) ----------
    pooled = jnp.mean(x1, axis=(2, 3))                               # (B, pdim)
    h = pooled @ params["w1"].T + params["b1"]                       # (B, pdim//2)
    h = jax.nn.gelu(h, approximate=False)                            # torch GELU = erf
    dkflat = h @ params["w2"].T + params["b2"]                       # (B, pdim*9)
    dk = dkflat.reshape(B, pdim, SK, SK)

    # ---------- fold (dynamic depthwise 3x3) + (x1 half of aggr) into the LK weights ----------
    hp = jax.lax.Precision.HIGHEST
    lkw = jnp.transpose(lk_filter, (2, 3, 0, 1)).astype(jnp.float32)  # (K, K, p, i)
    eye = jnp.eye(pdim, dtype=jnp.float32)
    dw = jnp.einsum("bpyx,pi->byxpi", dk.astype(jnp.float32), eye)    # (B, SK, SK, p, i)
    off0 = K // 2 - SK // 2
    dw = jnp.pad(dw, ((0, 0), (off0, off0), (off0, off0), (0, 0), (0, 0)))
    wcomb = lkw[None] + dw                                            # (B, K, K, p, i)  f32
    wa1 = params["w_aggr"][:, :pdim].astype(jnp.float32)              # (dim, p)
    wfold = jnp.einsum("op,byxpi->byxoi", wa1, wcomb, precision=hp)   # (B, K, K, dim, i) f32
    wfold = jnp.pad(wfold, ((0, 0), (0, 0), (0, 0), (0, 0), (0, pdim_p - pdim)))
    wfold = wfold.reshape(B, n_taps, dim, pdim_p)
    wfold = jnp.pad(wfold, ((0, 0), (0, n_groups * TG - n_taps), (0, 0), (0, 0)))
    wk = wfold.reshape(B, n_groups, TG, dim, pdim_p).transpose(0, 1, 3, 2, 4)
    wk = wk.reshape(B, n_groups, dim, TGp).astype(jnp.bfloat16)       # single bf16 cast

    # ---------- layout glue: pad, tile rows with halo, flatten ----------
    # TODO(synk): the slab gather / transposes below are pure data movement XLA will
    #             not fuse across the pallas_call; fold into the producer layout if it
    #             shows up in end-to-end profiles.
    x1p = jnp.pad(x1, ((0, 0), (0, pdim_p - pdim),
                       (pad, pad + (Ht - H)), (pad, pad)))
    row_idx = (jnp.arange(n_tiles)[:, None] * TH
               + jnp.arange(R_slab)[None, :])                        # (n_tiles, R_slab)
    slab = x1p[:, :, row_idx, :]                                     # (B,pdim_p,n_tiles,R_slab,Wp)
    slab = jnp.transpose(slab, (0, 2, 1, 3, 4)).reshape(B, n_tiles, pdim_p, R_slab * Wp)
    slab = jnp.pad(slab, ((0, 0), (0, 0), (0, 0), (0, F - R_slab * Wp)))
    slab = slab.astype(jnp.bfloat16)                                 # (B, n_tiles, pdim_p, F)

    x2p = jnp.pad(x2, ((0, 0), (0, 0), (0, Ht - H), (0, Wp - W)))    # (B, C2, Ht, Wp)
    x2t = x2p.reshape(B, C2, n_tiles, TH, Wp).transpose(0, 2, 1, 3, 4)
    x2t = x2t.reshape(B, n_tiles, C2, Lt)
    x2t = jnp.pad(x2t, ((0, 0), (0, 0), (0, 0), (0, Ltp - Lt))).astype(jnp.bfloat16)

    wa2 = params["w_aggr"][:, pdim:].astype(jnp.bfloat16)            # (dim, C2)
    ba = params["b_aggr"][:, None].astype(jnp.float32)               # (dim, 1)

    tap_offsets = tuple((t // K) * Wp + (t % K) for t in range(n_taps))

    kernel = functools.partial(_conv_attn_kernel, tap_offsets=tap_offsets,
                               group_sizes=group_sizes, pdim_p=pdim_p, Ltp=Ltp)
    vmem_limit = int(min(max(vmem_bytes(TH) * 5 // 4 + (4 << 20), 16 << 20), 100 << 20))

    out_t = pl.pallas_call(
        kernel,
        out_shape=jax.ShapeDtypeStruct((B, n_tiles, dim, Ltp), jnp.float32),
        grid_spec=pltpu.PrefetchScalarGridSpec(
            num_scalar_prefetch=0,
            grid=(B, n_tiles),                    # B outermost: wk re-DMA'd once per batch
            in_specs=[
                pl.BlockSpec((1, 1, pdim_p, F), lambda b, t: (b, t, 0, 0)),
                pl.BlockSpec((1, 1, C2, Ltp), lambda b, t: (b, t, 0, 0)),
                pl.BlockSpec((1, n_groups, dim, TGp), lambda b, t: (b, 0, 0, 0)),
                pl.BlockSpec((dim, C2), lambda b, t: (0, 0)),
                pl.BlockSpec((dim, 1), lambda b, t: (0, 0)),
            ],
            out_specs=pl.BlockSpec((1, 1, dim, Ltp), lambda b, t: (b, t, 0, 0)),
            scratch_shapes=[
                pltpu.VMEM((2, TGp, Ltp), jnp.bfloat16),   # double-buffered im2col
                pltpu.VMEM((dim, Ltp), jnp.float32),       # (dim, Ltp) accumulator
            ]),
        compiler_params=pltpu.CompilerParams(
            dimension_semantics=("parallel", "parallel"),
            vmem_limit_bytes=vmem_limit),
    )(slab, x2t, wk, wa2, ba)

    # crop junk lanes / junk columns / padded rows and restore NCHW
    out = out_t[..., :Lt].reshape(B, n_tiles, dim, TH, Wp)[..., :W]
    out = jnp.transpose(out, (0, 2, 1, 3, 4)).reshape(B, dim, Ht, W)[:, :, :H, :]
    return out


def reference_forward(x, lk_filter, params):
    """Pure-JAX f32 reference (lax conv), for correctness checking."""
    B, dim, H, W = x.shape
    pdim = params["pdim"]
    K = lk_filter.shape[-1]
    hp = jax.lax.Precision.HIGHEST
    x1 = x[:, :pdim]
    x2 = x[:, pdim:]
    pooled = jnp.mean(x1, axis=(2, 3))
    h = jax.nn.gelu(pooled @ params["w1"].T + params["b1"], approximate=False)
    dkflat = h @ params["w2"].T + params["b2"]
    dk = dkflat.reshape(B * pdim, 1, SK, SK)
    out_lk = jax.lax.conv_general_dilated(
        x1, lk_filter, (1, 1), [(K // 2, K // 2)] * 2,
        dimension_numbers=("NCHW", "OIHW", "NCHW"), precision=hp)
    x1g = x1.reshape(1, B * pdim, H, W)
    out_dw = jax.lax.conv_general_dilated(
        x1g, dk, (1, 1), [(1, 1), (1, 1)],
        dimension_numbers=("NCHW", "OIHW", "NCHW"),
        feature_group_count=B * pdim, precision=hp).reshape(B, pdim, H, W)
    x1o = out_lk + out_dw
    xfull = jnp.concatenate([x1o, x2], axis=1)
    out = jnp.einsum("oc,bchw->bohw", params["w_aggr"], xfull, precision=hp)
    return out + params["b_aggr"][None, :, None, None]


if __name__ == "__main__":
    B, dim, pdim, H, W, K = 2, 8, 4, 16, 16, 13

    key = jax.random.PRNGKey(0)
    keys = jax.random.split(key, 8)
    x = jax.random.normal(keys[0], (B, dim, H, W), jnp.float32)
    lk_filter = jax.random.normal(keys[1], (pdim, pdim, K, K), jnp.float32) * 0.05

    params = {
        "pdim": pdim,
        # dwc_proj: Conv2d(pdim, pdim//2, 1) -> GELU -> Conv2d(pdim//2, pdim*9, 1)
        "w1": jax.random.normal(keys[2], (pdim // 2, pdim), jnp.float32) * 0.5,
        "b1": jax.random.normal(keys[3], (pdim // 2,), jnp.float32) * 0.1,
        # NOTE: the original module zero-initializes this last projection; we use
        # small random values so the dynamic-kernel path is actually exercised.
        "w2": jax.random.normal(keys[4], (pdim * SK * SK, pdim // 2), jnp.float32) * 0.1,
        "b2": jax.random.normal(keys[5], (pdim * SK * SK,), jnp.float32) * 0.1,
        # aggr: Conv2d(dim, dim, 1)
        "w_aggr": jax.random.normal(keys[6], (dim, dim), jnp.float32) * 0.2,
        "b_aggr": jax.random.normal(keys[7], (dim,), jnp.float32) * 0.1,
    }

    # tile_rows=8 -> grid of (B=2, n_tiles=2) so the spatial pipeline is exercised.
    out = conv_attn_wrapper_forward(x, lk_filter, params, tile_rows=8)
    out = jax.block_until_ready(out)
    assert out.shape == (B, dim, H, W)

    ref = reference_forward(x, lk_filter, params)
    # bf16 MXU inputs (f32 accumulation) -> relaxed tolerance vs. the f32 reference.
    np.testing.assert_allclose(np.asarray(out), np.asarray(ref), rtol=2e-2, atol=2e-2)

    print("KERNEL_OK")
</pallas_src>

<mosaic_0001>
module attributes {stable_mosaic.version = 11 : i64} {
  func.func @_conv_attn_kernel(%arg0: i32, %arg1: i32, %arg2: memref<1x1x8x640xbf16, #tpu.memory_space<vmem>>, %arg3: memref<1x1x4x256xbf16, #tpu.memory_space<vmem>>, %arg4: memref<1x6x8x256xbf16, #tpu.memory_space<vmem>>, %arg5: memref<8x4xbf16, #tpu.memory_space<vmem>>, %arg6: memref<8x1xf32, #tpu.memory_space<vmem>>, %arg7: memref<1x1x8x256xf32, #tpu.memory_space<vmem>>, %arg8: memref<2x256x256xbf16, #tpu.memory_space<vmem>>, %arg9: memref<8x256xf32, #tpu.memory_space<vmem>>) attributes {dimension_semantics = [#tpu.dimension_semantics<parallel>, #tpu.dimension_semantics<parallel>], iteration_bounds = array<i64: 2, 2>, scalar_prefetch = 0 : i64, scratch_operands = 2 : i64, tpu.core_type = #tpu.core_type<tc>, window_params = [{transform_indices = @transform_0, window_bounds = array<i64: 1, 1, 8, 640>}, {transform_indices = @transform_1, window_bounds = array<i64: 1, 1, 4, 256>}, {transform_indices = @transform_2, window_bounds = array<i64: 1, 6, 8, 256>}, {pipeline_mode = #tpu.pipeline_mode<synchronous>, transform_indices = @transform_3, window_bounds = array<i64: 8, 4>}, {pipeline_mode = #tpu.pipeline_mode<synchronous>, transform_indices = @transform_4, window_bounds = array<i64: 8, 1>}, {transform_indices = @transform_5, window_bounds = array<i64: 1, 1, 8, 256>}]} {
    %c0 = arith.constant 0 : index
    %c0_0 = arith.constant 0 : index
    %0 = vector.load %arg5[%c0, %c0_0] : memref<8x4xbf16, #tpu.memory_space<vmem>>, vector<8x4xbf16>
    %c0_1 = arith.constant 0 : index
    %c0_2 = arith.constant 0 : index
    %c0_3 = arith.constant 0 : index
    %c0_4 = arith.constant 0 : index
    %1 = vector.load %arg3[%c0_1, %c0_2, %c0_3, %c0_4] : memref<1x1x4x256xbf16, #tpu.memory_space<vmem>>, vector<1x1x4x256xbf16>
    %2 = vector.shape_cast %1 : vector<1x1x4x256xbf16> to vector<4x256xbf16>
    %cst = arith.constant dense<0.000000e+00> : vector<8x256xf32>
    %3 = tpu.matmul %0, %2, %cst {dimension_numbers = #tpu.dot_dimension_numbers<[1], [0], [0], [1], [0, 0, 1, 1], [], []>} : vector<8x4xbf16>, vector<4x256xbf16>, vector<8x256xf32> -> vector<8x256xf32>
    %c0_5 = arith.constant 0 : index
    %c0_6 = arith.constant 0 : index
    %4 = vector.load %arg6[%c0_5, %c0_6] : memref<8x1xf32, #tpu.memory_space<vmem>>, vector<8x1xf32>
    %5 = vector.broadcast %4 : vector<8x1xf32> to vector<8x256xf32>
    %6 = arith.addf %3, %5 : vector<8x256xf32>
    %c0_7 = arith.constant 0 : index
    %c0_8 = arith.constant 0 : index
    %7 = vector.load %arg9[%c0_7, %c0_8] : memref<8x256xf32, #tpu.memory_space<vmem>>, vector<8x256xf32>
    tpu.vector_store %arg9[%c0_7, %c0_8], %6 {strides = array<i32>} : memref<8x256xf32, #tpu.memory_space<vmem>>, vector<8x256xf32>,
    %c0_9 = arith.constant 0 : index
    %c0_10 = arith.constant 0 : index
    %c0_11 = arith.constant 0 : index
    %c0_12 = arith.constant 0 : index
    %8 = vector.load %arg2[%c0_9, %c0_10, %c0_11, %c0_12] : memref<1x1x8x640xbf16, #tpu.memory_space<vmem>>, vector<1x1x8x256xbf16>
    %9 = vector.shape_cast %8 : vector<1x1x8x256xbf16> to vector<8x256xbf16>
    %c0_13 = arith.constant 0 : index
    %c0_14 = arith.constant 0 : index
    %c0_15 = arith.constant 0 : index
    %10 = vector.load %arg8[%c0_13, %c0_14, %c0_15] : memref<2x256x256xbf16, #tpu.memory_space<vmem>>, vector<1x8x256xbf16>
    %11 = vector.shape_cast %10 : vector<1x8x256xbf16> to vector<8x256xbf16>
    %12 = vector.shape_cast %9 : vector<8x256xbf16> to vector<1x8x256xbf16>
    tpu.vector_store %arg8[%c0_13, %c0_14, %c0_15], %12 {strides = array<i32>} : memref<2x256x256xbf16, #tpu.memory_space<vmem>>, vector<1x8x256xbf16>,
    %c0_16 = arith.constant 0 : index
    %c0_17 = arith.constant 0 : index
    %c0_18 = arith.constant 0 : index
    %c1 = arith.constant 1 : index
    %13 = vector.load %arg2[%c0_16, %c0_17, %c0_18, %c1] : memref<1x1x8x640xbf16, #tpu.memory_space<vmem>>, vector<1x1x8x256xbf16>
    %14 = vector.shape_cast %13 : vector<1x1x8x256xbf16> to vector<8x256xbf16>
    %c0_19 = arith.constant 0 : index
    %c8 = arith.constant 8 : index
    %c0_20 = arith.constant 0 : index
    %15 = vector.load %arg8[%c0_19, %c8, %c0_20] : memref<2x256x256xbf16, #tpu.memory_space<vmem>>, vector<1x8x256xbf16>
    %16 = vector.shape_cast %15 : vector<1x8x256xbf16> to vector<8x256xbf16>
    %17 = vector.shape_cast %14 : vector<8x256xbf16> to vector<1x8x256xbf16>
    tpu.vector_store %arg8[%c0_19, %c8, %c0_20], %17 {strides = array<i32>} : memref<2x256x256xbf16, #tpu.memory_space<vmem>>, vector<1x8x256xbf16>,
    %c0_21 = arith.constant 0 : index
    %c0_22 = arith.constant 0 : index
    %c0_23 = arith.constant 0 : index
    %c2 = arith.constant 2 : index
    %18 = vector.load %arg2[%c0_21, %c0_22, %c0_23, %c2] : memref<1x1x8x640xbf16, #tpu.memory_space<vmem>>, vector<1x1x8x256xbf16>
    %19 = vector.shape_cast %18 : vector<1x1x8x256xbf16> to vector<8x256xbf16>
    %c0_24 = arith.constant 0 : index
    %c16 = arith.constant 16 : index
    %c0_25 = arith.constant 0 : index
    %20 = vector.load %arg8[%c0_24, %c16, %c0_25] : memref<2x256x256xbf16, #tpu.memory_space<vmem>>, vector<1x8x256xbf16>
    %21 = vector.shape_cast %20 : vector<1x8x256xbf16> to vector<8x256xbf16>
    %22 = vector.shape_cast %19 : vector<8x256xbf16> to vector<1x8x256xbf16>
    tpu.vector_store %arg8[%c0_24, %c16, %c0_25], %22 {strides = array<i32>} : memref<2x256x256xbf16, #tpu.memory_space<vmem>>, vector<1x8x256xbf16>,
    %c0_26 = arith.constant 0 : index
    %c0_27 = arith.constant 0 : index
    %c0_28 = arith.constant 0 : index
    %c3 = arith.constant 3 : index
    %23 = vector.load %arg2[%c0_26, %c0_27, %c0_28, %c3] : memref<1x1x8x640xbf16, #tpu.memory_space<vmem>>, vector<1x1x8x256xbf16>
    %24 = vector.shape_cast %23 : vector<1x1x8x256xbf16> to vector<8x256xbf16>
    %c0_29 = arith.constant 0 : index
    %c24 = arith.constant 24 : index
    %c0_30 = arith.constant 0 : index
    %25 = vector.load %arg8[%c0_29, %c24, %c0_30] : memref<2x256x256xbf16, #tpu.memory_space<vmem>>, vector<1x8x256xbf16>
    %26 = vector.shape_cast %25 : vector<1x8x256xbf16> to vector<8x256xbf16>
    %27 = vector.shape_cast %24 : vector<8x256xbf16> to vector<1x8x256xbf16>
    tpu.vector_store %arg8[%c0_29, %c24, %c0_30], %27 {strides = array<i32>} : memref<2x256x256xbf16, #tpu.memory_space<vmem>>, vector<1x8x256xbf16>,
    %c0_31 = arith.constant 0 : index
    %c0_32 = arith.constant 0 : index
    %c0_33 = arith.constant 0 : index
    %c4 = arith.constant 4 : index
    %28 = vector.load %arg2[%c0_31, %c0_32, %c0_33, %c4] : memref<1x1x8x640xbf16, #tpu.memory_space<vmem>>, vector<1x1x8x256xbf16>
    %29 = vector.shape_cast %28 : vector<1x1x8x256xbf16> to vector<8x256xbf16>
    %c0_34 = arith.constant 0 : index
    %c32 = arith.constant 32 : index
    %c0_35 = arith.constant 0 : index
    %30 = vector.load %arg8[%c0_34, %c32, %c0_35] : memref<2x256x256xbf16, #tpu.memory_space<vmem>>, vector<1x8x256xbf16>
    %31 = vector.shape_cast %30 : vector<1x8x256xbf16> to vector<8x256xbf16>
    %32 = vector.shape_cast %29 : vector<8x256xbf16> to vector<1x8x256xbf16>
    tpu.vector_store %arg8[%c0_34, %c32, %c0_35], %32 {strides = array<i32>} : memref<2x256x256xbf16, #tpu.memory_space<vmem>>, vector<1x8x256xbf16>,
    %c0_36 = arith.constant 0 : index
    %c0_37 = arith.constant 0 : index
    %c0_38 = arith.constant 0 : index
    %c5 = arith.constant 5 : index
    %33 = vector.load %arg2[%c0_36, %c0_37, %c0_38, %c5] : memref<1x1x8x640xbf16, #tpu.memory_space<vmem>>, vector<1x1x8x256xbf16>
    %34 = vector.shape_cast %33 : vector<1x1x8x256xbf16> to vector<8x256xbf16>
    %c0_39 = arith.constant 0 : index
    %c40 = arith.constant 40 : index
    %c0_40 = arith.constant 0 : index
    %35 = vector.load %arg8[%c0_39, %c40, %c0_40] : memref<2x256x256xbf16, #tpu.memory_space<vmem>>, vector<1x8x256xbf16>
    %36 = vector.shape_cast %35 : vector<1x8x256xbf16> to vector<8x256xbf16>
    %37 = vector.shape_cast %34 : vector<8x256xbf16> to vector<1x8x256xbf16>
    tpu.vector_store %arg8[%c0_39, %c40, %c0_40], %37 {strides = array<i32>} : memref<2x256x256xbf16, #tpu.memory_space<vmem>>, vector<1x8x256xbf16>,
    %c0_41 = arith.constant 0 : index
    %c0_42 = arith.constant 0 : index
    %c0_43 = arith.constant 0 : index
    %c6 = arith.constant 6 : index
    %38 = vector.load %arg2[%c0_41, %c0_42, %c0_43, %c6] : memref<1x1x8x640xbf16, #tpu.memory_space<vmem>>, vector<1x1x8x256xbf16>
    %39 = vector.shape_cast %38 : vector<1x1x8x256xbf16> to vector<8x256xbf16>
    %c0_44 = arith.constant 0 : index
    %c48 = arith.constant 48 : index
    %c0_45 = arith.constant 0 : index
    %40 = vector.load %arg8[%c0_44, %c48, %c0_45] : memref<2x256x256xbf16, #tpu.memory_space<vmem>>, vector<1x8x256xbf16>
    %41 = vector.shape_cast %40 : vector<1x8x256xbf16> to vector<8x256xbf16>
    %42 = vector.shape_cast %39 : vector<8x256xbf16> to vector<1x8x256xbf16>
    tpu.vector_store %arg8[%c0_44, %c48, %c0_45], %42 {strides = array<i32>} : memref<2x256x256xbf16, #tpu.memory_space<vmem>>, vector<1x8x256xbf16>,
    %c0_46 = arith.constant 0 : index
    %c0_47 = arith.constant 0 : index
    %c0_48 = arith.constant 0 : index
    %c7 = arith.constant 7 : index
    %43 = vector.load %arg2[%c0_46, %c0_47, %c0_48, %c7] : memref<1x1x8x640xbf16, #tpu.memory_space<vmem>>, vector<1x1x8x256xbf16>
    %44 = vector.shape_cast %43 : vector<1x1x8x256xbf16> to vector<8x256xbf16>
    %c0_49 = arith.constant 0 : index
    %c56 = arith.constant 56 : index
    %c0_50 = arith.constant 0 : index
    %45 = vector.load %arg8[%c0_49, %c56, %c0_50] : memref<2x256x256xbf16, #tpu.memory_space<vmem>>, vector<1x8x256xbf16>
    %46 = vector.shape_cast %45 : vector<1x8x256xbf16> to vector<8x256xbf16>
    %47 = vector.shape_cast %44 : vector<8x256xbf16> to vector<1x8x256xbf16>
    tpu.vector_store %arg8[%c0_49, %c56, %c0_50], %47 {strides = array<i32>} : memref<2x256x256xbf16, #tpu.memory_space<vmem>>, vector<1x8x256xbf16>,
    %c0_51 = arith.constant 0 : index
    %c0_52 = arith.constant 0 : index
    %c0_53 = arith.constant 0 : index
    %c8_54 = arith.constant 8 : index
    %48 = vector.load %arg2[%c0_51, %c0_52, %c0_53, %c8_54] : memref<1x1x8x640xbf16, #tpu.memory_space<vmem>>, vector<1x1x8x256xbf16>
    %49 = vector.shape_cast %48 : vector<1x1x8x256xbf16> to vector<8x256xbf16>
    %c0_55 = arith.constant 0 : index
    %c64 = arith.constant 64 : index
    %c0_56 = arith.constant 0 : index
    %50 = vector.load %arg8[%c0_55, %c64, %c0_56] : memref<2x256x256xbf16, #tpu.memory_space<vmem>>, vector<1x8x256xbf16>
    %51 = vector.shape_cast %50 : vector<1x8x256xbf16> to vector<8x256xbf16>
    %52 = vector.shape_cast %49 : vector<8x256xbf16> to vector<1x8x256xbf16>
    tpu.vector_store %arg8[%c0_55, %c64, %c0_56], %52 {strides = array<i32>} : memref<2x256x256xbf16, #tpu.memory_space<vmem>>, vector<1x8x256xbf16>,
    %c0_57 = arith.constant 0 : index
    %c0_58 = arith.constant 0 : index
    %c0_59 = arith.constant 0 : index
    %c9 = arith.constant 9 : index
    %53 = vector.load %arg2[%c0_57, %c0_58, %c0_59, %c9] : memref<1x1x8x640xbf16, #tpu.memory_space<vmem>>, vector<1x1x8x256xbf16>
    %54 = vector.shape_cast %53 : vector<1x1x8x256xbf16> to vector<8x256xbf16>
    %c0_60 = arith.constant 0 : index
    %c72 = arith.constant 72 : index
    %c0_61 = arith.constant 0 : index
    %55 = vector.load %arg8[%c0_60, %c72, %c0_61] : memref<2x256x256xbf16, #tpu.memory_space<vmem>>, vector<1x8x256xbf16>
    %56 = vector.shape_cast %55 : vector<1x8x256xbf16> to vector<8x256xbf16>
    %57 = vector.shape_cast %54 : vector<8x256xbf16> to vector<1x8x256xbf16>
    tpu.vector_store %arg8[%c0_60, %c72, %c0_61], %57 {strides = array<i32>} : memref<2x256x256xbf16, #tpu.memory_space<vmem>>, vector<1x8x256xbf16>,
    %c0_62 = arith.constant 0 : index
    %c0_63 = arith.constant 0 : index
    %c0_64 = arith.constant 0 : index
    %c10 = arith.constant 10 : index
    %58 = vector.load %arg2[%c0_62, %c0_63, %c0_64, %c10] : memref<1x1x8x640xbf16, #tpu.memory_space<vmem>>, vector<1x1x8x256xbf16>
    %59 = vector.shape_cast %58 : vector<1x1x8x256xbf16> to vector<8x256xbf16>
    %c0_65 = arith.constant 0 : index
    %c80 = arith.constant 80 : index
    %c0_66 = arith.constant 0 : index
    %60 = vector.load %arg8[%c0_65, %c80, %c0_66] : memref<2x256x256xbf16, #tpu.memory_space<vmem>>, vector<1x8x256xbf16>
    %61 = vector.shape_cast %60 : vector<1x8x256xbf16> to vector<8x256xbf16>
    %62 = vector.shape_cast %59 : vector<8x256xbf16> to vector<1x8x256xbf16>
    tpu.vector_store %arg8[%c0_65, %c80, %c0_66], %62 {strides = array<i32>} : memref<2x256x256xbf16, #tpu.memory_space<vmem>>, vector<1x8x256xbf16>,
    %c0_67 = arith.constant 0 : index
    %c0_68 = arith.constant 0 : index
    %c0_69 = arith.constant 0 : index
    %c11 = arith.constant 11 : index
    %63 = vector.load %arg2[%c0_67, %c0_68, %c0_69, %c11] : memref<1x1x8x640xbf16, #tpu.memory_space<vmem>>, vector<1x1x8x256xbf16>
    %64 = vector.shape_cast %63 : vector<1x1x8x256xbf16> to vector<8x256xbf16>
    %c0_70 = arith.constant 0 : index
    %c88 = arith.constant 88 : index
    %c0_71 = arith.constant 0 : index
    %65 = vector.load %arg8[%c0_70, %c88, %c0_71] : memref<2x256x256xbf16, #tpu.memory_space<vmem>>, vector<1x8x256xbf16>
    %66 = vector.shape_cast %65 : vector<1x8x256xbf16> to vector<8x256xbf16>
    %67 = vector.shape_cast %64 : vector<8x256xbf16> to vector<1x8x256xbf16>
    tpu.vector_store %arg8[%c0_70, %c88, %c0_71], %67 {strides = array<i32>} : memref<2x256x256xbf16, #tpu.memory_space<vmem>>, vector<1x8x256xbf16>,
    %c0_72 = arith.constant 0 : index
    %c0_73 = arith.constant 0 : index
    %c0_74 = arith.constant 0 : index
    %c12 = arith.constant 12 : index
    %68 = vector.load %arg2[%c0_72, %c0_73, %c0_74, %c12] : memref<1x1x8x640xbf16, #tpu.memory_space<vmem>>, vector<1x1x8x256xbf16>
    %69 = vector.shape_cast %68 : vector<1x1x8x256xbf16> to vector<8x256xbf16>
    %c0_75 = arith.constant 0 : index
    %c96 = arith.constant 96 : index
    %c0_76 = arith.constant 0 : index
    %70 = vector.load %arg8[%c0_75, %c96, %c0_76] : memref<2x256x256xbf16, #tpu.memory_space<vmem>>, vector<1x8x256xbf16>
    %71 = vector.shape_cast %70 : vector<1x8x256xbf16> to vector<8x256xbf16>
    %72 = vector.shape_cast %69 : vector<8x256xbf16> to vector<1x8x256xbf16>
    tpu.vector_store %arg8[%c0_75, %c96, %c0_76], %72 {strides = array<i32>} : memref<2x256x256xbf16, #tpu.memory_space<vmem>>, vector<1x8x256xbf16>,
    %c0_77 = arith.constant 0 : index
    %c0_78 = arith.constant 0 : index
    %c0_79 = arith.constant 0 : index
    %c28 = arith.constant 28 : index
    %73 = vector.load %arg2[%c0_77, %c0_78, %c0_79, %c28] : memref<1x1x8x640xbf16, #tpu.memory_space<vmem>>, vector<1x1x8x256xbf16>
    %74 = vector.shape_cast %73 : vector<1x1x8x256xbf16> to vector<8x256xbf16>
    %c0_80 = arith.constant 0 : index
    %c104 = arith.constant 104 : index
    %c0_81 = arith.constant 0 : index
    %75 = vector.load %arg8[%c0_80, %c104, %c0_81] : memref<2x256x256xbf16, #tpu.memory_space<vmem>>, vector<1x8x256xbf16>
    %76 = vector.shape_cast %75 : vector<1x8x256xbf16> to vector<8x256xbf16>
    %77 = vector.shape_cast %74 : vector<8x256xbf16> to vector<1x8x256xbf16>
    tpu.vector_store %arg8[%c0_80, %c104, %c0_81], %77 {strides = array<i32>} : memref<2x256x256xbf16, #tpu.memory_space<vmem>>, vector<1x8x256xbf16>,
    %c0_82 = arith.constant 0 : index
    %c0_83 = arith.constant 0 : index
    %c0_84 = arith.constant 0 : index
    %c29 = arith.constant 29 : index
    %78 = vector.load %arg2[%c0_82, %c0_83, %c0_84, %c29] : memref<1x1x8x640xbf16, #tpu.memory_space<vmem>>, vector<1x1x8x256xbf16>
    %79 = vector.shape_cast %78 : vector<1x1x8x256xbf16> to vector<8x256xbf16>
    %c0_85 = arith.constant 0 : index
    %c112 = arith.constant 112 : index
    %c0_86 = arith.constant 0 : index
    %80 = vector.load %arg8[%c0_85, %c112, %c0_86] : memref<2x256x256xbf16, #tpu.memory_space<vmem>>, vector<1x8x256xbf16>
    %81 = vector.shape_cast %80 : vector<1x8x256xbf16> to vector<8x256xbf16>
    %82 = vector.shape_cast %79 : vector<8x256xbf16> to vector<1x8x256xbf16>
    tpu.vector_store %arg8[%c0_85, %c112, %c0_86], %82 {strides = array<i32>} : memref<2x256x256xbf16, #tpu.memory_space<vmem>>, vector<1x8x256xbf16>,
    %c0_87 = arith.constant 0 : index
    %c0_88 = arith.constant 0 : index
    %c0_89 = arith.constant 0 : index
    %c30 = arith.constant 30 : index
    %83 = vector.load %arg2[%c0_87, %c0_88, %c0_89, %c30] : memref<1x1x8x640xbf16, #tpu.memory_space<vmem>>, vector<1x1x8x256xbf16>
    %84 = vector.shape_cast %83 : vector<1x1x8x256xbf16> to vector<8x256xbf16>
    %c0_90 = arith.constant 0 : index
    %c120 = arith.constant 120 : index
    %c0_91 = arith.constant 0 : index
    %85 = vector.load %arg8[%c0_90, %c120, %c0_91] : memref<2x256x256xbf16, #tpu.memory_space<vmem>>, vector<1x8x256xbf16>
    %86 = vector.shape_cast %85 : vector<1x8x256xbf16> to vector<8x256xbf16>
    %87 = vector.shape_cast %84 : vector<8x256xbf16> to vector<1x8x256xbf16>
    tpu.vector_store %arg8[%c0_90, %c120, %c0_91], %87 {strides = array<i32>} : memref<2x256x256xbf16, #tpu.memory_space<vmem>>, vector<1x8x256xbf16>,
    %c0_92 = arith.constant 0 : index
    %c0_93 = arith.constant 0 : index
    %c0_94 = arith.constant 0 : index
    %c31 = arith.constant 31 : index
    %88 = vector.load %arg2[%c0_92, %c0_93, %c0_94, %c31] : memref<1x1x8x640xbf16, #tpu.memory_space<vmem>>, vector<1x1x8x256xbf16>
    %89 = vector.shape_cast %88 : vector<1x1x8x256xbf16> to vector<8x256xbf16>
    %c0_95 = arith.constant 0 : index
    %c128 = arith.constant 128 : index
    %c0_96 = arith.constant 0 : index
    %90 = vector.load %arg8[%c0_95, %c128, %c0_96] : memref<2x256x256xbf16, #tpu.memory_space<vmem>>, vector<1x8x256xbf16>
    %91 = vector.shape_cast %90 : vector<1x8x256xbf16> to vector<8x256xbf16>
    %92 = vector.shape_cast %89 : vector<8x256xbf16> to vector<1x8x256xbf16>
    tpu.vector_store %arg8[%c0_95, %c128, %c0_96], %92 {strides = array<i32>} : memref<2x256x256xbf16, #tpu.memory_space<vmem>>, vector<1x8x256xbf16>,
    %c0_97 = arith.constant 0 : index
    %c0_98 = arith.constant 0 : index
    %c0_99 = arith.constant 0 : index
    %c32_100 = arith.constant 32 : index
    %93 = vector.load %arg2[%c0_97, %c0_98, %c0_99, %c32_100] : memref<1x1x8x640xbf16, #tpu.memory_space<vmem>>, vector<1x1x8x256xbf16>
    %94 = vector.shape_cast %93 : vector<1x1x8x256xbf16> to vector<8x256xbf16>
    %c0_101 = arith.constant 0 : index
    %c136 = arith.constant 136 : index
    %c0_102 = arith.constant 0 : index
    %95 = vector.load %arg8[%c0_101, %c136, %c0_102] : memref<2x256x256xbf16, #tpu.memory_space<vmem>>, vector<1x8x256xbf16>
    %96 = vector.shape_cast %95 : vector<1x8x256xbf16> to vector<8x256xbf16>
    %97 = vector.shape_cast %94 : vector<8x256xbf16> to vector<1x8x256xbf16>
    tpu.vector_store %arg8[%c0_101, %c136, %c0_102], %97 {strides = array<i32>} : memref<2x256x256xbf16, #tpu.memory_space<vmem>>, vector<1x8x256xbf16>,
    %c0_103 = arith.constant 0 : index
    %c0_104 = arith.constant 0 : index
    %c0_105 = arith.constant 0 : index
    %c33 = arith.constant 33 : index
    %98 = vector.load %arg2[%c0_103, %c0_104, %c0_105, %c33] : memref<1x1x8x640xbf16, #tpu.memory_space<vmem>>, vector<1x1x8x256xbf16>
    %99 = vector.shape_cast %98 : vector<1x1x8x256xbf16> to vector<8x256xbf16>
    %c0_106 = arith.constant 0 : index
    %c144 = arith.constant 144 : index
    %c0_107 = arith.constant 0 : index
    %100 = vector.load %arg8[%c0_106, %c144, %c0_107] : memref<2x256x256xbf16, #tpu.memory_space<vmem>>, vector<1x8x256xbf16>
    %101 = vector.shape_cast %100 : vector<1x8x256xbf16> to vector<8x256xbf16>
    %102 = vector.shape_cast %99 : vector<8x256xbf16> to vector<1x8x256xbf16>
    tpu.vector_store %arg8[%c0_106, %c144, %c0_107], %102 {strides = array<i32>} : memref<2x256x256xbf16, #tpu.memory_space<vmem>>, vector<1x8x256xbf16>,
    %c0_108 = arith.constant 0 : index
    %c0_109 = arith.constant 0 : index
    %c0_110 = arith.constant 0 : index
    %c34 = arith.constant 34 : index
    %103 = vector.load %arg2[%c0_108, %c0_109, %c0_110, %c34] : memref<1x1x8x640xbf16, #tpu.memory_space<vmem>>, vector<1x1x8x256xbf16>
    %104 = vector.shape_cast %103 : vector<1x1x8x256xbf16> to vector<8x256xbf16>
    %c0_111 = arith.constant 0 : index
    %c152 = arith.constant 152 : index
    %c0_112 = arith.constant 0 : index
    %105 = vector.load %arg8[%c0_111, %c152, %c0_112] : memref<2x256x256xbf16, #tpu.memory_space<vmem>>, vector<1x8x256xbf16>
    %106 = vector.shape_cast %105 : vector<1x8x256xbf16> to vector<8x256xbf16>
    %107 = vector.shape_cast %104 : vector<8x256xbf16> to vector<1x8x256xbf16>
    tpu.vector_store %arg8[%c0_111, %c152, %c0_112], %107 {strides = array<i32>} : memref<2x256x256xbf16, #tpu.memory_space<vmem>>, vector<1x8x256xbf16>,
    %c0_113 = arith.constant 0 : index
    %c0_114 = arith.constant 0 : index
    %c0_115 = arith.constant 0 : index
    %c35 = arith.constant 35 : index
    %108 = vector.load %arg2[%c0_113, %c0_114, %c0_115, %c35] : memref<1x1x8x640xbf16, #tpu.memory_space<vmem>>, vector<1x1x8x256xbf16>
    %109 = vector.shape_cast %108 : vector<1x1x8x256xbf16> to vector<8x256xbf16>
    %c0_116 = arith.constant 0 : index
    %c160 = arith.constant 160 : index
    %c0_117 = arith.constant 0 : index
    %110 = vector.load %arg8[%c0_116, %c160, %c0_117] : memref<2x256x256xbf16, #tpu.memory_space<vmem>>, vector<1x8x256xbf16>
    %111 = vector.shape_cast %110 : vector<1x8x256xbf16> to vector<8x256xbf16>
    %112 = vector.shape_cast %109 : vector<8x256xbf16> to vector<1x8x256xbf16>
    tpu.vector_store %arg8[%c0_116, %c160, %c0_117], %112 {strides = array<i32>} : memref<2x256x256xbf16, #tpu.memory_space<vmem>>, vector<1x8x256xbf16>,
    %c0_118 = arith.constant 0 : index
    %c0_119 = arith.constant 0 : index
    %c0_120 = arith.constant 0 : index
    %c36 = arith.constant 36 : index
    %113 = vector.load %arg2[%c0_118, %c0_119, %c0_120, %c36] : memref<1x1x8x640xbf16, #tpu.memory_space<vmem>>, vector<1x1x8x256xbf16>
    %114 = vector.shape_cast %113 : vector<1x1x8x256xbf16> to vector<8x256xbf16>
    %c0_121 = arith.constant 0 : index
    %c168 = arith.constant 168 : index
    %c0_122 = arith.constant 0 : index
    %115 = vector.load %arg8[%c0_121, %c168, %c0_122] : memref<2x256x256xbf16, #tpu.memory_space<vmem>>, vector<1x8x256xbf16>
    %116 = vector.shape_cast %115 : vector<1x8x256xbf16> to vector<8x256xbf16>
    %117 = vector.shape_cast %114 : vector<8x256xbf16> to vector<1x8x256xbf16>
    tpu.vector_store %arg8[%c0_121, %c168, %c0_122], %117 {strides = array<i32>} : memref<2x256x256xbf16, #tpu.memory_space<vmem>>, vector<1x8x256xbf16>,
    %c0_123 = arith.constant 0 : index
    %c0_124 = arith.constant 0 : index
    %c0_125 = arith.constant 0 : index
    %c37 = arith.constant 37 : index
    %118 = vector.load %arg2[%c0_123, %c0_124, %c0_125, %c37] : memref<1x1x8x640xbf16, #tpu.memory_space<vmem>>, vector<1x1x8x256xbf16>
    %119 = vector.shape_cast %118 : vector<1x1x8x256xbf16> to vector<8x256xbf16>
    %c0_126 = arith.constant 0 : index
    %c176 = arith.constant 176 : index
    %c0_127 = arith.constant 0 : index
    %120 = vector.load %arg8[%c0_126, %c176, %c0_127] : memref<2x256x256xbf16, #tpu.memory_space<vmem>>, vector<1x8x256xbf16>
    %121 = vector.shape_cast %120 : vector<1x8x256xbf16> to vector<8x256xbf16>
    %122 = vector.shape_cast %119 : vector<8x256xbf16> to vector<1x8x256xbf16>
    tpu.vector_store %arg8[%c0_126, %c176, %c0_127], %122 {strides = array<i32>} : memref<2x256x256xbf16, #tpu.memory_space<vmem>>, vector<1x8x256xbf16>,
    %c0_128 = arith.constant 0 : index
    %c0_129 = arith.constant 0 : index
    %c0_130 = arith.constant 0 : index
    %c38 = arith.constant 38 : index
    %123 = vector.load %arg2[%c0_128, %c0_129, %c0_130, %c38] : memref<1x1x8x640xbf16, #tpu.memory_space<vmem>>, vector<1x1x8x256xbf16>
    %124 = vector.shape_cast %123 : vector<1x1x8x256xbf16> to vector<8x256xbf16>
    %c0_131 = arith.constant 0 : index
    %c184 = arith.constant 184 : index
    %c0_132 = arith.constant 0 : index
    %125 = vector.load %arg8[%c0_131, %c184, %c0_132] : memref<2x256x256xbf16, #tpu.memory_space<vmem>>, vector<1x8x256xbf16>
    %126 = vector.shape_cast %125 : vector<1x8x256xbf16> to vector<8x256xbf16>
    %127 = vector.shape_cast %124 : vector<8x256xbf16> to vector<1x8x256xbf16>
    tpu.vector_store %arg8[%c0_131, %c184, %c0_132], %127 {strides = array<i32>} : memref<2x256x256xbf16, #tpu.memory_space<vmem>>, vector<1x8x256xbf16>,
    %c0_133 = arith.constant 0 : index
    %c0_134 = arith.constant 0 : index
    %c0_135 = arith.constant 0 : index
    %c39 = arith.constant 39 : index
    %128 = vector.load %arg2[%c0_133, %c0_134, %c0_135, %c39] : memref<1x1x8x640xbf16, #tpu.memory_space<vmem>>, vector<1x1x8x256xbf16>
    %129 = vector.shape_cast %128 : vector<1x1x8x256xbf16> to vector<8x256xbf16>
    %c0_136 = arith.constant 0 : index
    %c192 = arith.constant 192 : index
    %c0_137 = arith.constant 0 : index
    %130 = vector.load %arg8[%c0_136, %c192, %c0_137] : memref<2x256x256xbf16, #tpu.memory_space<vmem>>, vector<1x8x256xbf16>
    %131 = vector.shape_cast %130 : vector<1x8x256xbf16> to vector<8x256xbf16>
    %132 = vector.shape_cast %129 : vector<8x256xbf16> to vector<1x8x256xbf16>
    tpu.vector_store %arg8[%c0_136, %c192, %c0_137], %132 {strides = array<i32>} : memref<2x256x256xbf16, #tpu.memory_space<vmem>>, vector<1x8x256xbf16>,
    %c0_138 = arith.constant 0 : index
    %c0_139 = arith.constant 0 : index
    %c0_140 = arith.constant 0 : index
    %c40_141 = arith.constant 40 : index
    %133 = vector.load %arg2[%c0_138, %c0_139, %c0_140, %c40_141] : memref<1x1x8x640xbf16, #tpu.memory_space<vmem>>, vector<1x1x8x256xbf16>
    %134 = vector.shape_cast %133 : vector<1x1x8x256xbf16> to vector<8x256xbf16>
    %c0_142 = arith.constant 0 : index
    %c200 = arith.constant 200 : index
    %c0_143 = arith.constant 0 : index
    %135 = vector.load %arg8[%c0_142, %c200, %c0_143] : memref<2x256x256xbf16, #tpu.memory_space<vmem>>, vector<1x8x256xbf16>
    %136 = vector.shape_cast %135 : vector<1x8x256xbf16> to vector<8x256xbf16>
    %137 = vector.shape_cast %134 : vector<8x256xbf16> to vector<1x8x256xbf16>
    tpu.vector_store %arg8[%c0_142, %c200, %c0_143], %137 {strides = array<i32>} : memref<2x256x256xbf16, #tpu.memory_space<vmem>>, vector<1x8x256xbf16>,
    %c0_144 = arith.constant 0 : index
    %c0_145 = arith.constant 0 : index
    %c0_146 = arith.constant 0 : index
    %c56_147 = arith.constant 56 : index
    %138 = vector.load %arg2[%c0_144, %c0_145, %c0_146, %c56_147] : memref<1x1x8x640xbf16, #tpu.memory_space<vmem>>, vector<1x1x8x256xbf16>
    %139 = vector.shape_cast %138 : vector<1x1x8x256xbf16> to vector<8x256xbf16>
    %c0_148 = arith.constant 0 : index
    %c208 = arith.constant 208 : index
    %c0_149 = arith.constant 0 : index
    %140 = vector.load %arg8[%c0_148, %c208, %c0_149] : memref<2x256x256xbf16, #tpu.memory_space<vmem>>, vector<1x8x256xbf16>
    %141 = vector.shape_cast %140 : vector<1x8x256xbf16> to vector<8x256xbf16>
    %142 = vector.shape_cast %139 : vector<8x256xbf16> to vector<1x8x256xbf16>
    tpu.vector_store %arg8[%c0_148, %c208, %c0_149], %142 {strides = array<i32>} : memref<2x256x256xbf16, #tpu.memory_space<vmem>>, vector<1x8x256xbf16>,
    %c0_150 = arith.constant 0 : index
    %c0_151 = arith.constant 0 : index
    %c0_152 = arith.constant 0 : index
    %c57 = arith.constant 57 : index
    %143 = vector.load %arg2[%c0_150, %c0_151, %c0_152, %c57] : memref<1x1x8x640xbf16, #tpu.memory_space<vmem>>, vector<1x1x8x256xbf16>
    %144 = vector.shape_cast %143 : vector<1x1x8x256xbf16> to vector<8x256xbf16>
    %c0_153 = arith.constant 0 : index
    %c216 = arith.constant 216 : index
    %c0_154 = arith.constant 0 : index
    %145 = vector.load %arg8[%c0_153, %c216, %c0_154] : memref<2x256x256xbf16, #tpu.memory_space<vmem>>, vector<1x8x256xbf16>
    %146 = vector.shape_cast %145 : vector<1x8x256xbf16> to vector<8x256xbf16>
    %147 = vector.shape_cast %144 : vector<8x256xbf16> to vector<1x8x256xbf16>
    tpu.vector_store %arg8[%c0_153, %c216, %c0_154], %147 {strides = array<i32>} : memref<2x256x256xbf16, #tpu.memory_space<vmem>>, vector<1x8x256xbf16>,
    %c0_155 = arith.constant 0 : index
    %c0_156 = arith.constant 0 : index
    %c0_157 = arith.constant 0 : index
    %c58 = arith.constant 58 : index
    %148 = vector.load %arg2[%c0_155, %c0_156, %c0_157, %c58] : memref<1x1x8x640xbf16, #tpu.memory_space<vmem>>, vector<1x1x8x256xbf16>
    %149 = vector.shape_cast %148 : vector<1x1x8x256xbf16> to vector<8x256xbf16>
    %c0_158 = arith.constant 0 : index
    %c224 = arith.constant 224 : index
    %c0_159 = arith.constant 0 : index
    %150 = vector.load %arg8[%c0_158, %c224, %c0_159] : memref<2x256x256xbf16, #tpu.memory_space<vmem>>, vector<1x8x256xbf16>
    %151 = vector.shape_cast %150 : vector<1x8x256xbf16> to vector<8x256xbf16>
    %152 = vector.shape_cast %149 : vector<8x256xbf16> to vector<1x8x256xbf16>
    tpu.vector_store %arg8[%c0_158, %c224, %c0_159], %152 {strides = array<i32>} : memref<2x256x256xbf16, #tpu.memory_space<vmem>>, vector<1x8x256xbf16>,
    %c0_160 = arith.constant 0 : index
    %c0_161 = arith.constant 0 : index
    %c0_162 = arith.constant 0 : index
    %c59 = arith.constant 59 : index
    %153 = vector.load %arg2[%c0_160, %c0_161, %c0_162, %c59] : memref<1x1x8x640xbf16, #tpu.memory_space<vmem>>, vector<1x1x8x256xbf16>
    %154 = vector.shape_cast %153 : vector<1x1x8x256xbf16> to vector<8x256xbf16>
    %c0_163 = arith.constant 0 : index
    %c232 = arith.constant 232 : index
    %c0_164 = arith.constant 0 : index
    %155 = vector.load %arg8[%c0_163, %c232, %c0_164] : memref<2x256x256xbf16, #tpu.memory_space<vmem>>, vector<1x8x256xbf16>
    %156 = vector.shape_cast %155 : vector<1x8x256xbf16> to vector<8x256xbf16>
    %157 = vector.shape_cast %154 : vector<8x256xbf16> to vector<1x8x256xbf16>
    tpu.vector_store %arg8[%c0_163, %c232, %c0_164], %157 {strides = array<i32>} : memref<2x256x256xbf16, #tpu.memory_space<vmem>>, vector<1x8x256xbf16>,
    %c0_165 = arith.constant 0 : index
    %c0_166 = arith.constant 0 : index
    %c0_167 = arith.constant 0 : index
    %c60 = arith.constant 60 : index
    %158 = vector.load %arg2[%c0_165, %c0_166, %c0_167, %c60] : memref<1x1x8x640xbf16, #tpu.memory_space<vmem>>, vector<1x1x8x256xbf16>
    %159 = vector.shape_cast %158 : vector<1x1x8x256xbf16> to vector<8x256xbf16>
    %c0_168 = arith.constant 0 : index
    %c240 = arith.constant 240 : index
    %c0_169 = arith.constant 0 : index
    %160 = vector.load %arg8[%c0_168, %c240, %c0_169] : memref<2x256x256xbf16, #tpu.memory_space<vmem>>, vector<1x8x256xbf16>
    %161 = vector.shape_cast %160 : vector<1x8x256xbf16> to vector<8x256xbf16>
    %162 = vector.shape_cast %159 : vector<8x256xbf16> to vector<1x8x256xbf16>
    tpu.vector_store %arg8[%c0_168, %c240, %c0_169], %162 {strides = array<i32>} : memref<2x256x256xbf16, #tpu.memory_space<vmem>>, vector<1x8x256xbf16>,
    %c0_170 = arith.constant 0 : index
    %c0_171 = arith.constant 0 : index
    %c0_172 = arith.constant 0 : index
    %c61 = arith.constant 61 : index
    %163 = vector.load %arg2[%c0_170, %c0_171, %c0_172, %c61] : memref<1x1x8x640xbf16, #tpu.memory_space<vmem>>, vector<1x1x8x256xbf16>
    %164 = vector.shape_cast %163 : vector<1x1x8x256xbf16> to vector<8x256xbf16>
    %c0_173 = arith.constant 0 : index
    %c248 = arith.constant 248 : index
    %c0_174 = arith.constant 0 : index
    %165 = vector.load %arg8[%c0_173, %c248, %c0_174] : memref<2x256x256xbf16, #tpu.memory_space<vmem>>, vector<1x8x256xbf16>
    %166 = vector.shape_cast %165 : vector<1x8x256xbf16> to vector<8x256xbf16>
    %167 = vector.shape_cast %164 : vector<8x256xbf16> to vector<1x8x256xbf16>
    tpu.vector_store %arg8[%c0_173, %c248, %c0_174], %167 {strides = array<i32>} : memref<2x256x256xbf16, #tpu.memory_space<vmem>>, vector<1x8x256xbf16>,
    %c0_175 = arith.constant 0 : index
    %c0_176 = arith.constant 0 : index
    %168 = vector.load %arg9[%c0_175, %c0_176] : memref<8x256xf32, #tpu.memory_space<vmem>>, vector<8x256xf32>
    %c0_177 = arith.constant 0 : index
    %c0_178 = arith.constant 0 : index
    %c0_179 = arith.constant 0 : index
    %c0_180 = arith.constant 0 : index
    %169 = vector.load %arg4[%c0_177, %c0_178, %c0_179, %c0_180] : memref<1x6x8x256xbf16, #tpu.memory_space<vmem>>, vector<1x1x8x256xbf16>
    %170 = vector.shape_cast %169 : vector<1x1x8x256xbf16> to vector<8x256xbf16>
    %c0_181 = arith.constant 0 : index
    %c0_182 = arith.constant 0 : index
    %c0_183 = arith.constant 0 : index
    %171 = vector.load %arg8[%c0_181, %c0_182, %c0_183] : memref<2x256x256xbf16, #tpu.memory_space<vmem>>, vector<1x256x256xbf16>
    %172 = vector.shape_cast %171 : vector<1x256x256xbf16> to vector<256x256xbf16>
    %cst_184 = arith.constant dense<0.000000e+00> : vector<8x256xf32>
    %173 = tpu.matmul %170, %172, %cst_184 {dimension_numbers = #tpu.dot_dimension_numbers<[1], [0], [0], [1], [0, 0, 1, 1], [], []>} : vector<8x256xbf16>, vector<256x256xbf16>, vector<8x256xf32> -> vector<8x256xf32>
    %174 = arith.addf %168, %173 : vector<8x256xf32>
    %c0_185 = arith.constant 0 : index
    %c0_186 = arith.constant 0 : index
    %175 = vector.load %arg9[%c0_185, %c0_186] : memref<8x256xf32, #tpu.memory_space<vmem>>, vector<8x256xf32>
    tpu.vector_store %arg9[%c0_185, %c0_186], %174 {strides = array<i32>} : memref<8x256xf32, #tpu.memory_space<vmem>>, vector<8x256xf32>,
    %c0_187 = arith.constant 0 : index
    %c0_188 = arith.constant 0 : index
    %c0_189 = arith.constant 0 : index
    %c62 = arith.constant 62 : index
    %176 = vector.load %arg2[%c0_187, %c0_188, %c0_189, %c62] : memref<1x1x8x640xbf16, #tpu.memory_space<vmem>>, vector<1x1x8x256xbf16>
    %177 = vector.shape_cast %176 : vector<1x1x8x256xbf16> to vector<8x256xbf16>
    %c1_190 = arith.constant 1 : index
    %c0_191 = arith.constant 0 : index
    %c0_192 = arith.constant 0 : index
    %178 = vector.load %arg8[%c1_190, %c0_191, %c0_192] : memref<2x256x256xbf16, #tpu.memory_space<vmem>>, vector<1x8x256xbf16>
    %179 = vector.shape_cast %178 : vector<1x8x256xbf16> to vector<8x256xbf16>
    %180 = vector.shape_cast %177 : vector<8x256xbf16> to vector<1x8x256xbf16>
    tpu.vector_store %arg8[%c1_190, %c0_191, %c0_192], %180 {strides = array<i32>} : memref<2x256x256xbf16, #tpu.memory_space<vmem>>, vector<1x8x256xbf16>,
    %c0_193 = arith.constant 0 : index
    %c0_194 = arith.constant 0 : index
    %c0_195 = arith.constant 0 : index
    %c63 = arith.constant 63 : index
    %181 = vector.load %arg2[%c0_193, %c0_194, %c0_195, %c63] : memref<1x1x8x640xbf16, #tpu.memory_space<vmem>>, vector<1x1x8x256xbf16>
    %182 = vector.shape_cast %181 : vector<1x1x8x256xbf16> to vector<8x256xbf16>
    %c1_196 = arith.constant 1 : index
    %c8_197 = arith.constant 8 : index
    %c0_198 = arith.constant 0 : index
    %183 = vector.load %arg8[%c1_196, %c8_197, %c0_198] : memref<2x256x256xbf16, #tpu.memory_space<vmem>>, vector<1x8x256xbf16>
    %184 = vector.shape_cast %183 : vector<1x8x256xbf16> to vector<8x256xbf16>
    %185 = vector.shape_cast %182 : vector<8x256xbf16> to vector<1x8x256xbf16>
    tpu.vector_store %arg8[%c1_196, %c8_197, %c0_198], %185 {strides = array<i32>} : memref<2x256x256xbf16, #tpu.memory_space<vmem>>, vector<1x8x256xbf16>,
    %c0_199 = arith.constant 0 : index
    %c0_200 = arith.constant 0 : index
    %c0_201 = arith.constant 0 : index
    %c64_202 = arith.constant 64 : index
    %186 = vector.load %arg2[%c0_199, %c0_200, %c0_201, %c64_202] : memref<1x1x8x640xbf16, #tpu.memory_space<vmem>>, vector<1x1x8x256xbf16>
    %187 = vector.shape_cast %186 : vector<1x1x8x256xbf16> to vector<8x256xbf16>
    %c1_203 = arith.constant 1 : index
    %c16_204 = arith.constant 16 : index
    %c0_205 = arith.constant 0 : index
    %188 = vector.load %arg8[%c1_203, %c16_204, %c0_205] : memref<2x256x256xbf16, #tpu.memory_space<vmem>>, vector<1x8x256xbf16>
    %189 = vector.shape_cast %188 : vector<1x8x256xbf16> to vector<8x256xbf16>
    %190 = vector.shape_cast %187 : vector<8x256xbf16> to vector<1x8x256xbf16>
    tpu.vector_store %arg8[%c1_203, %c16_204, %c0_205], %190 {strides = array<i32>} : memref<2x256x256xbf16, #tpu.memory_space<vmem>>, vector<1x8x256xbf16>,
    %c0_206 = arith.constant 0 : index
    %c0_207 = arith.constant 0 : index
    %c0_208 = arith.constant 0 : index
    %c65 = arith.constant 65 : index
    %191 = vector.load %arg2[%c0_206, %c0_207, %c0_208, %c65] : memref<1x1x8x640xbf16, #tpu.memory_space<vmem>>, vector<1x1x8x256xbf16>
    %192 = vector.shape_cast %191 : vector<1x1x8x256xbf16> to vector<8x256xbf16>
    %c1_209 = arith.constant 1 : index
    %c24_210 = arith.constant 24 : index
    %c0_211 = arith.constant 0 : index
    %193 = vector.load %arg8[%c1_209, %c24_210, %c0_211] : memref<2x256x256xbf16, #tpu.memory_space<vmem>>, vector<1x8x256xbf16>
    %194 = vector.shape_cast %193 : vector<1x8x256xbf16> to vector<8x256xbf16>
    %195 = vector.shape_cast %192 : vector<8x256xbf16> to vector<1x8x256xbf16>
    tpu.vector_store %arg8[%c1_209, %c24_210, %c0_211], %195 {strides = array<i32>} : memref<2x256x256xbf16, #tpu.memory_space<vmem>>, vector<1x8x256xbf16>,
    %c0_212 = arith.constant 0 : index
    %c0_213 = arith.constant 0 : index
    %c0_214 = arith.constant 0 : index
    %c66 = arith.constant 66 : index
    %196 = vector.load %arg2[%c0_212, %c0_213, %c0_214, %c66] : memref<1x1x8x640xbf16, #tpu.memory_space<vmem>>, vector<1x1x8x256xbf16>
    %197 = vector.shape_cast %196 : vector<1x1x8x256xbf16> to vector<8x256xbf16>
    %c1_215 = arith.constant 1 : index
    %c32_216 = arith.constant 32 : index
    %c0_217 = arith.constant 0 : index
    %198 = vector.load %arg8[%c1_215, %c32_216, %c0_217] : memref<2x256x256xbf16, #tpu.memory_space<vmem>>, vector<1x8x256xbf16>
    %199 = vector.shape_cast %198 : vector<1x8x256xbf16> to vector<8x256xbf16>
    %200 = vector.shape_cast %197 : vector<8x256xbf16> to vector<1x8x256xbf16>
    tpu.vector_store %arg8[%c1_215, %c32_216, %c0_217], %200 {strides = array<i32>} : memref<2x256x256xbf16, #tpu.memory_space<vmem>>, vector<1x8x256xbf16>,
    %c0_218 = arith.constant 0 : index
    %c0_219 = arith.constant 0 : index
    %c0_220 = arith.constant 0 : index
    %c67 = arith.constant 67 : index
    %201 = vector.load %arg2[%c0_218, %c0_219, %c0_220, %c67] : memref<1x1x8x640xbf16, #tpu.memory_space<vmem>>, vector<1x1x8x256xbf16>
    %202 = vector.shape_cast %201 : vector<1x1x8x256xbf16> to vector<8x256xbf16>
    %c1_221 = arith.constant 1 : index
    %c40_222 = arith.constant 40 : index
    %c0_223 = arith.constant 0 : index
    %203 = vector.load %arg8[%c1_221, %c40_222, %c0_223] : memref<2x256x256xbf16, #tpu.memory_space<vmem>>, vector<1x8x256xbf16>
    %204 = vector.shape_cast %203 : vector<1x8x256xbf16> to vector<8x256xbf16>
    %205 = vector.shape_cast %202 : vector<8x256xbf16> to vector<1x8x256xbf16>
    tpu.vector_store %arg8[%c1_221, %c40_222, %c0_223], %205 {strides = array<i32>} : memref<2x256x256xbf16, #tpu.memory_space<vmem>>, vector<1x8x256xbf16>,
    %c0_224 = arith.constant 0 : index
    %c0_225 = arith.constant 0 : index
    %c0_226 = arith.constant 0 : index
    %c68 = arith.constant 68 : index
    %206 = vector.load %arg2[%c0_224, %c0_225, %c0_226, %c68] : memref<1x1x8x640xbf16, #tpu.memory_space<vmem>>, vector<1x1x8x256xbf16>
    %207 = vector.shape_cast %206 : vector<1x1x8x256xbf16> to vector<8x256xbf16>
    %c1_227 = arith.constant 1 : index
    %c48_228 = arith.constant 48 : index
    %c0_229 = arith.constant 0 : index
    %208 = vector.load %arg8[%c1_227, %c48_228, %c0_229] : memref<2x256x256xbf16, #tpu.memory_space<vmem>>, vector<1x8x256xbf16>
    %209 = vector.shape_cast %208 : vector<1x8x256xbf16> to vector<8x256xbf16>
    %210 = vector.shape_cast %207 : vector<8x256xbf16> to vector<1x8x256xbf16>
    tpu.vector_store %arg8[%c1_227, %c48_228, %c0_229], %210 {strides = array<i32>} : memref<2x256x256xbf16, #tpu.memory_space<vmem>>, vector<1x8x256xbf16>,
    %c0_230 = arith.constant 0 : index
    %c0_231 = arith.constant 0 : index
    %c0_232 = arith.constant 0 : index
    %c84 = arith.constant 84 : index
    %211 = vector.load %arg2[%c0_230, %c0_231, %c0_232, %c84] : memref<1x1x8x640xbf16, #tpu.memory_space<vmem>>, vector<1x1x8x256xbf16>
    %212 = vector.shape_cast %211 : vector<1x1x8x256xbf16> to vector<8x256xbf16>
    %c1_233 = arith.constant 1 : index
    %c56_234 = arith.constant 56 : index
    %c0_235 = arith.constant 0 : index
    %213 = vector.load %arg8[%c1_233, %c56_234, %c0_235] : memref<2x256x256xbf16, #tpu.memory_space<vmem>>, vector<1x8x256xbf16>
    %214 = vector.shape_cast %213 : vector<1x8x256xbf16> to vector<8x256xbf16>
    %215 = vector.shape_cast %212 : vector<8x256xbf16> to vector<1x8x256xbf16>
    tpu.vector_store %arg8[%c1_233, %c56_234, %c0_235], %215 {strides = array<i32>} : memref<2x256x256xbf16, #tpu.memory_space<vmem>>, vector<1x8x256xbf16>,
    %c0_236 = arith.constant 0 : index
    %c0_237 = arith.constant 0 : index
    %c0_238 = arith.constant 0 : index
    %c85 = arith.constant 85 : index
    %216 = vector.load %arg2[%c0_236, %c0_237, %c0_238, %c85] : memref<1x1x8x640xbf16, #tpu.memory_space<vmem>>, vector<1x1x8x256xbf16>
    %217 = vector.shape_cast %216 : vector<1x1x8x256xbf16> to vector<8x256xbf16>
    %c1_239 = arith.constant 1 : index
    %c64_240 = arith.constant 64 : index
    %c0_241 = arith.constant 0 : index
    %218 = vector.load %arg8[%c1_239, %c64_240, %c0_241] : memref<2x256x256xbf16, #tpu.memory_space<vmem>>, vector<1x8x256xbf16>
    %219 = vector.shape_cast %218 : vector<1x8x256xbf16> to vector<8x256xbf16>
    %220 = vector.shape_cast %217 : vector<8x256xbf16> to vector<1x8x256xbf16>
    tpu.vector_store %arg8[%c1_239, %c64_240, %c0_241], %220 {strides = array<i32>} : memref<2x256x256xbf16, #tpu.memory_space<vmem>>, vector<1x8x256xbf16>,
    %c0_242 = arith.constant 0 : index
    %c0_243 = arith.constant 0 : index
    %c0_244 = arith.constant 0 : index
    %c86 = arith.constant 86 : index
    %221 = vector.load %arg2[%c0_242, %c0_243, %c0_244, %c86] : memref<1x1x8x640xbf16, #tpu.memory_space<vmem>>, vector<1x1x8x256xbf16>
    %222 = vector.shape_cast %221 : vector<1x1x8x256xbf16> to vector<8x256xbf16>
    %c1_245 = arith.constant 1 : index
    %c72_246 = arith.constant 72 : index
    %c0_247 = arith.constant 0 : index
    %223 = vector.load %arg8[%c1_245, %c72_246, %c0_247] : memref<2x256x256xbf16, #tpu.memory_space<vmem>>, vector<1x8x256xbf16>
    %224 = vector.shape_cast %223 : vector<1x8x256xbf16> to vector<8x256xbf16>
    %225 = vector.shape_cast %222 : vector<8x256xbf16> to vector<1x8x256xbf16>
    tpu.vector_store %arg8[%c1_245, %c72_246, %c0_247], %225 {strides = array<i32>} : memref<2x256x256xbf16, #tpu.memory_space<vmem>>, vector<1x8x256xbf16>,
    %c0_248 = arith.constant 0 : index
    %c0_249 = arith.constant 0 : index
    %c0_250 = arith.constant 0 : index
    %c87 = arith.constant 87 : index
    %226 = vector.load %arg2[%c0_248, %c0_249, %c0_250, %c87] : memref<1x1x8x640xbf16, #tpu.memory_space<vmem>>, vector<1x1x8x256xbf16>
    %227 = vector.shape_cast %226 : vector<1x1x8x256xbf16> to vector<8x256xbf16>
    %c1_251 = arith.constant 1 : index
    %c80_252 = arith.constant 80 : index
    %c0_253 = arith.constant 0 : index
    %228 = vector.load %arg8[%c1_251, %c80_252, %c0_253] : memref<2x256x256xbf16, #tpu.memory_space<vmem>>, vector<1x8x256xbf16>
    %229 = vector.shape_cast %228 : vector<1x8x256xbf16> to vector<8x256xbf16>
    %230 = vector.shape_cast %227 : vector<8x256xbf16> to vector<1x8x256xbf16>
    tpu.vector_store %arg8[%c1_251, %c80_252, %c0_253], %230 {strides = array<i32>} : memref<2x256x256xbf16, #tpu.memory_space<vmem>>, vector<1x8x256xbf16>,
    %c0_254 = arith.constant 0 : index
    %c0_255 = arith.constant 0 : index
    %c0_256 = arith.constant 0 : index
    %c88_257 = arith.constant 88 : index
    %231 = vector.load %arg2[%c0_254, %c0_255, %c0_256, %c88_257] : memref<1x1x8x640xbf16, #tpu.memory_space<vmem>>, vector<1x1x8x256xbf16>
    %232 = vector.shape_cast %231 : vector<1x1x8x256xbf16> to vector<8x256xbf16>
    %c1_258 = arith.constant 1 : index
    %c88_259 = arith.constant 88 : index
    %c0_260 = arith.constant 0 : index
    %233 = vector.load %arg8[%c1_258, %c88_259, %c0_260] : memref<2x256x256xbf16, #tpu.memory_space<vmem>>, vector<1x8x256xbf16>
    %234 = vector.shape_cast %233 : vector<1x8x256xbf16> to vector<8x256xbf16>
    %235 = vector.shape_cast %232 : vector<8x256xbf16> to vector<1x8x256xbf16>
    tpu.vector_store %arg8[%c1_258, %c88_259, %c0_260], %235 {strides = array<i32>} : memref<2x256x256xbf16, #tpu.memory_space<vmem>>, vector<1x8x256xbf16>,
    %c0_261 = arith.constant 0 : index
    %c0_262 = arith.constant 0 : index
    %c0_263 = arith.constant 0 : index
    %c89 = arith.constant 89 : index
    %236 = vector.load %arg2[%c0_261, %c0_262, %c0_263, %c89] : memref<1x1x8x640xbf16, #tpu.memory_space<vmem>>, vector<1x1x8x256xbf16>
    %237 = vector.shape_cast %236 : vector<1x1x8x256xbf16> to vector<8x256xbf16>
    %c1_264 = arith.constant 1 : index
    %c96_265 = arith.constant 96 : index
    %c0_266 = arith.constant 0 : index
    %238 = vector.load %arg8[%c1_264, %c96_265, %c0_266] : memref<2x256x256xbf16, #tpu.memory_space<vmem>>, vector<1x8x256xbf16>
    %239 = vector.shape_cast %238 : vector<1x8x256xbf16> to vector<8x256xbf16>
    %240 = vector.shape_cast %237 : vector<8x256xbf16> to vector<1x8x256xbf16>
    tpu.vector_store %arg8[%c1_264, %c96_265, %c0_266], %240 {strides = array<i32>} : memref<2x256x256xbf16, #tpu.memory_space<vmem>>, vector<1x8x256xbf16>,
    %c0_267 = arith.constant 0 : index
    %c0_268 = arith.constant 0 : index
    %c0_269 = arith.constant 0 : index
    %c90 = arith.constant 90 : index
    %241 = vector.load %arg2[%c0_267, %c0_268, %c0_269, %c90] : memref<1x1x8x640xbf16, #tpu.memory_space<vmem>>, vector<1x1x8x256xbf16>
    %242 = vector.shape_cast %241 : vector<1x1x8x256xbf16> to vector<8x256xbf16>
    %c1_270 = arith.constant 1 : index
    %c104_271 = arith.constant 104 : index
    %c0_272 = arith.constant 0 : index
    %243 = vector.load %arg8[%c1_270, %c104_271, %c0_272] : memref<2x256x256xbf16, #tpu.memory_space<vmem>>, vector<1x8x256xbf16>
    %244 = vector.shape_cast %243 : vector<1x8x256xbf16> to vector<8x256xbf16>
    %245 = vector.shape_cast %242 : vector<8x256xbf16> to vector<1x8x256xbf16>
    tpu.vector_store %arg8[%c1_270, %c104_271, %c0_272], %245 {strides = array<i32>} : memref<2x256x256xbf16, #tpu.memory_space<vmem>>, vector<1x8x256xbf16>,
    %c0_273 = arith.constant 0 : index
    %c0_274 = arith.constant 0 : index
    %c0_275 = arith.constant 0 : index
    %c91 = arith.constant 91 : index
    %246 = vector.load %arg2[%c0_273, %c0_274, %c0_275, %c91] : memref<1x1x8x640xbf16, #tpu.memory_space<vmem>>, vector<1x1x8x256xbf16>
    %247 = vector.shape_cast %246 : vector<1x1x8x256xbf16> to vector<8x256xbf16>
    %c1_276 = arith.constant 1 : index
    %c112_277 = arith.constant 112 : index
    %c0_278 = arith.constant 0 : index
    %248 = vector.load %arg8[%c1_276, %c112_277, %c0_278] : memref<2x256x256xbf16, #tpu.memory_space<vmem>>, vector<1x8x256xbf16>
    %249 = vector.shape_cast %248 : vector<1x8x256xbf16> to vector<8x256xbf16>
    %250 = vector.shape_cast %247 : vector<8x256xbf16> to vector<1x8x256xbf16>
    tpu.vector_store %arg8[%c1_276, %c112_277, %c0_278], %250 {strides = array<i32>} : memref<2x256x256xbf16, #tpu.memory_space<vmem>>, vector<1x8x256xbf16>,
    %c0_279 = arith.constant 0 : index
    %c0_280 = arith.constant 0 : index
    %c0_281 = arith.constant 0 : index
    %c92 = arith.constant 92 : index
    %251 = vector.load %arg2[%c0_279, %c0_280, %c0_281, %c92] : memref<1x1x8x640xbf16, #tpu.memory_space<vmem>>, vector<1x1x8x256xbf16>
    %252 = vector.shape_cast %251 : vector<1x1x8x256xbf16> to vector<8x256xbf16>
    %c1_282 = arith.constant 1 : index
    %c120_283 = arith.constant 120 : index
    %c0_284 = arith.constant 0 : index
    %253 = vector.load %arg8[%c1_282, %c120_283, %c0_284] : memref<2x256x256xbf16, #tpu.memory_space<vmem>>, vector<1x8x256xbf16>
    %254 = vector.shape_cast %253 : vector<1x8x256xbf16> to vector<8x256xbf16>
    %255 = vector.shape_cast %252 : vector<8x256xbf16> to vector<1x8x256xbf16>
    tpu.vector_store %arg8[%c1_282, %c120_283, %c0_284], %255 {strides = array<i32>} : memref<2x256x256xbf16, #tpu.memory_space<vmem>>, vector<1x8x256xbf16>,
    %c0_285 = arith.constant 0 : index
    %c0_286 = arith.constant 0 : index
    %c0_287 = arith.constant 0 : index
    %c93 = arith.constant 93 : index
    %256 = vector.load %arg2[%c0_285, %c0_286, %c0_287, %c93] : memref<1x1x8x640xbf16, #tpu.memory_space<vmem>>, vector<1x1x8x256xbf16>
    %257 = vector.shape_cast %256 : vector<1x1x8x256xbf16> to vector<8x256xbf16>
    %c1_288 = arith.constant 1 : index
    %c128_289 = arith.constant 128 : index
    %c0_290 = arith.constant 0 : index
    %258 = vector.load %arg8[%c1_288, %c128_289, %c0_290] : memref<2x256x256xbf16, #tpu.memory_space<vmem>>, vector<1x8x256xbf16>
    %259 = vector.shape_cast %258 : vector<1x8x256xbf16> to vector<8x256xbf16>
    %260 = vector.shape_cast %257 : vector<8x256xbf16> to vector<1x8x256xbf16>
    tpu.vector_store %arg8[%c1_288, %c128_289, %c0_290], %260 {strides = array<i32>} : memref<2x256x256xbf16, #tpu.memory_space<vmem>>, vector<1x8x256xbf16>,
    %c0_291 = arith.constant 0 : index
    %c0_292 = arith.constant 0 : index
    %c0_293 = arith.constant 0 : index
    %c94 = arith.constant 94 : index
    %261 = vector.load %arg2[%c0_291, %c0_292, %c0_293, %c94] : memref<1x1x8x640xbf16, #tpu.memory_space<vmem>>, vector<1x1x8x256xbf16>
    %262 = vector.shape_cast %261 : vector<1x1x8x256xbf16> to vector<8x256xbf16>
    %c1_294 = arith.constant 1 : index
    %c136_295 = arith.constant 136 : index
    %c0_296 = arith.constant 0 : index
    %263 = vector.load %arg8[%c1_294, %c136_295, %c0_296] : memref<2x256x256xbf16, #tpu.memory_space<vmem>>, vector<1x8x256xbf16>
    %264 = vector.shape_cast %263 : vector<1x8x256xbf16> to vector<8x256xbf16>
    %265 = vector.shape_cast %262 : vector<8x256xbf16> to vector<1x8x256xbf16>
    tpu.vector_store %arg8[%c1_294, %c136_295, %c0_296], %265 {strides = array<i32>} : memref<2x256x256xbf16, #tpu.memory_space<vmem>>, vector<1x8x256xbf16>,
    %c0_297 = arith.constant 0 : index
    %c0_298 = arith.constant 0 : index
    %c0_299 = arith.constant 0 : index
    %c95 = arith.constant 95 : index
    %266 = vector.load %arg2[%c0_297, %c0_298, %c0_299, %c95] : memref<1x1x8x640xbf16, #tpu.memory_space<vmem>>, vector<1x1x8x256xbf16>
    %267 = vector.shape_cast %266 : vector<1x1x8x256xbf16> to vector<8x256xbf16>
    %c1_300 = arith.constant 1 : index
    %c144_301 = arith.constant 144 : index
    %c0_302 = arith.constant 0 : index
    %268 = vector.load %arg8[%c1_300, %c144_301, %c0_302] : memref<2x256x256xbf16, #tpu.memory_space<vmem>>, vector<1x8x256xbf16>
    %269 = vector.shape_cast %268 : vector<1x8x256xbf16> to vector<8x256xbf16>
    %270 = vector.shape_cast %267 : vector<8x256xbf16> to vector<1x8x256xbf16>
    tpu.vector_store %arg8[%c1_300, %c144_301, %c0_302], %270 {strides = array<i32>} : memref<2x256x256xbf16, #tpu.memory_space<vmem>>, vector<1x8x256xbf16>,
    %c0_303 = arith.constant 0 : index
    %c0_304 = arith.constant 0 : index
    %c0_305 = arith.constant 0 : index
    %c96_306 = arith.constant 96 : index
    %271 = vector.load %arg2[%c0_303, %c0_304, %c0_305, %c96_306] : memref<1x1x8x640xbf16, #tpu.memory_space<vmem>>, vector<1x1x8x256xbf16>
    %272 = vector.shape_cast %271 : vector<1x1x8x256xbf16> to vector<8x256xbf16>
    %c1_307 = arith.constant 1 : index
    %c152_308 = arith.constant 152 : index
    %c0_309 = arith.constant 0 : index
    %273 = vector.load %arg8[%c1_307, %c152_308, %c0_309] : memref<2x256x256xbf16, #tpu.memory_space<vmem>>, vector<1x8x256xbf16>
    %274 = vector.shape_cast %273 : vector<1x8x256xbf16> to vector<8x256xbf16>
    %275 = vector.shape_cast %272 : vector<8x256xbf16> to vector<1x8x256xbf16>
    tpu.vector_store %arg8[%c1_307, %c152_308, %c0_309], %275 {strides = array<i32>} : memref<2x256x256xbf16, #tpu.memory_space<vmem>>, vector<1x8x256xbf16>,
    %c0_310 = arith.constant 0 : index
    %c0_311 = arith.constant 0 : index
    %c0_312 = arith.constant 0 : index
    %c112_313 = arith.constant 112 : index
    %276 = vector.load %arg2[%c0_310, %c0_311, %c0_312, %c112_313] : memref<1x1x8x640xbf16, #tpu.memory_space<vmem>>, vector<1x1x8x256xbf16>
    %277 = vector.shape_cast %276 : vector<1x1x8x256xbf16> to vector<8x256xbf16>
    %c1_314 = arith.constant 1 : index
    %c160_315 = arith.constant 160 : index
    %c0_316 = arith.constant 0 : index
    %278 = vector.load %arg8[%c1_314, %c160_315, %c0_316] : memref<2x256x256xbf16, #tpu.memory_space<vmem>>, vector<1x8x256xbf16>
    %279 = vector.shape_cast %278 : vector<1x8x256xbf16> to vector<8x256xbf16>
    %280 = vector.shape_cast %277 : vector<8x256xbf16> to vector<1x8x256xbf16>
    tpu.vector_store %arg8[%c1_314, %c160_315, %c0_316], %280 {strides = array<i32>} : memref<2x256x256xbf16, #tpu.memory_space<vmem>>, vector<1x8x256xbf16>,
    %c0_317 = arith.constant 0 : index
    %c0_318 = arith.constant 0 : index
    %c0_319 = arith.constant 0 : index
    %c113 = arith.constant 113 : index
    %281 = vector.load %arg2[%c0_317, %c0_318, %c0_319, %c113] : memref<1x1x8x640xbf16, #tpu.memory_space<vmem>>, vector<1x1x8x256xbf16>
    %282 = vector.shape_cast %281 : vector<1x1x8x256xbf16> to vector<8x256xbf16>
    %c1_320 = arith.constant 1 : index
    %c168_321 = arith.constant 168 : index
    %c0_322 = arith.constant 0 : index
    %283 = vector.load %arg8[%c1_320, %c168_321, %c0_322] : memref<2x256x256xbf16, #tpu.memory_space<vmem>>, vector<1x8x256xbf16>
    %284 = vector.shape_cast %283 : vector<1x8x256xbf16> to vector<8x256xbf16>
    %285 = vector.shape_cast %282 : vector<8x256xbf16> to vector<1x8x256xbf16>
    tpu.vector_store %arg8[%c1_320, %c168_321, %c0_322], %285 {strides = array<i32>} : memref<2x256x256xbf16, #tpu.memory_space<vmem>>, vector<1x8x256xbf16>,
    %c0_323 = arith.constant 0 : index
    %c0_324 = arith.constant 0 : index
    %c0_325 = arith.constant 0 : index
    %c114 = arith.constant 114 : index
    %286 = vector.load %arg2[%c0_323, %c0_324, %c0_325, %c114] : memref<1x1x8x640xbf16, #tpu.memory_space<vmem>>, vector<1x1x8x256xbf16>
    %287 = vector.shape_cast %286 : vector<1x1x8x256xbf16> to vector<8x256xbf16>
    %c1_326 = arith.constant 1 : index
    %c176_327 = arith.constant 176 : index
    %c0_328 = arith.constant 0 : index
    %288 = vector.load %arg8[%c1_326, %c176_327, %c0_328] : memref<2x256x256xbf16, #tpu.memory_space<vmem>>, vector<1x8x256xbf16>
    %289 = vector.shape_cast %288 : vector<1x8x256xbf16> to vector<8x256xbf16>
    %290 = vector.shape_cast %287 : vector<8x256xbf16> to vector<1x8x256xbf16>
    tpu.vector_store %arg8[%c1_326, %c176_327, %c0_328], %290 {strides = array<i32>} : memref<2x256x256xbf16, #tpu.memory_space<vmem>>, vector<1x8x256xbf16>,
    %c0_329 = arith.constant 0 : index
    %c0_330 = arith.constant 0 : index
    %c0_331 = arith.constant 0 : index
    %c115 = arith.constant 115 : index
    %291 = vector.load %arg2[%c0_329, %c0_330, %c0_331, %c115] : memref<1x1x8x640xbf16, #tpu.memory_space<vmem>>, vector<1x1x8x256xbf16>
    %292 = vector.shape_cast %291 : vector<1x1x8x256xbf16> to vector<8x256xbf16>
    %c1_332 = arith.constant 1 : index
    %c184_333 = arith.constant 184 : index
    %c0_334 = arith.constant 0 : index
    %293 = vector.load %arg8[%c1_332, %c184_333, %c0_334] : memref<2x256x256xbf16, #tpu.memory_space<vmem>>, vector<1x8x256xbf16>
    %294 = vector.shape_cast %293 : vector<1x8x256xbf16> to vector<8x256xbf16>
    %295 = vector.shape_cast %292 : vector<8x256xbf16> to vector<1x8x256xbf16>
    tpu.vector_store %arg8[%c1_332, %c184_333, %c0_334], %295 {strides = array<i32>} : memref<2x256x256xbf16, #tpu.memory_space<vmem>>, vector<1x8x256xbf16>,
    %c0_335 = arith.constant 0 : index
    %c0_336 = arith.constant 0 : index
    %c0_337 = arith.constant 0 : index
    %c116 = arith.constant 116 : index
    %296 = vector.load %arg2[%c0_335, %c0_336, %c0_337, %c116] : memref<1x1x8x640xbf16, #tpu.memory_space<vmem>>, vector<1x1x8x256xbf16>
    %297 = vector.shape_cast %296 : vector<1x1x8x256xbf16> to vector<8x256xbf16>
    %c1_338 = arith.constant 1 : index
    %c192_339 = arith.constant 192 : index
    %c0_340 = arith.constant 0 : index
    %298 = vector.load %arg8[%c1_338, %c192_339, %c0_340] : memref<2x256x256xbf16, #tpu.memory_space<vmem>>, vector<1x8x256xbf16>
    %299 = vector.shape_cast %298 : vector<1x8x256xbf16> to vector<8x256xbf16>
    %300 = vector.shape_cast %297 : vector<8x256xbf16> to vector<1x8x256xbf16>
    tpu.vector_store %arg8[%c1_338, %c192_339, %c0_340], %300 {strides = array<i32>} : memref<2x256x256xbf16, #tpu.memory_space<vmem>>, vector<1x8x256xbf16>,
    %c0_341 = arith.constant 0 : index
    %c0_342 = arith.constant 0 : index
    %c0_343 = arith.constant 0 : index
    %c117 = arith.constant 117 : index
    %301 = vector.load %arg2[%c0_341, %c0_342, %c0_343, %c117] : memref<1x1x8x640xbf16, #tpu.memory_space<vmem>>, vector<1x1x8x256xbf16>
    %302 = vector.shape_cast %301 : vector<1x1x8x256xbf16> to vector<8x256xbf16>
    %c1_344 = arith.constant 1 : index
    %c200_345 = arith.constant 200 : index
    %c0_346 = arith.constant 0 : index
    %303 = vector.load %arg8[%c1_344, %c200_345, %c0_346] : memref<2x256x256xbf16, #tpu.memory_space<vmem>>, vector<1x8x256xbf16>
    %304 = vector.shape_cast %303 : vector<1x8x256xbf16> to vector<8x256xbf16>
    %305 = vector.shape_cast %302 : vector<8x256xbf16> to vector<1x8x256xbf16>
    tpu.vector_store %arg8[%c1_344, %c200_345, %c0_346], %305 {strides = array<i32>} : memref<2x256x256xbf16, #tpu.memory_space<vmem>>, vector<1x8x256xbf16>,
    %c0_347 = arith.constant 0 : index
    %c0_348 = arith.constant 0 : index
    %c0_349 = arith.constant 0 : index
    %c118 = arith.constant 118 : index
    %306 = vector.load %arg2[%c0_347, %c0_348, %c0_349, %c118] : memref<1x1x8x640xbf16, #tpu.memory_space<vmem>>, vector<1x1x8x256xbf16>
    %307 = vector.shape_cast %306 : vector<1x1x8x256xbf16> to vector<8x256xbf16>
    %c1_350 = arith.constant 1 : index
    %c208_351 = arith.constant 208 : index
    %c0_352 = arith.constant 0 : index
    %308 = vector.load %arg8[%c1_350, %c208_351, %c0_352] : memref<2x256x256xbf16, #tpu.memory_space<vmem>>, vector<1x8x256xbf16>
    %309 = vector.shape_cast %308 : vector<1x8x256xbf16> to vector<8x256xbf16>
    %310 = vector.shape_cast %307 : vector<8x256xbf16> to vector<1x8x256xbf16>
    tpu.vector_store %arg8[%c1_350, %c208_351, %c0_352], %310 {strides = array<i32>} : memref<2x256x256xbf16, #tpu.memory_space<vmem>>, vector<1x8x256xbf16>,
    %c0_353 = arith.constant 0 : index
    %c0_354 = arith.constant 0 : index
    %c0_355 = arith.constant 0 : index
    %c119 = arith.constant 119 : index
    %311 = vector.load %arg2[%c0_353, %c0_354, %c0_355, %c119] : memref<1x1x8x640xbf16, #tpu.memory_space<vmem>>, vector<1x1x8x256xbf16>
    %312 = vector.shape_cast %311 : vector<1x1x8x256xbf16> to vector<8x256xbf16>
    %c1_356 = arith.constant 1 : index
    %c216_357 = arith.constant 216 : index
    %c0_358 = arith.constant 0 : index
    %313 = vector.load %arg8[%c1_356, %c216_357, %c0_358] : memref<2x256x256xbf16, #tpu.memory_space<vmem>>, vector<1x8x256xbf16>
    %314 = vector.shape_cast %313 : vector<1x8x256xbf16> to vector<8x256xbf16>
    %315 = vector.shape_cast %312 : vector<8x256xbf16> to vector<1x8x256xbf16>
    tpu.vector_store %arg8[%c1_356, %c216_357, %c0_358], %315 {strides = array<i32>} : memref<2x256x256xbf16, #tpu.memory_space<vmem>>, vector<1x8x256xbf16>,
    %c0_359 = arith.constant 0 : index
    %c0_360 = arith.constant 0 : index
    %c0_361 = arith.constant 0 : index
    %c120_362 = arith.constant 120 : index
    %316 = vector.load %arg2[%c0_359, %c0_360, %c0_361, %c120_362] : memref<1x1x8x640xbf16, #tpu.memory_space<vmem>>, vector<1x1x8x256xbf16>
    %317 = vector.shape_cast %316 : vector<1x1x8x256xbf16> to vector<8x256xbf16>
    %c1_363 = arith.constant 1 : index
    %c224_364 = arith.constant 224 : index
    %c0_365 = arith.constant 0 : index
    %318 = vector.load %arg8[%c1_363, %c224_364, %c0_365] : memref<2x256x256xbf16, #tpu.memory_space<vmem>>, vector<1x8x256xbf16>
    %319 = vector.shape_cast %318 : vector<1x8x256xbf16> to vector<8x256xbf16>
    %320 = vector.shape_cast %317 : vector<8x256xbf16> to vector<1x8x256xbf16>
    tpu.vector_store %arg8[%c1_363, %c224_364, %c0_365], %320 {strides = array<i32>} : memref<2x256x256xbf16, #tpu.memory_space<vmem>>, vector<1x8x256xbf16>,
    %c0_366 = arith.constant 0 : index
    %c0_367 = arith.constant 0 : index
    %c0_368 = arith.constant 0 : index
    %c121 = arith.constant 121 : index
    %321 = vector.load %arg2[%c0_366, %c0_367, %c0_368, %c121] : memref<1x1x8x640xbf16, #tpu.memory_space<vmem>>, vector<1x1x8x256xbf16>
    %322 = vector.shape_cast %321 : vector<1x1x8x256xbf16> to vector<8x256xbf16>
    %c1_369 = arith.constant 1 : index
    %c232_370 = arith.constant 232 : index
    %c0_371 = arith.constant 0 : index
    %323 = vector.load %arg8[%c1_369, %c232_370, %c0_371] : memref<2x256x256xbf16, #tpu.memory_space<vmem>>, vector<1x8x256xbf16>
    %324 = vector.shape_cast %323 : vector<1x8x256xbf16> to vector<8x256xbf16>
    %325 = vector.shape_cast %322 : vector<8x256xbf16> to vector<1x8x256xbf16>
    tpu.vector_store %arg8[%c1_369, %c232_370, %c0_371], %325 {strides = array<i32>} : memref<2x256x256xbf16, #tpu.memory_space<vmem>>, vector<1x8x256xbf16>,
    %c0_372 = arith.constant 0 : index
    %c0_373 = arith.constant 0 : index
    %c0_374 = arith.constant 0 : index
    %c122 = arith.constant 122 : index
    %326 = vector.load %arg2[%c0_372, %c0_373, %c0_374, %c122] : memref<1x1x8x640xbf16, #tpu.memory_space<vmem>>, vector<1x1x8x256xbf16>
    %327 = vector.shape_cast %326 : vector<1x1x8x256xbf16> to vector<8x256xbf16>
    %c1_375 = arith.constant 1 : index
    %c240_376 = arith.constant 240 : index
    %c0_377 = arith.constant 0 : index
    %328 = vector.load %arg8[%c1_375, %c240_376, %c0_377] : memref<2x256x256xbf16, #tpu.memory_space<vmem>>, vector<1x8x256xbf16>
    %329 = vector.shape_cast %328 : vector<1x8x256xbf16> to vector<8x256xbf16>
    %330 = vector.shape_cast %327 : vector<8x256xbf16> to vector<1x8x256xbf16>
    tpu.vector_store %arg8[%c1_375, %c240_376, %c0_377], %330 {strides = array<i32>} : memref<2x256x256xbf16, #tpu.memory_space<vmem>>, vector<1x8x256xbf16>,
    %c0_378 = arith.constant 0 : index
    %c0_379 = arith.constant 0 : index
    %c0_380 = arith.constant 0 : index
    %c123 = arith.constant 123 : index
    %331 = vector.load %arg2[%c0_378, %c0_379, %c0_380, %c123] : memref<1x1x8x640xbf16, #tpu.memory_space<vmem>>, vector<1x1x8x256xbf16>
    %332 = vector.shape_cast %331 : vector<1x1x8x256xbf16> to vector<8x256xbf16>
    %c1_381 = arith.constant 1 : index
    %c248_382 = arith.constant 248 : index
    %c0_383 = arith.constant 0 : index
    %333 = vector.load %arg8[%c1_381, %c248_382, %c0_383] : memref<2x256x256xbf16, #tpu.memory_space<vmem>>, vector<1x8x256xbf16>
    %334 = vector.shape_cast %333 : vector<1x8x256xbf16> to vector<8x256xbf16>
    %335 = vector.shape_cast %332 : vector<8x256xbf16> to vector<1x8x256xbf16>
    tpu.vector_store %arg8[%c1_381, %c248_382, %c0_383], %335 {strides = array<i32>} : memref<2x256x256xbf16, #tpu.memory_space<vmem>>, vector<1x8x256xbf16>,
    %c0_384 = arith.constant 0 : index
    %c0_385 = arith.constant 0 : index
    %336 = vector.load %arg9[%c0_384, %c0_385] : memref<8x256xf32, #tpu.memory_space<vmem>>, vector<8x256xf32>
    %c0_386 = arith.constant 0 : index
    %c1_387 = arith.constant 1 : index
    %c0_388 = arith.constant 0 : index
    %c0_389 = arith.constant 0 : index
    %337 = vector.load %arg4[%c0_386, %c1_387, %c0_388, %c0_389] : memref<1x6x8x256xbf16, #tpu.memory_space<vmem>>, vector<1x1x8x256xbf16>
    %338 = vector.shape_cast %337 : vector<1x1x8x256xbf16> to vector<8x256xbf16>
    %c1_390 = arith.constant 1 : index
    %c0_391 = arith.constant 0 : index
    %c0_392 = arith.constant 0 : index
    %339 = vector.load %arg8[%c1_390, %c0_391, %c0_392] : memref<2x256x256xbf16, #tpu.memory_space<vmem>>, vector<1x256x256xbf16>
    %340 = vector.shape_cast %339 : vector<1x256x256xbf16> to vector<256x256xbf16>
    %cst_393 = arith.constant dense<0.000000e+00> : vector<8x256xf32>
    %341 = tpu.matmul %338, %340, %cst_393 {dimension_numbers = #tpu.dot_dimension_numbers<[1], [0], [0], [1], [0, 0, 1, 1], [], []>} : vector<8x256xbf16>, vector<256x256xbf16>, vector<8x256xf32> -> vector<8x256xf32>
    %342 = arith.addf %336, %341 : vector<8x256xf32>
    %c0_394 = arith.constant 0 : index
    %c0_395 = arith.constant 0 : index
    %343 = vector.load %arg9[%c0_394, %c0_395] : memref<8x256xf32, #tpu.memory_space<vmem>>, vector<8x256xf32>
    tpu.vector_store %arg9[%c0_394, %c0_395], %342 {strides = array<i32>} : memref<8x256xf32, #tpu.memory_space<vmem>>, vector<8x256xf32>,
    %c0_396 = arith.constant 0 : index
    %c0_397 = arith.constant 0 : index
    %c0_398 = arith.constant 0 : index
    %c124 = arith.constant 124 : index
    %344 = vector.load %arg2[%c0_396, %c0_397, %c0_398, %c124] : memref<1x1x8x640xbf16, #tpu.memory_space<vmem>>, vector<1x1x8x256xbf16>
    %345 = vector.shape_cast %344 : vector<1x1x8x256xbf16> to vector<8x256xbf16>
    %c0_399 = arith.constant 0 : index
    %c0_400 = arith.constant 0 : index
    %c0_401 = arith.constant 0 : index
    %346 = vector.load %arg8[%c0_399, %c0_400, %c0_401] : memref<2x256x256xbf16, #tpu.memory_space<vmem>>, vector<1x8x256xbf16>
    %347 = vector.shape_cast %346 : vector<1x8x256xbf16> to vector<8x256xbf16>
    %348 = vector.shape_cast %345 : vector<8x256xbf16> to vector<1x8x256xbf16>
    tpu.vector_store %arg8[%c0_399, %c0_400, %c0_401], %348 {strides = array<i32>} : memref<2x256x256xbf16, #tpu.memory_space<vmem>>, vector<1x8x256xbf16>,
    %c0_402 = arith.constant 0 : index
    %c0_403 = arith.constant 0 : index
    %c0_404 = arith.constant 0 : index
    %c140 = arith.constant 140 : index
    %349 = vector.load %arg2[%c0_402, %c0_403, %c0_404, %c140] : memref<1x1x8x640xbf16, #tpu.memory_space<vmem>>, vector<1x1x8x256xbf16>
    %350 = vector.shape_cast %349 : vector<1x1x8x256xbf16> to vector<8x256xbf16>
    %c0_405 = arith.constant 0 : index
    %c8_406 = arith.constant 8 : index
    %c0_407 = arith.constant 0 : index
    %351 = vector.load %arg8[%c0_405, %c8_406, %c0_407] : memref<2x256x256xbf16, #tpu.memory_space<vmem>>, vector<1x8x256xbf16>
    %352 = vector.shape_cast %351 : vector<1x8x256xbf16> to vector<8x256xbf16>
    %353 = vector.shape_cast %350 : vector<8x256xbf16> to vector<1x8x256xbf16>
    tpu.vector_store %arg8[%c0_405, %c8_406, %c0_407], %353 {strides = array<i32>} : memref<2x256x256xbf16, #tpu.memory_space<vmem>>, vector<1x8x256xbf16>,
    %c0_408 = arith.constant 0 : index
    %c0_409 = arith.constant 0 : index
    %c0_410 = arith.constant 0 : index
    %c141 = arith.constant 141 : index
    %354 = vector.load %arg2[%c0_408, %c0_409, %c0_410, %c141] : memref<1x1x8x640xbf16, #tpu.memory_space<vmem>>, vector<1x1x8x256xbf16>
    %355 = vector.shape_cast %354 : vector<1x1x8x256xbf16> to vector<8x256xbf16>
    %c0_411 = arith.constant 0 : index
    %c16_412 = arith.constant 16 : index
    %c0_413 = arith.constant 0 : index
    %356 = vector.load %arg8[%c0_411, %c16_412, %c0_413] : memref<2x256x256xbf16, #tpu.memory_space<vmem>>, vector<1x8x256xbf16>
    %357 = vector.shape_cast %356 : vector<1x8x256xbf16> to vector<8x256xbf16>
    %358 = vector.shape_cast %355 : vector<8x256xbf16> to vector<1x8x256xbf16>
    tpu.vector_store %arg8[%c0_411, %c16_412, %c0_413], %358 {strides = array<i32>} : memref<2x256x256xbf16, #tpu.memory_space<vmem>>, vector<1x8x256xbf16>,
    %c0_414 = arith.constant 0 : index
    %c0_415 = arith.constant 0 : index
    %c0_416 = arith.constant 0 : index
    %c142 = arith.constant 142 : index
    %359 = vector.load %arg2[%c0_414, %c0_415, %c0_416, %c142] : memref<1x1x8x640xbf16, #tpu.memory_space<vmem>>, vector<1x1x8x256xbf16>
    %360 = vector.shape_cast %359 : vector<1x1x8x256xbf16> to vector<8x256xbf16>
    %c0_417 = arith.constant 0 : index
    %c24_418 = arith.constant 24 : index
    %c0_419 = arith.constant 0 : index
    %361 = vector.load %arg8[%c0_417, %c24_418, %c0_419] : memref<2x256x256xbf16, #tpu.memory_space<vmem>>, vector<1x8x256xbf16>
    %362 = vector.shape_cast %361 : vector<1x8x256xbf16> to vector<8x256xbf16>
    %363 = vector.shape_cast %360 : vector<8x256xbf16> to vector<1x8x256xbf16>
    tpu.vector_store %arg8[%c0_417, %c24_418, %c0_419], %363 {strides = array<i32>} : memref<2x256x256xbf16, #tpu.memory_space<vmem>>, vector<1x8x256xbf16>,
    %c0_420 = arith.constant 0 : index
    %c0_421 = arith.constant 0 : index
    %c0_422 = arith.constant 0 : index
    %c143 = arith.constant 143 : index
    %364 = vector.load %arg2[%c0_420, %c0_421, %c0_422, %c143] : memref<1x1x8x640xbf16, #tpu.memory_space<vmem>>, vector<1x1x8x256xbf16>
    %365 = vector.shape_cast %364 : vector<1x1x8x256xbf16> to vector<8x256xbf16>
    %c0_423 = arith.constant 0 : index
    %c32_424 = arith.constant 32 : index
    %c0_425 = arith.constant 0 : index
    %366 = vector.load %arg8[%c0_423, %c32_424, %c0_425] : memref<2x256x256xbf16, #tpu.memory_space<vmem>>, vector<1x8x256xbf16>
    %367 = vector.shape_cast %366 : vector<1x8x256xbf16> to vector<8x256xbf16>
    %368 = vector.shape_cast %365 : vector<8x256xbf16> to vector<1x8x256xbf16>
    tpu.vector_store %arg8[%c0_423, %c32_424, %c0_425], %368 {strides = array<i32>} : memref<2x256x256xbf16, #tpu.memory_space<vmem>>, vector<1x8x256xbf16>,
    %c0_426 = arith.constant 0 : index
    %c0_427 = arith.constant 0 : index
    %c0_428 = arith.constant 0 : index
    %c144_429 = arith.constant 144 : index
    %369 = vector.load %arg2[%c0_426, %c0_427, %c0_428, %c144_429] : memref<1x1x8x640xbf16, #tpu.memory_space<vmem>>, vector<1x1x8x256xbf16>
    %370 = vector.shape_cast %369 : vector<1x1x8x256xbf16> to vector<8x256xbf16>
    %c0_430 = arith.constant 0 : index
    %c40_431 = arith.constant 40 : index
    %c0_432 = arith.constant 0 : index
    %371 = vector.load %arg8[%c0_430, %c40_431, %c0_432] : memref<2x256x256xbf16, #tpu.memory_space<vmem>>, vector<1x8x256xbf16>
    %372 = vector.shape_cast %371 : vector<1x8x256xbf16> to vector<8x256xbf16>
    %373 = vector.shape_cast %370 : vector<8x256xbf16> to vector<1x8x256xbf16>
    tpu.vector_store %arg8[%c0_430, %c40_431, %c0_432], %373 {strides = array<i32>} : memref<2x256x256xbf16, #tpu.memory_space<vmem>>, vector<1x8x256xbf16>,
    %c0_433 = arith.constant 0 : index
    %c0_434 = arith.constant 0 : index
    %c0_435 = arith.constant 0 : index
    %c145 = arith.constant 145 : index
    %374 = vector.load %arg2[%c0_433, %c0_434, %c0_435, %c145] : memref<1x1x8x640xbf16, #tpu.memory_space<vmem>>, vector<1x1x8x256xbf16>
    %375 = vector.shape_cast %374 : vector<1x1x8x256xbf16> to vector<8x256xbf16>
    %c0_436 = arith.constant 0 : index
    %c48_437 = arith.constant 48 : index
    %c0_438 = arith.constant 0 : index
    %376 = vector.load %arg8[%c0_436, %c48_437, %c0_438] : memref<2x256x256xbf16, #tpu.memory_space<vmem>>, vector<1x8x256xbf16>
    %377 = vector.shape_cast %376 : vector<1x8x256xbf16> to vector<8x256xbf16>
    %378 = vector.shape_cast %375 : vector<8x256xbf16> to vector<1x8x256xbf16>
    tpu.vector_store %arg8[%c0_436, %c48_437, %c0_438], %378 {strides = array<i32>} : memref<2x256x256xbf16, #tpu.memory_space<vmem>>, vector<1x8x256xbf16>,
    %c0_439 = arith.constant 0 : index
    %c0_440 = arith.constant 0 : index
    %c0_441 = arith.constant 0 : index
    %c146 = arith.constant 146 : index
    %379 = vector.load %arg2[%c0_439, %c0_440, %c0_441, %c146] : memref<1x1x8x640xbf16, #tpu.memory_space<vmem>>, vector<1x1x8x256xbf16>
    %380 = vector.shape_cast %379 : vector<1x1x8x256xbf16> to vector<8x256xbf16>
    %c0_442 = arith.constant 0 : index
    %c56_443 = arith.constant 56 : index
    %c0_444 = arith.constant 0 : index
    %381 = vector.load %arg8[%c0_442, %c56_443, %c0_444] : memref<2x256x256xbf16, #tpu.memory_space<vmem>>, vector<1x8x256xbf16>
    %382 = vector.shape_cast %381 : vector<1x8x256xbf16> to vector<8x256xbf16>
    %383 = vector.shape_cast %380 : vector<8x256xbf16> to vector<1x8x256xbf16>
    tpu.vector_store %arg8[%c0_442, %c56_443, %c0_444], %383 {strides = array<i32>} : memref<2x256x256xbf16, #tpu.memory_space<vmem>>, vector<1x8x256xbf16>,
    %c0_445 = arith.constant 0 : index
    %c0_446 = arith.constant 0 : index
    %c0_447 = arith.constant 0 : index
    %c147 = arith.constant 147 : index
    %384 = vector.load %arg2[%c0_445, %c0_446, %c0_447, %c147] : memref<1x1x8x640xbf16, #tpu.memory_space<vmem>>, vector<1x1x8x256xbf16>
    %385 = vector.shape_cast %384 : vector<1x1x8x256xbf16> to vector<8x256xbf16>
    %c0_448 = arith.constant 0 : index
    %c64_449 = arith.constant 64 : index
    %c0_450 = arith.constant 0 : index
    %386 = vector.load %arg8[%c0_448, %c64_449, %c0_450] : memref<2x256x256xbf16, #tpu.memory_space<vmem>>, vector<1x8x256xbf16>
    %387 = vector.shape_cast %386 : vector<1x8x256xbf16> to vector<8x256xbf16>
    %388 = vector.shape_cast %385 : vector<8x256xbf16> to vector<1x8x256xbf16>
    tpu.vector_store %arg8[%c0_448, %c64_449, %c0_450], %388 {strides = array<i32>} : memref<2x256x256xbf16, #tpu.memory_space<vmem>>, vector<1x8x256xbf16>,
    %c0_451 = arith.constant 0 : index
    %c0_452 = arith.constant 0 : index
    %c0_453 = arith.constant 0 : index
    %c148 = arith.constant 148 : index
    %389 = vector.load %arg2[%c0_451, %c0_452, %c0_453, %c148] : memref<1x1x8x640xbf16, #tpu.memory_space<vmem>>, vector<1x1x8x256xbf16>
    %390 = vector.shape_cast %389 : vector<1x1x8x256xbf16> to vector<8x256xbf16>
    %c0_454 = arith.constant 0 : index
    %c72_455 = arith.constant 72 : index
    %c0_456 = arith.constant 0 : index
    %391 = vector.load %arg8[%c0_454, %c72_455, %c0_456] : memref<2x256x256xbf16, #tpu.memory_space<vmem>>, vector<1x8x256xbf16>
    %392 = vector.shape_cast %391 : vector<1x8x256xbf16> to vector<8x256xbf16>
    %393 = vector.shape_cast %390 : vector<8x256xbf16> to vector<1x8x256xbf16>
    tpu.vector_store %arg8[%c0_454, %c72_455, %c0_456], %393 {strides = array<i32>} : memref<2x256x256xbf16, #tpu.memory_space<vmem>>, vector<1x8x256xbf16>,
    %c0_457 = arith.constant 0 : index
    %c0_458 = arith.constant 0 : index
    %c0_459 = arith.constant 0 : index
    %c149 = arith.constant 149 : index
    %394 = vector.load %arg2[%c0_457, %c0_458, %c0_459, %c149] : memref<1x1x8x640xbf16, #tpu.memory_space<vmem>>, vector<1x1x8x256xbf16>
    %395 = vector.shape_cast %394 : vector<1x1x8x256xbf16> to vector<8x256xbf16>
    %c0_460 = arith.constant 0 : index
    %c80_461 = arith.constant 80 : index
    %c0_462 = arith.constant 0 : index
    %396 = vector.load %arg8[%c0_460, %c80_461, %c0_462] : memref<2x256x256xbf16, #tpu.memory_space<vmem>>, vector<1x8x256xbf16>
    %397 = vector.shape_cast %396 : vector<1x8x256xbf16> to vector<8x256xbf16>
    %398 = vector.shape_cast %395 : vector<8x256xbf16> to vector<1x8x256xbf16>
    tpu.vector_store %arg8[%c0_460, %c80_461, %c0_462], %398 {strides = array<i32>} : memref<2x256x256xbf16, #tpu.memory_space<vmem>>, vector<1x8x256xbf16>,
    %c0_463 = arith.constant 0 : index
    %c0_464 = arith.constant 0 : index
    %c0_465 = arith.constant 0 : index
    %c150 = arith.constant 150 : index
    %399 = vector.load %arg2[%c0_463, %c0_464, %c0_465, %c150] : memref<1x1x8x640xbf16, #tpu.memory_space<vmem>>, vector<1x1x8x256xbf16>
    %400 = vector.shape_cast %399 : vector<1x1x8x256xbf16> to vector<8x256xbf16>
    %c0_466 = arith.constant 0 : index
    %c88_467 = arith.constant 88 : index
    %c0_468 = arith.constant 0 : index
    %401 = vector.load %arg8[%c0_466, %c88_467, %c0_468] : memref<2x256x256xbf16, #tpu.memory_space<vmem>>, vector<1x8x256xbf16>
    %402 = vector.shape_cast %401 : vector<1x8x256xbf16> to vector<8x256xbf16>
    %403 = vector.shape_cast %400 : vector<8x256xbf16> to vector<1x8x256xbf16>
    tpu.vector_store %arg8[%c0_466, %c88_467, %c0_468], %403 {strides = array<i32>} : memref<2x256x256xbf16, #tpu.memory_space<vmem>>, vector<1x8x256xbf16>,
    %c0_469 = arith.constant 0 : index
    %c0_470 = arith.constant 0 : index
    %c0_471 = arith.constant 0 : index
    %c151 = arith.constant 151 : index
    %404 = vector.load %arg2[%c0_469, %c0_470, %c0_471, %c151] : memref<1x1x8x640xbf16, #tpu.memory_space<vmem>>, vector<1x1x8x256xbf16>
    %405 = vector.shape_cast %404 : vector<1x1x8x256xbf16> to vector<8x256xbf16>
    %c0_472 = arith.constant 0 : index
    %c96_473 = arith.constant 96 : index
    %c0_474 = arith.constant 0 : index
    %406 = vector.load %arg8[%c0_472, %c96_473, %c0_474] : memref<2x256x256xbf16, #tpu.memory_space<vmem>>, vector<1x8x256xbf16>
    %407 = vector.shape_cast %406 : vector<1x8x256xbf16> to vector<8x256xbf16>
    %408 = vector.shape_cast %405 : vector<8x256xbf16> to vector<1x8x256xbf16>
    tpu.vector_store %arg8[%c0_472, %c96_473, %c0_474], %408 {strides = array<i32>} : memref<2x256x256xbf16, #tpu.memory_space<vmem>>, vector<1x8x256xbf16>,
    %c0_475 = arith.constant 0 : index
    %c0_476 = arith.constant 0 : index
    %c0_477 = arith.constant 0 : index
    %c152_478 = arith.constant 152 : index
    %409 = vector.load %arg2[%c0_475, %c0_476, %c0_477, %c152_478] : memref<1x1x8x640xbf16, #tpu.memory_space<vmem>>, vector<1x1x8x256xbf16>
    %410 = vector.shape_cast %409 : vector<1x1x8x256xbf16> to vector<8x256xbf16>
    %c0_479 = arith.constant 0 : index
    %c104_480 = arith.constant 104 : index
    %c0_481 = arith.constant 0 : index
    %411 = vector.load %arg8[%c0_479, %c104_480, %c0_481] : memref<2x256x256xbf16, #tpu.memory_space<vmem>>, vector<1x8x256xbf16>
    %412 = vector.shape_cast %411 : vector<1x8x256xbf16> to vector<8x256xbf16>
    %413 = vector.shape_cast %410 : vector<8x256xbf16> to vector<1x8x256xbf16>
    tpu.vector_store %arg8[%c0_479, %c104_480, %c0_481], %413 {strides = array<i32>} : memref<2x256x256xbf16, #tpu.memory_space<vmem>>, vector<1x8x256xbf16>,
    %c0_482 = arith.constant 0 : index
    %c0_483 = arith.constant 0 : index
    %c0_484 = arith.constant 0 : index
    %c168_485 = arith.constant 168 : index
    %414 = vector.load %arg2[%c0_482, %c0_483, %c0_484, %c168_485] : memref<1x1x8x640xbf16, #tpu.memory_space<vmem>>, vector<1x1x8x256xbf16>
    %415 = vector.shape_cast %414 : vector<1x1x8x256xbf16> to vector<8x256xbf16>
    %c0_486 = arith.constant 0 : index
    %c112_487 = arith.constant 112 : index
    %c0_488 = arith.constant 0 : index
    %416 = vector.load %arg8[%c0_486, %c112_487, %c0_488] : memref<2x256x256xbf16, #tpu.memory_space<vmem>>, vector<1x8x256xbf16>
    %417 = vector.shape_cast %416 : vector<1x8x256xbf16> to vector<8x256xbf16>
    %418 = vector.shape_cast %415 : vector<8x256xbf16> to vector<1x8x256xbf16>
    tpu.vector_store %arg8[%c0_486, %c112_487, %c0_488], %418 {strides = array<i32>} : memref<2x256x256xbf16, #tpu.memory_space<vmem>>, vector<1x8x256xbf16>,
    %c0_489 = arith.constant 0 : index
    %c0_490 = arith.constant 0 : index
    %c0_491 = arith.constant 0 : index
    %c169 = arith.constant 169 : index
    %419 = vector.load %arg2[%c0_489, %c0_490, %c0_491, %c169] : memref<1x1x8x640xbf16, #tpu.memory_space<vmem>>, vector<1x1x8x256xbf16>
    %420 = vector.shape_cast %419 : vector<1x1x8x256xbf16> to vector<8x256xbf16>
    %c0_492 = arith.constant 0 : index
    %c120_493 = arith.constant 120 : index
    %c0_494 = arith.constant 0 : index
    %421 = vector.load %arg8[%c0_492, %c120_493, %c0_494] : memref<2x256x256xbf16, #tpu.memory_space<vmem>>, vector<1x8x256xbf16>
    %422 = vector.shape_cast %421 : vector<1x8x256xbf16> to vector<8x256xbf16>
    %423 = vector.shape_cast %420 : vector<8x256xbf16> to vector<1x8x256xbf16>
    tpu.vector_store %arg8[%c0_492, %c120_493, %c0_494], %423 {strides = array<i32>} : memref<2x256x256xbf16, #tpu.memory_space<vmem>>, vector<1x8x256xbf16>,
    %c0_495 = arith.constant 0 : index
    %c0_496 = arith.constant 0 : index
    %c0_497 = arith.constant 0 : index
    %c170 = arith.constant 170 : index
    %424 = vector.load %arg2[%c0_495, %c0_496, %c0_497, %c170] : memref<1x1x8x640xbf16, #tpu.memory_space<vmem>>, vector<1x1x8x256xbf16>
    %425 = vector.shape_cast %424 : vector<1x1x8x256xbf16> to vector<8x256xbf16>
    %c0_498 = arith.constant 0 : index
    %c128_499 = arith.constant 128 : index
    %c0_500 = arith.constant 0 : index
    %426 = vector.load %arg8[%c0_498, %c128_499, %c0_500] : memref<2x256x256xbf16, #tpu.memory_space<vmem>>, vector<1x8x256xbf16>
    %427 = vector.shape_cast %426 : vector<1x8x256xbf16> to vector<8x256xbf16>
    %428 = vector.shape_cast %425 : vector<8x256xbf16> to vector<1x8x256xbf16>
    tpu.vector_store %arg8[%c0_498, %c128_499, %c0_500], %428 {strides = array<i32>} : memref<2x256x256xbf16, #tpu.memory_space<vmem>>, vector<1x8x256xbf16>,
    %c0_501 = arith.constant 0 : index
    %c0_502 = arith.constant 0 : index
    %c0_503 = arith.constant 0 : index
    %c171 = arith.constant 171 : index
    %429 = vector.load %arg2[%c0_501, %c0_502, %c0_503, %c171] : memref<1x1x8x640xbf16, #tpu.memory_space<vmem>>, vector<1x1x8x256xbf16>
    %430 = vector.shape_cast %429 : vector<1x1x8x256xbf16> to vector<8x256xbf16>
    %c0_504 = arith.constant 0 : index
    %c136_505 = arith.constant 136 : index
    %c0_506 = arith.constant 0 : index
    %431 = vector.load %arg8[%c0_504, %c136_505, %c0_506] : memref<2x256x256xbf16, #tpu.memory_space<vmem>>, vector<1x8x256xbf16>
    %432 = vector.shape_cast %431 : vector<1x8x256xbf16> to vector<8x256xbf16>
    %433 = vector.shape_cast %430 : vector<8x256xbf16> to vector<1x8x256xbf16>
    tpu.vector_store %arg8[%c0_504, %c136_505, %c0_506], %433 {strides = array<i32>} : memref<2x256x256xbf16, #tpu.memory_space<vmem>>, vector<1x8x256xbf16>,
    %c0_507 = arith.constant 0 : index
    %c0_508 = arith.constant 0 : index
    %c0_509 = arith.constant 0 : index
    %c172 = arith.constant 172 : index
    %434 = vector.load %arg2[%c0_507, %c0_508, %c0_509, %c172] : memref<1x1x8x640xbf16, #tpu.memory_space<vmem>>, vector<1x1x8x256xbf16>
    %435 = vector.shape_cast %434 : vector<1x1x8x256xbf16> to vector<8x256xbf16>
    %c0_510 = arith.constant 0 : index
    %c144_511 = arith.constant 144 : index
    %c0_512 = arith.constant 0 : index
    %436 = vector.load %arg8[%c0_510, %c144_511, %c0_512] : memref<2x256x256xbf16, #tpu.memory_space<vmem>>, vector<1x8x256xbf16>
    %437 = vector.shape_cast %436 : vector<1x8x256xbf16> to vector<8x256xbf16>
    %438 = vector.shape_cast %435 : vector<8x256xbf16> to vector<1x8x256xbf16>
    tpu.vector_store %arg8[%c0_510, %c144_511, %c0_512], %438 {strides = array<i32>} : memref<2x256x256xbf16, #tpu.memory_space<vmem>>, vector<1x8x256xbf16>,
    %c0_513 = arith.constant 0 : index
    %c0_514 = arith.constant 0 : index
    %c0_515 = arith.constant 0 : index
    %c173 = arith.constant 173 : index
    %439 = vector.load %arg2[%c0_513, %c0_514, %c0_515, %c173] : memref<1x1x8x640xbf16, #tpu.memory_space<vmem>>, vector<1x1x8x256xbf16>
    %440 = vector.shape_cast %439 : vector<1x1x8x256xbf16> to vector<8x256xbf16>
    %c0_516 = arith.constant 0 : index
    %c152_517 = arith.constant 152 : index
    %c0_518 = arith.constant 0 : index
    %441 = vector.load %arg8[%c0_516, %c152_517, %c0_518] : memref<2x256x256xbf16, #tpu.memory_space<vmem>>, vector<1x8x256xbf16>
    %442 = vector.shape_cast %441 : vector<1x8x256xbf16> to vector<8x256xbf16>
    %443 = vector.shape_cast %440 : vector<8x256xbf16> to vector<1x8x256xbf16>
    tpu.vector_store %arg8[%c0_516, %c152_517, %c0_518], %443 {strides = array<i32>} : memref<2x256x256xbf16, #tpu.memory_space<vmem>>, vector<1x8x256xbf16>,
    %c0_519 = arith.constant 0 : index
    %c0_520 = arith.constant 0 : index
    %c0_521 = arith.constant 0 : index
    %c174 = arith.constant 174 : index
    %444 = vector.load %arg2[%c0_519, %c0_520, %c0_521, %c174] : memref<1x1x8x640xbf16, #tpu.memory_space<vmem>>, vector<1x1x8x256xbf16>
    %445 = vector.shape_cast %444 : vector<1x1x8x256xbf16> to vector<8x256xbf16>
    %c0_522 = arith.constant 0 : index
    %c160_523 = arith.constant 160 : index
    %c0_524 = arith.constant 0 : index
    %446 = vector.load %arg8[%c0_522, %c160_523, %c0_524] : memref<2x256x256xbf16, #tpu.memory_space<vmem>>, vector<1x8x256xbf16>
    %447 = vector.shape_cast %446 : vector<1x8x256xbf16> to vector<8x256xbf16>
    %448 = vector.shape_cast %445 : vector<8x256xbf16> to vector<1x8x256xbf16>
    tpu.vector_store %arg8[%c0_522, %c160_523, %c0_524], %448 {strides = array<i32>} : memref<2x256x256xbf16, #tpu.memory_space<vmem>>, vector<1x8x256xbf16>,
    %c0_525 = arith.constant 0 : index
    %c0_526 = arith.constant 0 : index
    %c0_527 = arith.constant 0 : index
    %c175 = arith.constant 175 : index
    %449 = vector.load %arg2[%c0_525, %c0_526, %c0_527, %c175] : memref<1x1x8x640xbf16, #tpu.memory_space<vmem>>, vector<1x1x8x256xbf16>
    %450 = vector.shape_cast %449 : vector<1x1x8x256xbf16> to vector<8x256xbf16>
    %c0_528 = arith.constant 0 : index
    %c168_529 = arith.constant 168 : index
    %c0_530 = arith.constant 0 : index
    %451 = vector.load %arg8[%c0_528, %c168_529, %c0_530] : memref<2x256x256xbf16, #tpu.memory_space<vmem>>, vector<1x8x256xbf16>
    %452 = vector.shape_cast %451 : vector<1x8x256xbf16> to vector<8x256xbf16>
    %453 = vector.shape_cast %450 : vector<8x256xbf16> to vector<1x8x256xbf16>
    tpu.vector_store %arg8[%c0_528, %c168_529, %c0_530], %453 {strides = array<i32>} : memref<2x256x256xbf16, #tpu.memory_space<vmem>>, vector<1x8x256xbf16>,
    %c0_531 = arith.constant 0 : index
    %c0_532 = arith.constant 0 : index
    %c0_533 = arith.constant 0 : index
    %c176_534 = arith.constant 176 : index
    %454 = vector.load %arg2[%c0_531, %c0_532, %c0_533, %c176_534] : memref<1x1x8x640xbf16, #tpu.memory_space<vmem>>, vector<1x1x8x256xbf16>
    %455 = vector.shape_cast %454 : vector<1x1x8x256xbf16> to vector<8x256xbf16>
    %c0_535 = arith.constant 0 : index
    %c176_536 = arith.constant 176 : index
    %c0_537 = arith.constant 0 : index
    %456 = vector.load %arg8[%c0_535, %c176_536, %c0_537] : memref<2x256x256xbf16, #tpu.memory_space<vmem>>, vector<1x8x256xbf16>
    %457 = vector.shape_cast %456 : vector<1x8x256xbf16> to vector<8x256xbf16>
    %458 = vector.shape_cast %455 : vector<8x256xbf16> to vector<1x8x256xbf16>
    tpu.vector_store %arg8[%c0_535, %c176_536, %c0_537], %458 {strides = array<i32>} : memref<2x256x256xbf16, #tpu.memory_space<vmem>>, vector<1x8x256xbf16>,
    %c0_538 = arith.constant 0 : index
    %c0_539 = arith.constant 0 : index
    %c0_540 = arith.constant 0 : index
    %c177 = arith.constant 177 : index
    %459 = vector.load %arg2[%c0_538, %c0_539, %c0_540, %c177] : memref<1x1x8x640xbf16, #tpu.memory_space<vmem>>, vector<1x1x8x256xbf16>
    %460 = vector.shape_cast %459 : vector<1x1x8x256xbf16> to vector<8x256xbf16>
    %c0_541 = arith.constant 0 : index
    %c184_542 = arith.constant 184 : index
    %c0_543 = arith.constant 0 : index
    %461 = vector.load %arg8[%c0_541, %c184_542, %c0_543] : memref<2x256x256xbf16, #tpu.memory_space<vmem>>, vector<1x8x256xbf16>
    %462 = vector.shape_cast %461 : vector<1x8x256xbf16> to vector<8x256xbf16>
    %463 = vector.shape_cast %460 : vector<8x256xbf16> to vector<1x8x256xbf16>
    tpu.vector_store %arg8[%c0_541, %c184_542, %c0_543], %463 {strides = array<i32>} : memref<2x256x256xbf16, #tpu.memory_space<vmem>>, vector<1x8x256xbf16>,
    %c0_544 = arith.constant 0 : index
    %c0_545 = arith.constant 0 : index
    %c0_546 = arith.constant 0 : index
    %c178 = arith.constant 178 : index
    %464 = vector.load %arg2[%c0_544, %c0_545, %c0_546, %c178] : memref<1x1x8x640xbf16, #tpu.memory_space<vmem>>, vector<1x1x8x256xbf16>
    %465 = vector.shape_cast %464 : vector<1x1x8x256xbf16> to vector<8x256xbf16>
    %c0_547 = arith.constant 0 : index
    %c192_548 = arith.constant 192 : index
    %c0_549 = arith.constant 0 : index
    %466 = vector.load %arg8[%c0_547, %c192_548, %c0_549] : memref<2x256x256xbf16, #tpu.memory_space<vmem>>, vector<1x8x256xbf16>
    %467 = vector.shape_cast %466 : vector<1x8x256xbf16> to vector<8x256xbf16>
    %468 = vector.shape_cast %465 : vector<8x256xbf16> to vector<1x8x256xbf16>
    tpu.vector_store %arg8[%c0_547, %c192_548, %c0_549], %468 {strides = array<i32>} : memref<2x256x256xbf16, #tpu.memory_space<vmem>>, vector<1x8x256xbf16>,
    %c0_550 = arith.constant 0 : index
    %c0_551 = arith.constant 0 : index
    %c0_552 = arith.constant 0 : index
    %c179 = arith.constant 179 : index
    %469 = vector.load %arg2[%c0_550, %c0_551, %c0_552, %c179] : memref<1x1x8x640xbf16, #tpu.memory_space<vmem>>, vector<1x1x8x256xbf16>
    %470 = vector.shape_cast %469 : vector<1x1x8x256xbf16> to vector<8x256xbf16>
    %c0_553 = arith.constant 0 : index
    %c200_554 = arith.constant 200 : index
    %c0_555 = arith.constant 0 : index
    %471 = vector.load %arg8[%c0_553, %c200_554, %c0_555] : memref<2x256x256xbf16, #tpu.memory_space<vmem>>, vector<1x8x256xbf16>
    %472 = vector.shape_cast %471 : vector<1x8x256xbf16> to vector<8x256xbf16>
    %473 = vector.shape_cast %470 : vector<8x256xbf16> to vector<1x8x256xbf16>
    tpu.vector_store %arg8[%c0_553, %c200_554, %c0_555], %473 {strides = array<i32>} : memref<2x256x256xbf16, #tpu.memory_space<vmem>>, vector<1x8x256xbf16>,
    %c0_556 = arith.constant 0 : index
    %c0_557 = arith.constant 0 : index
    %c0_558 = arith.constant 0 : index
    %c180 = arith.constant 180 : index
    %474 = vector.load %arg2[%c0_556, %c0_557, %c0_558, %c180] : memref<1x1x8x640xbf16, #tpu.memory_space<vmem>>, vector<1x1x8x256xbf16>
    %475 = vector.shape_cast %474 : vector<1x1x8x256xbf16> to vector<8x256xbf16>
    %c0_559 = arith.constant 0 : index
    %c208_560 = arith.constant 208 : index
    %c0_561 = arith.constant 0 : index
    %476 = vector.load %arg8[%c0_559, %c208_560, %c0_561] : memref<2x256x256xbf16, #tpu.memory_space<vmem>>, vector<1x8x256xbf16>
    %477 = vector.shape_cast %476 : vector<1x8x256xbf16> to vector<8x256xbf16>
    %478 = vector.shape_cast %475 : vector<8x256xbf16> to vector<1x8x256xbf16>
    tpu.vector_store %arg8[%c0_559, %c208_560, %c0_561], %478 {strides = array<i32>} : memref<2x256x256xbf16, #tpu.memory_space<vmem>>, vector<1x8x256xbf16>,
    %c0_562 = arith.constant 0 : index
    %c0_563 = arith.constant 0 : index
    %c0_564 = arith.constant 0 : index
    %c196 = arith.constant 196 : index
    %479 = vector.load %arg2[%c0_562, %c0_563, %c0_564, %c196] : memref<1x1x8x640xbf16, #tpu.memory_space<vmem>>, vector<1x1x8x256xbf16>
    %480 = vector.shape_cast %479 : vector<1x1x8x256xbf16> to vector<8x256xbf16>
    %c0_565 = arith.constant 0 : index
    %c216_566 = arith.constant 216 : index
    %c0_567 = arith.constant 0 : index
    %481 = vector.load %arg8[%c0_565, %c216_566, %c0_567] : memref<2x256x256xbf16, #tpu.memory_space<vmem>>, vector<1x8x256xbf16>
    %482 = vector.shape_cast %481 : vector<1x8x256xbf16> to vector<8x256xbf16>
    %483 = vector.shape_cast %480 : vector<8x256xbf16> to vector<1x8x256xbf16>
    tpu.vector_store %arg8[%c0_565, %c216_566, %c0_567], %483 {strides = array<i32>} : memref<2x256x256xbf16, #tpu.memory_space<vmem>>, vector<1x8x256xbf16>,
    %c0_568 = arith.constant 0 : index
    %c0_569 = arith.constant 0 : index
    %c0_570 = arith.constant 0 : index
    %c197 = arith.constant 197 : index
    %484 = vector.load %arg2[%c0_568, %c0_569, %c0_570, %c197] : memref<1x1x8x640xbf16, #tpu.memory_space<vmem>>, vector<1x1x8x256xbf16>
    %485 = vector.shape_cast %484 : vector<1x1x8x256xbf16> to vector<8x256xbf16>
    %c0_571 = arith.constant 0 : index
    %c224_572 = arith.constant 224 : index
    %c0_573 = arith.constant 0 : index
    %486 = vector.load %arg8[%c0_571, %c224_572, %c0_573] : memref<2x256x256xbf16, #tpu.memory_space<vmem>>, vector<1x8x256xbf16>
    %487 = vector.shape_cast %486 : vector<1x8x256xbf16> to vector<8x256xbf16>
    %488 = vector.shape_cast %485 : vector<8x256xbf16> to vector<1x8x256xbf16>
    tpu.vector_store %arg8[%c0_571, %c224_572, %c0_573], %488 {strides = array<i32>} : memref<2x256x256xbf16, #tpu.memory_space<vmem>>, vector<1x8x256xbf16>,
    %c0_574 = arith.constant 0 : index
    %c0_575 = arith.constant 0 : index
    %c0_576 = arith.constant 0 : index
    %c198 = arith.constant 198 : index
    %489 = vector.load %arg2[%c0_574, %c0_575, %c0_576, %c198] : memref<1x1x8x640xbf16, #tpu.memory_space<vmem>>, vector<1x1x8x256xbf16>
    %490 = vector.shape_cast %489 : vector<1x1x8x256xbf16> to vector<8x256xbf16>
    %c0_577 = arith.constant 0 : index
    %c232_578 = arith.constant 232 : index
    %c0_579 = arith.constant 0 : index
    %491 = vector.load %arg8[%c0_577, %c232_578, %c0_579] : memref<2x256x256xbf16, #tpu.memory_space<vmem>>, vector<1x8x256xbf16>
    %492 = vector.shape_cast %491 : vector<1x8x256xbf16> to vector<8x256xbf16>
    %493 = vector.shape_cast %490 : vector<8x256xbf16> to vector<1x8x256xbf16>
    tpu.vector_store %arg8[%c0_577, %c232_578, %c0_579], %493 {strides = array<i32>} : memref<2x256x256xbf16, #tpu.memory_space<vmem>>, vector<1x8x256xbf16>,
    %c0_580 = arith.constant 0 : index
    %c0_581 = arith.constant 0 : index
    %c0_582 = arith.constant 0 : index
    %c199 = arith.constant 199 : index
    %494 = vector.load %arg2[%c0_580, %c0_581, %c0_582, %c199] : memref<1x1x8x640xbf16, #tpu.memory_space<vmem>>, vector<1x1x8x256xbf16>
    %495 = vector.shape_cast %494 : vector<1x1x8x256xbf16> to vector<8x256xbf16>
    %c0_583 = arith.constant 0 : index
    %c240_584 = arith.constant 240 : index
    %c0_585 = arith.constant 0 : index
    %496 = vector.load %arg8[%c0_583, %c240_584, %c0_585] : memref<2x256x256xbf16, #tpu.memory_space<vmem>>, vector<1x8x256xbf16>
    %497 = vector.shape_cast %496 : vector<1x8x256xbf16> to vector<8x256xbf16>
    %498 = vector.shape_cast %495 : vector<8x256xbf16> to vector<1x8x256xbf16>
    tpu.vector_store %arg8[%c0_583, %c240_584, %c0_585], %498 {strides = array<i32>} : memref<2x256x256xbf16, #tpu.memory_space<vmem>>, vector<1x8x256xbf16>,
    %c0_586 = arith.constant 0 : index
    %c0_587 = arith.constant 0 : index
    %c0_588 = arith.constant 0 : index
    %c200_589 = arith.constant 200 : index
    %499 = vector.load %arg2[%c0_586, %c0_587, %c0_588, %c200_589] : memref<1x1x8x640xbf16, #tpu.memory_space<vmem>>, vector<1x1x8x256xbf16>
    %500 = vector.shape_cast %499 : vector<1x1x8x256xbf16> to vector<8x256xbf16>
    %c0_590 = arith.constant 0 : index
    %c248_591 = arith.constant 248 : index
    %c0_592 = arith.constant 0 : index
    %501 = vector.load %arg8[%c0_590, %c248_591, %c0_592] : memref<2x256x256xbf16, #tpu.memory_space<vmem>>, vector<1x8x256xbf16>
    %502 = vector.shape_cast %501 : vector<1x8x256xbf16> to vector<8x256xbf16>
    %503 = vector.shape_cast %500 : vector<8x256xbf16> to vector<1x8x256xbf16>
    tpu.vector_store %arg8[%c0_590, %c248_591, %c0_592], %503 {strides = array<i32>} : memref<2x256x256xbf16, #tpu.memory_space<vmem>>, vector<1x8x256xbf16>,
    %c0_593 = arith.constant 0 : index
    %c0_594 = arith.constant 0 : index
    %504 = vector.load %arg9[%c0_593, %c0_594] : memref<8x256xf32, #tpu.memory_space<vmem>>, vector<8x256xf32>
    %c0_595 = arith.constant 0 : index
    %c2_596 = arith.constant 2 : index
    %c0_597 = arith.constant 0 : index
    %c0_598 = arith.constant 0 : index
    %505 = vector.load %arg4[%c0_595, %c2_596, %c0_597, %c0_598] : memref<1x6x8x256xbf16, #tpu.memory_space<vmem>>, vector<1x1x8x256xbf16>
    %506 = vector.shape_cast %505 : vector<1x1x8x256xbf16> to vector<8x256xbf16>
    %c0_599 = arith.constant 0 : index
    %c0_600 = arith.constant 0 : index
    %c0_601 = arith.constant 0 : index
    %507 = vector.load %arg8[%c0_599, %c0_600, %c0_601] : memref<2x256x256xbf16, #tpu.memory_space<vmem>>, vector<1x256x256xbf16>
    %508 = vector.shape_cast %507 : vector<1x256x256xbf16> to vector<256x256xbf16>
    %cst_602 = arith.constant dense<0.000000e+00> : vector<8x256xf32>
    %509 = tpu.matmul %506, %508, %cst_602 {dimension_numbers = #tpu.dot_dimension_numbers<[1], [0], [0], [1], [0, 0, 1, 1], [], []>} : vector<8x256xbf16>, vector<256x256xbf16>, vector<8x256xf32> -> vector<8x256xf32>
    %510 = arith.addf %504, %509 : vector<8x256xf32>
    %c0_603 = arith.constant 0 : index
    %c0_604 = arith.constant 0 : index
    %511 = vector.load %arg9[%c0_603, %c0_604] : memref<8x256xf32, #tpu.memory_space<vmem>>, vector<8x256xf32>
    tpu.vector_store %arg9[%c0_603, %c0_604], %510 {strides = array<i32>} : memref<8x256xf32, #tpu.memory_space<vmem>>, vector<8x256xf32>,
    %c0_605 = arith.constant 0 : index
    %c0_606 = arith.constant 0 : index
    %c0_607 = arith.constant 0 : index
    %c201 = arith.constant 201 : index
    %512 = vector.load %arg2[%c0_605, %c0_606, %c0_607, %c201] : memref<1x1x8x640xbf16, #tpu.memory_space<vmem>>, vector<1x1x8x256xbf16>
    %513 = vector.shape_cast %512 : vector<1x1x8x256xbf16> to vector<8x256xbf16>
    %c1_608 = arith.constant 1 : index
    %c0_609 = arith.constant 0 : index
    %c0_610 = arith.constant 0 : index
    %514 = vector.load %arg8[%c1_608, %c0_609, %c0_610] : memref<2x256x256xbf16, #tpu.memory_space<vmem>>, vector<1x8x256xbf16>
    %515 = vector.shape_cast %514 : vector<1x8x256xbf16> to vector<8x256xbf16>
    %516 = vector.shape_cast %513 : vector<8x256xbf16> to vector<1x8x256xbf16>
    tpu.vector_store %arg8[%c1_608, %c0_609, %c0_610], %516 {strides = array<i32>} : memref<2x256x256xbf16, #tpu.memory_space<vmem>>, vector<1x8x256xbf16>,
    %c0_611 = arith.constant 0 : index
    %c0_612 = arith.constant 0 : index
    %c0_613 = arith.constant 0 : index
    %c202 = arith.constant 202 : index
    %517 = vector.load %arg2[%c0_611, %c0_612, %c0_613, %c202] : memref<1x1x8x640xbf16, #tpu.memory_space<vmem>>, vector<1x1x8x256xbf16>
    %518 = vector.shape_cast %517 : vector<1x1x8x256xbf16> to vector<8x256xbf16>
    %c1_614 = arith.constant 1 : index
    %c8_615 = arith.constant 8 : index
    %c0_616 = arith.constant 0 : index
    %519 = vector.load %arg8[%c1_614, %c8_615, %c0_616] : memref<2x256x256xbf16, #tpu.memory_space<vmem>>, vector<1x8x256xbf16>
    %520 = vector.shape_cast %519 : vector<1x8x256xbf16> to vector<8x256xbf16>
    %521 = vector.shape_cast %518 : vector<8x256xbf16> to vector<1x8x256xbf16>
    tpu.vector_store %arg8[%c1_614, %c8_615, %c0_616], %521 {strides = array<i32>} : memref<2x256x256xbf16, #tpu.memory_space<vmem>>, vector<1x8x256xbf16>,
    %c0_617 = arith.constant 0 : index
    %c0_618 = arith.constant 0 : index
    %c0_619 = arith.constant 0 : index
    %c203 = arith.constant 203 : index
    %522 = vector.load %arg2[%c0_617, %c0_618, %c0_619, %c203] : memref<1x1x8x640xbf16, #tpu.memory_space<vmem>>, vector<1x1x8x256xbf16>
    %523 = vector.shape_cast %522 : vector<1x1x8x256xbf16> to vector<8x256xbf16>
    %c1_620 = arith.constant 1 : index
    %c16_621 = arith.constant 16 : index
    %c0_622 = arith.constant 0 : index
    %524 = vector.load %arg8[%c1_620, %c16_621, %c0_622] : memref<2x256x256xbf16, #tpu.memory_space<vmem>>, vector<1x8x256xbf16>
    %525 = vector.shape_cast %524 : vector<1x8x256xbf16> to vector<8x256xbf16>
    %526 = vector.shape_cast %523 : vector<8x256xbf16> to vector<1x8x256xbf16>
    tpu.vector_store %arg8[%c1_620, %c16_621, %c0_622], %526 {strides = array<i32>} : memref<2x256x256xbf16, #tpu.memory_space<vmem>>, vector<1x8x256xbf16>,
    %c0_623 = arith.constant 0 : index
    %c0_624 = arith.constant 0 : index
    %c0_625 = arith.constant 0 : index
    %c204 = arith.constant 204 : index
    %527 = vector.load %arg2[%c0_623, %c0_624, %c0_625, %c204] : memref<1x1x8x640xbf16, #tpu.memory_space<vmem>>, vector<1x1x8x256xbf16>
    %528 = vector.shape_cast %527 : vector<1x1x8x256xbf16> to vector<8x256xbf16>
    %c1_626 = arith.constant 1 : index
    %c24_627 = arith.constant 24 : index
    %c0_628 = arith.constant 0 : index
    %529 = vector.load %arg8[%c1_626, %c24_627, %c0_628] : memref<2x256x256xbf16, #tpu.memory_space<vmem>>, vector<1x8x256xbf16>
    %530 = vector.shape_cast %529 : vector<1x8x256xbf16> to vector<8x256xbf16>
    %531 = vector.shape_cast %528 : vector<8x256xbf16> to vector<1x8x256xbf16>
    tpu.vector_store %arg8[%c1_626, %c24_627, %c0_628], %531 {strides = array<i32>} : memref<2x256x256xbf16, #tpu.memory_space<vmem>>, vector<1x8x256xbf16>,
    %c0_629 = arith.constant 0 : index
    %c0_630 = arith.constant 0 : index
    %c0_631 = arith.constant 0 : index
    %c205 = arith.constant 205 : index
    %532 = vector.load %arg2[%c0_629, %c0_630, %c0_631, %c205] : memref<1x1x8x640xbf16, #tpu.memory_space<vmem>>, vector<1x1x8x256xbf16>
    %533 = vector.shape_cast %532 : vector<1x1x8x256xbf16> to vector<8x256xbf16>
    %c1_632 = arith.constant 1 : index
    %c32_633 = arith.constant 32 : index
    %c0_634 = arith.constant 0 : index
    %534 = vector.load %arg8[%c1_632, %c32_633, %c0_634] : memref<2x256x256xbf16, #tpu.memory_space<vmem>>, vector<1x8x256xbf16>
    %535 = vector.shape_cast %534 : vector<1x8x256xbf16> to vector<8x256xbf16>
    %536 = vector.shape_cast %533 : vector<8x256xbf16> to vector<1x8x256xbf16>
    tpu.vector_store %arg8[%c1_632, %c32_633, %c0_634], %536 {strides = array<i32>} : memref<2x256x256xbf16, #tpu.memory_space<vmem>>, vector<1x8x256xbf16>,
    %c0_635 = arith.constant 0 : index
    %c0_636 = arith.constant 0 : index
    %c0_637 = arith.constant 0 : index
    %c206 = arith.constant 206 : index
    %537 = vector.load %arg2[%c0_635, %c0_636, %c0_637, %c206] : memref<1x1x8x640xbf16, #tpu.memory_space<vmem>>, vector<1x1x8x256xbf16>
    %538 = vector.shape_cast %537 : vector<1x1x8x256xbf16> to vector<8x256xbf16>
    %c1_638 = arith.constant 1 : index
    %c40_639 = arith.constant 40 : index
    %c0_640 = arith.constant 0 : index
    %539 = vector.load %arg8[%c1_638, %c40_639, %c0_640] : memref<2x256x256xbf16, #tpu.memory_space<vmem>>, vector<1x8x256xbf16>
    %540 = vector.shape_cast %539 : vector<1x8x256xbf16> to vector<8x256xbf16>
    %541 = vector.shape_cast %538 : vector<8x256xbf16> to vector<1x8x256xbf16>
    tpu.vector_store %arg8[%c1_638, %c40_639, %c0_640], %541 {strides = array<i32>} : memref<2x256x256xbf16, #tpu.memory_space<vmem>>, vector<1x8x256xbf16>,
    %c0_641 = arith.constant 0 : index
    %c0_642 = arith.constant 0 : index
    %c0_643 = arith.constant 0 : index
    %c207 = arith.constant 207 : index
    %542 = vector.load %arg2[%c0_641, %c0_642, %c0_643, %c207] : memref<1x1x8x640xbf16, #tpu.memory_space<vmem>>, vector<1x1x8x256xbf16>
    %543 = vector.shape_cast %542 : vector<1x1x8x256xbf16> to vector<8x256xbf16>
    %c1_644 = arith.constant 1 : index
    %c48_645 = arith.constant 48 : index
    %c0_646 = arith.constant 0 : index
    %544 = vector.load %arg8[%c1_644, %c48_645, %c0_646] : memref<2x256x256xbf16, #tpu.memory_space<vmem>>, vector<1x8x256xbf16>
    %545 = vector.shape_cast %544 : vector<1x8x256xbf16> to vector<8x256xbf16>
    %546 = vector.shape_cast %543 : vector<8x256xbf16> to vector<1x8x256xbf16>
    tpu.vector_store %arg8[%c1_644, %c48_645, %c0_646], %546 {strides = array<i32>} : memref<2x256x256xbf16, #tpu.memory_space<vmem>>, vector<1x8x256xbf16>,
    %c0_647 = arith.constant 0 : index
    %c0_648 = arith.constant 0 : index
    %c0_649 = arith.constant 0 : index
    %c208_650 = arith.constant 208 : index
    %547 = vector.load %arg2[%c0_647, %c0_648, %c0_649, %c208_650] : memref<1x1x8x640xbf16, #tpu.memory_space<vmem>>, vector<1x1x8x256xbf16>
    %548 = vector.shape_cast %547 : vector<1x1x8x256xbf16> to vector<8x256xbf16>
    %c1_651 = arith.constant 1 : index
    %c56_652 = arith.constant 56 : index
    %c0_653 = arith.constant 0 : index
    %549 = vector.load %arg8[%c1_651, %c56_652, %c0_653] : memref<2x256x256xbf16, #tpu.memory_space<vmem>>, vector<1x8x256xbf16>
    %550 = vector.shape_cast %549 : vector<1x8x256xbf16> to vector<8x256xbf16>
    %551 = vector.shape_cast %548 : vector<8x256xbf16> to vector<1x8x256xbf16>
    tpu.vector_store %arg8[%c1_651, %c56_652, %c0_653], %551 {strides = array<i32>} : memref<2x256x256xbf16, #tpu.memory_space<vmem>>, vector<1x8x256xbf16>,
    %c0_654 = arith.constant 0 : index
    %c0_655 = arith.constant 0 : index
    %c0_656 = arith.constant 0 : index
    %c224_657 = arith.constant 224 : index
    %552 = vector.load %arg2[%c0_654, %c0_655, %c0_656, %c224_657] : memref<1x1x8x640xbf16, #tpu.memory_space<vmem>>, vector<1x1x8x256xbf16>
    %553 = vector.shape_cast %552 : vector<1x1x8x256xbf16> to vector<8x256xbf16>
    %c1_658 = arith.constant 1 : index
    %c64_659 = arith.constant 64 : index
    %c0_660 = arith.constant 0 : index
    %554 = vector.load %arg8[%c1_658, %c64_659, %c0_660] : memref<2x256x256xbf16, #tpu.memory_space<vmem>>, vector<1x8x256xbf16>
    %555 = vector.shape_cast %554 : vector<1x8x256xbf16> to vector<8x256xbf16>
    %556 = vector.shape_cast %553 : vector<8x256xbf16> to vector<1x8x256xbf16>
    tpu.vector_store %arg8[%c1_658, %c64_659, %c0_660], %556 {strides = array<i32>} : memref<2x256x256xbf16, #tpu.memory_space<vmem>>, vector<1x8x256xbf16>,
    %c0_661 = arith.constant 0 : index
    %c0_662 = arith.constant 0 : index
    %c0_663 = arith.constant 0 : index
    %c225 = arith.constant 225 : index
    %557 = vector.load %arg2[%c0_661, %c0_662, %c0_663, %c225] : memref<1x1x8x640xbf16, #tpu.memory_space<vmem>>, vector<1x1x8x256xbf16>
    %558 = vector.shape_cast %557 : vector<1x1x8x256xbf16> to vector<8x256xbf16>
    %c1_664 = arith.constant 1 : index
    %c72_665 = arith.constant 72 : index
    %c0_666 = arith.constant 0 : index
    %559 = vector.load %arg8[%c1_664, %c72_665, %c0_666] : memref<2x256x256xbf16, #tpu.memory_space<vmem>>, vector<1x8x256xbf16>
    %560 = vector.shape_cast %559 : vector<1x8x256xbf16> to vector<8x256xbf16>
    %561 = vector.shape_cast %558 : vector<8x256xbf16> to vector<1x8x256xbf16>
    tpu.vector_store %arg8[%c1_664, %c72_665, %c0_666], %561 {strides = array<i32>} : memref<2x256x256xbf16, #tpu.memory_space<vmem>>, vector<1x8x256xbf16>,
    %c0_667 = arith.constant 0 : index
    %c0_668 = arith.constant 0 : index
    %c0_669 = arith.constant 0 : index
    %c226 = arith.constant 226 : index
    %562 = vector.load %arg2[%c0_667, %c0_668, %c0_669, %c226] : memref<1x1x8x640xbf16, #tpu.memory_space<vmem>>, vector<1x1x8x256xbf16>
    %563 = vector.shape_cast %562 : vector<1x1x8x256xbf16> to vector<8x256xbf16>
    %c1_670 = arith.constant 1 : index
    %c80_671 = arith.constant 80 : index
    %c0_672 = arith.constant 0 : index
    %564 = vector.load %arg8[%c1_670, %c80_671, %c0_672] : memref<2x256x256xbf16, #tpu.memory_space<vmem>>, vector<1x8x256xbf16>
    %565 = vector.shape_cast %564 : vector<1x8x256xbf16> to vector<8x256xbf16>
    %566 = vector.shape_cast %563 : vector<8x256xbf16> to vector<1x8x256xbf16>
    tpu.vector_store %arg8[%c1_670, %c80_671, %c0_672], %566 {strides = array<i32>} : memref<2x256x256xbf16, #tpu.memory_space<vmem>>, vector<1x8x256xbf16>,
    %c0_673 = arith.constant 0 : index
    %c0_674 = arith.constant 0 : index
    %c0_675 = arith.constant 0 : index
    %c227 = arith.constant 227 : index
    %567 = vector.load %arg2[%c0_673, %c0_674, %c0_675, %c227] : memref<1x1x8x640xbf16, #tpu.memory_space<vmem>>, vector<1x1x8x256xbf16>
    %568 = vector.shape_cast %567 : vector<1x1x8x256xbf16> to vector<8x256xbf16>
    %c1_676 = arith.constant 1 : index
    %c88_677 = arith.constant 88 : index
    %c0_678 = arith.constant 0 : index
    %569 = vector.load %arg8[%c1_676, %c88_677, %c0_678] : memref<2x256x256xbf16, #tpu.memory_space<vmem>>, vector<1x8x256xbf16>
    %570 = vector.shape_cast %569 : vector<1x8x256xbf16> to vector<8x256xbf16>
    %571 = vector.shape_cast %568 : vector<8x256xbf16> to vector<1x8x256xbf16>
    tpu.vector_store %arg8[%c1_676, %c88_677, %c0_678], %571 {strides = array<i32>} : memref<2x256x256xbf16, #tpu.memory_space<vmem>>, vector<1x8x256xbf16>,
    %c0_679 = arith.constant 0 : index
    %c0_680 = arith.constant 0 : index
    %c0_681 = arith.constant 0 : index
    %c228 = arith.constant 228 : index
    %572 = vector.load %arg2[%c0_679, %c0_680, %c0_681, %c228] : memref<1x1x8x640xbf16, #tpu.memory_space<vmem>>, vector<1x1x8x256xbf16>
    %573 = vector.shape_cast %572 : vector<1x1x8x256xbf16> to vector<8x256xbf16>
    %c1_682 = arith.constant 1 : index
    %c96_683 = arith.constant 96 : index
    %c0_684 = arith.constant 0 : index
    %574 = vector.load %arg8[%c1_682, %c96_683, %c0_684] : memref<2x256x256xbf16, #tpu.memory_space<vmem>>, vector<1x8x256xbf16>
    %575 = vector.shape_cast %574 : vector<1x8x256xbf16> to vector<8x256xbf16>
    %576 = vector.shape_cast %573 : vector<8x256xbf16> to vector<1x8x256xbf16>
    tpu.vector_store %arg8[%c1_682, %c96_683, %c0_684], %576 {strides = array<i32>} : memref<2x256x256xbf16, #tpu.memory_space<vmem>>, vector<1x8x256xbf16>,
    %c0_685 = arith.constant 0 : index
    %c0_686 = arith.constant 0 : index
    %c0_687 = arith.constant 0 : index
    %c229 = arith.constant 229 : index
    %577 = vector.load %arg2[%c0_685, %c0_686, %c0_687, %c229] : memref<1x1x8x640xbf16, #tpu.memory_space<vmem>>, vector<1x1x8x256xbf16>
    %578 = vector.shape_cast %577 : vector<1x1x8x256xbf16> to vector<8x256xbf16>
    %c1_688 = arith.constant 1 : index
    %c104_689 = arith.constant 104 : index
    %c0_690 = arith.constant 0 : index
    %579 = vector.load %arg8[%c1_688, %c104_689, %c0_690] : memref<2x256x256xbf16, #tpu.memory_space<vmem>>, vector<1x8x256xbf16>
    %580 = vector.shape_cast %579 : vector<1x8x256xbf16> to vector<8x256xbf16>
    %581 = vector.shape_cast %578 : vector<8x256xbf16> to vector<1x8x256xbf16>
    tpu.vector_store %arg8[%c1_688, %c104_689, %c0_690], %581 {strides = array<i32>} : memref<2x256x256xbf16, #tpu.memory_space<vmem>>, vector<1x8x256xbf16>,
    %c0_691 = arith.constant 0 : index
    %c0_692 = arith.constant 0 : index
    %c0_693 = arith.constant 0 : index
    %c230 = arith.constant 230 : index
    %582 = vector.load %arg2[%c0_691, %c0_692, %c0_693, %c230] : memref<1x1x8x640xbf16, #tpu.memory_space<vmem>>, vector<1x1x8x256xbf16>
    %583 = vector.shape_cast %582 : vector<1x1x8x256xbf16> to vector<8x256xbf16>
    %c1_694 = arith.constant 1 : index
    %c112_695 = arith.constant 112 : index
    %c0_696 = arith.constant 0 : index
    %584 = vector.load %arg8[%c1_694, %c112_695, %c0_696] : memref<2x256x256xbf16, #tpu.memory_space<vmem>>, vector<1x8x256xbf16>
    %585 = vector.shape_cast %584 : vector<1x8x256xbf16> to vector<8x256xbf16>
    %586 = vector.shape_cast %583 : vector<8x256xbf16> to vector<1x8x256xbf16>
    tpu.vector_store %arg8[%c1_694, %c112_695, %c0_696], %586 {strides = array<i32>} : memref<2x256x256xbf16, #tpu.memory_space<vmem>>, vector<1x8x256xbf16>,
    %c0_697 = arith.constant 0 : index
    %c0_698 = arith.constant 0 : index
    %c0_699 = arith.constant 0 : index
    %c231 = arith.constant 231 : index
    %587 = vector.load %arg2[%c0_697, %c0_698, %c0_699, %c231] : memref<1x1x8x640xbf16, #tpu.memory_space<vmem>>, vector<1x1x8x256xbf16>
    %588 = vector.shape_cast %587 : vector<1x1x8x256xbf16> to vector<8x256xbf16>
    %c1_700 = arith.constant 1 : index
    %c120_701 = arith.constant 120 : index
    %c0_702 = arith.constant 0 : index
    %589 = vector.load %arg8[%c1_700, %c120_701, %c0_702] : memref<2x256x256xbf16, #tpu.memory_space<vmem>>, vector<1x8x256xbf16>
    %590 = vector.shape_cast %589 : vector<1x8x256xbf16> to vector<8x256xbf16>
    %591 = vector.shape_cast %588 : vector<8x256xbf16> to vector<1x8x256xbf16>
    tpu.vector_store %arg8[%c1_700, %c120_701, %c0_702], %591 {strides = array<i32>} : memref<2x256x256xbf16, #tpu.memory_space<vmem>>, vector<1x8x256xbf16>,
    %c0_703 = arith.constant 0 : index
    %c0_704 = arith.constant 0 : index
    %c0_705 = arith.constant 0 : index
    %c232_706 = arith.constant 232 : index
    %592 = vector.load %arg2[%c0_703, %c0_704, %c0_705, %c232_706] : memref<1x1x8x640xbf16, #tpu.memory_space<vmem>>, vector<1x1x8x256xbf16>
    %593 = vector.shape_cast %592 : vector<1x1x8x256xbf16> to vector<8x256xbf16>
    %c1_707 = arith.constant 1 : index
    %c128_708 = arith.constant 128 : index
    %c0_709 = arith.constant 0 : index
    %594 = vector.load %arg8[%c1_707, %c128_708, %c0_709] : memref<2x256x256xbf16, #tpu.memory_space<vmem>>, vector<1x8x256xbf16>
    %595 = vector.shape_cast %594 : vector<1x8x256xbf16> to vector<8x256xbf16>
    %596 = vector.shape_cast %593 : vector<8x256xbf16> to vector<1x8x256xbf16>
    tpu.vector_store %arg8[%c1_707, %c128_708, %c0_709], %596 {strides = array<i32>} : memref<2x256x256xbf16, #tpu.memory_space<vmem>>, vector<1x8x256xbf16>,
    %c0_710 = arith.constant 0 : index
    %c0_711 = arith.constant 0 : index
    %c0_712 = arith.constant 0 : index
    %c233 = arith.constant 233 : index
    %597 = vector.load %arg2[%c0_710, %c0_711, %c0_712, %c233] : memref<1x1x8x640xbf16, #tpu.memory_space<vmem>>, vector<1x1x8x256xbf16>
    %598 = vector.shape_cast %597 : vector<1x1x8x256xbf16> to vector<8x256xbf16>
    %c1_713 = arith.constant 1 : index
    %c136_714 = arith.constant 136 : index
    %c0_715 = arith.constant 0 : index
    %599 = vector.load %arg8[%c1_713, %c136_714, %c0_715] : memref<2x256x256xbf16, #tpu.memory_space<vmem>>, vector<1x8x256xbf16>
    %600 = vector.shape_cast %599 : vector<1x8x256xbf16> to vector<8x256xbf16>
    %601 = vector.shape_cast %598 : vector<8x256xbf16> to vector<1x8x256xbf16>
    tpu.vector_store %arg8[%c1_713, %c136_714, %c0_715], %601 {strides = array<i32>} : memref<2x256x256xbf16, #tpu.memory_space<vmem>>, vector<1x8x256xbf16>,
    %c0_716 = arith.constant 0 : index
    %c0_717 = arith.constant 0 : index
    %c0_718 = arith.constant 0 : index
    %c234 = arith.constant 234 : index
    %602 = vector.load %arg2[%c0_716, %c0_717, %c0_718, %c234] : memref<1x1x8x640xbf16, #tpu.memory_space<vmem>>, vector<1x1x8x256xbf16>
    %603 = vector.shape_cast %602 : vector<1x1x8x256xbf16> to vector<8x256xbf16>
    %c1_719 = arith.constant 1 : index
    %c144_720 = arith.constant 144 : index
    %c0_721 = arith.constant 0 : index
    %604 = vector.load %arg8[%c1_719, %c144_720, %c0_721] : memref<2x256x256xbf16, #tpu.memory_space<vmem>>, vector<1x8x256xbf16>
    %605 = vector.shape_cast %604 : vector<1x8x256xbf16> to vector<8x256xbf16>
    %606 = vector.shape_cast %603 : vector<8x256xbf16> to vector<1x8x256xbf16>
    tpu.vector_store %arg8[%c1_719, %c144_720, %c0_721], %606 {strides = array<i32>} : memref<2x256x256xbf16, #tpu.memory_space<vmem>>, vector<1x8x256xbf16>,
    %c0_722 = arith.constant 0 : index
    %c0_723 = arith.constant 0 : index
    %c0_724 = arith.constant 0 : index
    %c235 = arith.constant 235 : index
    %607 = vector.load %arg2[%c0_722, %c0_723, %c0_724, %c235] : memref<1x1x8x640xbf16, #tpu.memory_space<vmem>>, vector<1x1x8x256xbf16>
    %608 = vector.shape_cast %607 : vector<1x1x8x256xbf16> to vector<8x256xbf16>
    %c1_725 = arith.constant 1 : index
    %c152_726 = arith.constant 152 : index
    %c0_727 = arith.constant 0 : index
    %609 = vector.load %arg8[%c1_725, %c152_726, %c0_727] : memref<2x256x256xbf16, #tpu.memory_space<vmem>>, vector<1x8x256xbf16>
    %610 = vector.shape_cast %609 : vector<1x8x256xbf16> to vector<8x256xbf16>
    %611 = vector.shape_cast %608 : vector<8x256xbf16> to vector<1x8x256xbf16>
    tpu.vector_store %arg8[%c1_725, %c152_726, %c0_727], %611 {strides = array<i32>} : memref<2x256x256xbf16, #tpu.memory_space<vmem>>, vector<1x8x256xbf16>,
    %c0_728 = arith.constant 0 : index
    %c0_729 = arith.constant 0 : index
    %c0_730 = arith.constant 0 : index
    %c236 = arith.constant 236 : index
    %612 = vector.load %arg2[%c0_728, %c0_729, %c0_730, %c236] : memref<1x1x8x640xbf16, #tpu.memory_space<vmem>>, vector<1x1x8x256xbf16>
    %613 = vector.shape_cast %612 : vector<1x1x8x256xbf16> to vector<8x256xbf16>
    %c1_731 = arith.constant 1 : index
    %c160_732 = arith.constant 160 : index
    %c0_733 = arith.constant 0 : index
    %614 = vector.load %arg8[%c1_731, %c160_732, %c0_733] : memref<2x256x256xbf16, #tpu.memory_space<vmem>>, vector<1x8x256xbf16>
    %615 = vector.shape_cast %614 : vector<1x8x256xbf16> to vector<8x256xbf16>
    %616 = vector.shape_cast %613 : vector<8x256xbf16> to vector<1x8x256xbf16>
    tpu.vector_store %arg8[%c1_731, %c160_732, %c0_733], %616 {strides = array<i32>} : memref<2x256x256xbf16, #tpu.memory_space<vmem>>, vector<1x8x256xbf16>,
    %c0_734 = arith.constant 0 : index
    %c0_735 = arith.constant 0 : index
    %c0_736 = arith.constant 0 : index
    %c252 = arith.constant 252 : index
    %617 = vector.load %arg2[%c0_734, %c0_735, %c0_736, %c252] : memref<1x1x8x640xbf16, #tpu.memory_space<vmem>>, vector<1x1x8x256xbf16>
    %618 = vector.shape_cast %617 : vector<1x1x8x256xbf16> to vector<8x256xbf16>
    %c1_737 = arith.constant 1 : index
    %c168_738 = arith.constant 168 : index
    %c0_739 = arith.constant 0 : index
    %619 = vector.load %arg8[%c1_737, %c168_738, %c0_739] : memref<2x256x256xbf16, #tpu.memory_space<vmem>>, vector<1x8x256xbf16>
    %620 = vector.shape_cast %619 : vector<1x8x256xbf16> to vector<8x256xbf16>
    %621 = vector.shape_cast %618 : vector<8x256xbf16> to vector<1x8x256xbf16>
    tpu.vector_store %arg8[%c1_737, %c168_738, %c0_739], %621 {strides = array<i32>} : memref<2x256x256xbf16, #tpu.memory_space<vmem>>, vector<1x8x256xbf16>,
    %c0_740 = arith.constant 0 : index
    %c0_741 = arith.constant 0 : index
    %c0_742 = arith.constant 0 : index
    %c253 = arith.constant 253 : index
    %622 = vector.load %arg2[%c0_740, %c0_741, %c0_742, %c253] : memref<1x1x8x640xbf16, #tpu.memory_space<vmem>>, vector<1x1x8x256xbf16>
    %623 = vector.shape_cast %622 : vector<1x1x8x256xbf16> to vector<8x256xbf16>
    %c1_743 = arith.constant 1 : index
    %c176_744 = arith.constant 176 : index
    %c0_745 = arith.constant 0 : index
    %624 = vector.load %arg8[%c1_743, %c176_744, %c0_745] : memref<2x256x256xbf16, #tpu.memory_space<vmem>>, vector<1x8x256xbf16>
    %625 = vector.shape_cast %624 : vector<1x8x256xbf16> to vector<8x256xbf16>
    %626 = vector.shape_cast %623 : vector<8x256xbf16> to vector<1x8x256xbf16>
    tpu.vector_store %arg8[%c1_743, %c176_744, %c0_745], %626 {strides = array<i32>} : memref<2x256x256xbf16, #tpu.memory_space<vmem>>, vector<1x8x256xbf16>,
    %c0_746 = arith.constant 0 : index
    %c0_747 = arith.constant 0 : index
    %c0_748 = arith.constant 0 : index
    %c254 = arith.constant 254 : index
    %627 = vector.load %arg2[%c0_746, %c0_747, %c0_748, %c254] : memref<1x1x8x640xbf16, #tpu.memory_space<vmem>>, vector<1x1x8x256xbf16>
    %628 = vector.shape_cast %627 : vector<1x1x8x256xbf16> to vector<8x256xbf16>
    %c1_749 = arith.constant 1 : index
    %c184_750 = arith.constant 184 : index
    %c0_751 = arith.constant 0 : index
    %629 = vector.load %arg8[%c1_749, %c184_750, %c0_751] : memref<2x256x256xbf16, #tpu.memory_space<vmem>>, vector<1x8x256xbf16>
    %630 = vector.shape_cast %629 : vector<1x8x256xbf16> to vector<8x256xbf16>
    %631 = vector.shape_cast %628 : vector<8x256xbf16> to vector<1x8x256xbf16>
    tpu.vector_store %arg8[%c1_749, %c184_750, %c0_751], %631 {strides = array<i32>} : memref<2x256x256xbf16, #tpu.memory_space<vmem>>, vector<1x8x256xbf16>,
    %c0_752 = arith.constant 0 : index
    %c0_753 = arith.constant 0 : index
    %c0_754 = arith.constant 0 : index
    %c255 = arith.constant 255 : index
    %632 = vector.load %arg2[%c0_752, %c0_753, %c0_754, %c255] : memref<1x1x8x640xbf16, #tpu.memory_space<vmem>>, vector<1x1x8x256xbf16>
    %633 = vector.shape_cast %632 : vector<1x1x8x256xbf16> to vector<8x256xbf16>
    %c1_755 = arith.constant 1 : index
    %c192_756 = arith.constant 192 : index
    %c0_757 = arith.constant 0 : index
    %634 = vector.load %arg8[%c1_755, %c192_756, %c0_757] : memref<2x256x256xbf16, #tpu.memory_space<vmem>>, vector<1x8x256xbf16>
    %635 = vector.shape_cast %634 : vector<1x8x256xbf16> to vector<8x256xbf16>
    %636 = vector.shape_cast %633 : vector<8x256xbf16> to vector<1x8x256xbf16>
    tpu.vector_store %arg8[%c1_755, %c192_756, %c0_757], %636 {strides = array<i32>} : memref<2x256x256xbf16, #tpu.memory_space<vmem>>, vector<1x8x256xbf16>,
    %c0_758 = arith.constant 0 : index
    %c0_759 = arith.constant 0 : index
    %c0_760 = arith.constant 0 : index
    %c256 = arith.constant 256 : index
    %637 = vector.load %arg2[%c0_758, %c0_759, %c0_760, %c256] : memref<1x1x8x640xbf16, #tpu.memory_space<vmem>>, vector<1x1x8x256xbf16>
    %638 = vector.shape_cast %637 : vector<1x1x8x256xbf16> to vector<8x256xbf16>
    %c1_761 = arith.constant 1 : index
    %c200_762 = arith.constant 200 : index
    %c0_763 = arith.constant 0 : index
    %639 = vector.load %arg8[%c1_761, %c200_762, %c0_763] : memref<2x256x256xbf16, #tpu.memory_space<vmem>>, vector<1x8x256xbf16>
    %640 = vector.shape_cast %639 : vector<1x8x256xbf16> to vector<8x256xbf16>
    %641 = vector.shape_cast %638 : vector<8x256xbf16> to vector<1x8x256xbf16>
    tpu.vector_store %arg8[%c1_761, %c200_762, %c0_763], %641 {strides = array<i32>} : memref<2x256x256xbf16, #tpu.memory_space<vmem>>, vector<1x8x256xbf16>,
    %c0_764 = arith.constant 0 : index
    %c0_765 = arith.constant 0 : index
    %c0_766 = arith.constant 0 : index
    %c257 = arith.constant 257 : index
    %642 = vector.load %arg2[%c0_764, %c0_765, %c0_766, %c257] : memref<1x1x8x640xbf16, #tpu.memory_space<vmem>>, vector<1x1x8x256xbf16>
    %643 = vector.shape_cast %642 : vector<1x1x8x256xbf16> to vector<8x256xbf16>
    %c1_767 = arith.constant 1 : index
    %c208_768 = arith.constant 208 : index
    %c0_769 = arith.constant 0 : index
    %644 = vector.load %arg8[%c1_767, %c208_768, %c0_769] : memref<2x256x256xbf16, #tpu.memory_space<vmem>>, vector<1x8x256xbf16>
    %645 = vector.shape_cast %644 : vector<1x8x256xbf16> to vector<8x256xbf16>
    %646 = vector.shape_cast %643 : vector<8x256xbf16> to vector<1x8x256xbf16>
    tpu.vector_store %arg8[%c1_767, %c208_768, %c0_769], %646 {strides = array<i32>} : memref<2x256x256xbf16, #tpu.memory_space<vmem>>, vector<1x8x256xbf16>,
    %c0_770 = arith.constant 0 : index
    %c0_771 = arith.constant 0 : index
    %c0_772 = arith.constant 0 : index
    %c258 = arith.constant 258 : index
    %647 = vector.load %arg2[%c0_770, %c0_771, %c0_772, %c258] : memref<1x1x8x640xbf16, #tpu.memory_space<vmem>>, vector<1x1x8x256xbf16>
    %648 = vector.shape_cast %647 : vector<1x1x8x256xbf16> to vector<8x256xbf16>
    %c1_773 = arith.constant 1 : index
    %c216_774 = arith.constant 216 : index
    %c0_775 = arith.constant 0 : index
    %649 = vector.load %arg8[%c1_773, %c216_774, %c0_775] : memref<2x256x256xbf16, #tpu.memory_space<vmem>>, vector<1x8x256xbf16>
    %650 = vector.shape_cast %649 : vector<1x8x256xbf16> to vector<8x256xbf16>
    %651 = vector.shape_cast %648 : vector<8x256xbf16> to vector<1x8x256xbf16>
    tpu.vector_store %arg8[%c1_773, %c216_774, %c0_775], %651 {strides = array<i32>} : memref<2x256x256xbf16, #tpu.memory_space<vmem>>, vector<1x8x256xbf16>,
    %c0_776 = arith.constant 0 : index
    %c0_777 = arith.constant 0 : index
    %c0_778 = arith.constant 0 : index
    %c259 = arith.constant 259 : index
    %652 = vector.load %arg2[%c0_776, %c0_777, %c0_778, %c259] : memref<1x1x8x640xbf16, #tpu.memory_space<vmem>>, vector<1x1x8x256xbf16>
    %653 = vector.shape_cast %652 : vector<1x1x8x256xbf16> to vector<8x256xbf16>
    %c1_779 = arith.constant 1 : index
    %c224_780 = arith.constant 224 : index
    %c0_781 = arith.constant 0 : index
    %654 = vector.load %arg8[%c1_779, %c224_780, %c0_781] : memref<2x256x256xbf16, #tpu.memory_space<vmem>>, vector<1x8x256xbf16>
    %655 = vector.shape_cast %654 : vector<1x8x256xbf16> to vector<8x256xbf16>
    %656 = vector.shape_cast %653 : vector<8x256xbf16> to vector<1x8x256xbf16>
    tpu.vector_store %arg8[%c1_779, %c224_780, %c0_781], %656 {strides = array<i32>} : memref<2x256x256xbf16, #tpu.memory_space<vmem>>, vector<1x8x256xbf16>,
    %c0_782 = arith.constant 0 : index
    %c0_783 = arith.constant 0 : index
    %c0_784 = arith.constant 0 : index
    %c260 = arith.constant 260 : index
    %657 = vector.load %arg2[%c0_782, %c0_783, %c0_784, %c260] : memref<1x1x8x640xbf16, #tpu.memory_space<vmem>>, vector<1x1x8x256xbf16>
    %658 = vector.shape_cast %657 : vector<1x1x8x256xbf16> to vector<8x256xbf16>
    %c1_785 = arith.constant 1 : index
    %c232_786 = arith.constant 232 : index
    %c0_787 = arith.constant 0 : index
    %659 = vector.load %arg8[%c1_785, %c232_786, %c0_787] : memref<2x256x256xbf16, #tpu.memory_space<vmem>>, vector<1x8x256xbf16>
    %660 = vector.shape_cast %659 : vector<1x8x256xbf16> to vector<8x256xbf16>
    %661 = vector.shape_cast %658 : vector<8x256xbf16> to vector<1x8x256xbf16>
    tpu.vector_store %arg8[%c1_785, %c232_786, %c0_787], %661 {strides = array<i32>} : memref<2x256x256xbf16, #tpu.memory_space<vmem>>, vector<1x8x256xbf16>,
    %c0_788 = arith.constant 0 : index
    %c0_789 = arith.constant 0 : index
    %c0_790 = arith.constant 0 : index
    %c261 = arith.constant 261 : index
    %662 = vector.load %arg2[%c0_788, %c0_789, %c0_790, %c261] : memref<1x1x8x640xbf16, #tpu.memory_space<vmem>>, vector<1x1x8x256xbf16>
    %663 = vector.shape_cast %662 : vector<1x1x8x256xbf16> to vector<8x256xbf16>
    %c1_791 = arith.constant 1 : index
    %c240_792 = arith.constant 240 : index
    %c0_793 = arith.constant 0 : index
    %664 = vector.load %arg8[%c1_791, %c240_792, %c0_793] : memref<2x256x256xbf16, #tpu.memory_space<vmem>>, vector<1x8x256xbf16>
    %665 = vector.shape_cast %664 : vector<1x8x256xbf16> to vector<8x256xbf16>
    %666 = vector.shape_cast %663 : vector<8x256xbf16> to vector<1x8x256xbf16>
    tpu.vector_store %arg8[%c1_791, %c240_792, %c0_793], %666 {strides = array<i32>} : memref<2x256x256xbf16, #tpu.memory_space<vmem>>, vector<1x8x256xbf16>,
    %c0_794 = arith.constant 0 : index
    %c0_795 = arith.constant 0 : index
    %c0_796 = arith.constant 0 : index
    %c262 = arith.constant 262 : index
    %667 = vector.load %arg2[%c0_794, %c0_795, %c0_796, %c262] : memref<1x1x8x640xbf16, #tpu.memory_space<vmem>>, vector<1x1x8x256xbf16>
    %668 = vector.shape_cast %667 : vector<1x1x8x256xbf16> to vector<8x256xbf16>
    %c1_797 = arith.constant 1 : index
    %c248_798 = arith.constant 248 : index
    %c0_799 = arith.constant 0 : index
    %669 = vector.load %arg8[%c1_797, %c248_798, %c0_799] : memref<2x256x256xbf16, #tpu.memory_space<vmem>>, vector<1x8x256xbf16>
    %670 = vector.shape_cast %669 : vector<1x8x256xbf16> to vector<8x256xbf16>
    %671 = vector.shape_cast %668 : vector<8x256xbf16> to vector<1x8x256xbf16>
    tpu.vector_store %arg8[%c1_797, %c248_798, %c0_799], %671 {strides = array<i32>} : memref<2x256x256xbf16, #tpu.memory_space<vmem>>, vector<1x8x256xbf16>,
    %c0_800 = arith.constant 0 : index
    %c0_801 = arith.constant 0 : index
    %672 = vector.load %arg9[%c0_800, %c0_801] : memref<8x256xf32, #tpu.memory_space<vmem>>, vector<8x256xf32>
    %c0_802 = arith.constant 0 : index
    %c3_803 = arith.constant 3 : index
    %c0_804 = arith.constant 0 : index
    %c0_805 = arith.constant 0 : index
    %673 = vector.load %arg4[%c0_802, %c3_803, %c0_804, %c0_805] : memref<1x6x8x256xbf16, #tpu.memory_space<vmem>>, vector<1x1x8x256xbf16>
    %674 = vector.shape_cast %673 : vector<1x1x8x256xbf16> to vector<8x256xbf16>
    %c1_806 = arith.constant 1 : index
    %c0_807 = arith.constant 0 : index
    %c0_808 = arith.constant 0 : index
    %675 = vector.load %arg8[%c1_806, %c0_807, %c0_808] : memref<2x256x256xbf16, #tpu.memory_space<vmem>>, vector<1x256x256xbf16>
    %676 = vector.shape_cast %675 : vector<1x256x256xbf16> to vector<256x256xbf16>
    %cst_809 = arith.constant dense<0.000000e+00> : vector<8x256xf32>
    %677 = tpu.matmul %674, %676, %cst_809 {dimension_numbers = #tpu.dot_dimension_numbers<[1], [0], [0], [1], [0, 0, 1, 1], [], []>} : vector<8x256xbf16>, vector<256x256xbf16>, vector<8x256xf32> -> vector<8x256xf32>
    %678 = arith.addf %672, %677 : vector<8x256xf32>
    %c0_810 = arith.constant 0 : index
    %c0_811 = arith.constant 0 : index
    %679 = vector.load %arg9[%c0_810, %c0_811] : memref<8x256xf32, #tpu.memory_space<vmem>>, vector<8x256xf32>
    tpu.vector_store %arg9[%c0_810, %c0_811], %678 {strides = array<i32>} : memref<8x256xf32, #tpu.memory_space<vmem>>, vector<8x256xf32>,
    %c0_812 = arith.constant 0 : index
    %c0_813 = arith.constant 0 : index
    %c0_814 = arith.constant 0 : index
    %c263 = arith.constant 263 : index
    %680 = vector.load %arg2[%c0_812, %c0_813, %c0_814, %c263] : memref<1x1x8x640xbf16, #tpu.memory_space<vmem>>, vector<1x1x8x256xbf16>
    %681 = vector.shape_cast %680 : vector<1x1x8x256xbf16> to vector<8x256xbf16>
    %c0_815 = arith.constant 0 : index
    %c0_816 = arith.constant 0 : index
    %c0_817 = arith.constant 0 : index
    %682 = vector.load %arg8[%c0_815, %c0_816, %c0_817] : memref<2x256x256xbf16, #tpu.memory_space<vmem>>, vector<1x8x256xbf16>
    %683 = vector.shape_cast %682 : vector<1x8x256xbf16> to vector<8x256xbf16>
    %684 = vector.shape_cast %681 : vector<8x256xbf16> to vector<1x8x256xbf16>
    tpu.vector_store %arg8[%c0_815, %c0_816, %c0_817], %684 {strides = array<i32>} : memref<2x256x256xbf16, #tpu.memory_space<vmem>>, vector<1x8x256xbf16>,
    %c0_818 = arith.constant 0 : index
    %c0_819 = arith.constant 0 : index
    %c0_820 = arith.constant 0 : index
    %c264 = arith.constant 264 : index
    %685 = vector.load %arg2[%c0_818, %c0_819, %c0_820, %c264] : memref<1x1x8x640xbf16, #tpu.memory_space<vmem>>, vector<1x1x8x256xbf16>
    %686 = vector.shape_cast %685 : vector<1x1x8x256xbf16> to vector<8x256xbf16>
    %c0_821 = arith.constant 0 : index
    %c8_822 = arith.constant 8 : index
    %c0_823 = arith.constant 0 : index
    %687 = vector.load %arg8[%c0_821, %c8_822, %c0_823] : memref<2x256x256xbf16, #tpu.memory_space<vmem>>, vector<1x8x256xbf16>
    %688 = vector.shape_cast %687 : vector<1x8x256xbf16> to vector<8x256xbf16>
    %689 = vector.shape_cast %686 : vector<8x256xbf16> to vector<1x8x256xbf16>
    tpu.vector_store %arg8[%c0_821, %c8_822, %c0_823], %689 {strides = array<i32>} : memref<2x256x256xbf16, #tpu.memory_space<vmem>>, vector<1x8x256xbf16>,
    %c0_824 = arith.constant 0 : index
    %c0_825 = arith.constant 0 : index
    %c0_826 = arith.constant 0 : index
    %c280 = arith.constant 280 : index
    %690 = vector.load %arg2[%c0_824, %c0_825, %c0_826, %c280] : memref<1x1x8x640xbf16, #tpu.memory_space<vmem>>, vector<1x1x8x256xbf16>
    %691 = vector.shape_cast %690 : vector<1x1x8x256xbf16> to vector<8x256xbf16>
    %c0_827 = arith.constant 0 : index
    %c16_828 = arith.constant 16 : index
    %c0_829 = arith.constant 0 : index
    %692 = vector.load %arg8[%c0_827, %c16_828, %c0_829] : memref<2x256x256xbf16, #tpu.memory_space<vmem>>, vector<1x8x256xbf16>
    %693 = vector.shape_cast %692 : vector<1x8x256xbf16> to vector<8x256xbf16>
    %694 = vector.shape_cast %691 : vector<8x256xbf16> to vector<1x8x256xbf16>
    tpu.vector_store %arg8[%c0_827, %c16_828, %c0_829], %694 {strides = array<i32>} : memref<2x256x256xbf16, #tpu.memory_space<vmem>>, vector<1x8x256xbf16>,
    %c0_830 = arith.constant 0 : index
    %c0_831 = arith.constant 0 : index
    %c0_832 = arith.constant 0 : index
    %c281 = arith.constant 281 : index
    %695 = vector.load %arg2[%c0_830, %c0_831, %c0_832, %c281] : memref<1x1x8x640xbf16, #tpu.memory_space<vmem>>, vector<1x1x8x256xbf16>
    %696 = vector.shape_cast %695 : vector<1x1x8x256xbf16> to vector<8x256xbf16>
    %c0_833 = arith.constant 0 : index
    %c24_834 = arith.constant 24 : index
    %c0_835 = arith.constant 0 : index
    %697 = vector.load %arg8[%c0_833, %c24_834, %c0_835] : memref<2x256x256xbf16, #tpu.memory_space<vmem>>, vector<1x8x256xbf16>
    %698 = vector.shape_cast %697 : vector<1x8x256xbf16> to vector<8x256xbf16>
    %699 = vector.shape_cast %696 : vector<8x256xbf16> to vector<1x8x256xbf16>
    tpu.vector_store %arg8[%c0_833, %c24_834, %c0_835], %699 {strides = array<i32>} : memref<2x256x256xbf16, #tpu.memory_space<vmem>>, vector<1x8x256xbf16>,
    %c0_836 = arith.constant 0 : index
    %c0_837 = arith.constant 0 : index
    %c0_838 = arith.constant 0 : index
    %c282 = arith.constant 282 : index
    %700 = vector.load %arg2[%c0_836, %c0_837, %c0_838, %c282] : memref<1x1x8x640xbf16, #tpu.memory_space<vmem>>, vector<1x1x8x256xbf16>
    %701 = vector.shape_cast %700 : vector<1x1x8x256xbf16> to vector<8x256xbf16>
    %c0_839 = arith.constant 0 : index
    %c32_840 = arith.constant 32 : index
    %c0_841 = arith.constant 0 : index
    %702 = vector.load %arg8[%c0_839, %c32_840, %c0_841] : memref<2x256x256xbf16, #tpu.memory_space<vmem>>, vector<1x8x256xbf16>
    %703 = vector.shape_cast %702 : vector<1x8x256xbf16> to vector<8x256xbf16>
    %704 = vector.shape_cast %701 : vector<8x256xbf16> to vector<1x8x256xbf16>
    tpu.vector_store %arg8[%c0_839, %c32_840, %c0_841], %704 {strides = array<i32>} : memref<2x256x256xbf16, #tpu.memory_space<vmem>>, vector<1x8x256xbf16>,
    %c0_842 = arith.constant 0 : index
    %c0_843 = arith.constant 0 : index
    %c0_844 = arith.constant 0 : index
    %c283 = arith.constant 283 : index
    %705 = vector.load %arg2[%c0_842, %c0_843, %c0_844, %c283] : memref<1x1x8x640xbf16, #tpu.memory_space<vmem>>, vector<1x1x8x256xbf16>
    %706 = vector.shape_cast %705 : vector<1x1x8x256xbf16> to vector<8x256xbf16>
    %c0_845 = arith.constant 0 : index
    %c40_846 = arith.constant 40 : index
    %c0_847 = arith.constant 0 : index
    %707 = vector.load %arg8[%c0_845, %c40_846, %c0_847] : memref<2x256x256xbf16, #tpu.memory_space<vmem>>, vector<1x8x256xbf16>
    %708 = vector.shape_cast %707 : vector<1x8x256xbf16> to vector<8x256xbf16>
    %709 = vector.shape_cast %706 : vector<8x256xbf16> to vector<1x8x256xbf16>
    tpu.vector_store %arg8[%c0_845, %c40_846, %c0_847], %709 {strides = array<i32>} : memref<2x256x256xbf16, #tpu.memory_space<vmem>>, vector<1x8x256xbf16>,
    %c0_848 = arith.constant 0 : index
    %c0_849 = arith.constant 0 : index
    %c0_850 = arith.constant 0 : index
    %c284 = arith.constant 284 : index
    %710 = vector.load %arg2[%c0_848, %c0_849, %c0_850, %c284] : memref<1x1x8x640xbf16, #tpu.memory_space<vmem>>, vector<1x1x8x256xbf16>
    %711 = vector.shape_cast %710 : vector<1x1x8x256xbf16> to vector<8x256xbf16>
    %c0_851 = arith.constant 0 : index
    %c48_852 = arith.constant 48 : index
    %c0_853 = arith.constant 0 : index
    %712 = vector.load %arg8[%c0_851, %c48_852, %c0_853] : memref<2x256x256xbf16, #tpu.memory_space<vmem>>, vector<1x8x256xbf16>
    %713 = vector.shape_cast %712 : vector<1x8x256xbf16> to vector<8x256xbf16>
    %714 = vector.shape_cast %711 : vector<8x256xbf16> to vector<1x8x256xbf16>
    tpu.vector_store %arg8[%c0_851, %c48_852, %c0_853], %714 {strides = array<i32>} : memref<2x256x256xbf16, #tpu.memory_space<vmem>>, vector<1x8x256xbf16>,
    %c0_854 = arith.constant 0 : index
    %c0_855 = arith.constant 0 : index
    %c0_856 = arith.constant 0 : index
    %c285 = arith.constant 285 : index
    %715 = vector.load %arg2[%c0_854, %c0_855, %c0_856, %c285] : memref<1x1x8x640xbf16, #tpu.memory_space<vmem>>, vector<1x1x8x256xbf16>
    %716 = vector.shape_cast %715 : vector<1x1x8x256xbf16> to vector<8x256xbf16>
    %c0_857 = arith.constant 0 : index
    %c56_858 = arith.constant 56 : index
    %c0_859 = arith.constant 0 : index
    %717 = vector.load %arg8[%c0_857, %c56_858, %c0_859] : memref<2x256x256xbf16, #tpu.memory_space<vmem>>, vector<1x8x256xbf16>
    %718 = vector.shape_cast %717 : vector<1x8x256xbf16> to vector<8x256xbf16>
    %719 = vector.shape_cast %716 : vector<8x256xbf16> to vector<1x8x256xbf16>
    tpu.vector_store %arg8[%c0_857, %c56_858, %c0_859], %719 {strides = array<i32>} : memref<2x256x256xbf16, #tpu.memory_space<vmem>>, vector<1x8x256xbf16>,
    %c0_860 = arith.constant 0 : index
    %c0_861 = arith.constant 0 : index
    %c0_862 = arith.constant 0 : index
    %c286 = arith.constant 286 : index
    %720 = vector.load %arg2[%c0_860, %c0_861, %c0_862, %c286] : memref<1x1x8x640xbf16, #tpu.memory_space<vmem>>, vector<1x1x8x256xbf16>
    %721 = vector.shape_cast %720 : vector<1x1x8x256xbf16> to vector<8x256xbf16>
    %c0_863 = arith.constant 0 : index
    %c64_864 = arith.constant 64 : index
    %c0_865 = arith.constant 0 : index
    %722 = vector.load %arg8[%c0_863, %c64_864, %c0_865] : memref<2x256x256xbf16, #tpu.memory_space<vmem>>, vector<1x8x256xbf16>
    %723 = vector.shape_cast %722 : vector<1x8x256xbf16> to vector<8x256xbf16>
    %724 = vector.shape_cast %721 : vector<8x256xbf16> to vector<1x8x256xbf16>
    tpu.vector_store %arg8[%c0_863, %c64_864, %c0_865], %724 {strides = array<i32>} : memref<2x256x256xbf16, #tpu.memory_space<vmem>>, vector<1x8x256xbf16>,
    %c0_866 = arith.constant 0 : index
    %c0_867 = arith.constant 0 : index
    %c0_868 = arith.constant 0 : index
    %c287 = arith.constant 287 : index
    %725 = vector.load %arg2[%c0_866, %c0_867, %c0_868, %c287] : memref<1x1x8x640xbf16, #tpu.memory_space<vmem>>, vector<1x1x8x256xbf16>
    %726 = vector.shape_cast %725 : vector<1x1x8x256xbf16> to vector<8x256xbf16>
    %c0_869 = arith.constant 0 : index
    %c72_870 = arith.constant 72 : index
    %c0_871 = arith.constant 0 : index
    %727 = vector.load %arg8[%c0_869, %c72_870, %c0_871] : memref<2x256x256xbf16, #tpu.memory_space<vmem>>, vector<1x8x256xbf16>
    %728 = vector.shape_cast %727 : vector<1x8x256xbf16> to vector<8x256xbf16>
    %729 = vector.shape_cast %726 : vector<8x256xbf16> to vector<1x8x256xbf16>
    tpu.vector_store %arg8[%c0_869, %c72_870, %c0_871], %729 {strides = array<i32>} : memref<2x256x256xbf16, #tpu.memory_space<vmem>>, vector<1x8x256xbf16>,
    %c0_872 = arith.constant 0 : index
    %c0_873 = arith.constant 0 : index
    %c0_874 = arith.constant 0 : index
    %c288 = arith.constant 288 : index
    %730 = vector.load %arg2[%c0_872, %c0_873, %c0_874, %c288] : memref<1x1x8x640xbf16, #tpu.memory_space<vmem>>, vector<1x1x8x256xbf16>
    %731 = vector.shape_cast %730 : vector<1x1x8x256xbf16> to vector<8x256xbf16>
    %c0_875 = arith.constant 0 : index
    %c80_876 = arith.constant 80 : index
    %c0_877 = arith.constant 0 : index
    %732 = vector.load %arg8[%c0_875, %c80_876, %c0_877] : memref<2x256x256xbf16, #tpu.memory_space<vmem>>, vector<1x8x256xbf16>
    %733 = vector.shape_cast %732 : vector<1x8x256xbf16> to vector<8x256xbf16>
    %734 = vector.shape_cast %731 : vector<8x256xbf16> to vector<1x8x256xbf16>
    tpu.vector_store %arg8[%c0_875, %c80_876, %c0_877], %734 {strides = array<i32>} : memref<2x256x256xbf16, #tpu.memory_space<vmem>>, vector<1x8x256xbf16>,
    %c0_878 = arith.constant 0 : index
    %c0_879 = arith.constant 0 : index
    %c0_880 = arith.constant 0 : index
    %c289 = arith.constant 289 : index
    %735 = vector.load %arg2[%c0_878, %c0_879, %c0_880, %c289] : memref<1x1x8x640xbf16, #tpu.memory_space<vmem>>, vector<1x1x8x256xbf16>
    %736 = vector.shape_cast %735 : vector<1x1x8x256xbf16> to vector<8x256xbf16>
    %c0_881 = arith.constant 0 : index
    %c88_882 = arith.constant 88 : index
    %c0_883 = arith.constant 0 : index
    %737 = vector.load %arg8[%c0_881, %c88_882, %c0_883] : memref<2x256x256xbf16, #tpu.memory_space<vmem>>, vector<1x8x256xbf16>
    %738 = vector.shape_cast %737 : vector<1x8x256xbf16> to vector<8x256xbf16>
    %739 = vector.shape_cast %736 : vector<8x256xbf16> to vector<1x8x256xbf16>
    tpu.vector_store %arg8[%c0_881, %c88_882, %c0_883], %739 {strides = array<i32>} : memref<2x256x256xbf16, #tpu.memory_space<vmem>>, vector<1x8x256xbf16>,
    %c0_884 = arith.constant 0 : index
    %c0_885 = arith.constant 0 : index
    %c0_886 = arith.constant 0 : index
    %c290 = arith.constant 290 : index
    %740 = vector.load %arg2[%c0_884, %c0_885, %c0_886, %c290] : memref<1x1x8x640xbf16, #tpu.memory_space<vmem>>, vector<1x1x8x256xbf16>
    %741 = vector.shape_cast %740 : vector<1x1x8x256xbf16> to vector<8x256xbf16>
    %c0_887 = arith.constant 0 : index
    %c96_888 = arith.constant 96 : index
    %c0_889 = arith.constant 0 : index
    %742 = vector.load %arg8[%c0_887, %c96_888, %c0_889] : memref<2x256x256xbf16, #tpu.memory_space<vmem>>, vector<1x8x256xbf16>
    %743 = vector.shape_cast %742 : vector<1x8x256xbf16> to vector<8x256xbf16>
    %744 = vector.shape_cast %741 : vector<8x256xbf16> to vector<1x8x256xbf16>
    tpu.vector_store %arg8[%c0_887, %c96_888, %c0_889], %744 {strides = array<i32>} : memref<2x256x256xbf16, #tpu.memory_space<vmem>>, vector<1x8x256xbf16>,
    %c0_890 = arith.constant 0 : index
    %c0_891 = arith.constant 0 : index
    %c0_892 = arith.constant 0 : index
    %c291 = arith.constant 291 : index
    %745 = vector.load %arg2[%c0_890, %c0_891, %c0_892, %c291] : memref<1x1x8x640xbf16, #tpu.memory_space<vmem>>, vector<1x1x8x256xbf16>
    %746 = vector.shape_cast %745 : vector<1x1x8x256xbf16> to vector<8x256xbf16>
    %c0_893 = arith.constant 0 : index
    %c104_894 = arith.constant 104 : index
    %c0_895 = arith.constant 0 : index
    %747 = vector.load %arg8[%c0_893, %c104_894, %c0_895] : memref<2x256x256xbf16, #tpu.memory_space<vmem>>, vector<1x8x256xbf16>
    %748 = vector.shape_cast %747 : vector<1x8x256xbf16> to vector<8x256xbf16>
    %749 = vector.shape_cast %746 : vector<8x256xbf16> to vector<1x8x256xbf16>
    tpu.vector_store %arg8[%c0_893, %c104_894, %c0_895], %749 {strides = array<i32>} : memref<2x256x256xbf16, #tpu.memory_space<vmem>>, vector<1x8x256xbf16>,
    %c0_896 = arith.constant 0 : index
    %c0_897 = arith.constant 0 : index
    %c0_898 = arith.constant 0 : index
    %c292 = arith.constant 292 : index
    %750 = vector.load %arg2[%c0_896, %c0_897, %c0_898, %c292] : memref<1x1x8x640xbf16, #tpu.memory_space<vmem>>, vector<1x1x8x256xbf16>
    %751 = vector.shape_cast %750 : vector<1x1x8x256xbf16> to vector<8x256xbf16>
    %c0_899 = arith.constant 0 : index
    %c112_900 = arith.constant 112 : index
    %c0_901 = arith.constant 0 : index
    %752 = vector.load %arg8[%c0_899, %c112_900, %c0_901] : memref<2x256x256xbf16, #tpu.memory_space<vmem>>, vector<1x8x256xbf16>
    %753 = vector.shape_cast %752 : vector<1x8x256xbf16> to vector<8x256xbf16>
    %754 = vector.shape_cast %751 : vector<8x256xbf16> to vector<1x8x256xbf16>
    tpu.vector_store %arg8[%c0_899, %c112_900, %c0_901], %754 {strides = array<i32>} : memref<2x256x256xbf16, #tpu.memory_space<vmem>>, vector<1x8x256xbf16>,
    %c0_902 = arith.constant 0 : index
    %c0_903 = arith.constant 0 : index
    %c0_904 = arith.constant 0 : index
    %c308 = arith.constant 308 : index
    %755 = vector.load %arg2[%c0_902, %c0_903, %c0_904, %c308] : memref<1x1x8x640xbf16, #tpu.memory_space<vmem>>, vector<1x1x8x256xbf16>
    %756 = vector.shape_cast %755 : vector<1x1x8x256xbf16> to vector<8x256xbf16>
    %c0_905 = arith.constant 0 : index
    %c120_906 = arith.constant 120 : index
    %c0_907 = arith.constant 0 : index
    %757 = vector.load %arg8[%c0_905, %c120_906, %c0_907] : memref<2x256x256xbf16, #tpu.memory_space<vmem>>, vector<1x8x256xbf16>
    %758 = vector.shape_cast %757 : vector<1x8x256xbf16> to vector<8x256xbf16>
    %759 = vector.shape_cast %756 : vector<8x256xbf16> to vector<1x8x256xbf16>
    tpu.vector_store %arg8[%c0_905, %c120_906, %c0_907], %759 {strides = array<i32>} : memref<2x256x256xbf16, #tpu.memory_space<vmem>>, vector<1x8x256xbf16>,
    %c0_908 = arith.constant 0 : index
    %c0_909 = arith.constant 0 : index
    %c0_910 = arith.constant 0 : index
    %c309 = arith.constant 309 : index
    %760 = vector.load %arg2[%c0_908, %c0_909, %c0_910, %c309] : memref<1x1x8x640xbf16, #tpu.memory_space<vmem>>, vector<1x1x8x256xbf16>
    %761 = vector.shape_cast %760 : vector<1x1x8x256xbf16> to vector<8x256xbf16>
    %c0_911 = arith.constant 0 : index
    %c128_912 = arith.constant 128 : index
    %c0_913 = arith.constant 0 : index
    %762 = vector.load %arg8[%c0_911, %c128_912, %c0_913] : memref<2x256x256xbf16, #tpu.memory_space<vmem>>, vector<1x8x256xbf16>
    %763 = vector.shape_cast %762 : vector<1x8x256xbf16> to vector<8x256xbf16>
    %764 = vector.shape_cast %761 : vector<8x256xbf16> to vector<1x8x256xbf16>
    tpu.vector_store %arg8[%c0_911, %c128_912, %c0_913], %764 {strides = array<i32>} : memref<2x256x256xbf16, #tpu.memory_space<vmem>>, vector<1x8x256xbf16>,
    %c0_914 = arith.constant 0 : index
    %c0_915 = arith.constant 0 : index
    %c0_916 = arith.constant 0 : index
    %c310 = arith.constant 310 : index
    %765 = vector.load %arg2[%c0_914, %c0_915, %c0_916, %c310] : memref<1x1x8x640xbf16, #tpu.memory_space<vmem>>, vector<1x1x8x256xbf16>
    %766 = vector.shape_cast %765 : vector<1x1x8x256xbf16> to vector<8x256xbf16>
    %c0_917 = arith.constant 0 : index
    %c136_918 = arith.constant 136 : index
    %c0_919 = arith.constant 0 : index
    %767 = vector.load %arg8[%c0_917, %c136_918, %c0_919] : memref<2x256x256xbf16, #tpu.memory_space<vmem>>, vector<1x8x256xbf16>
    %768 = vector.shape_cast %767 : vector<1x8x256xbf16> to vector<8x256xbf16>
    %769 = vector.shape_cast %766 : vector<8x256xbf16> to vector<1x8x256xbf16>
    tpu.vector_store %arg8[%c0_917, %c136_918, %c0_919], %769 {strides = array<i32>} : memref<2x256x256xbf16, #tpu.memory_space<vmem>>, vector<1x8x256xbf16>,
    %c0_920 = arith.constant 0 : index
    %c0_921 = arith.constant 0 : index
    %c0_922 = arith.constant 0 : index
    %c311 = arith.constant 311 : index
    %770 = vector.load %arg2[%c0_920, %c0_921, %c0_922, %c311] : memref<1x1x8x640xbf16, #tpu.memory_space<vmem>>, vector<1x1x8x256xbf16>
    %771 = vector.shape_cast %770 : vector<1x1x8x256xbf16> to vector<8x256xbf16>
    %c0_923 = arith.constant 0 : index
    %c144_924 = arith.constant 144 : index
    %c0_925 = arith.constant 0 : index
    %772 = vector.load %arg8[%c0_923, %c144_924, %c0_925] : memref<2x256x256xbf16, #tpu.memory_space<vmem>>, vector<1x8x256xbf16>
    %773 = vector.shape_cast %772 : vector<1x8x256xbf16> to vector<8x256xbf16>
    %774 = vector.shape_cast %771 : vector<8x256xbf16> to vector<1x8x256xbf16>
    tpu.vector_store %arg8[%c0_923, %c144_924, %c0_925], %774 {strides = array<i32>} : memref<2x256x256xbf16, #tpu.memory_space<vmem>>, vector<1x8x256xbf16>,
    %c0_926 = arith.constant 0 : index
    %c0_927 = arith.constant 0 : index
    %c0_928 = arith.constant 0 : index
    %c312 = arith.constant 312 : index
    %775 = vector.load %arg2[%c0_926, %c0_927, %c0_928, %c312] : memref<1x1x8x640xbf16, #tpu.memory_space<vmem>>, vector<1x1x8x256xbf16>
    %776 = vector.shape_cast %775 : vector<1x1x8x256xbf16> to vector<8x256xbf16>
    %c0_929 = arith.constant 0 : index
    %c152_930 = arith.constant 152 : index
    %c0_931 = arith.constant 0 : index
    %777 = vector.load %arg8[%c0_929, %c152_930, %c0_931] : memref<2x256x256xbf16, #tpu.memory_space<vmem>>, vector<1x8x256xbf16>
    %778 = vector.shape_cast %777 : vector<1x8x256xbf16> to vector<8x256xbf16>
    %779 = vector.shape_cast %776 : vector<8x256xbf16> to vector<1x8x256xbf16>
    tpu.vector_store %arg8[%c0_929, %c152_930, %c0_931], %779 {strides = array<i32>} : memref<2x256x256xbf16, #tpu.memory_space<vmem>>, vector<1x8x256xbf16>,
    %c0_932 = arith.constant 0 : index
    %c0_933 = arith.constant 0 : index
    %c0_934 = arith.constant 0 : index
    %c313 = arith.constant 313 : index
    %780 = vector.load %arg2[%c0_932, %c0_933, %c0_934, %c313] : memref<1x1x8x640xbf16, #tpu.memory_space<vmem>>, vector<1x1x8x256xbf16>
    %781 = vector.shape_cast %780 : vector<1x1x8x256xbf16> to vector<8x256xbf16>
    %c0_935 = arith.constant 0 : index
    %c160_936 = arith.constant 160 : index
    %c0_937 = arith.constant 0 : index
    %782 = vector.load %arg8[%c0_935, %c160_936, %c0_937] : memref<2x256x256xbf16, #tpu.memory_space<vmem>>, vector<1x8x256xbf16>
    %783 = vector.shape_cast %782 : vector<1x8x256xbf16> to vector<8x256xbf16>
    %784 = vector.shape_cast %781 : vector<8x256xbf16> to vector<1x8x256xbf16>
    tpu.vector_store %arg8[%c0_935, %c160_936, %c0_937], %784 {strides = array<i32>} : memref<2x256x256xbf16, #tpu.memory_space<vmem>>, vector<1x8x256xbf16>,
    %c0_938 = arith.constant 0 : index
    %c0_939 = arith.constant 0 : index
    %c0_940 = arith.constant 0 : index
    %c314 = arith.constant 314 : index
    %785 = vector.load %arg2[%c0_938, %c0_939, %c0_940, %c314] : memref<1x1x8x640xbf16, #tpu.memory_space<vmem>>, vector<1x1x8x256xbf16>
    %786 = vector.shape_cast %785 : vector<1x1x8x256xbf16> to vector<8x256xbf16>
    %c0_941 = arith.constant 0 : index
    %c168_942 = arith.constant 168 : index
    %c0_943 = arith.constant 0 : index
    %787 = vector.load %arg8[%c0_941, %c168_942, %c0_943] : memref<2x256x256xbf16, #tpu.memory_space<vmem>>, vector<1x8x256xbf16>
    %788 = vector.shape_cast %787 : vector<1x8x256xbf16> to vector<8x256xbf16>
    %789 = vector.shape_cast %786 : vector<8x256xbf16> to vector<1x8x256xbf16>
    tpu.vector_store %arg8[%c0_941, %c168_942, %c0_943], %789 {strides = array<i32>} : memref<2x256x256xbf16, #tpu.memory_space<vmem>>, vector<1x8x256xbf16>,
    %c0_944 = arith.constant 0 : index
    %c0_945 = arith.constant 0 : index
    %c0_946 = arith.constant 0 : index
    %c315 = arith.constant 315 : index
    %790 = vector.load %arg2[%c0_944, %c0_945, %c0_946, %c315] : memref<1x1x8x640xbf16, #tpu.memory_space<vmem>>, vector<1x1x8x256xbf16>
    %791 = vector.shape_cast %790 : vector<1x1x8x256xbf16> to vector<8x256xbf16>
    %c0_947 = arith.constant 0 : index
    %c176_948 = arith.constant 176 : index
    %c0_949 = arith.constant 0 : index
    %792 = vector.load %arg8[%c0_947, %c176_948, %c0_949] : memref<2x256x256xbf16, #tpu.memory_space<vmem>>, vector<1x8x256xbf16>
    %793 = vector.shape_cast %792 : vector<1x8x256xbf16> to vector<8x256xbf16>
    %794 = vector.shape_cast %791 : vector<8x256xbf16> to vector<1x8x256xbf16>
    tpu.vector_store %arg8[%c0_947, %c176_948, %c0_949], %794 {strides = array<i32>} : memref<2x256x256xbf16, #tpu.memory_space<vmem>>, vector<1x8x256xbf16>,
    %c0_950 = arith.constant 0 : index
    %c0_951 = arith.constant 0 : index
    %c0_952 = arith.constant 0 : index
    %c316 = arith.constant 316 : index
    %795 = vector.load %arg2[%c0_950, %c0_951, %c0_952, %c316] : memref<1x1x8x640xbf16, #tpu.memory_space<vmem>>, vector<1x1x8x256xbf16>
    %796 = vector.shape_cast %795 : vector<1x1x8x256xbf16> to vector<8x256xbf16>
    %c0_953 = arith.constant 0 : index
    %c184_954 = arith.constant 184 : index
    %c0_955 = arith.constant 0 : index
    %797 = vector.load %arg8[%c0_953, %c184_954, %c0_955] : memref<2x256x256xbf16, #tpu.memory_space<vmem>>, vector<1x8x256xbf16>
    %798 = vector.shape_cast %797 : vector<1x8x256xbf16> to vector<8x256xbf16>
    %799 = vector.shape_cast %796 : vector<8x256xbf16> to vector<1x8x256xbf16>
    tpu.vector_store %arg8[%c0_953, %c184_954, %c0_955], %799 {strides = array<i32>} : memref<2x256x256xbf16, #tpu.memory_space<vmem>>, vector<1x8x256xbf16>,
    %c0_956 = arith.constant 0 : index
    %c0_957 = arith.constant 0 : index
    %c0_958 = arith.constant 0 : index
    %c317 = arith.constant 317 : index
    %800 = vector.load %arg2[%c0_956, %c0_957, %c0_958, %c317] : memref<1x1x8x640xbf16, #tpu.memory_space<vmem>>, vector<1x1x8x256xbf16>
    %801 = vector.shape_cast %800 : vector<1x1x8x256xbf16> to vector<8x256xbf16>
    %c0_959 = arith.constant 0 : index
    %c192_960 = arith.constant 192 : index
    %c0_961 = arith.constant 0 : index
    %802 = vector.load %arg8[%c0_959, %c192_960, %c0_961] : memref<2x256x256xbf16, #tpu.memory_space<vmem>>, vector<1x8x256xbf16>
    %803 = vector.shape_cast %802 : vector<1x8x256xbf16> to vector<8x256xbf16>
    %804 = vector.shape_cast %801 : vector<8x256xbf16> to vector<1x8x256xbf16>
    tpu.vector_store %arg8[%c0_959, %c192_960, %c0_961], %804 {strides = array<i32>} : memref<2x256x256xbf16, #tpu.memory_space<vmem>>, vector<1x8x256xbf16>,
    %c0_962 = arith.constant 0 : index
    %c0_963 = arith.constant 0 : index
    %c0_964 = arith.constant 0 : index
    %c318 = arith.constant 318 : index
    %805 = vector.load %arg2[%c0_962, %c0_963, %c0_964, %c318] : memref<1x1x8x640xbf16, #tpu.memory_space<vmem>>, vector<1x1x8x256xbf16>
    %806 = vector.shape_cast %805 : vector<1x1x8x256xbf16> to vector<8x256xbf16>
    %c0_965 = arith.constant 0 : index
    %c200_966 = arith.constant 200 : index
    %c0_967 = arith.constant 0 : index
    %807 = vector.load %arg8[%c0_965, %c200_966, %c0_967] : memref<2x256x256xbf16, #tpu.memory_space<vmem>>, vector<1x8x256xbf16>
    %808 = vector.shape_cast %807 : vector<1x8x256xbf16> to vector<8x256xbf16>
    %809 = vector.shape_cast %806 : vector<8x256xbf16> to vector<1x8x256xbf16>
    tpu.vector_store %arg8[%c0_965, %c200_966, %c0_967], %809 {strides = array<i32>} : memref<2x256x256xbf16, #tpu.memory_space<vmem>>, vector<1x8x256xbf16>,
    %c0_968 = arith.constant 0 : index
    %c0_969 = arith.constant 0 : index
    %c0_970 = arith.constant 0 : index
    %c319 = arith.constant 319 : index
    %810 = vector.load %arg2[%c0_968, %c0_969, %c0_970, %c319] : memref<1x1x8x640xbf16, #tpu.memory_space<vmem>>, vector<1x1x8x256xbf16>
    %811 = vector.shape_cast %810 : vector<1x1x8x256xbf16> to vector<8x256xbf16>
    %c0_971 = arith.constant 0 : index
    %c208_972 = arith.constant 208 : index
    %c0_973 = arith.constant 0 : index
    %812 = vector.load %arg8[%c0_971, %c208_972, %c0_973] : memref<2x256x256xbf16, #tpu.memory_space<vmem>>, vector<1x8x256xbf16>
    %813 = vector.shape_cast %812 : vector<1x8x256xbf16> to vector<8x256xbf16>
    %814 = vector.shape_cast %811 : vector<8x256xbf16> to vector<1x8x256xbf16>
    tpu.vector_store %arg8[%c0_971, %c208_972, %c0_973], %814 {strides = array<i32>} : memref<2x256x256xbf16, #tpu.memory_space<vmem>>, vector<1x8x256xbf16>,
    %c0_974 = arith.constant 0 : index
    %c0_975 = arith.constant 0 : index
    %c0_976 = arith.constant 0 : index
    %c320 = arith.constant 320 : index
    %815 = vector.load %arg2[%c0_974, %c0_975, %c0_976, %c320] : memref<1x1x8x640xbf16, #tpu.memory_space<vmem>>, vector<1x1x8x256xbf16>
    %816 = vector.shape_cast %815 : vector<1x1x8x256xbf16> to vector<8x256xbf16>
    %c0_977 = arith.constant 0 : index
    %c216_978 = arith.constant 216 : index
    %c0_979 = arith.constant 0 : index
    %817 = vector.load %arg8[%c0_977, %c216_978, %c0_979] : memref<2x256x256xbf16, #tpu.memory_space<vmem>>, vector<1x8x256xbf16>
    %818 = vector.shape_cast %817 : vector<1x8x256xbf16> to vector<8x256xbf16>
    %819 = vector.shape_cast %816 : vector<8x256xbf16> to vector<1x8x256xbf16>
    tpu.vector_store %arg8[%c0_977, %c216_978, %c0_979], %819 {strides = array<i32>} : memref<2x256x256xbf16, #tpu.memory_space<vmem>>, vector<1x8x256xbf16>,
    %c0_980 = arith.constant 0 : index
    %c0_981 = arith.constant 0 : index
    %c0_982 = arith.constant 0 : index
    %c336 = arith.constant 336 : index
    %820 = vector.load %arg2[%c0_980, %c0_981, %c0_982, %c336] : memref<1x1x8x640xbf16, #tpu.memory_space<vmem>>, vector<1x1x8x256xbf16>
    %821 = vector.shape_cast %820 : vector<1x1x8x256xbf16> to vector<8x256xbf16>
    %c0_983 = arith.constant 0 : index
    %c224_984 = arith.constant 224 : index
    %c0_985 = arith.constant 0 : index
    %822 = vector.load %arg8[%c0_983, %c224_984, %c0_985] : memref<2x256x256xbf16, #tpu.memory_space<vmem>>, vector<1x8x256xbf16>
    %823 = vector.shape_cast %822 : vector<1x8x256xbf16> to vector<8x256xbf16>
    %824 = vector.shape_cast %821 : vector<8x256xbf16> to vector<1x8x256xbf16>
    tpu.vector_store %arg8[%c0_983, %c224_984, %c0_985], %824 {strides = array<i32>} : memref<2x256x256xbf16, #tpu.memory_space<vmem>>, vector<1x8x256xbf16>,
    %c0_986 = arith.constant 0 : index
    %c0_987 = arith.constant 0 : index
    %c0_988 = arith.constant 0 : index
    %c337 = arith.constant 337 : index
    %825 = vector.load %arg2[%c0_986, %c0_987, %c0_988, %c337] : memref<1x1x8x640xbf16, #tpu.memory_space<vmem>>, vector<1x1x8x256xbf16>
    %826 = vector.shape_cast %825 : vector<1x1x8x256xbf16> to vector<8x256xbf16>
    %c0_989 = arith.constant 0 : index
    %c232_990 = arith.constant 232 : index
    %c0_991 = arith.constant 0 : index
    %827 = vector.load %arg8[%c0_989, %c232_990, %c0_991] : memref<2x256x256xbf16, #tpu.memory_space<vmem>>, vector<1x8x256xbf16>
    %828 = vector.shape_cast %827 : vector<1x8x256xbf16> to vector<8x256xbf16>
    %829 = vector.shape_cast %826 : vector<8x256xbf16> to vector<1x8x256xbf16>
    tpu.vector_store %arg8[%c0_989, %c232_990, %c0_991], %829 {strides = array<i32>} : memref<2x256x256xbf16, #tpu.memory_space<vmem>>, vector<1x8x256xbf16>,
    %c0_992 = arith.constant 0 : index
    %c0_993 = arith.constant 0 : index
    %c0_994 = arith.constant 0 : index
    %c338 = arith.constant 338 : index
    %830 = vector.load %arg2[%c0_992, %c0_993, %c0_994, %c338] : memref<1x1x8x640xbf16, #tpu.memory_space<vmem>>, vector<1x1x8x256xbf16>
    %831 = vector.shape_cast %830 : vector<1x1x8x256xbf16> to vector<8x256xbf16>
    %c0_995 = arith.constant 0 : index
    %c240_996 = arith.constant 240 : index
    %c0_997 = arith.constant 0 : index
    %832 = vector.load %arg8[%c0_995, %c240_996, %c0_997] : memref<2x256x256xbf16, #tpu.memory_space<vmem>>, vector<1x8x256xbf16>
    %833 = vector.shape_cast %832 : vector<1x8x256xbf16> to vector<8x256xbf16>
    %834 = vector.shape_cast %831 : vector<8x256xbf16> to vector<1x8x256xbf16>
    tpu.vector_store %arg8[%c0_995, %c240_996, %c0_997], %834 {strides = array<i32>} : memref<2x256x256xbf16, #tpu.memory_space<vmem>>, vector<1x8x256xbf16>,
    %c0_998 = arith.constant 0 : index
    %c0_999 = arith.constant 0 : index
    %c0_1000 = arith.constant 0 : index
    %c339 = arith.constant 339 : index
    %835 = vector.load %arg2[%c0_998, %c0_999, %c0_1000, %c339] : memref<1x1x8x640xbf16, #tpu.memory_space<vmem>>, vector<1x1x8x256xbf16>
    %836 = vector.shape_cast %835 : vector<1x1x8x256xbf16> to vector<8x256xbf16>
    %c0_1001 = arith.constant 0 : index
    %c248_1002 = arith.constant 248 : index
    %c0_1003 = arith.constant 0 : index
    %837 = vector.load %arg8[%c0_1001, %c248_1002, %c0_1003] : memref<2x256x256xbf16, #tpu.memory_space<vmem>>, vector<1x8x256xbf16>
    %838 = vector.shape_cast %837 : vector<1x8x256xbf16> to vector<8x256xbf16>
    %839 = vector.shape_cast %836 : vector<8x256xbf16> to vector<1x8x256xbf16>
    tpu.vector_store %arg8[%c0_1001, %c248_1002, %c0_1003], %839 {strides = array<i32>} : memref<2x256x256xbf16, #tpu.memory_space<vmem>>, vector<1x8x256xbf16>,
    %c0_1004 = arith.constant 0 : index
    %c0_1005 = arith.constant 0 : index
    %840 = vector.load %arg9[%c0_1004, %c0_1005] : memref<8x256xf32, #tpu.memory_space<vmem>>, vector<8x256xf32>
    %c0_1006 = arith.constant 0 : index
    %c4_1007 = arith.constant 4 : index
    %c0_1008 = arith.constant 0 : index
    %c0_1009 = arith.constant 0 : index
    %841 = vector.load %arg4[%c0_1006, %c4_1007, %c0_1008, %c0_1009] : memref<1x6x8x256xbf16, #tpu.memory_space<vmem>>, vector<1x1x8x256xbf16>
    %842 = vector.shape_cast %841 : vector<1x1x8x256xbf16> to vector<8x256xbf16>
    %c0_1010 = arith.constant 0 : index
    %c0_1011 = arith.constant 0 : index
    %c0_1012 = arith.constant 0 : index
    %843 = vector.load %arg8[%c0_1010, %c0_1011, %c0_1012] : memref<2x256x256xbf16, #tpu.memory_space<vmem>>, vector<1x256x256xbf16>
    %844 = vector.shape_cast %843 : vector<1x256x256xbf16> to vector<256x256xbf16>
    %cst_1013 = arith.constant dense<0.000000e+00> : vector<8x256xf32>
    %845 = tpu.matmul %842, %844, %cst_1013 {dimension_numbers = #tpu.dot_dimension_numbers<[1], [0], [0], [1], [0, 0, 1, 1], [], []>} : vector<8x256xbf16>, vector<256x256xbf16>, vector<8x256xf32> -> vector<8x256xf32>
    %846 = arith.addf %840, %845 : vector<8x256xf32>
    %c0_1014 = arith.constant 0 : index
    %c0_1015 = arith.constant 0 : index
    %847 = vector.load %arg9[%c0_1014, %c0_1015] : memref<8x256xf32, #tpu.memory_space<vmem>>, vector<8x256xf32>
    tpu.vector_store %arg9[%c0_1014, %c0_1015], %846 {strides = array<i32>} : memref<8x256xf32, #tpu.memory_space<vmem>>, vector<8x256xf32>,
    %c0_1016 = arith.constant 0 : index
    %c0_1017 = arith.constant 0 : index
    %c0_1018 = arith.constant 0 : index
    %c340 = arith.constant 340 : index
    %848 = vector.load %arg2[%c0_1016, %c0_1017, %c0_1018, %c340] : memref<1x1x8x640xbf16, #tpu.memory_space<vmem>>, vector<1x1x8x256xbf16>
    %849 = vector.shape_cast %848 : vector<1x1x8x256xbf16> to vector<8x256xbf16>
    %c1_1019 = arith.constant 1 : index
    %c0_1020 = arith.constant 0 : index
    %c0_1021 = arith.constant 0 : index
    %850 = vector.load %arg8[%c1_1019, %c0_1020, %c0_1021] : memref<2x256x256xbf16, #tpu.memory_space<vmem>>, vector<1x8x256xbf16>
    %851 = vector.shape_cast %850 : vector<1x8x256xbf16> to vector<8x256xbf16>
    %852 = vector.shape_cast %849 : vector<8x256xbf16> to vector<1x8x256xbf16>
    tpu.vector_store %arg8[%c1_1019, %c0_1020, %c0_1021], %852 {strides = array<i32>} : memref<2x256x256xbf16, #tpu.memory_space<vmem>>, vector<1x8x256xbf16>,
    %c0_1022 = arith.constant 0 : index
    %c0_1023 = arith.constant 0 : index
    %c0_1024 = arith.constant 0 : index
    %c341 = arith.constant 341 : index
    %853 = vector.load %arg2[%c0_1022, %c0_1023, %c0_1024, %c341] : memref<1x1x8x640xbf16, #tpu.memory_space<vmem>>, vector<1x1x8x256xbf16>
    %854 = vector.shape_cast %853 : vector<1x1x8x256xbf16> to vector<8x256xbf16>
    %c1_1025 = arith.constant 1 : index
    %c8_1026 = arith.constant 8 : index
    %c0_1027 = arith.constant 0 : index
    %855 = vector.load %arg8[%c1_1025, %c8_1026, %c0_1027] : memref<2x256x256xbf16, #tpu.memory_space<vmem>>, vector<1x8x256xbf16>
    %856 = vector.shape_cast %855 : vector<1x8x256xbf16> to vector<8x256xbf16>
    %857 = vector.shape_cast %854 : vector<8x256xbf16> to vector<1x8x256xbf16>
    tpu.vector_store %arg8[%c1_1025, %c8_1026, %c0_1027], %857 {strides = array<i32>} : memref<2x256x256xbf16, #tpu.memory_space<vmem>>, vector<1x8x256xbf16>,
    %c0_1028 = arith.constant 0 : index
    %c0_1029 = arith.constant 0 : index
    %c0_1030 = arith.constant 0 : index
    %c342 = arith.constant 342 : index
    %858 = vector.load %arg2[%c0_1028, %c0_1029, %c0_1030, %c342] : memref<1x1x8x640xbf16, #tpu.memory_space<vmem>>, vector<1x1x8x256xbf16>
    %859 = vector.shape_cast %858 : vector<1x1x8x256xbf16> to vector<8x256xbf16>
    %c1_1031 = arith.constant 1 : index
    %c16_1032 = arith.constant 16 : index
    %c0_1033 = arith.constant 0 : index
    %860 = vector.load %arg8[%c1_1031, %c16_1032, %c0_1033] : memref<2x256x256xbf16, #tpu.memory_space<vmem>>, vector<1x8x256xbf16>
    %861 = vector.shape_cast %860 : vector<1x8x256xbf16> to vector<8x256xbf16>
    %862 = vector.shape_cast %859 : vector<8x256xbf16> to vector<1x8x256xbf16>
    tpu.vector_store %arg8[%c1_1031, %c16_1032, %c0_1033], %862 {strides = array<i32>} : memref<2x256x256xbf16, #tpu.memory_space<vmem>>, vector<1x8x256xbf16>,
    %c0_1034 = arith.constant 0 : index
    %c0_1035 = arith.constant 0 : index
    %c0_1036 = arith.constant 0 : index
    %c343 = arith.constant 343 : index
    %863 = vector.load %arg2[%c0_1034, %c0_1035, %c0_1036, %c343] : memref<1x1x8x640xbf16, #tpu.memory_space<vmem>>, vector<1x1x8x256xbf16>
    %864 = vector.shape_cast %863 : vector<1x1x8x256xbf16> to vector<8x256xbf16>
    %c1_1037 = arith.constant 1 : index
    %c24_1038 = arith.constant 24 : index
    %c0_1039 = arith.constant 0 : index
    %865 = vector.load %arg8[%c1_1037, %c24_1038, %c0_1039] : memref<2x256x256xbf16, #tpu.memory_space<vmem>>, vector<1x8x256xbf16>
    %866 = vector.shape_cast %865 : vector<1x8x256xbf16> to vector<8x256xbf16>
    %867 = vector.shape_cast %864 : vector<8x256xbf16> to vector<1x8x256xbf16>
    tpu.vector_store %arg8[%c1_1037, %c24_1038, %c0_1039], %867 {strides = array<i32>} : memref<2x256x256xbf16, #tpu.memory_space<vmem>>, vector<1x8x256xbf16>,
    %c0_1040 = arith.constant 0 : index
    %c0_1041 = arith.constant 0 : index
    %c0_1042 = arith.constant 0 : index
    %c344 = arith.constant 344 : index
    %868 = vector.load %arg2[%c0_1040, %c0_1041, %c0_1042, %c344] : memref<1x1x8x640xbf16, #tpu.memory_space<vmem>>, vector<1x1x8x256xbf16>
    %869 = vector.shape_cast %868 : vector<1x1x8x256xbf16> to vector<8x256xbf16>
    %c1_1043 = arith.constant 1 : index
    %c32_1044 = arith.constant 32 : index
    %c0_1045 = arith.constant 0 : index
    %870 = vector.load %arg8[%c1_1043, %c32_1044, %c0_1045] : memref<2x256x256xbf16, #tpu.memory_space<vmem>>, vector<1x8x256xbf16>
    %871 = vector.shape_cast %870 : vector<1x8x256xbf16> to vector<8x256xbf16>
    %872 = vector.shape_cast %869 : vector<8x256xbf16> to vector<1x8x256xbf16>
    tpu.vector_store %arg8[%c1_1043, %c32_1044, %c0_1045], %872 {strides = array<i32>} : memref<2x256x256xbf16, #tpu.memory_space<vmem>>, vector<1x8x256xbf16>,
    %c0_1046 = arith.constant 0 : index
    %c0_1047 = arith.constant 0 : index
    %c0_1048 = arith.constant 0 : index
    %c345 = arith.constant 345 : index
    %873 = vector.load %arg2[%c0_1046, %c0_1047, %c0_1048, %c345] : memref<1x1x8x640xbf16, #tpu.memory_space<vmem>>, vector<1x1x8x256xbf16>
    %874 = vector.shape_cast %873 : vector<1x1x8x256xbf16> to vector<8x256xbf16>
    %c1_1049 = arith.constant 1 : index
    %c40_1050 = arith.constant 40 : index
    %c0_1051 = arith.constant 0 : index
    %875 = vector.load %arg8[%c1_1049, %c40_1050, %c0_1051] : memref<2x256x256xbf16, #tpu.memory_space<vmem>>, vector<1x8x256xbf16>
    %876 = vector.shape_cast %875 : vector<1x8x256xbf16> to vector<8x256xbf16>
    %877 = vector.shape_cast %874 : vector<8x256xbf16> to vector<1x8x256xbf16>
    tpu.vector_store %arg8[%c1_1049, %c40_1050, %c0_1051], %877 {strides = array<i32>} : memref<2x256x256xbf16, #tpu.memory_space<vmem>>, vector<1x8x256xbf16>,
    %c0_1052 = arith.constant 0 : index
    %c0_1053 = arith.constant 0 : index
    %c0_1054 = arith.constant 0 : index
    %c346 = arith.constant 346 : index
    %878 = vector.load %arg2[%c0_1052, %c0_1053, %c0_1054, %c346] : memref<1x1x8x640xbf16, #tpu.memory_space<vmem>>, vector<1x1x8x256xbf16>
    %879 = vector.shape_cast %878 : vector<1x1x8x256xbf16> to vector<8x256xbf16>
    %c1_1055 = arith.constant 1 : index
    %c48_1056 = arith.constant 48 : index
    %c0_1057 = arith.constant 0 : index
    %880 = vector.load %arg8[%c1_1055, %c48_1056, %c0_1057] : memref<2x256x256xbf16, #tpu.memory_space<vmem>>, vector<1x8x256xbf16>
    %881 = vector.shape_cast %880 : vector<1x8x256xbf16> to vector<8x256xbf16>
    %882 = vector.shape_cast %879 : vector<8x256xbf16> to vector<1x8x256xbf16>
    tpu.vector_store %arg8[%c1_1055, %c48_1056, %c0_1057], %882 {strides = array<i32>} : memref<2x256x256xbf16, #tpu.memory_space<vmem>>, vector<1x8x256xbf16>,
    %c0_1058 = arith.constant 0 : index
    %c0_1059 = arith.constant 0 : index
    %c0_1060 = arith.constant 0 : index
    %c347 = arith.constant 347 : index
    %883 = vector.load %arg2[%c0_1058, %c0_1059, %c0_1060, %c347] : memref<1x1x8x640xbf16, #tpu.memory_space<vmem>>, vector<1x1x8x256xbf16>
    %884 = vector.shape_cast %883 : vector<1x1x8x256xbf16> to vector<8x256xbf16>
    %c1_1061 = arith.constant 1 : index
    %c56_1062 = arith.constant 56 : index
    %c0_1063 = arith.constant 0 : index
    %885 = vector.load %arg8[%c1_1061, %c56_1062, %c0_1063] : memref<2x256x256xbf16, #tpu.memory_space<vmem>>, vector<1x8x256xbf16>
    %886 = vector.shape_cast %885 : vector<1x8x256xbf16> to vector<8x256xbf16>
    %887 = vector.shape_cast %884 : vector<8x256xbf16> to vector<1x8x256xbf16>
    tpu.vector_store %arg8[%c1_1061, %c56_1062, %c0_1063], %887 {strides = array<i32>} : memref<2x256x256xbf16, #tpu.memory_space<vmem>>, vector<1x8x256xbf16>,
    %c0_1064 = arith.constant 0 : index
    %c0_1065 = arith.constant 0 : index
    %c0_1066 = arith.constant 0 : index
    %c348 = arith.constant 348 : index
    %888 = vector.load %arg2[%c0_1064, %c0_1065, %c0_1066, %c348] : memref<1x1x8x640xbf16, #tpu.memory_space<vmem>>, vector<1x1x8x256xbf16>
    %889 = vector.shape_cast %888 : vector<1x1x8x256xbf16> to vector<8x256xbf16>
    %c1_1067 = arith.constant 1 : index
    %c64_1068 = arith.constant 64 : index
    %c0_1069 = arith.constant 0 : index
    %890 = vector.load %arg8[%c1_1067, %c64_1068, %c0_1069] : memref<2x256x256xbf16, #tpu.memory_space<vmem>>, vector<1x8x256xbf16>
    %891 = vector.shape_cast %890 : vector<1x8x256xbf16> to vector<8x256xbf16>
    %892 = vector.shape_cast %889 : vector<8x256xbf16> to vector<1x8x256xbf16>
    tpu.vector_store %arg8[%c1_1067, %c64_1068, %c0_1069], %892 {strides = array<i32>} : memref<2x256x256xbf16, #tpu.memory_space<vmem>>, vector<1x8x256xbf16>,
    %c0_1070 = arith.constant 0 : index
    %c0_1071 = arith.constant 0 : index
    %893 = vector.load %arg9[%c0_1070, %c0_1071] : memref<8x256xf32, #tpu.memory_space<vmem>>, vector<8x256xf32>
    %c0_1072 = arith.constant 0 : index
    %c5_1073 = arith.constant 5 : index
    %c0_1074 = arith.constant 0 : index
    %c0_1075 = arith.constant 0 : index
    %894 = vector.load %arg4[%c0_1072, %c5_1073, %c0_1074, %c0_1075] : memref<1x6x8x256xbf16, #tpu.memory_space<vmem>>, vector<1x1x8x72xbf16>
    %895 = vector.shape_cast %894 : vector<1x1x8x72xbf16> to vector<8x72xbf16>
    %c1_1076 = arith.constant 1 : index
    %c0_1077 = arith.constant 0 : index
    %c0_1078 = arith.constant 0 : index
    %896 = vector.load %arg8[%c1_1076, %c0_1077, %c0_1078] : memref<2x256x256xbf16, #tpu.memory_space<vmem>>, vector<1x72x256xbf16>
    %897 = vector.shape_cast %896 : vector<1x72x256xbf16> to vector<72x256xbf16>
    %cst_1079 = arith.constant dense<0.000000e+00> : vector<8x256xf32>
    %898 = tpu.matmul %895, %897, %cst_1079 {dimension_numbers = #tpu.dot_dimension_numbers<[1], [0], [0], [1], [0, 0, 1, 1], [], []>} : vector<8x72xbf16>, vector<72x256xbf16>, vector<8x256xf32> -> vector<8x256xf32>
    %899 = arith.addf %893, %898 : vector<8x256xf32>
    %c0_1080 = arith.constant 0 : index
    %c0_1081 = arith.constant 0 : index
    %900 = vector.load %arg9[%c0_1080, %c0_1081] : memref<8x256xf32, #tpu.memory_space<vmem>>, vector<8x256xf32>
    tpu.vector_store %arg9[%c0_1080, %c0_1081], %899 {strides = array<i32>} : memref<8x256xf32, #tpu.memory_space<vmem>>, vector<8x256xf32>,
    %c0_1082 = arith.constant 0 : index
    %c0_1083 = arith.constant 0 : index
    %901 = vector.load %arg9[%c0_1082, %c0_1083] : memref<8x256xf32, #tpu.memory_space<vmem>>, vector<8x256xf32>
    %c0_1084 = arith.constant 0 : index
    %c0_1085 = arith.constant 0 : index
    %c0_1086 = arith.constant 0 : index
    %c0_1087 = arith.constant 0 : index
    %902 = vector.load %arg7[%c0_1084, %c0_1085, %c0_1086, %c0_1087] : memref<1x1x8x256xf32, #tpu.memory_space<vmem>>, vector<1x1x8x256xf32>
    %903 = vector.shape_cast %902 : vector<1x1x8x256xf32> to vector<8x256xf32>
    %904 = vector.shape_cast %901 : vector<8x256xf32> to vector<1x1x8x256xf32>
    tpu.vector_store %arg7[%c0_1084, %c0_1085, %c0_1086, %c0_1087], %904 {strides = array<i32>} : memref<1x1x8x256xf32, #tpu.memory_space<vmem>>, vector<1x1x8x256xf32>,
    return
  }
  func.func @transform_0(%arg0: i32, %arg1: i32) -> (i32, i32, i32, i32) {
    %c0_i32 = arith.constant 0 : i32
    %c0_i32_0 = arith.constant 0 : i32
    %c0_i32_1 = arith.constant 0 : i32
    return %arg0, %arg1, %c0_i32, %c0_i32_0 : i32, i32, i32, i32
  }
  func.func @transform_1(%arg0: i32, %arg1: i32) -> (i32, i32, i32, i32) {
    %c0_i32 = arith.constant 0 : i32
    %c0_i32_0 = arith.constant 0 : i32
    %c0_i32_1 = arith.constant 0 : i32
    return %arg0, %arg1, %c0_i32, %c0_i32_0 : i32, i32, i32, i32
  }
  func.func @transform_2(%arg0: i32, %arg1: i32) -> (i32, i32, i32, i32) {
    %c0_i32 = arith.constant 0 : i32
    %c0_i32_0 = arith.constant 0 : i32
    %c0_i32_1 = arith.constant 0 : i32
    %c0_i32_2 = arith.constant 0 : i32
    return %arg0, %c0_i32, %c0_i32_0, %c0_i32_1 : i32, i32, i32, i32
  }
  func.func @transform_3(%arg0: i32, %arg1: i32) -> (i32, i32) {
    %c0_i32 = arith.constant 0 : i32
    %c0_i32_0 = arith.constant 0 : i32
    %c0_i32_1 = arith.constant 0 : i32
    return %c0_i32, %c0_i32_0 : i32, i32
  }
  func.func @transform_4(%arg0: i32, %arg1: i32) -> (i32, i32) {
    %c0_i32 = arith.constant 0 : i32
    %c0_i32_0 = arith.constant 0 : i32
    %c0_i32_1 = arith.constant 0 : i32
    return %c0_i32, %c0_i32_0 : i32, i32
  }
  func.func @transform_5(%arg0: i32, %arg1: i32) -> (i32, i32, i32, i32) {
    %c0_i32 = arith.constant 0 : i32
    %c0_i32_0 = arith.constant 0 : i32
    %c0_i32_1 = arith.constant 0 : i32
    return %arg0, %arg1, %c0_i32, %c0_i32_0 : i32, i32, i32, i32
  }
}

</mosaic_0001>

<bundles_post_ra>
// kernel: tpu_custom_call.1
= control target key start
LH: loop header
LB: loop body
LE: loop exit
PB: predicated region body
PF: predicated region fallthrough
CT: control target
= control target key end

     0   :  { %s7414_s0 = inlined_call_operand.hbm [shape: bf16[2,2,8,640], index: 0, kind: input, shape index: {}]   ;;  %s7415_s1 = inlined_call_operand.hbm [shape: bf16[2,2,4,256], index: 1, kind: input, shape index: {}]   ;;  %s7416_s2 = inlined_call_operand.hbm [shape: bf16[2,6,8,256], index: 2, kind: input, shape index: {}]   ;;  %s7417_s3 = inlined_call_operand.vmem [shape: bf16[8,4], index: 3, kind: input, shape index: {}]   ;;  %s7418_s4 = inlined_call_operand.vmem [shape: f32[8,1], index: 4, kind: input, shape index: {}]   ;;  %s7419_s5 = inlined_call_operand.hbm [shape: f32[2,2,8,256], index: 5, kind: output, shape index: {}]  }
   0x1   :  { %7499 = sst [smem:[#allocation28_spill]] %s7415_s1 }
   0x2   :  { %7500 = sst [smem:[#allocation29_spill]] %s7417_s3 }
   0x3   :  { %7501 = sst [smem:[#allocation30_spill]] %s7418_s4 }
   0x4   :  { %7502 = sst [smem:[#allocation31_spill]] %s7419_s5 }
   0x5   :  { %10 = vsyncpa [#allocation5], 0 }
   0x6   :  { %12 = vsyncpa [#allocation5 + $0x1], 0 }
   0x7   :  { %13 = vsyncpa [#allocation8], 0 }
   0x8   :  { %15 = vsyncpa [#allocation8 + $0x1], 0 }
   0x9   :  { %16 = vsyncpa [#allocation6], 0 }
   0xa   :  { %18 = vsyncpa [#allocation6 + $0x1], 0  ;;  %s5905_s18 = smov 0   ;;  %s5907_s19 = smov 0  }
   0xb   :  { %s5909_s20 = smov 0   ;;  %s5911_s21 = smov 0  }
   0xc   :  { %s5913_s22 = smov 0   ;;  %s5915_s23 = smov 0  }
   0xd   :  { %s5917_s24 = smov 0   ;;  %s5919_s25 = smov 0  }
   0xe   :  { %s5921_s26 = smov 0   ;;  %s5923_s27 = smov 0  }
   0xf   :  { %s5925_s28 = smov 0  }
  0x10 LB: > { %7503 = sst [smem:[#allocation15_spill]] %s5714_s20  ;;  %s5961_s29 = sadd.s32 4294967295, %s5746_s28   ;;  %s5746_s28 = sphi %s5925_s28, %s24_s28   ;;  %s5742_s27 = sphi %s5923_s27, %s7597_s27   ;;  %s5738_s26 = sphi %s5921_s26, %s7590_s26   ;;  %s5734_s25 = sphi %s5919_s25, %s7596_s25   ;;  %s5730_s24 = sphi %s5917_s24, %s7589_s24   ;;  %s5726_s23 = sphi %s5915_s23, %s7588_s23   ;;  %s5722_s22 = sphi %s5913_s22, %s7595_s22   ;;  %s5718_s21 = sphi %s5911_s21, %s7594_s21   ;;  %s5714_s20 = sphi %s5909_s20, %s7586_s20   ;;  %s5710_s19 = sphi %s5907_s19, %s7593_s19   ;;  %s5706_s18 = sphi %s5905_s18, %s7592_s18  }
  0x11   : > { %7504 = sst [smem:[#allocation16_spill]] %s5718_s21  ;;  %s4412_s30 = sadd.s32 4294967294, %s5746_s28  }
  0x12   : > { %7505 = sst [smem:[#allocation17_spill]] %s5726_s23  ;;  %s33_s6 = sadd.s32 1, %s5738_s26 }
  0x13   : > { %7506 = sst [smem:[#allocation18_spill]] %s5730_s24  ;;  %s36_s7 = sadd.s32 1, %s5742_s27 }
  0x14   : > { %7507 = sst [smem:[#allocation19_spill]] %s5734_s25  ;;  %p34_p0 = scmp.ge.s32.totalorder %s33_s6, 2 }
  0x15   : > { %7508 = sst [smem:[#allocation20_spill]] %s5738_s26  ;;  %s45_s8 = sadd.s32 1, %s5726_s23 }
  0x16   : > { %7509 = sst [smem:[#allocation21_spill]] %s5746_s28  ;;  %p52_p1 = scmp.ne.s32.totalorder %s5726_s23, %s5722_s22 }
  0x17   : > { %p53_p2 = scmp.eq.s32.totalorder %s5746_s28, 0  ;;  %s7599_s6 = smov (%p34_p0, %s33_s6), 0 }
  0x18   : > { %7510 = sst [smem:[#allocation22_spill]] %s7599_s6  ;;  %s7601_s7 = smov (!%p34_p0, %s36_s7), %s5742_s27 }
  0x19   : > { %s41_s9 = ssub.s32 %s5738_s26, %s7599_s6  ;;  %p5980_p3 = por %p53_p2, %p52_p1 }
  0x1a   : > { %p38_p4 = scmp.ge.s32.totalorder %s7601_s7, 2  ;;  %p7421_p5 = scmp.ne.s32.totalorder %s5722_s22, %s5718_s21 }
  0x1b   : > { %p59_p6 = scmp.eq.s32.totalorder %s5961_s29, 0  ;;  %s99_s11 = sadd.s32 1, %s5714_s20 }
  0x1c   : > { %s7603_s7 = smov (%p38_p4, %s7601_s7), 0  ;;  %p106_p8 = scmp.ne.s32.totalorder %s5714_s20, %s5710_s19 }
  0x1d   : > { %7512 = sst [smem:[#allocation23_spill]] %s7603_s7  ;;  %p5995_p7 = por %p59_p6, %p7421_p5 }
  0x1e   : > { %s40_s13 = ssub.s32 %s5742_s27, %s7603_s7  ;;  %p112_p9 = scmp.ne.s32.totalorder %s5710_s19, %s5706_s18 }
  0x1f   : > { %s42_s14 = sor.u32 %s41_s9, %s40_s13  ;;  %p97_p10 = scmp.eq.s32.totalorder %s40_s13, 0 }
  0x20   : > { %p43_p11 = scmp.eq.s32.totalorder %s42_s14, 0  ;;  %p6007_p12 = por %p106_p8, %p53_p2 }
  0x21   : > { %s6012_s16 = scalar_select %p97_p10, %s5714_s20, %s99_s11  }
  0x22   : > { %s6015_s17 = scalar_select %p43_p11, %s5726_s23, %s45_s8  }
  0x23   : > { %7515 = sst [smem:[#allocation24_spill]] %s6012_s16  ;;  %p6019_p13 = por %p112_p9, %p59_p6 }
  0x24   : > { %7516 = sst [smem:[#allocation25_spill]] %s6015_s17  ;;  %p180_p0 = scmp.eq.s32.totalorder %s5961_s29, 3 }
  0x25   : > { %p186_p4 = scmp.eq.s32.totalorder %s4412_s30, 3  ;;  %p5308_p2 = scmp.lt.s32.totalorder %s5746_s28, 4 }
  0x26   : > { %p6027_p5 = por %p180_p0, %p52_p1  ;;  %p7520_p8 = scmp.ne.s32.totalorder %s5722_s22, %s5718_s21 }
  0x27   : > { %s6040_s9 = sand.u32 1, %s5726_s23   ;;  %p6046_p6 = pnand %p5308_p2, %p5980_p3 }
  0x28   : > { %s7518_s18 = scalar_select %p6027_p5, 1, 0 }
  0x29   : > { %p6035_p10 = por %p186_p4, %p7520_p8  ;;  %s234_s11 = sand.u32 1, %s5746_s28  }
  0x2a   : > { %7519 = sst [smem:[#allocation26_spill]] %s7518_s18  ;;  %s4416_s13 = sshll.u32 %s6040_s9, 2 }
  0x2b   : > { %s7521_s8 = scalar_select %p6035_p10, 1, 0 }
  0x2c   : > { %s4417_s14 = sshll.u32 %s5738_s26, 1  ;;  %s4418_s7 = sshll.u32 %s5742_s27, 2 }
  0x2d   : > { %7522 = sst [smem:[#allocation27_spill]] %s7521_s8  ;;  %s243_s17 = sadd.s32 %s4418_s7, %s4417_s14 }
  0x2e   : > { %s238_s16 = scalar_lea.vmem [#allocation7], %s4416_s13  ;;  %s4419_s10 = sshll.u32 %s243_s17, 1 }
  0x2f   : > { %s249_s23 = sshll.u32 %s238_s16, 4  ;;  %s7524_s1 = sld [smem:[#allocation28_spill]]  ;;  %s250_s23 = int_to_ptr.vmem [resolvable:$true] %s249_s23 }
  0x30   : > { %p6061_p1 = pnand %p5308_p2, %p6007_p12  ;;  %p4421_p3 = scmp.ge.s32.totalorder %s5746_s28, 1 }
  0x31   : > { %s6066_s7 = scalar_lea.sflag [#allocation8], %s234_s11  ;;  %p276_p9 = scmp.lt.s32.totalorder %s5746_s28, 5 }
  0x32   : > { %s5279_s21 = smul.u32 20, %s6040_s9  ;;  %s258_s17 = sand.u32 1, %s5714_s20  }
  0x33   : > { %p6072_p11 = pnand %p4421_p3, %p276_p9  ;;  %s5280_s15 = smul.u32 5, %s5738_s26 }
  0x34   : > { %s5281_s8 = smul.u32 10, %s5742_s27 }
  0x35   : > { %s245_s18 = scalar_lea.hbm %s7524_s1, %s4419_s10  ;;  %s5282_s14 = smul.u32 48, %s258_s17 }
  0x36   : > { %s247_s25 = sshll.u32 %s245_s18, 4  ;;  %s216_s18 = scalar_lea.vmem [#allocation4], %s5279_s21  ;;  %s248_s25 = int_to_ptr.hbm [resolvable:$true] %s247_s25 }
  0x37   : > { %5300 = dma.hbm_to_vmem [thread:$0]  (!%p6046_p6), %s248_s25, 64, %s250_s23, %s6066_s7  }
  0x38   : > { %s227_s13 = sshll.u32 %s216_s18, 4  ;;  %s221_s10 = sadd.s32 %s5281_s8, %s5280_s15  ;;  %s228_s13 = int_to_ptr.vmem [resolvable:$true] %s227_s13 }
  0x39   : > { %s4415_s11 = sshll.u32 %s221_s10, 2  ;;  %s5283_s28 = smul.u32 48, %s5742_s27 }
  0x3a   : > { %s223_s1 = scalar_lea.hbm %s7414_s0, %s4415_s11  ;;  %s260_s3 = scalar_lea.vmem [#allocation9], %s5282_s14 }
  0x3b   : > { %s225_s24 = sshll.u32 %s223_s1, 4  ;;  %s268_s26 = sshll.u32 %s260_s3, 4  ;;  %s226_s24 = int_to_ptr.hbm [resolvable:$true] %s225_s24  ;;  %s269_s26 = int_to_ptr.vmem [resolvable:$true] %s268_s26 }
  0x3c   : > { %s265_s21 = scalar_lea.hbm %s7416_s2, %s5283_s28  ;;  %s213_s18 = scalar_lea.sflag [#allocation5], %s6040_s9 }
  0x3d   : > { %5297 = dma.hbm_to_vmem [thread:$0]  (!%p6046_p6), %s226_s24, 320, %s228_s13, %s213_s18  }
  0x3e   : > { %s266_s15 = sshll.u32 %s265_s21, 4  ;;  %s5748_s17 = smov 128   ;;  %s267_s15 = int_to_ptr.hbm [resolvable:$true] %s266_s15 }
  0x3f   : > { %s5749_s8 = smov 8   ;;  %280 = sbr.rel (%p6072_p11) target bundleno = 1245 (0x4dd), region = 40 }
  0x40   : > { %5303 = dma.hbm_to_vmem [thread:$0]  (!%p6061_p1), %s267_s15, 768, %s269_s26, %s6066_s7, %s5748_s17, %s5748_s17, %s5749_s8  }
  0x41   : > { %s6096_s1 = sand.u32 (!%p6072_p11), 1, %s5722_s22  }
  0x42   : > { %s5284_s3 = smul.u32 (!%p6072_p11), 20, %s6096_s1  ;;  %s283_s4 = scalar_lea.sflag (!%p6072_p11), [#allocation5], %s6096_s1 }
  0x44   : > { %s6100_s20 = scalar_lea.vmem [#allocation4], %s5284_s3 }
  0x45   : > { %5689 = dma.done.wait (%p5995_p7), %s283_s4, 320  }
  0x46   : > { %5691 = vsyncadd (%p5995_p7), %s283_s4, 4294966976  ;;  %s292_s5 = sand.u32 1, %s5961_s29   ;;  %s4422_s24 = sshll.u32 %s6096_s1, 2 }
  0x47   : > { %s293_s26 = scalar_lea.sflag [#allocation8], %s292_s5  ;;  %s296_s28 = scalar_lea.vmem [#allocation7], %s4422_s24 }
  0x48   : > { %5693 = dma.done.wait (%p5995_p7), %s293_s26, 64  }
  0x49   : > { %5695 = vsyncadd (%p5995_p7), %s293_s26, 4294967232  ;;  %s304_s9 = sand.u32 1, %s5710_s19  }
  0x4a   : > { %s5285_s30 = smul.u32 48, %s304_s9 }
  0x4c   : > { %s6113_s7 = scalar_lea.vmem [#allocation9], %s5285_s30 }
  0x4d   : > { %5697 = dma.done.wait (%p6019_p13), %s293_s26, 768  }
  0x4e   : > { %5699 = vsyncadd (%p6019_p13), %s293_s26, 4294966528  ;;  %v5750_v0 = vmov 0   ;;  %v413_v1 = vld [vmem:[%s6100_s20 + $0x8] sm:$0xf]  ;;  %s7527_s16 = sld [smem:[#allocation30_spill]]  ;;  %s5751_s13 = smov 126  }
  0x4f   : > { %5525 = vset.pattern.permute.xlu0 %v5750_v0  ;;  %v397_v2 = vld [vmem:[%s6100_s20 + $0x8] sm:$0xf]  ;;  %418 = vrot.lane.b32.xlu2 %v413_v1, %s5751_s13  ;;  %s5752_s14 = smov 127   ;;  %v6127_v5 = vld [vmem:[%s6100_s20] sm:$0xff]  ;;  %vm361_vm0 = vcmask 1041408   ;;  %s5753_s6 = smov 125  }
  0x50   : > { %402 = vrot.lane.b32.xlu1 %v397_v2, %s5752_s14  ;;  %v346_v4 = vld [vmem:[%s296_s28] sm:$0xf]  ;;  %395 = vst [vmem:[#allocation2] sm:$0xff] %v6127_v5  ;;  %s7528_s23 = sld [smem:[#allocation29_spill]]  ;;  %vm357_vm1 = vcmask 31744   ;;  %s5754_s25 = smov 124  }
  0x51   : > { %354 = vst [vmem:[#allocation1] ss:$4 sm:$0xff] %v346_v4  ;;  %v443_v11 = vld [vmem:[%s6100_s20 + $0x8] sm:$0xf]  ;;  %s5755_s21 = smov 122   ;;  %s5756_s18 = smov 123  }
  0x52   : > { %v428_v12 = vld [vmem:[%s6100_s20 + $0x8] sm:$0xf]  ;;  %s5757_s15 = smov 121   ;;  %s5758_s17 = smov 119   ;;  %vm406_vm2 = vcmask 1043456   ;;  %vm423_vm3 = vcmask 1031168  }
  0x53   : > { %v458_v13 = vld [vmem:[%s6100_s20 + $0x8] sm:$0xf]  ;;  %s5759_s8 = smov 120   ;;  %s5760_s3 = smov 118   ;;  %vm408_vm4 = vcmask 1039360   ;;  %vm453_vm5 = vcmask 1014784  }
  0x54   : > { %v347_v3 = vld [vmem:[%s7527_s16] sm:$0xff]  ;;  %s5761_s4 = smov 116   ;;  %s5762_s5 = smov 117   ;;  %vm438_vm6 = vcmask 1022976   ;;  %vm468_vm7 = vcmask 1006592   ;;  %vm498_vm8 = vcmask 990208  }
  0x55   : > { %350 = vperm.xlu0 %5525, %v347_v3   ;;  %v488_v14 = vld [vmem:[%s6100_s20 + $0x8] sm:$0xf]  ;;  %s7443_s24 = smov 100   ;;  %s5764_s26 = smov 98   ;;  %vm483_vm9 = vcmask 998400   ;;  %vm7449_vm10 = vcmask 982016  }
  0x56   : > { %v345_v10 = vld [vmem:[%s7528_s23] sm:$0xf]  ;;  %v473_v15 = vld [vmem:[%s6100_s20 + $0x8] sm:$0xf]  ;;  %s7445_s28 = smov 99   ;;  %s7472_s9 = smov 97  }
  0x57   : > { %431 = vrot.lane.b32.xlu2 %v6127_v5, %s5753_s6  ;;  %v503_v16 = vld [vmem:[%s6100_s20 + $0x8] sm:$0xf]  ;;  %s5767_s30 = smov 95   ;;  %s5768_s29 = smov 96   ;;  %vm543_vm11 = vcmask 965632   ;;  %vm528_vm12 = vcmask 973824  }
  0x58   : > { %416 = vrot.lane.b32.xlu1 %v6127_v5, %s5751_s13  ;;  %v355_v6 = vld.sshfl [vmem:[#allocation1] sm:$0xff pattern:$0x73625140]  ;;  %v356_v7 = vld.sshfl [vmem:[#allocation1 + $0x8] sm:$0xff pattern:$0x73625140] }
  0x59   : > { %v362_v8 = vsel %vm361_vm0, %v355_v6, 0  ;;  %v364_v9 = vsel %vm361_vm0, %v356_v7, 0  ;;  %v533_v17 = vld [vmem:[%s6100_s20 + $0x8] sm:$0xf]  ;;  %s5769_s12 = smov 94   ;;  %s5770_s16 = smov 92  }
  0x5a   : > { %373 = vmatpush.bf16.msra.mxu0 %v362_v8  ;;  %386 = vmatpush.bf16.msra.mxu1 %v364_v9  ;;  %v518_v18 = vld [vmem:[%s6100_s20 + $0x8] sm:$0xf]  ;;  %s5771_s10 = smov 93   ;;  %s5772_s11 = smov 91   ;;  %vm558_vm13 = vcmask 957440   ;;  %vm7455_vm14 = vcmask 818176  }
  0x5b   : > { %v548_v19 = vld [vmem:[%s6100_s20 + $0x8] sm:$0xf]  ;;  %s5773_s23 = smov 89   ;;  %vm573_vm15 = vcmask 949248   ;;  %vm7450_vm0 = vcmask 809984  }
  0x5c   : > { %v578_v20 = vld [vmem:[%s6100_s20 + $0x8] sm:$0xf] }
  0x5d   : > { %400 = vrot.lane.b32.xlu0 %v6127_v5, %s5752_s14  ;;  %4424 = vmatmul.msk.bf16.vlgmr.msra.gmra.mxu0 %vm357_vm1, %v345_v10  ;;  %v563_v21 = vld [vmem:[%s6100_s20 + $0x8] sm:$0xf] }
  0x5e   : > { %4425 = vmatmul.msk.bf16.vlgmr.msra.gmra.mxu1 %vm357_vm1, %v345_v10  ;;  %v593_v22 = vld [vmem:[%s6100_s20 + $0x8] sm:$0xf] }
  0x5f   : > { %448 = vrot.lane.b32.xlu2 %v443_v11, %s5754_s25  ;;  %v623_v23 = vld [vmem:[%s6100_s20 + $0x8] sm:$0xf] }
  0x60   : > { %446 = vrot.lane.b32.xlu1 %v6127_v5, %s5754_s25  ;;  %v608_v24 = vld [vmem:[%s6100_s20 + $0x8] sm:$0xf] }
  0x61   : > { %v638_v25 = vld [vmem:[%s6100_s20 + $0x8] sm:$0xf] }
  0x62   : > { %v668_v27 = vld [vmem:[%s6100_s20 + $0x8] sm:$0xf] }
  0x63   : > { %v653_v28 = vld [vmem:[%s6100_s20 + $0x8] sm:$0xf] }
  0x64   : > { %v683_v30 = vld [vmem:[%s6100_s20 + $0x8] sm:$0xf] }
  0x65   : > { %433 = vrot.lane.b32.xlu0 %v428_v12, %s5753_s6  ;;  %v713_v32 = vld [vmem:[%s6100_s20 + $0x8] sm:$0xf] }
  0x66   : > { %v698_v33 = vld [vmem:[%s6100_s20 + $0x8] sm:$0xf] }
  0x67   : > { %476 = vrot.lane.b32.xlu2 %v6127_v5, %s5755_s21  ;;  %v728_v37 = vld [vmem:[%s6100_s20 + $0x8] sm:$0xf] }
  0x68   : > { %463 = vrot.lane.b32.xlu1 %v458_v13, %s5756_s18  ;;  %v758_v46 = vld [vmem:[%s6100_s20 + $0x8] sm:$0xf] }
  0x69   : > { %v743_v49 = vld [vmem:[%s6100_s20 + $0x8] sm:$0xf] }
  0x6a   : > { %v773_v59 = vld [vmem:[%s6100_s20 + $0x8] sm:$0xf] }
  0x6b   : > { %v803_v7 = vld [vmem:[%s6100_s20 + $0x8] sm:$0xf] }
  0x6c   : > { %v788_v8 = vld [vmem:[%s6100_s20 + $0x8] sm:$0xf] }
  0x6d   : > { %461 = vrot.lane.b32.xlu0 %v6127_v5, %s5756_s18 }
  0x6f   : > { %493 = vrot.lane.b32.xlu2 %v488_v14, %s5757_s15 }
  0x70   : > { %491 = vrot.lane.b32.xlu1 %v6127_v5, %s5757_s15 }
  0x75   : > { %478 = vrot.lane.b32.xlu0 %v473_v15, %s5755_s21 }
  0x77   : > { %521 = vrot.lane.b32.xlu2 %v6127_v5, %s5758_s17 }
  0x78   : > { %508 = vrot.lane.b32.xlu1 %v503_v16, %s5759_s8 }
  0x7d   : > { %506 = vrot.lane.b32.xlu0 %v6127_v5, %s5759_s8 }
  0x7f   : > { %538 = vrot.lane.b32.xlu2 %v533_v17, %s5760_s3 }
  0x80   : > { %536 = vrot.lane.b32.xlu1 %v6127_v5, %s5760_s3  ;;  %s5775_s3 = smov 88  }
  0x85   : > { %523 = vrot.lane.b32.xlu0 %v518_v18, %s5758_s17  ;;  %s5774_s17 = smov 90  }
  0x87   : > { %566 = vrot.lane.b32.xlu2 %v6127_v5, %s5761_s4 }
  0x88   : > { %553 = vrot.lane.b32.xlu1 %v548_v19, %s5762_s5 }
  0x8d   : > { %551 = vrot.lane.b32.xlu0 %v6127_v5, %s5762_s5  ;;  %s7435_s5 = smov 71  }
  0x8f   : > { %583 = vrot.lane.b32.xlu2 %v578_v20, %s7443_s24  ;;  %v818_v20 = vld [vmem:[%s6100_s20 + $0x8] sm:$0xf] }
  0x90   : > { %581 = vrot.lane.b32.xlu1 %v6127_v5, %s7443_s24  ;;  %s5785_s24 = smov 62  }
  0x95   : > { %568 = vrot.lane.b32.xlu0 %v563_v21, %s5761_s4 }
  0x97   : > { %611 = vrot.lane.b32.xlu2 %v6127_v5, %s5764_s26 }
  0x98   : > { %598 = vrot.lane.b32.xlu1 %v593_v22, %s7445_s28 }
  0x9d   : > { %596 = vrot.lane.b32.xlu0 %v6127_v5, %s7445_s28  ;;  %s5786_s28 = smov 63  }
  0x9f   : > { %628 = vrot.lane.b32.xlu2 %v623_v23, %s7472_s9 }
  0xa0   : > { %626 = vrot.lane.b32.xlu1 %v6127_v5, %s7472_s9  ;;  %s5799_s9 = smov 34  }
  0xa5   : > { %613 = vrot.lane.b32.xlu0 %v608_v24, %s5764_s26 }
  0xa7   : > { %656 = vrot.lane.b32.xlu2 %v6127_v5, %s5767_s30 }
  0xa8   : > { %643 = vrot.lane.b32.xlu1 %v638_v25, %s5768_s29 }
  0xa9   : > { %v419_v26 = vpop.permute.xlu2 %418 }
  0xaa   : > { %v421_v38 = vrot.slane %v419_v26, 4 }
  0xad   : > { %641 = vrot.lane.b32.xlu0 %v6127_v5, %s5768_s29 }
  0xaf   : > { %673 = vrot.lane.b32.xlu2 %v668_v27, %s5769_s12 }
  0xb0   : > { %671 = vrot.lane.b32.xlu1 %v6127_v5, %s5769_s12 }
  0xb1   : > { %v432_v29 = vpop.permute.xlu2 %431 }
  0xb2   : > { %v435_v52 = vrot.slane %v432_v29, 4 }
  0xb5   : > { %658 = vrot.lane.b32.xlu0 %v653_v28, %s5767_s30 }
  0xb7   : > { %701 = vrot.lane.b32.xlu2 %v6127_v5, %s5770_s16 }
  0xb8   : > { %688 = vrot.lane.b32.xlu1 %v683_v30, %s5771_s10  ;;  %v848_v30 = vld [vmem:[%s6100_s20 + $0x8] sm:$0xf] }
  0xb9   : > { %v449_v31 = vpop.permute.xlu2 %448 }
  0xba   : > { %v451_v51 = vrot.slane %v449_v31, 4  ;;  %v833_v31 = vld [vmem:[%s6100_s20 + $0x8] sm:$0xf] }
  0xbd   : > { %686 = vrot.lane.b32.xlu0 %v6127_v5, %s5771_s10 }
  0xbf   : > { %718 = vrot.lane.b32.xlu2 %v713_v32, %s5772_s11 }
  0xc0   : > { %716 = vrot.lane.b32.xlu1 %v6127_v5, %s5772_s11  ;;  %s7433_s11 = smov 72  }
  0xc1   : > { %v6211_v34 = vpop.permute.xlu2 %476 }
  0xc2   : > { %v403_v35 = vpop.permute.xlu1 %402  ;;  %v480_v14 = vrot.slane %v6211_v34, 4 }
  0xc3   : > { %v405_v43 = vrot.slane %v403_v35, 4 }
  0xc5   : > { %703 = vrot.lane.b32.xlu0 %v698_v33, %s5770_s16 }
  0xc7   : > { %v6213_v36 = vpop.permute.xlu0 %350  ;;  %746 = vrot.lane.b32.xlu2 %v6127_v5, %s5773_s23 }
  0xc8   : > { %733 = vrot.lane.b32.xlu1 %v728_v37, %s5774_s17 }
  0xc9   : > { %v6218_v39 = vpop.permute.xlu2 %493 }
  0xca   : > { %v417_v40 = vpop.permute.xlu1 %416  ;;  %v496_v11 = vrot.slane %v6218_v39, 4 }
  0xcb   : > { %v420_v41 = vrot.slane %v417_v40, 4 }
  0xcd   : > { %731 = vrot.lane.b32.xlu0 %v6127_v5, %s5774_s17  ;;  %v422_v45 = vsel %vm406_vm2, %v420_v41, %v421_v38  ;;  %s7439_s17 = smov 68  }
  0xce   : > { %v424_v47 = vsel %vm423_vm3, %v417_v40, %v422_v45 }
  0xcf   : > { %v401_v42 = vpop.permute.xlu0 %400  ;;  %426 = vst [vmem:[#allocation2 + $0x10] sm:$0xff] %v424_v47  ;;  %763 = vrot.lane.b32.xlu2 %v758_v46, %s5775_s3 }
  0xd0   : > { %v404_v44 = vrot.slane %v401_v42, 4  ;;  %761 = vrot.lane.b32.xlu1 %v6127_v5, %s5775_s3 }
  0xd1   : > { %v6229_v53 = vpop.permute.xlu2 %521 }
  0xd2   : > { %v407_v48 = vsel %vm406_vm2, %v404_v44, %v405_v43  ;;  %v447_v54 = vpop.permute.xlu1 %446  ;;  %v525_v35 = vrot.slane %v6229_v53, 4 }
  0xd3   : > { %v409_v50 = vsel %vm408_vm4, %v401_v42, %v407_v48  ;;  %v450_v55 = vrot.slane %v447_v54, 4  ;;  %v1121_v42 = vld [vmem:[%s6100_s20 + $0x8] sm:$0xf] }
  0xd4   : > { %411 = vst [vmem:[#allocation2 + $0x8] sm:$0xff] %v409_v50 }
  0xd5   : > { %748 = vrot.lane.b32.xlu0 %v743_v49, %s5773_s23  ;;  %v452_v58 = vsel %vm406_vm2, %v450_v55, %v451_v51  ;;  %s7437_s23 = smov 70  }
  0xd6   : > { %v454_v60 = vsel %vm453_vm5, %v447_v54, %v452_v58 }
  0xd7   : > { %v434_v56 = vpop.permute.xlu0 %433  ;;  %456 = vst [vmem:[#allocation2 + $0x20] sm:$0xff] %v454_v60  ;;  %791 = vrot.lane.b32.xlu2 %v6127_v5, %s7435_s5 }
  0xd8   : > { %v436_v57 = vrot.slane %v434_v56, 4  ;;  %778 = vrot.lane.b32.xlu1 %v773_v59, %s7433_s11 }
  0xd9   : > { %v6245_v1 = vpop.permute.xlu2 %538 }
  0xda   : > { %v437_v61 = vsel %vm406_vm2, %v435_v52, %v436_v57  ;;  %v6241_v63 = vpop.f32.mrf.mxu0  ;;  %v464_v2 = vpop.permute.xlu1 %463  ;;  %v1152_v52 = vld [vmem:[%s6100_s20 + $0x8] sm:$0xf] }
  0xdb   : > { %v439_v62 = vsel %vm438_vm6, %v432_v29, %v437_v61  ;;  %v6243_v0 = vpop.f32.mrf.mxu1  ;;  %v466_v3 = vrot.slane %v464_v2, 4 }
  0xdc   : > { %441 = vst [vmem:[#allocation2 + $0x18] sm:$0xff] %v439_v62 }
  0xdd   : > { %776 = vrot.lane.b32.xlu0 %v6127_v5, %s7433_s11  ;;  %s7441_s11 = smov 69  }
  0xdf   : > { %v462_v4 = vpop.permute.xlu0 %461  ;;  %808 = vrot.lane.b32.xlu2 %v803_v7, %s7437_s23 }
  0xe0   : > { %v465_v6 = vrot.slane %v462_v4, 4  ;;  %806 = vrot.lane.b32.xlu1 %v6127_v5, %s7437_s23  ;;  %s5782_s23 = smov 65  }
  0xe1   : > { %v6257_v15 = vpop.permute.xlu2 %566 }
  0xe2   : > { %v467_v9 = vsel %vm406_vm2, %v465_v6, %v466_v3  ;;  %v377_v12 = vpop.f32.mrf.mxu0  ;;  %v492_v16 = vpop.permute.xlu1 %491  ;;  %v570_v57 = vrot.slane %v6257_v15, 4 }
  0xe3   : > { %v469_v10 = vsel %vm468_vm7, %v462_v4, %v467_v9  ;;  %v390_v13 = vpop.f32.mrf.mxu1  ;;  %v495_v17 = vrot.slane %v492_v16, 4  ;;  %v1197_v12 = vld [vmem:[%s6100_s20 + $0x8] sm:$0xf] }
  0xe4   : > { %471 = vst [vmem:[#allocation2 + $0x28] sm:$0xff] %v469_v10  ;;  %v1182_v13 = vld [vmem:[%s6100_s20 + $0x8] sm:$0xf] }
  0xe5   : > { %793 = vrot.lane.b32.xlu0 %v788_v8, %s7435_s5  ;;  %v497_v21 = vsel %vm406_vm2, %v495_v17, %v496_v11  ;;  %s7487_s5 = smov 67  }
  0xe6   : > { %v499_v22 = vsel %vm498_vm8, %v492_v16, %v497_v21 }
  0xe7   : > { %v479_v18 = vpop.permute.xlu0 %478  ;;  %501 = vst [vmem:[#allocation2 + $0x38] sm:$0xff] %v499_v22  ;;  %836 = vrot.lane.b32.xlu2 %v6127_v5, %s7439_s17 }
  0xe8   : > { %v481_v19 = vrot.slane %v479_v18, 4  ;;  %823 = vrot.lane.b32.xlu1 %v818_v20, %s7441_s11 }
  0xe9   : > { %v6270_v25 = vpop.permute.xlu2 %583 }
  0xea   : > { %v482_v23 = vsel %vm406_vm2, %v480_v14, %v481_v19  ;;  %v509_v26 = vpop.permute.xlu1 %508  ;;  %v586_v56 = vrot.slane %v6270_v25, 4 }
  0xeb   : > { %v484_v24 = vsel %vm483_vm9, %v6211_v34, %v482_v23  ;;  %v511_v27 = vrot.slane %v509_v26, 4  ;;  %v541_v34 = vrot.slane %v6245_v1, 4  ;;  %v1167_v1 = vld [vmem:[%s6100_s20 + $0x8] sm:$0xf] }
  0xec   : > { %486 = vst [vmem:[#allocation2 + $0x30] sm:$0xff] %v484_v24  ;;  %v1212_v23 = vld [vmem:[%s6100_s20 + $0x8] sm:$0xf] }
  0xed   : > { %821 = vrot.lane.b32.xlu0 %v6127_v5, %s7441_s11  ;;  %s5784_s11 = smov 64  }
  0xef   : > { %v507_v28 = vpop.permute.xlu0 %506  ;;  %853 = vrot.lane.b32.xlu2 %v848_v30, %s7487_s5 }
  0xf0   : > { %v510_v29 = vrot.slane %v507_v28, 4  ;;  %851 = vrot.lane.b32.xlu1 %v6127_v5, %s7487_s5  ;;  %s5814_s5 = smov 4  }
  0xf1   : > { %v6282_v37 = vpop.permute.xlu2 %611 }
  0xf2   : > { %v512_v32 = vsel %vm406_vm2, %v510_v29, %v511_v27  ;;  %v537_v38 = vpop.permute.xlu1 %536  ;;  %v615_v17 = vrot.slane %v6282_v37, 4 }
  0xf3   : > { %v514_v33 = vsel %vm7449_vm10, %v507_v28, %v512_v32  ;;  %v540_v39 = vrot.slane %v537_v38, 4  ;;  %vm7493_vm10 = vcmask 769024  }
  0xf4   : > { %516 = vst [vmem:[#allocation2 + $0x40] sm:$0xff] %v514_v33  ;;  %v1242_v33 = vld [vmem:[%s6100_s20 + $0x8] sm:$0xf] }
  0xf5   : > { %838 = vrot.lane.b32.xlu0 %v833_v31, %s7439_s17  ;;  %v542_v43 = vsel %vm406_vm2, %v540_v39, %v541_v34  ;;  %s7447_s17 = smov 66   ;;  %v1227_v34 = vld [vmem:[%s6100_s20 + $0x8] sm:$0xf] }
  0xf6   : > { %v544_v44 = vsel %vm543_vm11, %v537_v38, %v542_v43  ;;  %vm7458_vm11 = vcmask 793600  }
  0xf7   : > { %v524_v40 = vpop.permute.xlu0 %523  ;;  %546 = vst [vmem:[#allocation2 + $0x50] sm:$0xff] %v544_v44  ;;  %1140 = vrot.lane.b32.xlu2 %v6127_v5, %s5782_s23 }
  0xf8   : > { %v526_v41 = vrot.slane %v524_v40, 4  ;;  %1126 = vrot.lane.b32.xlu1 %v1121_v42, %s7447_s17 }
  0xf9   : > { %v6293_v47 = vpop.permute.xlu2 %628 }
  0xfa   : > { %v527_v45 = vsel %vm406_vm2, %v525_v35, %v526_v41  ;;  %v554_v48 = vpop.permute.xlu1 %553  ;;  %v631_v16 = vrot.slane %v6293_v47, 4 }
  0xfb   : > { %v529_v46 = vsel %vm528_vm12, %v6229_v53, %v527_v45  ;;  %v556_v49 = vrot.slane %v554_v48, 4  ;;  %v1137_v53 = vld [vmem:[%s6100_s20 + $0x8] sm:$0xf]  ;;  %vm7459_vm12 = vcmask 801792  }
  0xfc   : > { %531 = vst [vmem:[#allocation2 + $0x48] sm:$0xff] %v529_v46 }
  0xfd   : > { %1124 = vrot.lane.b32.xlu0 %v6127_v5, %s7447_s17  ;;  %s5787_s17 = smov 61  }
  0xff   : > { %v552_v50 = vpop.permute.xlu0 %551  ;;  %1157 = vrot.lane.b32.xlu2 %v1152_v52, %s5784_s11 }
 0x100   : > { %v555_v51 = vrot.slane %v552_v50, 4  ;;  %1155 = vrot.lane.b32.xlu1 %v6127_v5, %s5784_s11 }
 0x101   : > { %v6304_v58 = vpop.permute.xlu2 %656 }
 0x102   : > { %v557_v54 = vsel %vm406_vm2, %v555_v51, %v556_v49  ;;  %v582_v59 = vpop.permute.xlu1 %581  ;;  %v660_v49 = vrot.slane %v6304_v58, 4 }
 0x103   : > { %v559_v55 = vsel %vm558_vm13, %v552_v50, %v557_v54  ;;  %v585_v60 = vrot.slane %v582_v59, 4  ;;  %vm7466_vm13 = vcmask 785408  }
 0x104   : > { %561 = vst [vmem:[#allocation2 + $0x58] sm:$0xff] %v559_v55 }
 0x105   : > { %1142 = vrot.lane.b32.xlu0 %v1137_v53, %s5782_s23  ;;  %v587_v2 = vsel %vm406_vm2, %v585_v60, %v586_v56 }
 0x106   : > { %v589_v3 = vsel %vm7455_vm14, %v582_v59, %v587_v2  ;;  %vm7474_vm14 = vcmask 760832  }
 0x107   : > { %v569_v61 = vpop.permute.xlu0 %568  ;;  %591 = vst [vmem:[#allocation2 + $0x68] sm:$0xff] %v589_v3  ;;  %1185 = vrot.lane.b32.xlu2 %v6127_v5, %s5785_s24  ;;  %v4468_v3 = vld [vmem:[#allocation2 + $0x50] sm:$0xf] }
 0x108   : > { %v571_v62 = vrot.slane %v569_v61, 4  ;;  %1172 = vrot.lane.b32.xlu1 %v1167_v1, %s5786_s28 }
 0x109   : > { %v6314_v7 = vpop.permute.xlu2 %673 }
 0x10a   : > { %v572_v4 = vsel %vm406_vm2, %v570_v57, %v571_v62  ;;  %v599_v8 = vpop.permute.xlu1 %598  ;;  %v676_v42 = vrot.slane %v6314_v7, 4  ;;  %v1257_v57 = vld [vmem:[%s6100_s20 + $0x8] sm:$0xf] }
 0x10b   : > { %v574_v6 = vsel %vm573_vm15, %v6257_v15, %v572_v4  ;;  %v601_v9 = vrot.slane %v599_v8, 4  ;;  %v5122_v60 = vld [vmem:[#allocation2 + $0x54] sm:$0xf0]  ;;  %v4470_v61 = vld [vmem:[#allocation2 + $0x58] sm:$0xf0] }
 0x10c   : > { %576 = vst [vmem:[#allocation2 + $0x60] sm:$0xff] %v574_v6  ;;  %v5121_v4 = vld [vmem:[#allocation2 + $0x54] sm:$0xf]  ;;  %v4469_v6 = vor.u32 %v5122_v60, %v4468_v3  ;;  %v5120_v8 = vld [vmem:[#allocation2 + $0x44] sm:$0xf0] }
 0x10d   : > { %1170 = vrot.lane.b32.xlu0 %v6127_v5, %s5786_s28  ;;  %s5789_s28 = smov 60   ;;  %v4473_v7 = vor.u32 %v5121_v4, %v4470_v61  ;;  %v1332_v4 = vld [vmem:[%s6100_s20 + $0x8] sm:$0xf] }
 0x10e   : > { %v5124_v45 = vld [vmem:[#allocation2 + $0x64] sm:$0xf0]  ;;  %v4478_v48 = vld [vmem:[#allocation2 + $0x68] sm:$0xf0] }
 0x10f   : > { %v597_v10 = vpop.permute.xlu0 %596  ;;  %1202 = vrot.lane.b32.xlu2 %v1197_v12, %s5787_s17 }
 0x110   : > { %v600_v11 = vrot.slane %v597_v10, 4  ;;  %1200 = vrot.lane.b32.xlu1 %v6127_v5, %s5787_s17  ;;  %s7451_s17 = smov 43  }
 0x111   : > { %v6323_v18 = vpop.permute.xlu2 %701 }
 0x112   : > { %v602_v14 = vsel %vm406_vm2, %v600_v11, %v601_v9  ;;  %v627_v19 = vpop.permute.xlu1 %626  ;;  %v4462_v9 = vld [vmem:[#allocation2 + $0x48] sm:$0xf0] }
 0x113   : > { %v604_v15 = vsel %vm7450_vm0, %v597_v10, %v602_v14  ;;  %v630_v20 = vrot.slane %v627_v19, 4  ;;  %v4476_v46 = vld [vmem:[#allocation2 + $0x60] sm:$0xf]  ;;  %v5123_v47 = vld [vmem:[#allocation2 + $0x64] sm:$0xf]  ;;  %vm7471_vm0 = vcmask 777216  }
 0x114   : > { %606 = vst [vmem:[#allocation2 + $0x70] sm:$0xff] %v604_v15  ;;  %v4477_v55 = vor.u32 %v5124_v45, %v4476_v46  ;;  %v4481_v56 = vor.u32 %v5123_v47, %v4478_v48  ;;  %v5119_v14 = vld [vmem:[#allocation2 + $0x44] sm:$0xf]  ;;  %v5118_v15 = vld [vmem:[#allocation2 + $0x34] sm:$0xf0] }
 0x115   : > { %1187 = vrot.lane.b32.xlu0 %v1182_v13, %s5785_s24  ;;  %v632_v24 = vsel %vm406_vm2, %v630_v20, %v631_v16  ;;  %s7453_s24 = smov 44   ;;  %v4460_v13 = vld [vmem:[#allocation2 + $0x40] sm:$0xf]  ;;  %v1287_v20 = vld [vmem:[%s6100_s20 + $0x8] sm:$0xf] }
 0x116   : > { %v634_v25 = vsel %vm7458_vm11, %v627_v19, %v632_v24  ;;  %v4465_v19 = vor.u32 %v5119_v14, %v4462_v9  ;;  %v5117_v24 = vld [vmem:[#allocation2 + $0x34] sm:$0xf]  ;;  %vm723_vm11 = vcmask 744448   ;;  %v5114_v45 = vld [vmem:[#allocation2 + $0x14] sm:$0xf0] }
 0x117   : > { %v614_v21 = vpop.permute.xlu0 %613  ;;  %636 = vst [vmem:[#allocation2 + $0x80] sm:$0xff] %v634_v25  ;;  %1230 = vrot.lane.b32.xlu2 %v6127_v5, %s7453_s24  ;;  %v4438_v46 = vld [vmem:[#allocation2 + $0x18] sm:$0xf0] }
 0x118   : > { %v616_v22 = vrot.slane %v614_v21, 4  ;;  %1217 = vrot.lane.b32.xlu1 %v1212_v23, %s5789_s28  ;;  %v4454_v21 = vld [vmem:[#allocation2 + $0x38] sm:$0xf0]  ;;  %v4452_v23 = vld [vmem:[#allocation2 + $0x30] sm:$0xf] }
 0x119   : > { %v6336_v28 = vpop.permute.xlu2 %718 }
 0x11a   : > { %v617_v26 = vsel %vm406_vm2, %v615_v17, %v616_v22  ;;  %v644_v29 = vpop.permute.xlu1 %643  ;;  %v4461_v17 = vor.u32 %v5120_v8, %v4460_v13  ;;  %v1272_v22 = vld [vmem:[%s6100_s20 + $0x8] sm:$0xf] }
 0x11b   : > { %v619_v27 = vsel %vm7459_vm12, %v6282_v37, %v617_v26  ;;  %v646_v30 = vrot.slane %v644_v29, 4  ;;  %v4484_v37 = vld [vmem:[#allocation2 + $0x70] sm:$0xf]  ;;  %v5125_v40 = vld [vmem:[#allocation2 + $0x74] sm:$0xf]  ;;  %v4457_v29 = vor.u32 %v5117_v24, %v4454_v21  ;;  %vm7498_vm12 = vcmask 752640  }
 0x11c   : > { %621 = vst [vmem:[#allocation2 + $0x78] sm:$0xff] %v619_v27  ;;  %v4453_v27 = vor.u32 %v5118_v15, %v4452_v23 }
 0x11d   : > { %1215 = vrot.lane.b32.xlu0 %v6127_v5, %s5789_s28 }
 0x11f   : > { %v642_v31 = vpop.permute.xlu0 %641  ;;  %1247 = vrot.lane.b32.xlu2 %v1242_v33, %s7451_s17  ;;  %v705_v33 = vrot.slane %v6323_v18, 4 }
 0x120   : > { %v645_v32 = vrot.slane %v642_v31, 4  ;;  %1245 = vrot.lane.b32.xlu1 %v6127_v5, %s7451_s17  ;;  %s7460_s17 = smov 41  }
 0x121   : > { %v6348_v50 = vpop.permute.xlu2 %746 }
 0x122   : > { %v647_v35 = vsel %vm406_vm2, %v645_v32, %v646_v30  ;;  %v672_v51 = vpop.permute.xlu1 %671  ;;  %v721_v30 = vrot.slane %v6336_v28, 4  ;;  %v4446_v32 = vld [vmem:[#allocation2 + $0x28] sm:$0xf0]  ;;  %v1302_v28 = vld [vmem:[%s6100_s20 + $0x8] sm:$0xf] }
 0x123   : > { %v649_v38 = vsel %vm7466_vm13, %v642_v31, %v647_v35  ;;  %v5126_v39 = vld [vmem:[#allocation2 + $0x74] sm:$0xf0]  ;;  %v4486_v41 = vld [vmem:[#allocation2 + $0x78] sm:$0xf0]  ;;  %v675_v52 = vrot.slane %v672_v51, 4  ;;  %vm768_vm13 = vcmask 719872  }
 0x124   : > { %651 = vst [vmem:[#allocation2 + $0x88] sm:$0xff] %v649_v38  ;;  %v4485_v43 = vor.u32 %v5126_v39, %v4484_v37  ;;  %v4489_v44 = vor.u32 %v5125_v40, %v4486_v41  ;;  %v5116_v31 = vld [vmem:[#allocation2 + $0x24] sm:$0xf0]  ;;  %v4444_v39 = vld [vmem:[#allocation2 + $0x20] sm:$0xf] }
 0x125   : > { %1232 = vrot.lane.b32.xlu0 %v1227_v34, %s7453_s24  ;;  %v677_v59 = vsel %vm406_vm2, %v675_v52, %v676_v42  ;;  %s7456_s24 = smov 42   ;;  %v5115_v40 = vld [vmem:[#allocation2 + $0x24] sm:$0xf]  ;;  %v4445_v42 = vor.u32 %v5116_v31, %v4444_v39  ;;  %v5113_v52 = vld [vmem:[#allocation2 + $0x14] sm:$0xf] }
 0x126   : > { %1064 = vmatpush.bf16.msra.mxu2 %v4485_v43  ;;  %1090 = vmatpush.bf16.msrb.mxu0 %v4489_v44  ;;  %v679_v62 = vsel %vm7493_vm10, %v672_v51, %v677_v59  ;;  %v4449_v43 = vor.u32 %v5115_v40, %v4446_v32  ;;  %v4436_v51 = vld [vmem:[#allocation2 + $0x10] sm:$0xf]  ;;  %v1392_v39 = vld [vmem:[%s6100_s20 + $0x8] sm:$0xf]  ;;  %vm7496_vm10 = vcmask 310272  }
 0x127   : > { %v659_v53 = vpop.permute.xlu0 %658  ;;  %681 = vst [vmem:[#allocation2 + $0x98] sm:$0xff] %v679_v62  ;;  %1275 = vrot.lane.b32.xlu2 %v6127_v5, %s7460_s17 }
 0x128   : > { %v661_v54 = vrot.slane %v659_v53, 4  ;;  %1262 = vrot.lane.b32.xlu1 %v1257_v57, %s7456_s24  ;;  %v4437_v53 = vor.u32 %v5114_v45, %v4436_v51  ;;  %v4430_v57 = vld [vmem:[#allocation2 + $0x8] sm:$0xf0] }
 0x12a   : > { %v662_v1 = vsel %vm406_vm2, %v660_v49, %v661_v54  ;;  %1065 = vmatpush.bf16.msra.mxu2 %v4477_v55  ;;  %1091 = vmatpush.bf16.msrb.mxu0 %v4481_v56  ;;  %v689_v10 = vpop.permute.xlu1 %688  ;;  %v4441_v54 = vor.u32 %v5113_v52, %v4438_v46  ;;  %v4428_v55 = vld [vmem:[#allocation2] sm:$0xf]  ;;  %v5112_v56 = vld [vmem:[#allocation2 + $0x4] sm:$0xf0] }
 0x12b   : > { %v664_v2 = vsel %vm7471_vm0, %v6304_v58, %v662_v1  ;;  %v6361_v58 = vpop.permute.xlu2 %763  ;;  %v691_v11 = vrot.slane %v689_v10, 4  ;;  %v750_v10 = vrot.slane %v6348_v50, 4  ;;  %vm7475_vm0 = vcmask 588800  }
 0x12c   : > { %666 = vst [vmem:[#allocation2 + $0x90] sm:$0xff] %v664_v2  ;;  %v4429_v2 = vor.u32 %v5112_v56, %v4428_v55  ;;  %v766_v9 = vrot.slane %v6361_v58, 4 }
 0x12d   : > { %1260 = vrot.lane.b32.xlu0 %v6127_v5, %s7456_s24  ;;  %s7462_s24 = smov 40  }
 0x12e   : > { %1066 = vmatpush.bf16.msra.mxu2 %v4469_v6  ;;  %1092 = vmatpush.bf16.msrb.mxu0 %v4473_v7  ;;  %v1317_v6 = vld [vmem:[%s6100_s20 + $0x8] sm:$0xf] }
 0x12f   : > { %v687_v12 = vpop.permute.xlu0 %686  ;;  %1292 = vrot.lane.b32.xlu2 %v1287_v20, %s7462_s24 }
 0x130   : > { %v690_v16 = vrot.slane %v687_v12, 4  ;;  %1290 = vrot.lane.b32.xlu1 %v6127_v5, %s7462_s24  ;;  %s7464_s24 = smov 39  }
 0x132   : > { %v692_v25 = vsel %vm406_vm2, %v690_v16, %v691_v11  ;;  %1067 = vmatpush.bf16.msra.mxu2 %v4461_v17  ;;  %1093 = vmatpush.bf16.msrb.mxu0 %v4465_v19  ;;  %v717_v35 = vpop.permute.xlu1 %716  ;;  %v6399_v16 = vld [vmem:[%s6100_s20] sm:$0xff]  ;;  %v1347_v17 = vld [vmem:[%s6100_s20 + $0x8] sm:$0xf] }
 0x133   : > { %v694_v26 = vsel %vm7474_vm14, %v687_v12, %v692_v25  ;;  %v6373_v34 = vpop.permute.xlu2 %791  ;;  %v720_v37 = vrot.slane %v717_v35, 4  ;;  %vm7479_vm14 = vcmask 580608  }
 0x134   : > { %696 = vst [vmem:[#allocation2 + $0xa0] sm:$0xff] %v694_v26  ;;  %v1377_v26 = vld [vmem:[%s6100_s20 + $0x8] sm:$0xf]  ;;  %v795_v31 = vrot.slane %v6373_v34, 4 }
 0x135   : > { %1277 = vrot.lane.b32.xlu0 %v1272_v22, %s7460_s17  ;;  %v722_v44 = vsel %vm406_vm2, %v720_v37, %v721_v30  ;;  %s7469_s17 = smov 38  }
 0x136   : > { %1068 = vmatpush.bf16.msra.mxu2 %v4453_v27  ;;  %1094 = vmatpush.bf16.msrb.mxu0 %v4457_v29  ;;  %v724_v47 = vsel %vm723_vm11, %v717_v35, %v722_v44  ;;  %vm738_vm11 = vcmask 736256   ;;  %v1362_v27 = vld [vmem:[%s6100_s20 + $0x8] sm:$0xf] }
 0x137   : > { %v704_v38 = vpop.permute.xlu0 %703  ;;  %726 = vst [vmem:[#allocation2 + $0xb0] sm:$0xff] %v724_v47  ;;  %1320 = vrot.lane.b32.xlu2 %v6127_v5, %s7469_s17 }
 0x138   : > { %v706_v41 = vrot.slane %v704_v38, 4  ;;  %1307 = vrot.lane.b32.xlu1 %v1302_v28, %s7464_s24 }
 0x13a   : > { %v707_v48 = vsel %vm406_vm2, %v705_v33, %v706_v41  ;;  %1069 = vmatpush.bf16.msra.mxu2 %v4445_v42  ;;  %1095 = vmatpush.bf16.msrb.mxu0 %v4449_v43  ;;  %v734_v60 = vpop.permute.xlu1 %733 }
 0x13b   : > { %v709_v49 = vsel %vm7498_vm12, %v6323_v18, %v707_v48  ;;  %v5111_v18 = vld [vmem:[#allocation2 + $0x4] sm:$0xf]  ;;  %v6385_v59 = vpop.permute.xlu2 %808  ;;  %v736_v61 = vrot.slane %v734_v60, 4  ;;  %v1422_v48 = vld [vmem:[%s6100_s20 + $0x8] sm:$0xf]  ;;  %vm1507_vm12 = vcmask 89088  }
 0x13c   : > { %711 = vst [vmem:[#allocation2 + $0xa8] sm:$0xff] %v709_v49  ;;  %v4433_v3 = vor.u32 %v5111_v18, %v4430_v57  ;;  %v811_v30 = vrot.slane %v6385_v59, 4  ;;  %v1407_v49 = vld [vmem:[%s6100_s20 + $0x8] sm:$0xf] }
 0x13d   : > { %1305 = vrot.lane.b32.xlu0 %v6127_v5, %s7464_s24  ;;  %s7467_s24 = smov 37   ;;  %v1437_v59 = vld [vmem:[%s6100_s20 + $0x8] sm:$0xf] }
 0x13e   : > { %1070 = vmatpush.bf16.msra.mxu2 %v4437_v53  ;;  %1096 = vmatpush.bf16.msrb.mxu0 %v4441_v54 }
 0x13f   : > { %v732_v62 = vpop.permute.xlu0 %731  ;;  %1337 = vrot.lane.b32.xlu2 %v1332_v4, %s7467_s24 }
 0x140   : > { %v735_v1 = vrot.slane %v732_v62, 4  ;;  %1335 = vrot.lane.b32.xlu1 %v6127_v5, %s7467_s24  ;;  %s5797_s24 = smov 35  }
 0x142   : > { %v737_v7 = vsel %vm406_vm2, %v735_v1, %v736_v61  ;;  %1071 = vmatpush.bf16.msra.mxu2 %v4429_v2  ;;  %1097 = vmatpush.bf16.msrb.mxu0 %v4433_v3  ;;  %v762_v12 = vpop.permute.xlu1 %761 }
 0x143   : > { %v739_v8 = vsel %vm738_vm11, %v732_v62, %v737_v7  ;;  %v6396_v11 = vpop.permute.xlu2 %836  ;;  %v765_v13 = vrot.slane %v762_v12, 4  ;;  %vm753_vm11 = vcmask 728064  }
 0x144   : > { %741 = vst [vmem:[#allocation2 + $0xb8] sm:$0xff] %v739_v8  ;;  %v840_v53 = vrot.slane %v6396_v11, 4  ;;  %v1467_v8 = vld [vmem:[%s6100_s20 + $0x8] sm:$0xf] }
 0x145   : > { %1322 = vrot.lane.b32.xlu0 %v1317_v6, %s7469_s17  ;;  %v767_v5 = vsel %vm406_vm2, %v765_v13, %v766_v9  ;;  %s7476_s17 = smov 36   ;;  %v6454_v9 = vld [vmem:[%s6113_s7] sm:$0xff] }
 0x146   : > { %v769_v19 = vsel %vm768_vm13, %v762_v12, %v767_v5 }
 0x147   : > { %v749_v14 = vpop.permute.xlu0 %748  ;;  %771 = vst [vmem:[#allocation2 + $0xc8] sm:$0xff] %v769_v19  ;;  %1365 = vrot.lane.b32.xlu2 %v6399_v16, %s5797_s24 }
 0x148   : > { %v751_v15 = vrot.slane %v749_v14, 4  ;;  %1352 = vrot.lane.b32.xlu1 %v1347_v17, %s7476_s17 }
 0x14a   : > { %v752_v58 = vsel %vm406_vm2, %v750_v10, %v751_v15  ;;  %v779_v22 = vpop.permute.xlu1 %778  ;;  %v1452_v10 = vld [vmem:[%s6100_s20 + $0x8] sm:$0xf] }
 0x14b   : > { %v754_v20 = vsel %vm753_vm11, %v6348_v50, %v752_v58  ;;  %v6410_v21 = vpop.permute.xlu2 %853  ;;  %v781_v23 = vrot.slane %v779_v22, 4  ;;  %vm7478_vm11 = vcmask 572416  }
 0x14c   : > { %756 = vst [vmem:[#allocation2 + $0xc0] sm:$0xff] %v754_v20  ;;  %v856_v52 = vrot.slane %v6410_v21, 4 }
 0x14d   : > { %1350 = vrot.lane.b32.xlu0 %v6399_v16, %s7476_s17  ;;  %s5802_s17 = smov 16  }
 0x14f   : > { %v777_v24 = vpop.permute.xlu0 %776  ;;  %1382 = vrot.lane.b32.xlu2 %v1377_v26, %s5799_s9 }
 0x150   : > { %v780_v25 = vrot.slane %v777_v24, 4  ;;  %1380 = vrot.lane.b32.xlu1 %v6399_v16, %s5799_s9  ;;  %s5800_s9 = smov 32  }
 0x152   : > { %v782_v50 = vsel %vm406_vm2, %v780_v25, %v781_v23  ;;  %v807_v33 = vpop.permute.xlu1 %806 }
 0x153   : > { %v784_v29 = vsel %vm7475_vm0, %v777_v24, %v782_v50  ;;  %v6419_v32 = vpop.permute.xlu2 %1140  ;;  %v810_v35 = vrot.slane %v807_v33, 4  ;;  %vm7480_vm0 = vcmask 564224  }
 0x154   : > { %786 = vst [vmem:[#allocation2 + $0xd0] sm:$0xff] %v784_v29  ;;  %v1144_v24 = vrot.slane %v6419_v32, 4 }
 0x155   : > { %1367 = vrot.lane.b32.xlu0 %v1362_v27, %s5797_s24  ;;  %v812_v40 = vsel %vm406_vm2, %v810_v35, %v811_v30  ;;  %s5801_s24 = smov 33  }
 0x156   : > { %v814_v41 = vsel %vm7478_vm11, %v807_v33, %v812_v40  ;;  %vm7482_vm11 = vcmask 547840  }
 0x157   : > { %v794_v37 = vpop.permute.xlu0 %793  ;;  %816 = vst [vmem:[#allocation2 + $0xe0] sm:$0xff] %v814_v41  ;;  %1410 = vrot.lane.b32.xlu2 %v6399_v16, %s5800_s9 }
 0x158   : > { %v796_v38 = vrot.slane %v794_v37, 4  ;;  %1397 = vrot.lane.b32.xlu1 %v1392_v39, %s5801_s24  ;;  %v1482_v37 = vld [vmem:[%s6100_s20 + $0x8] sm:$0xf] }
 0x15a   : > { %v797_v42 = vsel %vm406_vm2, %v795_v31, %v796_v38  ;;  %v824_v44 = vpop.permute.xlu1 %823 }
 0x15b   : > { %v799_v43 = vsel %vm7479_vm14, %v6373_v34, %v797_v42  ;;  %v6430_v28 = vpop.permute.xlu2 %1157  ;;  %v826_v45 = vrot.slane %v824_v44, 4  ;;  %vm7481_vm14 = vcmask 556032   ;;  %v5137_v44 = vld [vmem:[#allocation2 + $0xd4] sm:$0xf] }
 0x15c   : > { %801 = vst [vmem:[#allocation2 + $0xd8] sm:$0xff] %v799_v43  ;;  %v1160_v21 = vrot.slane %v6430_v28, 4  ;;  %v4532_v28 = vld [vmem:[#allocation2 + $0xd0] sm:$0xf] }
 0x15d   : > { %1395 = vrot.lane.b32.xlu0 %v6399_v16, %s5801_s24  ;;  %s5804_s24 = smov 15  }
 0x15e   : > { %v4540_v29 = vld [vmem:[#allocation2 + $0xe0] sm:$0xf]  ;;  %v5139_v30 = vld [vmem:[#allocation2 + $0xe4] sm:$0xf] }
 0x15f   : > { %v822_v46 = vpop.permute.xlu0 %821  ;;  %1427 = vrot.lane.b32.xlu2 %v1422_v48, %s5802_s17  ;;  %v4524_v48 = vld [vmem:[#allocation2 + $0xc0] sm:$0xf] }
 0x160   : > { %v825_v47 = vrot.slane %v822_v46, 4  ;;  %1425 = vrot.lane.b32.xlu1 %v6399_v16, %s5802_s17  ;;  %s5803_s17 = smov 14  }
 0x162   : > { %v827_v34 = vsel %vm406_vm2, %v825_v47, %v826_v45  ;;  %v852_v55 = vpop.permute.xlu1 %851  ;;  %v5136_v47 = vld [vmem:[#allocation2 + $0xc4] sm:$0xf0] }
 0x163   : > { %v829_v51 = vsel %vm7480_vm0, %v822_v46, %v827_v34  ;;  %v6440_v54 = vpop.permute.xlu2 %1185  ;;  %v855_v56 = vrot.slane %v852_v55, 4  ;;  %vm7483_vm0 = vcmask 539648   ;;  %v5138_v39 = vld [vmem:[#allocation2 + $0xd4] sm:$0xf0]  ;;  %v4534_v40 = vld [vmem:[#allocation2 + $0xd8] sm:$0xf0] }
 0x164   : > { %831 = vst [vmem:[#allocation2 + $0xe8] sm:$0xff] %v829_v51  ;;  %v4533_v45 = vor.u32 %v5138_v39, %v4532_v28  ;;  %v4537_v46 = vor.u32 %v5137_v44, %v4534_v40  ;;  %v4526_v34 = vld [vmem:[#allocation2 + $0xc8] sm:$0xf0] }
 0x165   : > { %1412 = vrot.lane.b32.xlu0 %v1407_v49, %s5800_s9  ;;  %v857_v60 = vsel %vm406_vm2, %v855_v56, %v856_v52  ;;  %v5135_v49 = vld [vmem:[#allocation2 + $0xc4] sm:$0xf]  ;;  %v4525_v56 = vor.u32 %v5136_v47, %v4524_v48  ;;  %v1542_v47 = vld [vmem:[%s6100_s20 + $0x8] sm:$0xf] }
 0x166   : > { %v859_v61 = vsel %vm7482_vm11, %v852_v55, %v857_v60  ;;  %vm7485_vm11 = vcmask 531456   ;;  %v5134_v60 = vld [vmem:[#allocation2 + $0xb4] sm:$0xf0] }
 0x167   : > { %v839_v18 = vpop.permute.xlu0 %838  ;;  %861 = vst [vmem:[#allocation2 + $0xf8] sm:$0xff] %v859_v61  ;;  %1455 = vrot.lane.b32.xlu2 %v6399_v16, %s5803_s17  ;;  %v4518_v61 = vld [vmem:[#allocation2 + $0xb8] sm:$0xf0] }
 0x168   : > { %v841_v57 = vrot.slane %v839_v18, 4  ;;  %1442 = vrot.lane.b32.xlu1 %v1437_v59, %s5804_s24  ;;  %v4529_v18 = vor.u32 %v5135_v49, %v4526_v34  ;;  %v1497_v59 = vld [vmem:[%s6100_s20 + $0x8] sm:$0xf] }
 0x16a   : > { %v842_v62 = vsel %vm406_vm2, %v840_v53, %v841_v57  ;;  %v1127_v3 = vpop.permute.xlu1 %1126  ;;  %v1512_v57 = vld [vmem:[%s6100_s20 + $0x8] sm:$0xf] }
 0x16b   : > { %v844_v1 = vsel %vm7481_vm14, %v6396_v11, %v842_v62  ;;  %v6450_v2 = vpop.permute.xlu2 %1202  ;;  %v1129_v4 = vrot.slane %v1127_v3, 4  ;;  %v898_v11 = vunpack.c.l.b16 %v6454_v9  ;;  %v5140_v22 = vld [vmem:[#allocation2 + $0xe4] sm:$0xf0]  ;;  %v4542_v23 = vld [vmem:[#allocation2 + $0xe8] sm:$0xf0]  ;;  %vm7484_vm14 = vcmask 523264  }
 0x16c   : > { %846 = vst [vmem:[#allocation2 + $0xf0] sm:$0xff] %v844_v1  ;;  %v4541_v33 = vor.u32 %v5140_v22, %v4540_v29  ;;  %v4545_v35 = vor.u32 %v5139_v30, %v4542_v23  ;;  %v4516_v3 = vld [vmem:[#allocation2 + $0xb0] sm:$0xf]  ;;  %v5130_v22 = vld [vmem:[#allocation2 + $0x94] sm:$0xf0] }
 0x16d   : > { %1440 = vrot.lane.b32.xlu0 %v6399_v16, %s5804_s24  ;;  %s5805_s24 = smov 13   ;;  %v900_v19 = vpack.c.b16 %v898_v11, %v898_v11  ;;  %v4510_v11 = vld [vmem:[#allocation2 + $0xa8] sm:$0xf0] }
 0x16e   : > { %v5142_v13 = vld [vmem:[#allocation2 + $0xf4] sm:$0xf0]  ;;  %v4550_v14 = vld [vmem:[#allocation2 + $0xf8] sm:$0xf0] }
 0x16f   : > { %v1125_v6 = vpop.permute.xlu0 %1124  ;;  %1472 = vrot.lane.b32.xlu2 %v1467_v8, %s5805_s24  ;;  %1072 = vmatmul.bf16.vlgmr.msra.gmra.mxu2 %v900_v19  ;;  %v1205_v8 = vrot.slane %v6450_v2, 4  ;;  %v1527_v2 = vld [vmem:[%s6100_s20 + $0x8] sm:$0xf] }
 0x170   : > { %v1128_v7 = vrot.slane %v1125_v6, 4  ;;  %1470 = vrot.lane.b32.xlu1 %v6399_v16, %s5805_s24  ;;  %1098 = vmatmul.bf16.vlgmr.msrb.gmra.mxu0 %v900_v19  ;;  %s5807_s24 = smov 12   ;;  %v5131_v19 = vld [vmem:[#allocation2 + $0xa4] sm:$0xf] }
 0x172   : > { %v1130_v12 = vsel %vm406_vm2, %v1128_v7, %v1129_v4  ;;  %v1156_v26 = vpop.permute.xlu1 %1155  ;;  %v5133_v4 = vld [vmem:[#allocation2 + $0xb4] sm:$0xf] }
 0x173   : > { %v1132_v15 = vsel %vm7483_vm0, %v1125_v6, %v1130_v12  ;;  %v4548_v17 = vld [vmem:[#allocation2 + $0xf0] sm:$0xf]  ;;  %v5141_v5 = vld [vmem:[#allocation2 + $0xf4] sm:$0xf]  ;;  %v6463_v25 = vpop.permute.xlu2 %1230  ;;  %v1159_v27 = vrot.slane %v1156_v26, 4  ;;  %vm1177_vm0 = vcmask 515072   ;;  %v4517_v6 = vor.u32 %v5134_v60, %v4516_v3 }
 0x174   : > { %1135 = vst [vmem:[#allocation2 + $0x100] sm:$0xff] %v1132_v15  ;;  %v4549_v58 = vor.u32 %v5142_v13, %v4548_v17  ;;  %v4553_v20 = vor.u32 %v5141_v5, %v4550_v14  ;;  %v4521_v7 = vor.u32 %v5133_v4, %v4518_v61  ;;  %v1189_v12 = vrot.slane %v6440_v54, 4  ;;  %v4508_v5 = vld [vmem:[#allocation2 + $0xa0] sm:$0xf] }
 0x175   : > { %1457 = vrot.lane.b32.xlu0 %v1452_v10, %s5803_s17  ;;  %v1161_v38 = vsel %vm406_vm2, %v1159_v27, %v1160_v21  ;;  %s5806_s17 = smov 11   ;;  %v5132_v10 = vld [vmem:[#allocation2 + $0xa4] sm:$0xf0]  ;;  %v4513_v21 = vor.u32 %v5131_v19, %v4510_v11  ;;  %v4502_v27 = vld [vmem:[#allocation2 + $0x98] sm:$0xf0] }
 0x176   : > { %1077 = vmatpush.bf16.msra.mxu3 %v4549_v58  ;;  %1103 = vmatpush.bf16.msrb.mxu1 %v4553_v20  ;;  %v1163_v41 = vsel %vm7484_vm14, %v1156_v26, %v1161_v38  ;;  %vm1192_vm14 = vcmask 506880   ;;  %v4509_v20 = vor.u32 %v5132_v10, %v4508_v5  ;;  %v5129_v26 = vld [vmem:[#allocation2 + $0x94] sm:$0xf]  ;;  %v899_v38 = vunpack.c.h.b16 %v6454_v9 }
 0x177   : > { %v1143_v50 = vpop.permute.xlu0 %1142  ;;  %1165 = vst [vmem:[#allocation2 + $0x110] sm:$0xff] %v1163_v41  ;;  %1500 = vrot.lane.b32.xlu2 %v6399_v16, %s5806_s17 }
 0x178   : > { %v1145_v31 = vrot.slane %v1143_v50, 4  ;;  %1487 = vrot.lane.b32.xlu1 %v1482_v37, %s5807_s24  ;;  %v4494_v37 = vld [vmem:[#allocation2 + $0x88] sm:$0xf0]  ;;  %v901_v48 = vpack.c.b16 %v899_v38, %v899_v38 }
 0x17a   : > { %v1146_v42 = vsel %vm406_vm2, %v1144_v24, %v1145_v31  ;;  %1078 = vmatpush.bf16.msra.mxu3 %v4541_v33  ;;  %1104 = vmatpush.bf16.msrb.mxu1 %v4545_v35  ;;  %v1173_v51 = vpop.permute.xlu1 %1172  ;;  %v4500_v24 = vld [vmem:[#allocation2 + $0x90] sm:$0xf]  ;;  %v4505_v33 = vor.u32 %v5129_v26, %v4502_v27  ;;  %v5128_v35 = vld [vmem:[#allocation2 + $0x84] sm:$0xf0] }
 0x17b   : > { %v1148_v43 = vsel %vm7485_vm11, %v6419_v32, %v1146_v42  ;;  %v6474_v32 = vpop.permute.xlu2 %1247  ;;  %v1175_v52 = vrot.slane %v1173_v51, 4  ;;  %v4501_v31 = vor.u32 %v5130_v22, %v4500_v24  ;;  %v4492_v42 = vld [vmem:[#allocation2 + $0x80] sm:$0xf]  ;;  %v1234_v51 = vrot.slane %v6463_v25, 4 }
 0x17c   : > { %1150 = vst [vmem:[#allocation2 + $0x108] sm:$0xff] %v1148_v43  ;;  %v5127_v43 = vld [vmem:[#allocation2 + $0x84] sm:$0xf]  ;;  %v4493_v44 = vor.u32 %v5128_v35, %v4492_v42  ;;  %v1250_v34 = vrot.slane %v6474_v32, 4  ;;  %vm7489_vm11 = vcmask 359424  }
 0x17d   : > { %1485 = vrot.lane.b32.xlu0 %v6399_v16, %s5807_s24  ;;  %s5808_s24 = smov 10  }
 0x17e   : > { %1079 = vmatpush.bf16.msra.mxu3 %v4533_v45  ;;  %1105 = vmatpush.bf16.msrb.mxu1 %v4537_v46  ;;  %v4497_v45 = vor.u32 %v5127_v43, %v4494_v37  ;;  %v1557_v46 = vld [vmem:[%s6100_s20 + $0x8] sm:$0xf] }
 0x17f   : > { %v1171_v53 = vpop.permute.xlu0 %1170  ;;  %1517 = vrot.lane.b32.xlu2 %v1512_v57, %s5808_s24  ;;  %v1572_v57 = vld [vmem:[%s6100_s20 + $0x8] sm:$0xf] }
 0x180   : > { %v1174_v55 = vrot.slane %v1171_v53, 4  ;;  %1515 = vrot.lane.b32.xlu1 %v6399_v16, %s5808_s24  ;;  %s5810_s24 = smov 9  }
 0x182   : > { %v1176_v62 = vsel %vm406_vm2, %v1174_v55, %v1175_v52  ;;  %1080 = vmatpush.bf16.msra.mxu3 %v4525_v56  ;;  %1106 = vmatpush.bf16.msrb.mxu1 %v4529_v18  ;;  %v1201_v14 = vpop.permute.xlu1 %1200 }
 0x183   : > { %v1178_v1 = vsel %vm1177_vm0, %v1171_v53, %v1176_v62  ;;  %v6483_v13 = vpop.permute.xlu2 %1275  ;;  %vm1207_vm0 = vcmask 498688   ;;  %v1204_v15 = vrot.slane %v1201_v14, 4 }
 0x184   : > { %1180 = vst [vmem:[#allocation2 + $0x118] sm:$0xff] %v1178_v1 }
 0x185   : > { %1502 = vrot.lane.b32.xlu0 %v1497_v59, %s5806_s17  ;;  %v1206_v23 = vsel %vm406_vm2, %v1204_v15, %v1205_v8  ;;  %s5809_s17 = smov 8   ;;  %v1587_v8 = vld [vmem:[%s6100_s20 + $0x8] sm:$0xf] }
 0x186   : > { %1081 = vmatpush.bf16.msra.mxu3 %v4517_v6  ;;  %1107 = vmatpush.bf16.msrb.mxu1 %v4521_v7  ;;  %v1208_v50 = vsel %vm1207_vm0, %v1201_v14, %v1206_v23  ;;  %vm7486_vm0 = vcmask 351232   ;;  %v1861_v7 = vld [vmem:[%s6100_s20 + $0x8] sm:$0xf] }
 0x187   : > { %v1188_v17 = vpop.permute.xlu0 %1187  ;;  %1210 = vst [vmem:[#allocation2 + $0x128] sm:$0xff] %v1208_v50  ;;  %1545 = vrot.lane.b32.xlu2 %v6399_v16, %s5809_s17 }
 0x188   : > { %v1190_v58 = vrot.slane %v1188_v17, 4  ;;  %1532 = vrot.lane.b32.xlu1 %v1527_v2, %s5810_s24 }
 0x18a   : > { %v1191_v29 = vsel %vm406_vm2, %v1189_v12, %v1190_v58  ;;  %1082 = vmatpush.bf16.msra.mxu3 %v4509_v20  ;;  %1108 = vmatpush.bf16.msrb.mxu1 %v4513_v21  ;;  %v1218_v39 = vpop.permute.xlu1 %1217  ;;  %v1279_v12 = vrot.slane %v6483_v13, 4  ;;  %v6527_v58 = vld [vmem:[%s6100_s20 + $0x4] sm:$0xff]  ;;  %v1876_v20 = vld [vmem:[%s6100_s20 + $0xc] sm:$0xf] }
 0x18b   : > { %v1193_v30 = vsel %vm1192_vm14, %v6440_v54, %v1191_v29  ;;  %v6493_v54 = vpop.permute.xlu2 %1292  ;;  %v1220_v40 = vrot.slane %v1218_v39, 4  ;;  %vm1222_vm14 = vcmask 490496   ;;  %v1905_v29 = vld [vmem:[%s6100_s20 + $0xc] sm:$0xf] }
 0x18c   : > { %1195 = vst [vmem:[#allocation2 + $0x120] sm:$0xff] %v1193_v30  ;;  %v1295_v11 = vrot.slane %v6493_v54, 4  ;;  %v1890_v30 = vld [vmem:[%s6100_s20 + $0xc] sm:$0xf] }
 0x18d   : > { %1530 = vrot.lane.b32.xlu0 %v6399_v16, %s5810_s24  ;;  %s5811_s24 = smov 7  }
 0x18e   : > { %1083 = vmatpush.bf16.msra.mxu3 %v4501_v31  ;;  %1109 = vmatpush.bf16.msrb.mxu1 %v4505_v33 }
 0x18f   : > { %v1216_v41 = vpop.permute.xlu0 %1215  ;;  %1562 = vrot.lane.b32.xlu2 %v1557_v46, %s5811_s24 }
 0x190   : > { %v1219_v28 = vrot.slane %v1216_v41, 4  ;;  %1560 = vrot.lane.b32.xlu1 %v6399_v16, %s5811_s24  ;;  %s5813_s24 = smov 6  }
 0x192   : > { %v1221_v49 = vsel %vm406_vm2, %v1219_v28, %v1220_v40  ;;  %1084 = vmatpush.bf16.msra.mxu3 %v4493_v44  ;;  %1110 = vmatpush.bf16.msrb.mxu1 %v4497_v45  ;;  %v1246_v53 = vpop.permute.xlu1 %1245 }
 0x193   : > { %v1223_v9 = vsel %vm1222_vm14, %v1216_v41, %v1221_v49  ;;  %v6503_v52 = vpop.permute.xlu2 %1320  ;;  %v1249_v55 = vrot.slane %v1246_v53, 4  ;;  %v1920_v41 = vld [vmem:[%s6100_s20 + $0xc] sm:$0xf] }
 0x194   : > { %1225 = vst [vmem:[#allocation2 + $0x130] sm:$0xff] %v1223_v9  ;;  %v1324_v35 = vrot.slane %v6503_v52, 4  ;;  %v1950_v9 = vld [vmem:[%s6100_s20 + $0xc] sm:$0xf] }
 0x195   : > { %1547 = vrot.lane.b32.xlu0 %v1542_v47, %s5809_s17  ;;  %1085 = vmatmul.bf16.vlgmr.msra.gmra.mxu3 %v901_v48  ;;  %v1251_v59 = vsel %vm406_vm2, %v1249_v55, %v1250_v34  ;;  %s5812_s17 = smov 5   ;;  %v1935_v34 = vld [vmem:[%s6100_s20 + $0xc] sm:$0xf] }
 0x196   : > { %1111 = vmatmul.bf16.vlgmr.msrb.gmra.mxu1 %v901_v48  ;;  %v1253_v60 = vsel %vm7486_vm0, %v1246_v53, %v1251_v59  ;;  %vm7490_vm0 = vcmask 343040  }
 0x197   : > { %v1233_v56 = vpop.permute.xlu0 %1232  ;;  %1255 = vst [vmem:[#allocation2 + $0x140] sm:$0xff] %v1253_v60  ;;  %1590 = vrot.lane.b32.xlu2 %v6399_v16, %s5812_s17 }
 0x198   : > { %v1235_v18 = vrot.slane %v1233_v56, 4  ;;  %1577 = vrot.lane.b32.xlu1 %v1572_v57, %s5813_s24 }
 0x19a   : > { %v1236_v32 = vsel %vm406_vm2, %v1234_v51, %v1235_v18  ;;  %v1263_v1 = vpop.permute.xlu1 %1262 }
 0x19b   : > { %v1238_v61 = vsel %vm7489_vm11, %v6463_v25, %v1236_v32  ;;  %v6513_v62 = vpop.permute.xlu2 %1337  ;;  %v1265_v3 = vrot.slane %v1263_v1, 4  ;;  %vm7491_vm11 = vcmask 326656   ;;  %v1965_v32 = vld [vmem:[%s6100_s20 + $0xc] sm:$0xf] }
 0x19c   : > { %1240 = vst [vmem:[#allocation2 + $0x138] sm:$0xff] %v1238_v61  ;;  %v1340_v33 = vrot.slane %v6513_v62, 4 }
 0x19d   : > { %1575 = vrot.lane.b32.xlu0 %v6399_v16, %s5813_s24  ;;  %s5816_s24 = smov 114  }
 0x19f   : > { %v1261_v4 = vpop.permute.xlu0 %1260  ;;  %1866 = vrot.lane.b32.xlu2 %v1861_v7, %s5814_s5 }
 0x1a0   : > { %v1264_v6 = vrot.slane %v1261_v4, 4  ;;  %1864 = vrot.lane.b32.xlu1 %v6399_v16, %s5814_s5 }
 0x1a2   : > { %v1266_v10 = vsel %vm406_vm2, %v1264_v6, %v1265_v3  ;;  %v1291_v15 = vpop.permute.xlu1 %1290 }
 0x1a3   : > { %v1268_v25 = vsel %vm7490_vm0, %v1261_v4, %v1266_v10  ;;  %v6524_v14 = vpop.permute.xlu2 %1365  ;;  %v1294_v17 = vrot.slane %v1291_v15, 4  ;;  %vm7492_vm0 = vcmask 334848  }
 0x1a4   : > { %1270 = vst [vmem:[#allocation2 + $0x148] sm:$0xff] %v1268_v25  ;;  %v1369_v55 = vrot.slane %v6524_v14, 4 }
 0x1a5   : > { %1592 = vrot.lane.b32.xlu0 %v1587_v8, %s5812_s17  ;;  %v1296_v21 = vsel %vm406_vm2, %v1294_v17, %v1295_v11  ;;  %s5815_s17 = smov 115  }
 0x1a6   : > { %v1298_v16 = vsel %vm7491_vm11, %v1291_v15, %v1296_v21  ;;  %vm7494_vm11 = vcmask 318464  }
 0x1a7   : > { %v1278_v5 = vpop.permute.xlu0 %1277  ;;  %1300 = vst [vmem:[#allocation2 + $0x158] sm:$0xff] %v1298_v16  ;;  %1893 = vrot.lane.b32.xlu2 %v6527_v58, %s5815_s17 }
 0x1a8   : > { %v1280_v19 = vrot.slane %v1278_v5, 4  ;;  %1881 = vrot.lane.b32.xlu1 %v1876_v20, %s5761_s4 }
 0x1aa   : > { %v1281_v2 = vsel %vm406_vm2, %v1279_v12, %v1280_v19  ;;  %v1308_v24 = vpop.permute.xlu1 %1307 }
 0x1ab   : > { %v1283_v22 = vsel %vm7492_vm0, %v6483_v13, %v1281_v2  ;;  %v6539_v23 = vpop.permute.xlu2 %1382  ;;  %v1310_v26 = vrot.slane %v1308_v24, 4  ;;  %vm7495_vm0 = vcmask 302080  }
 0x1ac   : > { %1285 = vst [vmem:[#allocation2 + $0x150] sm:$0xff] %v1283_v22  ;;  %v1385_v53 = vrot.slane %v6539_v23, 4  ;;  %v1995_v23 = vld [vmem:[%s6100_s20 + $0xc] sm:$0xf] }
 0x1ad   : > { %1879 = vrot.lane.b32.xlu0 %v6527_v58, %s5761_s4  ;;  %s5817_s4 = smov 112  }
 0x1ae   : > { %v5154_v21 = vld [vmem:[#allocation2 + $0x154] sm:$0xf0]  ;;  %v4599_v24 = vld [vmem:[#allocation2 + $0x158] sm:$0xf0] }
 0x1af   : > { %v1306_v27 = vpop.permute.xlu0 %1305  ;;  %1910 = vrot.lane.b32.xlu2 %v1905_v29, %s5816_s24 }
 0x1b0   : > { %v1309_v50 = vrot.slane %v1306_v27, 4  ;;  %1908 = vrot.lane.b32.xlu1 %v6527_v58, %s5816_s24  ;;  %s5819_s24 = smov 111  }
 0x1b2   : > { %v1311_v13 = vsel %vm406_vm2, %v1309_v50, %v1310_v26  ;;  %v1336_v38 = vpop.permute.xlu1 %1335  ;;  %v1980_v26 = vld [vmem:[%s6100_s20 + $0xc] sm:$0xf] }
 0x1b3   : > { %v1313_v31 = vsel %vm7494_vm11, %v1306_v27, %v1311_v13  ;;  %v6548_v37 = vpop.permute.xlu2 %1410  ;;  %v1339_v54 = vrot.slane %v1336_v38, 4  ;;  %vm7497_vm11 = vcmask 293888   ;;  %v4597_v27 = vld [vmem:[#allocation2 + $0x150] sm:$0xf]  ;;  %v5153_v50 = vld [vmem:[#allocation2 + $0x154] sm:$0xf] }
 0x1b4   : > { %1315 = vst [vmem:[#allocation2 + $0x160] sm:$0xff] %v1313_v31  ;;  %v4598_v13 = vor.u32 %v5154_v21, %v4597_v27  ;;  %v4602_v31 = vor.u32 %v5153_v50, %v4599_v24  ;;  %v4557_v50 = vld [vmem:[#allocation2 + $0x100] sm:$0xf] }
 0x1b5   : > { %1895 = vrot.lane.b32.xlu0 %v1890_v30, %s5815_s17  ;;  %v1341_v42 = vsel %vm406_vm2, %v1339_v54, %v1340_v33  ;;  %s5818_s17 = smov 113   ;;  %v1414_v54 = vrot.slane %v6548_v37, 4 }
 0x1b6   : > { %v1343_v43 = vsel %vm7495_vm0, %v1336_v38, %v1341_v42  ;;  %vm1387_vm0 = vcmask 277504   ;;  %v4591_v38 = vld [vmem:[#allocation2 + $0x148] sm:$0xf0] }
 0x1b7   : > { %v1323_v39 = vpop.permute.xlu0 %1322  ;;  %1345 = vst [vmem:[#allocation2 + $0x170] sm:$0xff] %v1343_v43  ;;  %1938 = vrot.lane.b32.xlu2 %v6527_v58, %s5817_s4  ;;  %v4589_v43 = vld [vmem:[#allocation2 + $0x140] sm:$0xf] }
 0x1b8   : > { %v1325_v40 = vrot.slane %v1323_v39, 4  ;;  %1925 = vrot.lane.b32.xlu1 %v1920_v41, %s5818_s17 }
 0x1ba   : > { %v1326_v28 = vsel %vm406_vm2, %v1324_v35, %v1325_v40  ;;  %v1353_v46 = vpop.permute.xlu1 %1352  ;;  %v5152_v35 = vld [vmem:[#allocation2 + $0x144] sm:$0xf0] }
 0x1bb   : > { %v1328_v44 = vsel %vm7496_vm10, %v6503_v52, %v1326_v28  ;;  %v6558_v45 = vpop.permute.xlu2 %1427  ;;  %v1355_v47 = vrot.slane %v1353_v46, 4  ;;  %vm1372_vm10 = vcmask 285696   ;;  %v4605_v19 = vld [vmem:[#allocation2 + $0x160] sm:$0xf]  ;;  %v5155_v20 = vld [vmem:[#allocation2 + $0x164] sm:$0xf]  ;;  %v4590_v46 = vor.u32 %v5152_v35, %v4589_v43 }
 0x1bc   : > { %1330 = vst [vmem:[#allocation2 + $0x168] sm:$0xff] %v1328_v44  ;;  %v1430_v33 = vrot.slane %v6558_v45, 4  ;;  %v5151_v28 = vld [vmem:[#allocation2 + $0x144] sm:$0xf]  ;;  %v2010_v45 = vld [vmem:[%s6100_s20 + $0xc] sm:$0xf] }
 0x1bd   : > { %1923 = vrot.lane.b32.xlu0 %v6527_v58, %s5818_s17  ;;  %s5821_s17 = smov 110  }
 0x1be   : > { %v4613_v3 = vld [vmem:[#allocation2 + $0x170] sm:$0xf]  ;;  %v5157_v4 = vld [vmem:[#allocation2 + $0x174] sm:$0xf] }
 0x1bf   : > { %v1351_v48 = vpop.permute.xlu0 %1350  ;;  %1955 = vrot.lane.b32.xlu2 %v1950_v9, %s5819_s24  ;;  %v4583_v9 = vld [vmem:[#allocation2 + $0x138] sm:$0xf0] }
 0x1c0   : > { %v1354_v49 = vrot.slane %v1351_v48, 4  ;;  %1953 = vrot.lane.b32.xlu1 %v6527_v58, %s5819_s24  ;;  %s5822_s24 = smov 108  }
 0x1c2   : > { %v1356_v51 = vsel %vm406_vm2, %v1354_v49, %v1355_v47  ;;  %v1381_v18 = vpop.permute.xlu1 %1380  ;;  %v4594_v47 = vor.u32 %v5151_v28, %v4591_v38  ;;  %v5150_v49 = vld [vmem:[#allocation2 + $0x134] sm:$0xf0] }
 0x1c3   : > { %v1358_v52 = vsel %vm7497_vm11, %v1351_v48, %v1356_v51  ;;  %v6567_v56 = vpop.permute.xlu2 %1455  ;;  %v1384_v57 = vrot.slane %v1381_v18, 4  ;;  %v5156_v11 = vld [vmem:[#allocation2 + $0x164] sm:$0xf0]  ;;  %v4607_v12 = vld [vmem:[#allocation2 + $0x168] sm:$0xf0]  ;;  %vm1462_vm11 = vcmask 113664  }
 0x1c4   : > { %1360 = vst [vmem:[#allocation2 + $0x178] sm:$0xff] %v1358_v52  ;;  %v4606_v2 = vor.u32 %v5156_v11, %v4605_v19  ;;  %v4610_v22 = vor.u32 %v5155_v20, %v4607_v12  ;;  %v4567_v11 = vld [vmem:[#allocation2 + $0x118] sm:$0xf0] }
 0x1c5   : > { %1940 = vrot.lane.b32.xlu0 %v1935_v34, %s5817_s4  ;;  %v1386_v61 = vsel %vm406_vm2, %v1384_v57, %v1385_v53  ;;  %s5820_s4 = smov 109   ;;  %v4581_v53 = vld [vmem:[#allocation2 + $0x130] sm:$0xf] }
 0x1c6   : > { %v1388_v62 = vsel %vm1387_vm0, %v1381_v18, %v1386_v61  ;;  %vm1432_vm0 = vcmask 130048   ;;  %v4582_v18 = vor.u32 %v5150_v49, %v4581_v53  ;;  %v4575_v61 = vld [vmem:[#allocation2 + $0x128] sm:$0xf0] }
 0x1c7   : > { %v1368_v59 = vpop.permute.xlu0 %1367  ;;  %1390 = vst [vmem:[#allocation2 + $0x188] sm:$0xff] %v1388_v62  ;;  %1983 = vrot.lane.b32.xlu2 %v6527_v58, %s5820_s4 }
 0x1c8   : > { %v1370_v60 = vrot.slane %v1368_v59, 4  ;;  %1970 = vrot.lane.b32.xlu1 %v1965_v32, %s5821_s17  ;;  %v5148_v59 = vld [vmem:[#allocation2 + $0x124] sm:$0xf0]  ;;  %v5147_v32 = vld [vmem:[#allocation2 + $0x124] sm:$0xf] }
 0x1ca   : > { %v1371_v1 = vsel %vm406_vm2, %v1369_v55, %v1370_v60  ;;  %v1398_v15 = vpop.permute.xlu1 %1397  ;;  %v5149_v55 = vld [vmem:[#allocation2 + $0x134] sm:$0xf]  ;;  %v4573_v60 = vld [vmem:[#allocation2 + $0x120] sm:$0xf] }
 0x1cb   : > { %v1373_v6 = vsel %vm1372_vm10, %v6524_v14, %v1371_v1  ;;  %v5158_v7 = vld [vmem:[#allocation2 + $0x174] sm:$0xf0]  ;;  %v4615_v8 = vld [vmem:[#allocation2 + $0x178] sm:$0xf0]  ;;  %v6576_v14 = vpop.permute.xlu2 %1472  ;;  %v1400_v17 = vrot.slane %v1398_v15, 4  ;;  %vm1402_vm10 = vcmask 269312   ;;  %v4586_v57 = vor.u32 %v5149_v55, %v4583_v9 }
 0x1cc   : > { %1375 = vst [vmem:[#allocation2 + $0x180] sm:$0xff] %v1373_v6  ;;  %v4614_v10 = vor.u32 %v5158_v7, %v4613_v3  ;;  %v4618_v25 = vor.u32 %v5157_v4, %v4615_v8  ;;  %v4574_v6 = vor.u32 %v5148_v59, %v4573_v60  ;;  %v4578_v7 = vor.u32 %v5147_v32, %v4575_v61  ;;  %v2040_v8 = vld [vmem:[%s6100_s20 + $0xc] sm:$0xf] }
 0x1cd   : > { %1968 = vrot.lane.b32.xlu0 %v6527_v58, %s5821_s17  ;;  %s5824_s17 = smov 107   ;;  %v1475_v21 = vrot.slane %v6576_v14, 4  ;;  %v2055_v14 = vld [vmem:[%s6100_s20 + $0xc] sm:$0xf] }
 0x1ce   : > { %1804 = vmatpush.bf16.msrb.mxu2 %v4614_v10  ;;  %1830 = vmatpush.bf16.msra.mxu0 %v4618_v25  ;;  %v2025_v10 = vld [vmem:[%s6100_s20 + $0xc] sm:$0xf]  ;;  %v5146_v25 = vld [vmem:[#allocation2 + $0x114] sm:$0xf0] }
 0x1cf   : > { %v1396_v5 = vpop.permute.xlu0 %1395  ;;  %2000 = vrot.lane.b32.xlu2 %v1995_v23, %s5822_s24  ;;  %v2099_v55 = vld [vmem:[%s6100_s20 + $0xc] sm:$0xf] }
 0x1d0   : > { %v1399_v16 = vrot.slane %v1396_v5, 4  ;;  %1998 = vrot.lane.b32.xlu1 %v6527_v58, %s5822_s24  ;;  %s5825_s24 = smov 105  }
 0x1d2   : > { %v1401_v29 = vsel %vm406_vm2, %v1399_v16, %v1400_v17  ;;  %1805 = vmatpush.bf16.msrb.mxu2 %v4606_v2  ;;  %1831 = vmatpush.bf16.msra.mxu0 %v4610_v22  ;;  %v1426_v40 = vpop.permute.xlu1 %1425  ;;  %v4565_v17 = vld [vmem:[#allocation2 + $0x110] sm:$0xf]  ;;  %v5144_v16 = vld [vmem:[#allocation2 + $0x104] sm:$0xf0]  ;;  %v4559_v2 = vld [vmem:[#allocation2 + $0x108] sm:$0xf0] }
 0x1d3   : > { %v1403_v30 = vsel %vm1402_vm10, %v1396_v5, %v1401_v29  ;;  %v6585_v39 = vpop.permute.xlu2 %1500  ;;  %v1429_v41 = vrot.slane %v1426_v40, 4  ;;  %vm1417_vm10 = vcmask 261120   ;;  %v5145_v5 = vld [vmem:[#allocation2 + $0x114] sm:$0xf]  ;;  %v4566_v19 = vor.u32 %v5146_v25, %v4565_v17  ;;  %v5143_v29 = vld [vmem:[#allocation2 + $0x104] sm:$0xf] }
 0x1d4   : > { %1405 = vst [vmem:[#allocation2 + $0x190] sm:$0xff] %v1403_v30  ;;  %v4570_v20 = vor.u32 %v5145_v5, %v4567_v11  ;;  %v1459_v22 = vrot.slane %v6567_v56, 4  ;;  %v1504_v49 = vrot.slane %v6585_v39, 4 }
 0x1d5   : > { %1985 = vrot.lane.b32.xlu0 %v1980_v26, %s5820_s4  ;;  %v1431_v48 = vsel %vm406_vm2, %v1429_v41, %v1430_v33  ;;  %s5823_s4 = smov 106  }
 0x1d6   : > { %1806 = vmatpush.bf16.msrb.mxu2 %v4598_v13  ;;  %1832 = vmatpush.bf16.msra.mxu0 %v4602_v31  ;;  %v1433_v34 = vsel %vm1432_vm0, %v1426_v40, %v1431_v48  ;;  %vm1447_vm0 = vcmask 121856   ;;  %v4558_v13 = vor.u32 %v5144_v16, %v4557_v50  ;;  %v4562_v31 = vor.u32 %v5143_v29, %v4559_v2 }
 0x1d7   : > { %v1413_v42 = vpop.permute.xlu0 %1412  ;;  %1435 = vst [vmem:[#allocation2 + $0x1a0] sm:$0xff] %v1433_v34  ;;  %2028 = vrot.lane.b32.xlu2 %v6527_v58, %s5823_s4 }
 0x1d8   : > { %v1415_v44 = vrot.slane %v1413_v42, 4  ;;  %2015 = vrot.lane.b32.xlu1 %v2010_v45, %s5824_s17 }
 0x1da   : > { %v1416_v51 = vsel %vm406_vm2, %v1414_v54, %v1415_v44  ;;  %1807 = vmatpush.bf16.msrb.mxu2 %v4590_v46  ;;  %1833 = vmatpush.bf16.msra.mxu0 %v4594_v47  ;;  %v1443_v62 = vpop.permute.xlu1 %1442  ;;  %v2084_v44 = vld [vmem:[%s6100_s20 + $0xc] sm:$0xf] }
 0x1db   : > { %v1418_v52 = vsel %vm1417_vm10, %v6548_v37, %v1416_v51  ;;  %v6595_v37 = vpop.permute.xlu2 %1517  ;;  %v1445_v1 = vrot.slane %v1443_v62, 4  ;;  %v2070_v46 = vld [vmem:[%s6100_s20 + $0xc] sm:$0xf] }
 0x1dc   : > { %1420 = vst [vmem:[#allocation2 + $0x198] sm:$0xff] %v1418_v52  ;;  %v1520_v48 = vrot.slane %v6595_v37, 4 }
 0x1dd   : > { %2013 = vrot.lane.b32.xlu0 %v6527_v58, %s5824_s17  ;;  %s5827_s17 = smov 87  }
 0x1de   : > { %1808 = vmatpush.bf16.msrb.mxu2 %v4582_v18  ;;  %1834 = vmatpush.bf16.msra.mxu0 %v4586_v57 }
 0x1df   : > { %v1441_v3 = vpop.permute.xlu0 %1440  ;;  %2045 = vrot.lane.b32.xlu2 %v2040_v8, %s5825_s24  ;;  %v2114_v8 = vld [vmem:[%s6100_s20 + $0xc] sm:$0xf] }
 0x1e0   : > { %v1444_v4 = vrot.slane %v1441_v3, 4  ;;  %2043 = vrot.lane.b32.xlu1 %v6527_v58, %s5825_s24  ;;  %s5829_s24 = smov 86  }
 0x1e2   : > { %v1446_v12 = vsel %vm406_vm2, %v1444_v4, %v1445_v1  ;;  %1809 = vmatpush.bf16.msrb.mxu2 %v4574_v6  ;;  %1835 = vmatpush.bf16.msra.mxu0 %v4578_v7  ;;  %v1471_v24 = vpop.permute.xlu1 %1470  ;;  %v2129_v6 = vld [vmem:[%s6100_s20 + $0xc] sm:$0xf] }
 0x1e3   : > { %v1448_v15 = vsel %vm1447_vm0, %v1441_v3, %v1446_v12  ;;  %v6604_v23 = vpop.permute.xlu2 %1545  ;;  %vm1477_vm0 = vcmask 105472   ;;  %v1474_v26 = vrot.slane %v1471_v24, 4 }
 0x1e4   : > { %1450 = vst [vmem:[#allocation2 + $0x1a8] sm:$0xff] %v1448_v15  ;;  %v1549_v11 = vrot.slane %v6604_v23, 4 }
 0x1e5   : > { %2030 = vrot.lane.b32.xlu0 %v2025_v10, %s5823_s4  ;;  %v1476_v33 = vsel %vm406_vm2, %v1474_v26, %v1475_v21  ;;  %s5826_s4 = smov 104  }
 0x1e6   : > { %1810 = vmatpush.bf16.msrb.mxu2 %v4566_v19  ;;  %1836 = vmatpush.bf16.msra.mxu0 %v4570_v20  ;;  %v1478_v35 = vsel %vm1477_vm0, %v1471_v24, %v1476_v33  ;;  %vm1492_vm0 = vcmask 97280   ;;  %v2144_v20 = vld [vmem:[%s6100_s20 + $0xc] sm:$0xf] }
 0x1e7   : > { %v1458_v27 = vpop.permute.xlu0 %1457  ;;  %1480 = vst [vmem:[#allocation2 + $0x1b8] sm:$0xff] %v1478_v35  ;;  %2073 = vrot.lane.b32.xlu2 %v6527_v58, %s5775_s3 }
 0x1e8   : > { %v1460_v30 = vrot.slane %v1458_v27, 4  ;;  %2060 = vrot.lane.b32.xlu1 %v2055_v14, %s5826_s4  ;;  %v389_v14 = vadd.f32 %v6243_v0, %v6213_v36 }
 0x1ea   : > { %v1461_v38 = vsel %vm406_vm2, %v1459_v22, %v1460_v30  ;;  %1811 = vmatpush.bf16.msrb.mxu2 %v4558_v13  ;;  %1837 = vmatpush.bf16.msra.mxu0 %v4562_v31  ;;  %v1488_v41 = vpop.permute.xlu1 %1487  ;;  %v2174_v30 = vld [vmem:[%s6100_s20 + $0xc] sm:$0xf] }
 0x1eb   : > { %v1463_v54 = vsel %vm1462_vm11, %v6567_v56, %v1461_v38  ;;  %v6615_v40 = vpop.permute.xlu2 %1562  ;;  %v1490_v42 = vrot.slane %v1488_v41, 4  ;;  %vm1522_vm11 = vcmask 80896   ;;  %v2159_v13 = vld [vmem:[%s6100_s20 + $0xc] sm:$0xf] }
 0x1ec   : > { %1465 = vst [vmem:[#allocation2 + $0x1b0] sm:$0xff] %v1463_v54  ;;  %v1565_v25 = vrot.slane %v6615_v40, 4  ;;  %v2969_v40 = vld [vmem:[%s6100_s20 + $0x8] sm:$0xff] }
 0x1ed   : > { %2058 = vrot.lane.b32.xlu0 %v6527_v58, %s5826_s4  ;;  %v6620_v47 = vpop.f32.mrf.mxu0 }
 0x1ef   : > { %v1486_v43 = vpop.permute.xlu0 %1485  ;;  %2089 = vrot.lane.b32.xlu2 %v2084_v44, %s5827_s17 }
 0x1f0   : > { %v1489_v28 = vrot.slane %v1486_v43, 4  ;;  %2087 = vrot.lane.b32.xlu1 %v6527_v58, %s5827_s17  ;;  %s5830_s17 = smov 84  }
 0x1f2   : > { %v1491_v56 = vsel %vm406_vm2, %v1489_v28, %v1490_v42  ;;  %v1516_v34 = vpop.permute.xlu1 %1515  ;;  %v6629_v18 = vpop.f32.mrf.mxu2 }
 0x1f3   : > { %v1493_v45 = vsel %vm1492_vm0, %v1486_v43, %v1491_v56  ;;  %v6626_v9 = vpop.permute.xlu2 %1590  ;;  %v1519_v51 = vrot.slane %v1516_v34, 4  ;;  %vm1537_vm0 = vcmask 72704  }
 0x1f4   : > { %1495 = vst [vmem:[#allocation2 + $0x1c0] sm:$0xff] %v1493_v45  ;;  %v1594_v0 = vrot.slane %v6626_v9, 4  ;;  %v2189_v45 = vld [vmem:[%s6100_s20 + $0xc] sm:$0xf] }
 0x1f5   : > { %2075 = vrot.lane.b32.xlu0 %v2070_v46, %s5775_s3  ;;  %v1521_v57 = vsel %vm406_vm2, %v1519_v51, %v1520_v48  ;;  %v1101_v32 = vpop.f32.mrf.mxu0  ;;  %s5828_s3 = smov 85   ;;  %v376_v48 = vadd.f32 %v6241_v63, %v6213_v36 }
 0x1f6   : > { %v1523_v59 = vsel %vm1522_vm11, %v1516_v34, %v1521_v57  ;;  %vm1552_vm11 = vcmask 64512   ;;  %v2219_v32 = vld [vmem:[%s6100_s20 + $0xc] sm:$0xf] }
 0x1f7   : > { %v1503_v52 = vpop.permute.xlu0 %1502  ;;  %1525 = vst [vmem:[#allocation2 + $0x1d0] sm:$0xff] %v1523_v59  ;;  %2117 = vrot.lane.b32.xlu2 %v6527_v58, %s5828_s3 }
 0x1f8   : > { %v1505_v53 = vrot.slane %v1503_v52, 4  ;;  %2104 = vrot.lane.b32.xlu1 %v2099_v55, %s5829_s24 }
 0x1fa   : > { %v1506_v60 = vsel %vm406_vm2, %v1504_v49, %v1505_v53  ;;  %v1533_v62 = vpop.permute.xlu1 %1532  ;;  %v1075_v7 = vpop.f32.mrf.mxu2 }
 0x1fb   : > { %v1508_v61 = vsel %vm1507_vm12, %v6585_v39, %v1506_v60  ;;  %v6636_v37 = vpop.permute.xlu2 %1866  ;;  %v1535_v1 = vrot.slane %v1533_v62, 4  ;;  %vm1567_vm12 = vcmask 56320  }
 0x1fc   : > { %1510 = vst [vmem:[#allocation2 + $0x1c8] sm:$0xff] %v1508_v61  ;;  %v1869_v41 = vrot.slane %v6636_v37, 4  ;;  %v6688_v61 = vld [vmem:[%s6113_s7 + $0x8] sm:$0xff]  ;;  %v2204_v37 = vld [vmem:[%s6100_s20 + $0xc] sm:$0xf] }
 0x1fd   : > { %2102 = vrot.lane.b32.xlu0 %v6527_v58, %s5829_s24  ;;  %s5832_s24 = smov 83   ;;  %v1638_v62 = vunpack.c.l.b16 %v6688_v61 }
 0x1ff   : > { %v1531_v3 = vpop.permute.xlu0 %1530  ;;  %2134 = vrot.lane.b32.xlu2 %v2129_v6, %s5830_s17 }
 0x200   : > { %v1534_v4 = vrot.slane %v1531_v3, 4  ;;  %2132 = vrot.lane.b32.xlu1 %v6527_v58, %s5830_s17  ;;  %s5833_s17 = smov 81  }
 0x202   : > { %v1536_v39 = vsel %vm406_vm2, %v1534_v4, %v1535_v1  ;;  %v1561_v15 = vpop.permute.xlu1 %1560 }
 0x203   : > { %v1538_v10 = vsel %vm1537_vm0, %v1531_v3, %v1536_v39  ;;  %v6644_v12 = vpop.permute.xlu2 %1893  ;;  %v1564_v17 = vrot.slane %v1561_v15, 4  ;;  %vm1582_vm0 = vcmask 48128   ;;  %v6661_v38 = vld [vmem:[#allocation2 + $0x1c4] sm:$0xf0]  ;;  %v6663_v54 = vld [vmem:[#allocation2 + $0x1c8] sm:$0xf0]  ;;  %v1640_v39 = vpack.c.b16 %v1638_v62, %v1638_v62 }
 0x204   : > { %1540 = vst [vmem:[#allocation2 + $0x1d8] sm:$0xff] %v1538_v10 }
 0x205   : > { %2119 = vrot.lane.b32.xlu0 %v2114_v8, %s5828_s3  ;;  %v1566_v21 = vsel %vm406_vm2, %v1564_v17, %v1565_v25  ;;  %s5831_s3 = smov 82   ;;  %2970 = vst [vmem:[#allocation2 + $0x1c8] sm:$0xff] %v2969_v40  ;;  %1812 = vmatmul.bf16.vlgmr.msrb.gmra.mxu2 %v1640_v39 }
 0x206   : > { %v1568_v16 = vsel %vm1567_vm12, %v1561_v15, %v1566_v21  ;;  %vm1597_vm12 = vcmask 39936   ;;  %1838 = vmatmul.bf16.vlgmr.msra.gmra.mxu0 %v1640_v39 }
 0x207   : > { %v1548_v5 = vpop.permute.xlu0 %1547  ;;  %1570 = vst [vmem:[#allocation2 + $0x1e8] sm:$0xff] %v1568_v16  ;;  %2162 = vrot.lane.b32.xlu2 %v6527_v58, %s5831_s3 }
 0x208   : > { %v1550_v19 = vrot.slane %v1548_v5, 4  ;;  %2149 = vrot.lane.b32.xlu1 %v2144_v20, %s5832_s24  ;;  %v1897_v20 = vrot.slane %v6644_v12, 4 }
 0x20a   : > { %v1551_v2 = vsel %vm406_vm2, %v1549_v11, %v1550_v19  ;;  %v1578_v26 = vpop.permute.xlu1 %1577 }
 0x20b   : > { %v1553_v22 = vsel %vm1552_vm11, %v6604_v23, %v1551_v2  ;;  %v6652_v24 = vpop.permute.xlu2 %1910  ;;  %v1580_v27 = vrot.slane %v1578_v26, 4  ;;  %vm1900_vm11 = vcmask 941056  }
 0x20c   : > { %1555 = vst [vmem:[#allocation2 + $0x1e0] sm:$0xff] %v1553_v22  ;;  %v1913_v10 = vrot.slane %v6652_v24, 4 }
 0x20d   : > { %2147 = vrot.lane.b32.xlu0 %v6527_v58, %s5832_s24  ;;  %s5835_s24 = smov 80  }
 0x20e   : > { %v5172_v15 = vld [vmem:[#allocation2 + $0x1e4] sm:$0xf0]  ;;  %v4671_v19 = vld [vmem:[#allocation2 + $0x1e8] sm:$0xf0] }
 0x20f   : > { %v1576_v50 = vpop.permute.xlu0 %1575  ;;  %2179 = vrot.lane.b32.xlu2 %v2174_v30, %s5833_s17  ;;  %v5170_v30 = vld [vmem:[#allocation2 + $0x1d4] sm:$0xf0] }
 0x210   : > { %v1579_v29 = vrot.slane %v1576_v50, 4  ;;  %2177 = vrot.lane.b32.xlu1 %v6527_v58, %s5833_s17  ;;  %s5836_s17 = smov 78  }
 0x212   : > { %v1581_v23 = vsel %vm406_vm2, %v1579_v29, %v1580_v27  ;;  %v1865_v28 = vpop.permute.xlu1 %1864 }
 0x213   : > { %v1112_v31 = vpop.f32.mrf.mxu1  ;;  %v1583_v33 = vsel %vm1582_vm0, %v1576_v50, %v1581_v23  ;;  %v6670_v43 = vpop.permute.xlu2 %1938  ;;  %v1868_v44 = vrot.slane %v1865_v28, 4  ;;  %v4669_v17 = vld [vmem:[#allocation2 + $0x1e0] sm:$0xf]  ;;  %v5171_v5 = vld [vmem:[#allocation2 + $0x1e4] sm:$0xf]  ;;  %vm1930_vm0 = vcmask 924672  }
 0x214   : > { %v1113_v35 = vadd.f32 %v1112_v31, %v6620_v47  ;;  %1585 = vst [vmem:[#allocation2 + $0x1f0] sm:$0xff] %v1583_v33  ;;  %v4670_v26 = vor.u32 %v5172_v15, %v4669_v17  ;;  %v4674_v27 = vor.u32 %v5171_v5, %v4671_v19  ;;  %v2234_v50 = vld [vmem:[%s6100_s20 + $0xc] sm:$0xf]  ;;  %v4661_v33 = vld [vmem:[#allocation2 + $0x1d0] sm:$0xf] }
 0x215   : > { %2164 = vrot.lane.b32.xlu0 %v2159_v13, %s5831_s3  ;;  %v1870_v49 = vsel %vm406_vm2, %v1868_v44, %v1869_v41  ;;  %s5834_s3 = smov 79   ;;  %v4663_v13 = vld [vmem:[#allocation2 + $0x1d8] sm:$0xf0]  ;;  %v4662_v40 = vor.u32 %v5170_v30, %v4661_v33  ;;  %v4629_v19 = vld [vmem:[#allocation2 + $0x190] sm:$0xf] }
 0x216   : > { %v6667_v42 = vadd.f32 %v1113_v35, %v389_v14  ;;  %v1872_v51 = vsel %vm357_vm1, %v1865_v28, %v1870_v49  ;;  %v5169_v35 = vld [vmem:[#allocation2 + $0x1d4] sm:$0xf]  ;;  %v2308_v33 = vld [vmem:[%s6100_s20 + $0xc] sm:$0xf] }
 0x217   : > { %v1593_v46 = vpop.permute.xlu0 %1592  ;;  %1874 = vst [vmem:[#allocation2] sm:$0xff] %v1872_v51  ;;  %2207 = vrot.lane.b32.xlu2 %v6527_v58, %s5834_s3  ;;  %v4666_v41 = vor.u32 %v5169_v35, %v4663_v13  ;;  %v4647_v51 = vld [vmem:[#allocation2 + $0x1b8] sm:$0xf0]  ;;  %v2293_v35 = vld [vmem:[%s6100_s20 + $0xc] sm:$0xf] }
 0x218   : > { %v1595_v56 = vrot.slane %v1593_v46, 4  ;;  %v1086_v47 = vpop.f32.mrf.mxu3  ;;  %2194 = vrot.lane.b32.xlu1 %v2189_v45, %s5835_s24  ;;  %v4653_v46 = vld [vmem:[#allocation2 + $0x1c0] sm:$0xf] }
 0x219   : > { %v1087_v34 = vadd.f32 %v1086_v47, %v6629_v18  ;;  %v5166_v47 = vld [vmem:[#allocation2 + $0x1b4] sm:$0xf0] }
 0x21a   : > { %v1596_v52 = vsel %vm406_vm2, %v1594_v0, %v1595_v56  ;;  %v1882_v63 = vpop.permute.xlu1 %1881  ;;  %v5167_v56 = vld [vmem:[#allocation2 + $0x1c4] sm:$0xf] }
 0x21b   : > { %v1114_v53 = vpop.f32.mrf.mxu1  ;;  %v1598_v55 = vsel %vm1597_vm12, %v6626_v9, %v1596_v52  ;;  %v6680_v57 = vadd.f32 %v1087_v34, %v376_v48  ;;  %v6684_v36 = vpop.permute.xlu2 %1955  ;;  %v1884_v18 = vrot.slane %v1882_v63, 4  ;;  %v4677_v3 = vld [vmem:[#allocation2 + $0x1f0] sm:$0xf]  ;;  %v5173_v7 = vld [vmem:[#allocation2 + $0x1f4] sm:$0xf]  ;;  %v4654_v48 = vor.u32 %v6661_v38, %v4653_v46 }
 0x21c   : > { %1600 = vst [vmem:[#allocation2 + $0x1f8] sm:$0xff] %v1598_v55  ;;  %v4658_v49 = vor.u32 %v5167_v56, %v6663_v54  ;;  %v2264_v34 = vld [vmem:[%s6100_s20 + $0xc] sm:$0xf]  ;;  %v4645_v53 = vld [vmem:[#allocation2 + $0x1b0] sm:$0xf]  ;;  %vm1960_vm12 = vcmask 908288  }
 0x21d   : > { %2192 = vrot.lane.b32.xlu0 %v6527_v58, %s5835_s24  ;;  %s5838_s24 = smov 77   ;;  %v2249_v52 = vld [vmem:[%s6100_s20 + $0xc] sm:$0xf]  ;;  %v5165_v55 = vld [vmem:[#allocation2 + $0x1b4] sm:$0xf]  ;;  %v4646_v38 = vor.u32 %v5166_v47, %v4645_v53 }
 0x21e   : > { %v4650_v54 = vor.u32 %v5165_v55, %v4647_v51 }
 0x21f   : > { %v1880_v59 = vpop.permute.xlu0 %1879  ;;  %2224 = vrot.lane.b32.xlu2 %v2219_v32, %s5836_s17  ;;  %v4639_v32 = vld [vmem:[#allocation2 + $0x1a8] sm:$0xf0] }
 0x220   : > { %v1883_v60 = vrot.slane %v1880_v59, 4  ;;  %v1088_v9 = vpop.f32.mrf.mxu3  ;;  %2222 = vrot.lane.b32.xlu1 %v6527_v58, %s5836_s17  ;;  %s5840_s17 = smov 59  }
 0x221   : > { %v1942_v9 = vrot.slane %v6670_v43, 4 }
 0x222   : > { %v1885_v1 = vsel %vm406_vm2, %v1883_v60, %v1884_v18  ;;  %v1909_v16 = vpop.permute.xlu1 %1908  ;;  %v5164_v60 = vld [vmem:[#allocation2 + $0x1a4] sm:$0xf0] }
 0x223   : > { %v1886_v4 = vsel %vm573_vm15, %v1880_v59, %v1885_v1  ;;  %v5174_v6 = vld [vmem:[#allocation2 + $0x1f4] sm:$0xf0]  ;;  %v4679_v8 = vld [vmem:[#allocation2 + $0x1f8] sm:$0xf0]  ;;  %v6697_v21 = vpop.permute.xlu2 %1983  ;;  %vm1915_vm15 = vcmask 932864   ;;  %v1912_v2 = vrot.slane %v1909_v16, 4 }
 0x224   : > { %1888 = vst [vmem:[#allocation2 + $0x8] sm:$0xff] %v1886_v4  ;;  %v4678_v25 = vor.u32 %v5174_v6, %v4677_v3  ;;  %v4682_v11 = vor.u32 %v5173_v7, %v4679_v8  ;;  %v1958_v59 = vrot.slane %v6684_v36, 4  ;;  %v4637_v4 = vld [vmem:[#allocation2 + $0x1a0] sm:$0xf]  ;;  %v5163_v6 = vld [vmem:[#allocation2 + $0x1a4] sm:$0xf] }
 0x225   : > { %2209 = vrot.lane.b32.xlu0 %v2204_v37, %s5834_s3  ;;  %v1914_v29 = vsel %vm406_vm2, %v1912_v2, %v1913_v10  ;;  %s5837_s3 = smov 76   ;;  %v4638_v8 = vor.u32 %v5164_v60, %v4637_v4  ;;  %v4642_v39 = vor.u32 %v5163_v6, %v4639_v32  ;;  %v2278_v36 = vld [vmem:[%s6100_s20 + $0xc] sm:$0xf] }
 0x226   : > { %1817 = vmatpush.bf16.msrb.mxu3 %v4678_v25  ;;  %1843 = vmatpush.bf16.msra.mxu1 %v4682_v11  ;;  %v1916_v23 = vsel %vm1915_vm15, %v1909_v16, %v1914_v29  ;;  %vm1945_vm15 = vcmask 916480   ;;  %v5162_v25 = vld [vmem:[#allocation2 + $0x194] sm:$0xf0]  ;;  %v4631_v11 = vld [vmem:[#allocation2 + $0x198] sm:$0xf0] }
 0x227   : > { %v1896_v22 = vpop.permute.xlu0 %1895  ;;  %1918 = vst [vmem:[#allocation2 + $0x18] sm:$0xff] %v1916_v23  ;;  %2252 = vrot.lane.b32.xlu2 %v6527_v58, %s5837_s3  ;;  %v4630_v16 = vor.u32 %v5162_v25, %v4629_v19  ;;  %v2627_v6 = vld [vmem:[%s6100_s20 + $0xc] sm:$0xf] }
 0x228   : > { %v1898_v24 = vrot.slane %v1896_v22, 4  ;;  %2239 = vrot.lane.b32.xlu1 %v2234_v50, %s5838_s24  ;;  %v5160_v22 = vld [vmem:[#allocation2 + $0x184] sm:$0xf0]  ;;  %v2642_v19 = vld [vmem:[%s6100_s20 + $0xc] sm:$0xf] }
 0x22a   : > { %v1899_v31 = vsel %vm406_vm2, %v1897_v20, %v1898_v24  ;;  %1818 = vmatpush.bf16.msrb.mxu3 %v4670_v26  ;;  %1844 = vmatpush.bf16.msra.mxu1 %v4674_v27  ;;  %v5161_v20 = vld [vmem:[#allocation2 + $0x194] sm:$0xf]  ;;  %v4621_v24 = vld [vmem:[#allocation2 + $0x180] sm:$0xf]  ;;  %v5159_v26 = vld [vmem:[#allocation2 + $0x184] sm:$0xf] }
 0x22b   : > { %v1901_v14 = vsel %vm1900_vm11, %v6644_v12, %v1899_v31  ;;  %v6706_v0 = vpop.permute.xlu2 %2000  ;;  %v1926_v12 = vpop.permute.xlu1 %1925  ;;  %v4634_v2 = vor.u32 %v5161_v20, %v4631_v11  ;;  %v4623_v27 = vld [vmem:[#allocation2 + $0x188] sm:$0xf0]  ;;  %vm1975_vm11 = vcmask 900096   ;;  %v4622_v31 = vor.u32 %v5160_v22, %v4621_v24 }
 0x22c   : > { %1903 = vst [vmem:[#allocation2 + $0x10] sm:$0xff] %v1901_v14  ;;  %v1928_v28 = vrot.slane %v1926_v12, 4  ;;  %v4626_v14 = vor.u32 %v5159_v26, %v4623_v27 }
 0x22d   : > { %2237 = vrot.lane.b32.xlu0 %v6527_v58, %s5838_s24  ;;  %s5841_s24 = smov 57  }
 0x22e   : > { %1819 = vmatpush.bf16.msrb.mxu3 %v4662_v40  ;;  %1845 = vmatpush.bf16.msra.mxu1 %v4666_v41 }
 0x22f   : > { %v1924_v44 = vpop.permute.xlu0 %1923  ;;  %2269 = vrot.lane.b32.xlu2 %v2264_v34, %s5789_s28 }
 0x230   : > { %v1927_v45 = vrot.slane %v1924_v44, 4  ;;  %2267 = vrot.lane.b32.xlu1 %v6527_v58, %s5789_s28  ;;  %s5839_s28 = smov 58  }
 0x232   : > { %v1929_v63 = vsel %vm406_vm2, %v1927_v45, %v1928_v28  ;;  %1820 = vmatpush.bf16.msrb.mxu3 %v4654_v48  ;;  %1846 = vmatpush.bf16.msra.mxu1 %v4658_v49  ;;  %v1987_v28 = vrot.slane %v6697_v21, 4  ;;  %v6741_v48 = vld [vmem:[%s6100_s20 + $0x4] sm:$0xff] }
 0x233   : > { %v1931_v18 = vsel %vm1930_vm0, %v1924_v44, %v1929_v63  ;;  %v6719_v37 = vpop.permute.xlu2 %2028  ;;  %v1954_v62 = vpop.permute.xlu1 %1953  ;;  %vm2005_vm0 = vcmask 883712  }
 0x234   : > { %1933 = vst [vmem:[#allocation2 + $0x20] sm:$0xff] %v1931_v18  ;;  %v1957_v1 = vrot.slane %v1954_v62, 4  ;;  %v2032_v32 = vrot.slane %v6719_v37, 4 }
 0x235   : > { %2254 = vrot.lane.b32.xlu0 %v2249_v52, %s5837_s3 }
 0x236   : > { %1821 = vmatpush.bf16.msrb.mxu3 %v4646_v38  ;;  %1847 = vmatpush.bf16.msra.mxu1 %v4650_v54  ;;  %v1959_v10 = vsel %vm406_vm2, %v1957_v1, %v1958_v59  ;;  %v2612_v38 = vld [vmem:[%s6100_s20 + $0xc] sm:$0xf] }
 0x237   : > { %v1941_v3 = vpop.permute.xlu0 %1940  ;;  %v1961_v15 = vsel %vm1960_vm12, %v1954_v62, %v1959_v10  ;;  %2296 = vrot.lane.b32.xlu2 %v6527_v58, %s5839_s28  ;;  %vm1990_vm12 = vcmask 891904   ;;  %v2597_v54 = vld [vmem:[%s6100_s20 + $0xc] sm:$0xf] }
 0x238   : > { %v1943_v7 = vrot.slane %v1941_v3, 4  ;;  %1963 = vst [vmem:[#allocation2 + $0x30] sm:$0xff] %v1961_v15  ;;  %2283 = vrot.lane.b32.xlu1 %v2278_v36, %s5840_s17 }
 0x23a   : > { %v1944_v17 = vsel %vm406_vm2, %v1942_v9, %v1943_v7  ;;  %1822 = vmatpush.bf16.msrb.mxu3 %v4638_v8  ;;  %1848 = vmatpush.bf16.msra.mxu1 %v4642_v39 }
 0x23b   : > { %v1946_v5 = vsel %vm1945_vm15, %v6670_v43, %v1944_v17  ;;  %v1639_v43 = vunpack.c.h.b16 %v6688_v61  ;;  %v6729_v50 = vpop.permute.xlu2 %2045  ;;  %v1971_v29 = vpop.permute.xlu1 %1970  ;;  %v2003_v61 = vrot.slane %v6706_v0, 4  ;;  %vm2020_vm15 = vcmask 875520  }
 0x23c   : > { %1948 = vst [vmem:[#allocation2 + $0x28] sm:$0xff] %v1946_v5  ;;  %v1973_v30 = vrot.slane %v1971_v29, 4  ;;  %v2048_v60 = vrot.slane %v6729_v50, 4  ;;  %v2657_v5 = vld [vmem:[%s6100_s20 + $0xc] sm:$0xf] }
 0x23d   : > { %2281 = vrot.lane.b32.xlu0 %v6527_v58, %s5840_s17  ;;  %v1641_v40 = vpack.c.b16 %v1639_v43, %v1639_v43  ;;  %s5843_s17 = smov 56   ;;  %v2672_v50 = vld [vmem:[%s6100_s20 + $0xc] sm:$0xf] }
 0x23e   : > { %1823 = vmatpush.bf16.msrb.mxu3 %v4630_v16  ;;  %1849 = vmatpush.bf16.msra.mxu1 %v4634_v2 }
 0x23f   : > { %v1969_v13 = vpop.permute.xlu0 %1968  ;;  %2313 = vrot.lane.b32.xlu2 %v2308_v33, %s5841_s24 }
 0x240   : > { %v1972_v23 = vrot.slane %v1969_v13, 4  ;;  %2311 = vrot.lane.b32.xlu1 %v6527_v58, %s5841_s24  ;;  %v2323_v58 = vld [vmem:[%s6100_s20 + $0xc] sm:$0xf]  ;;  %s5844_s24 = smov 54  }
 0x242   : > { %v1974_v41 = vsel %vm406_vm2, %v1972_v23, %v1973_v30  ;;  %1824 = vmatpush.bf16.msrb.mxu3 %v4622_v31  ;;  %1850 = vmatpush.bf16.msra.mxu1 %v4626_v14 }
 0x243   : > { %v1976_v12 = vsel %vm1975_vm11, %v1969_v13, %v1974_v41  ;;  %v6738_v44 = vpop.permute.xlu2 %2073  ;;  %v1999_v46 = vpop.permute.xlu1 %1998  ;;  %vm2050_vm11 = vcmask 859136   ;;  %v2702_v41 = vld [vmem:[%s6100_s20 + $0xc] sm:$0xf] }
 0x244   : > { %1978 = vst [vmem:[#allocation2 + $0x38] sm:$0xff] %v1976_v12  ;;  %v2002_v56 = vrot.slane %v1999_v46, 4  ;;  %v2077_v2 = vrot.slane %v6738_v44, 4  ;;  %v2687_v12 = vld [vmem:[%s6100_s20 + $0xc] sm:$0xf] }
 0x245   : > { %2298 = vrot.lane.b32.xlu0 %v2293_v35, %s5839_s28  ;;  %1825 = vmatmul.bf16.vlgmr.msrb.gmra.mxu3 %v1641_v40  ;;  %s5842_s28 = smov 55  }
 0x246   : > { %1851 = vmatmul.bf16.vlgmr.msra.gmra.mxu1 %v1641_v40  ;;  %v2004_v49 = vsel %vm406_vm2, %v2002_v56, %v2003_v61 }
 0x247   : > { %v1986_v47 = vpop.permute.xlu0 %1985  ;;  %v2006_v34 = vsel %vm2005_vm0, %v1999_v46, %v2004_v49  ;;  %2600 = vrot.lane.b32.xlu2 %v6741_v48, %s5842_s28  ;;  %vm2035_vm0 = vcmask 867328  }
 0x248   : > { %v1988_v45 = vrot.slane %v1986_v47, 4  ;;  %2008 = vst [vmem:[#allocation2 + $0x48] sm:$0xff] %v2006_v34  ;;  %2328 = vrot.lane.b32.xlu1 %v2323_v58, %s5843_s17 }
 0x24a   : > { %v1989_v0 = vsel %vm406_vm2, %v1987_v28, %v1988_v45 }
 0x24b   : > { %v1991_v51 = vsel %vm1990_vm12, %v6697_v21, %v1989_v0  ;;  %v2090_v52 = vpop.permute.xlu2 %2089  ;;  %v2016_v53 = vpop.permute.xlu1 %2015  ;;  %vm2065_vm12 = vcmask 850944  }
 0x24c   : > { %1993 = vst [vmem:[#allocation2 + $0x40] sm:$0xff] %v1991_v51  ;;  %v2018_v55 = vrot.slane %v2016_v53, 4  ;;  %v2092_v16 = vrot.slane %v2090_v52, 4 }
 0x24d   : > { %2326 = vrot.lane.b32.xlu0 %v6741_v48, %s5843_s17  ;;  %s5846_s17 = smov 53  }
 0x24f   : > { %v2014_v63 = vpop.permute.xlu0 %2013  ;;  %2617 = vrot.lane.b32.xlu2 %v2612_v38, %s5844_s24 }
 0x250   : > { %v2017_v18 = vrot.slane %v2014_v63, 4  ;;  %2615 = vrot.lane.b32.xlu1 %v6741_v48, %s5844_s24  ;;  %s5847_s24 = smov 51  }
 0x252   : > { %v2019_v59 = vsel %vm406_vm2, %v2017_v18, %v2018_v55 }
 0x253   : > { %v2021_v21 = vsel %vm2020_vm15, %v2014_v63, %v2019_v59  ;;  %v6755_v9 = vpop.permute.xlu2 %2117  ;;  %v2044_v62 = vpop.permute.xlu1 %2043  ;;  %vm2094_vm15 = vcmask 711680  }
 0x254   : > { %2023 = vst [vmem:[#allocation2 + $0x50] sm:$0xff] %v2021_v21  ;;  %v2047_v1 = vrot.slane %v2044_v62, 4  ;;  %v2121_v51 = vrot.slane %v6755_v9, 4 }
 0x255   : > { %2602 = vrot.lane.b32.xlu0 %v2597_v54, %s5842_s28  ;;  %s5845_s28 = smov 52  }
 0x256   : > { %v2049_v7 = vsel %vm406_vm2, %v2047_v1, %v2048_v60  ;;  %v2717_v60 = vld [vmem:[%s6100_s20 + $0xc] sm:$0xf] }
 0x257   : > { %v2031_v3 = vpop.permute.xlu0 %2030  ;;  %v2051_v8 = vsel %vm2050_vm11, %v2044_v62, %v2049_v7  ;;  %2645 = vrot.lane.b32.xlu2 %v6741_v48, %s5845_s28  ;;  %vm2109_vm11 = vcmask 703488  }
 0x258   : > { %v2033_v4 = vrot.slane %v2031_v3, 4  ;;  %2053 = vst [vmem:[#allocation2 + $0x60] sm:$0xff] %v2051_v8  ;;  %2632 = vrot.lane.b32.xlu1 %v2627_v6, %s5846_s17 }
 0x25a   : > { %v2034_v39 = vsel %vm406_vm2, %v2032_v32, %v2033_v4 }
 0x25b   : > { %v2036_v36 = vsel %vm2035_vm0, %v6719_v37, %v2034_v39  ;;  %v6763_v10 = vpop.permute.xlu2 %2134  ;;  %v2061_v25 = vpop.permute.xlu1 %2060  ;;  %vm2124_vm0 = vcmask 695296   ;;  %v4726_v7 = vld [vmem:[#allocation2 + $0x50] sm:$0xf]  ;;  %v5185_v8 = vld [vmem:[#allocation2 + $0x54] sm:$0xf] }
 0x25c   : > { %2038 = vst [vmem:[#allocation2 + $0x58] sm:$0xff] %v2036_v36  ;;  %v2063_v11 = vrot.slane %v2061_v25, 4  ;;  %v2137_v49 = vrot.slane %v6763_v10, 4  ;;  %v5184_v10 = vld [vmem:[#allocation2 + $0x44] sm:$0xf0] }
 0x25d   : > { %2630 = vrot.lane.b32.xlu0 %v6741_v48, %s5846_s17  ;;  %s5849_s17 = smov 50   ;;  %v4718_v25 = vld [vmem:[#allocation2 + $0x40] sm:$0xf] }
 0x25f   : > { %v2059_v15 = vpop.permute.xlu0 %2058  ;;  %2662 = vrot.lane.b32.xlu2 %v2657_v5, %s5847_s24  ;;  %v4734_v18 = vld [vmem:[#allocation2 + $0x60] sm:$0xf]  ;;  %v5187_v38 = vld [vmem:[#allocation2 + $0x64] sm:$0xf] }
 0x260   : > { %v2062_v17 = vrot.slane %v2059_v15, 4  ;;  %2660 = vrot.lane.b32.xlu1 %v6741_v48, %s5847_s24  ;;  %s5850_s24 = smov 48  }
 0x262   : > { %v2064_v37 = vsel %vm406_vm2, %v2062_v17, %v2063_v11  ;;  %v5183_v11 = vld [vmem:[#allocation2 + $0x44] sm:$0xf] }
 0x263   : > { %v2066_v20 = vsel %vm2065_vm12, %v2059_v15, %v2064_v37  ;;  %v6771_v22 = vpop.permute.xlu2 %2162  ;;  %v2088_v24 = vpop.permute.xlu1 %2087  ;;  %v5186_v62 = vld [vmem:[#allocation2 + $0x54] sm:$0xf0]  ;;  %v4728_v1 = vld [vmem:[#allocation2 + $0x58] sm:$0xf0] }
 0x264   : > { %2068 = vst [vmem:[#allocation2 + $0x68] sm:$0xff] %v2066_v20  ;;  %v2091_v26 = vrot.slane %v2088_v24, 4  ;;  %v4727_v39 = vor.u32 %v5186_v62, %v4726_v7  ;;  %v4731_v36 = vor.u32 %v5185_v8, %v4728_v1  ;;  %v4719_v20 = vor.u32 %v5184_v10, %v4718_v25  ;;  %v4686_v62 = vld [vmem:[#allocation2] sm:$0xf]  ;;  %v5175_v1 = vld [vmem:[#allocation2 + $0x4] sm:$0xf] }
 0x265   : > { %2647 = vrot.lane.b32.xlu0 %v2642_v19, %s5845_s28  ;;  %s5848_s28 = smov 49   ;;  %v2791_v7 = vld [vmem:[%s6100_s20 + $0xc] sm:$0xf] }
 0x266   : > { %v2093_v29 = vsel %vm406_vm2, %v2091_v26, %v2092_v16  ;;  %v5182_v26 = vld [vmem:[#allocation2 + $0x34] sm:$0xf0]  ;;  %v2776_v8 = vld [vmem:[%s6100_s20 + $0xc] sm:$0xf] }
 0x267   : > { %v2076_v27 = vpop.permute.xlu0 %2075  ;;  %v2095_v30 = vsel %vm2094_vm15, %v2088_v24, %v2093_v29  ;;  %2690 = vrot.lane.b32.xlu2 %v6741_v48, %s5848_s28  ;;  %vm2154_vm15 = vcmask 678912   ;;  %v2731_v24 = vld [vmem:[%s6100_s20 + $0xc] sm:$0xf]  ;;  %v4710_v29 = vld [vmem:[#allocation2 + $0x30] sm:$0xf] }
 0x268   : > { %v2078_v43 = vrot.slane %v2076_v27, 4  ;;  %2097 = vst [vmem:[#allocation2 + $0x78] sm:$0xff] %v2095_v30  ;;  %2677 = vrot.lane.b32.xlu1 %v2672_v50, %s5849_s17  ;;  %v4712_v27 = vld [vmem:[#allocation2 + $0x38] sm:$0xf0]  ;;  %v5181_v30 = vld [vmem:[#allocation2 + $0x34] sm:$0xf] }
 0x26a   : > { %v2079_v13 = vsel %vm406_vm2, %v2077_v2, %v2078_v43  ;;  %v2746_v2 = vld [vmem:[%s6100_s20 + $0xc] sm:$0xf] }
 0x26b   : > { %v2080_v23 = vsel %vm768_vm13, %v6738_v44, %v2079_v13  ;;  %v6780_v31 = vpop.permute.xlu2 %2179  ;;  %v2105_v14 = vpop.permute.xlu1 %2104  ;;  %v5188_v34 = vld [vmem:[#allocation2 + $0x64] sm:$0xf0]  ;;  %v4736_v0 = vld [vmem:[#allocation2 + $0x68] sm:$0xf0]  ;;  %vm2139_vm13 = vcmask 687104   ;;  %v4711_v13 = vor.u32 %v5182_v26, %v4710_v29 }
 0x26c   : > { %2082 = vst [vmem:[#allocation2 + $0x70] sm:$0xff] %v2080_v23  ;;  %v2107_v33 = vrot.slane %v2105_v14, 4  ;;  %v4735_v59 = vor.u32 %v5188_v34, %v4734_v18  ;;  %v4739_v21 = vor.u32 %v5187_v38, %v4736_v0  ;;  %v4715_v23 = vor.u32 %v5181_v30, %v4712_v27  ;;  %v4694_v34 = vld [vmem:[#allocation2 + $0x10] sm:$0xf]  ;;  %v5177_v0 = vld [vmem:[#allocation2 + $0x14] sm:$0xf] }
 0x26d   : > { %2675 = vrot.lane.b32.xlu0 %v6741_v48, %s5849_s17  ;;  %v2182_v14 = vrot.slane %v6780_v31, 4  ;;  %v2761_v31 = vld [vmem:[%s6100_s20 + $0xc] sm:$0xf]  ;;  %s5853_s17 = smov 28  }
 0x26e   : > { %v2836_v29 = vld [vmem:[%s6100_s20 + $0xc] sm:$0xf] }
 0x26f   : > { %v2103_v35 = vpop.permute.xlu0 %2102  ;;  %v5190_v28 = vld [vmem:[#allocation2 + $0x74] sm:$0xf0]  ;;  %v4744_v44 = vld [vmem:[#allocation2 + $0x78] sm:$0xf0]  ;;  %2707 = vrot.lane.b32.xlu2 %v2702_v41, %s5850_s24  ;;  %v2821_v30 = vld [vmem:[%s6100_s20 + $0xc] sm:$0xf] }
 0x270   : > { %v2106_v40 = vrot.slane %v2103_v35, 4  ;;  %2705 = vrot.lane.b32.xlu1 %v6741_v48, %s5850_s24 }
 0x272   : > { %v2108_v61 = vsel %vm406_vm2, %v2106_v40, %v2107_v33  ;;  %v5180_v33 = vld [vmem:[#allocation2 + $0x24] sm:$0xf0]  ;;  %v2166_v40 = vrot.slane %v6771_v22, 4 }
 0x273   : > { %v2110_v46 = vsel %vm2109_vm11, %v2103_v35, %v2108_v61  ;;  %v4742_v56 = vld [vmem:[#allocation2 + $0x70] sm:$0xf]  ;;  %v5189_v47 = vld [vmem:[#allocation2 + $0x74] sm:$0xf]  ;;  %v6790_v52 = vpop.permute.xlu2 %2207  ;;  %v2133_v53 = vpop.permute.xlu1 %2132  ;;  %v4704_v35 = vld [vmem:[#allocation2 + $0x28] sm:$0xf0] }
 0x274   : > { %2112 = vst [vmem:[#allocation2 + $0x80] sm:$0xff] %v2110_v46  ;;  %v4743_v45 = vor.u32 %v5190_v28, %v4742_v56  ;;  %v4747_v58 = vor.u32 %v5189_v47, %v4744_v44  ;;  %v2136_v55 = vrot.slane %v2133_v53, 4  ;;  %vm2184_vm11 = vcmask 662528   ;;  %v4702_v44 = vld [vmem:[#allocation2 + $0x20] sm:$0xf] }
 0x275   : > { %2692 = vrot.lane.b32.xlu0 %v2687_v12, %s5848_s28  ;;  %s5851_s28 = smov 31   ;;  %v5179_v46 = vld [vmem:[#allocation2 + $0x24] sm:$0xf]  ;;  %v4703_v47 = vor.u32 %v5180_v33, %v4702_v44  ;;  %v2211_v25 = vrot.slane %v6790_v52, 4  ;;  %v2851_v44 = vld [vmem:[%s6100_s20 + $0xc] sm:$0xf] }
 0x276   : > { %2540 = vmatpush.bf16.msra.mxu2 %v4743_v45  ;;  %2566 = vmatpush.bf16.msrb.mxu0 %v4747_v58  ;;  %v2138_v32 = vsel %vm406_vm2, %v2136_v55, %v2137_v49  ;;  %v4707_v45 = vor.u32 %v5179_v46, %v4704_v35  ;;  %v5178_v58 = vld [vmem:[#allocation2 + $0x14] sm:$0xf0] }
 0x277   : > { %v2120_v63 = vpop.permute.xlu0 %2119  ;;  %v2140_v3 = vsel %vm2139_vm13, %v2133_v53, %v2138_v32  ;;  %2734 = vrot.lane.b32.xlu2 %v6741_v48, %s5851_s28  ;;  %vm2169_vm13 = vcmask 670720   ;;  %v4695_v18 = vor.u32 %v5178_v58, %v4694_v34 }
 0x278   : > { %v2122_v54 = vrot.slane %v2120_v63, 4  ;;  %2142 = vst [vmem:[#allocation2 + $0x90] sm:$0xff] %v2140_v3  ;;  %2722 = vrot.lane.b32.xlu1 %v2717_v60, %s5800_s9 }
 0x27a   : > { %v2123_v4 = vsel %vm406_vm2, %v2121_v51, %v2122_v54  ;;  %2541 = vmatpush.bf16.msra.mxu2 %v4735_v59  ;;  %2567 = vmatpush.bf16.msrb.mxu0 %v4739_v21  ;;  %v4696_v51 = vld [vmem:[#allocation2 + $0x18] sm:$0xf0]  ;;  %v5176_v54 = vld [vmem:[#allocation2 + $0x4] sm:$0xf0]  ;;  %v4688_v59 = vld [vmem:[#allocation2 + $0x8] sm:$0xf0] }
 0x27b   : > { %v2125_v6 = vsel %vm2124_vm0, %v6755_v9, %v2123_v4  ;;  %v4720_v9 = vld [vmem:[#allocation2 + $0x48] sm:$0xf0]  ;;  %v6801_v15 = vpop.permute.xlu2 %2224  ;;  %v2150_v17 = vpop.permute.xlu1 %2149  ;;  %v4699_v38 = vor.u32 %v5177_v0, %v4696_v51  ;;  %vm2199_vm0 = vcmask 654336   ;;  %v4687_v4 = vor.u32 %v5176_v54, %v4686_v62 }
 0x27c   : > { %2127 = vst [vmem:[#allocation2 + $0x88] sm:$0xff] %v2125_v6  ;;  %v2152_v5 = vrot.slane %v2150_v17, 4  ;;  %v4723_v16 = vor.u32 %v5183_v11, %v4720_v9  ;;  %v4691_v6 = vor.u32 %v5175_v1, %v4688_v59  ;;  %v2227_v10 = vrot.slane %v6801_v15, 4  ;;  %v2896_v1 = vld [vmem:[%s6100_s20 + $0xc] sm:$0xf] }
 0x27d   : > { %2720 = vrot.lane.b32.xlu0 %v6741_v48, %s5800_s9  ;;  %s5852_s9 = smov 30  }
 0x27e   : > { %2542 = vmatpush.bf16.msra.mxu2 %v4727_v39  ;;  %2568 = vmatpush.bf16.msrb.mxu0 %v4731_v36 }
 0x27f   : > { %v2148_v19 = vpop.permute.xlu0 %2147  ;;  %2751 = vrot.lane.b32.xlu2 %v2746_v2, %s5852_s9 }
 0x280   : > { %v2151_v37 = vrot.slane %v2148_v19, 4  ;;  %2749 = vrot.lane.b32.xlu1 %v6741_v48, %s5852_s9  ;;  %s5855_s9 = smov 27  }
 0x282   : > { %v2153_v43 = vsel %vm406_vm2, %v2151_v37, %v2152_v5  ;;  %2543 = vmatpush.bf16.msra.mxu2 %v4719_v20  ;;  %2569 = vmatpush.bf16.msrb.mxu0 %v4723_v16  ;;  %v2806_v37 = vld [vmem:[%s6100_s20 + $0xc] sm:$0xf] }
 0x283   : > { %v2155_v50 = vsel %vm2154_vm15, %v2148_v19, %v2153_v43  ;;  %v6810_v41 = vpop.permute.xlu2 %2252  ;;  %v2178_v12 = vpop.permute.xlu1 %2177  ;;  %vm2229_vm15 = vcmask 637952  }
 0x284   : > { %2157 = vst [vmem:[#allocation2 + $0x98] sm:$0xff] %v2155_v50  ;;  %v2181_v61 = vrot.slane %v2178_v12, 4  ;;  %v2256_v33 = vrot.slane %v6810_v41, 4 }
 0x285   : > { %2736 = vrot.lane.b32.xlu0 %v2731_v24, %s5851_s28  ;;  %s5854_s28 = smov 29  }
 0x286   : > { %2544 = vmatpush.bf16.msra.mxu2 %v4711_v13  ;;  %2570 = vmatpush.bf16.msrb.mxu0 %v4715_v23  ;;  %v2183_v49 = vsel %vm406_vm2, %v2181_v61, %v2182_v14 }
 0x287   : > { %v2165_v28 = vpop.permute.xlu0 %2164  ;;  %v2185_v53 = vsel %vm2184_vm11, %v2178_v12, %v2183_v49  ;;  %2779 = vrot.lane.b32.xlu2 %v6741_v48, %s5853_s17  ;;  %vm2214_vm11 = vcmask 646144  }
 0x288   : > { %v2167_v56 = vrot.slane %v2165_v28, 4  ;;  %2187 = vst [vmem:[#allocation2 + $0xa8] sm:$0xff] %v2185_v53  ;;  %2766 = vrot.lane.b32.xlu1 %v2761_v31, %s5854_s28  ;;  %v6849_v46 = vpop.f32.mrf.mxu2 }
 0x28a   : > { %v2168_v55 = vsel %vm406_vm2, %v2166_v40, %v2167_v56  ;;  %2545 = vmatpush.bf16.msra.mxu2 %v4703_v47  ;;  %2571 = vmatpush.bf16.msrb.mxu0 %v4707_v45 }
 0x28b   : > { %v2170_v63 = vsel %vm2169_vm13, %v6771_v22, %v2168_v55  ;;  %v6819_v21 = vpop.permute.xlu2 %2269  ;;  %v2195_v22 = vpop.permute.xlu1 %2194  ;;  %vm2244_vm13 = vcmask 629760   ;;  %v2881_v55 = vld [vmem:[%s6100_s20 + $0xc] sm:$0xf] }
 0x28c   : > { %2172 = vst [vmem:[#allocation2 + $0xa0] sm:$0xff] %v2170_v63  ;;  %v2197_v60 = vrot.slane %v2195_v22, 4  ;;  %v2272_v14 = vrot.slane %v6819_v21, 4 }
 0x28d   : > { %2764 = vrot.lane.b32.xlu0 %v6741_v48, %s5854_s28  ;;  %s5857_s28 = smov 26  }
 0x28e   : > { %2546 = vmatpush.bf16.msra.mxu2 %v4695_v18  ;;  %2572 = vmatpush.bf16.msrb.mxu0 %v4699_v38  ;;  %v2866_v18 = vld [vmem:[%s6100_s20 + $0xc] sm:$0xf] }
 0x28f   : > { %v2193_v32 = vpop.permute.xlu0 %2192  ;;  %2796 = vrot.lane.b32.xlu2 %v2791_v7, %s5855_s9 }
 0x290   : > { %v2196_v3 = vrot.slane %v2193_v32, 4  ;;  %2794 = vrot.lane.b32.xlu1 %v6741_v48, %s5855_s9  ;;  %s5858_s9 = smov 24   ;;  %v1815_v63 = vpop.f32.mrf.mxu2 }
 0x292   : > { %v2198_v39 = vsel %vm406_vm2, %v2196_v3, %v2197_v60  ;;  %2547 = vmatpush.bf16.msra.mxu2 %v4687_v4  ;;  %2573 = vmatpush.bf16.msrb.mxu0 %v4691_v6 }
 0x293   : > { %v2200_v36 = vsel %vm2199_vm0, %v2193_v32, %v2198_v39  ;;  %v6828_v11 = vpop.permute.xlu2 %2296  ;;  %v2223_v9 = vpop.permute.xlu1 %2222  ;;  %vm2259_vm0 = vcmask 621568  }
 0x294   : > { %2202 = vst [vmem:[#allocation2 + $0xb0] sm:$0xff] %v2200_v36  ;;  %v2226_v17 = vrot.slane %v2223_v9, 4  ;;  %v2300_v59 = vrot.slane %v6828_v11, 4 }
 0x295   : > { %2781 = vrot.lane.b32.xlu0 %v2776_v8, %s5853_s17  ;;  %s5856_s17 = smov 25  }
 0x296   : > { %v2228_v20 = vsel %vm406_vm2, %v2226_v17, %v2227_v10  ;;  %v2911_v17 = vld [vmem:[%s6100_s20 + $0xc] sm:$0xf] }
 0x297   : > { %v2210_v5 = vpop.permute.xlu0 %2209  ;;  %v2230_v16 = vsel %vm2229_vm15, %v2223_v9, %v2228_v20  ;;  %2824 = vrot.lane.b32.xlu2 %v6741_v48, %s5856_s17  ;;  %vm2318_vm15 = vcmask 465920   ;;  %v2925_v9 = vld [vmem:[%s6100_s20 + $0xc] sm:$0xf] }
 0x298   : > { %v2212_v19 = vrot.slane %v2210_v5, 4  ;;  %2232 = vst [vmem:[#allocation2 + $0xc0] sm:$0xff] %v2230_v16  ;;  %2811 = vrot.lane.b32.xlu1 %v2806_v37, %s5857_s28 }
 0x29a   : > { %v2213_v2 = vsel %vm406_vm2, %v2211_v25, %v2212_v19 }
 0x29b   : > { %v2215_v15 = vsel %vm2214_vm11, %v6790_v52, %v2213_v2  ;;  %v6836_v24 = vpop.permute.xlu2 %2313  ;;  %v2240_v26 = vpop.permute.xlu1 %2239  ;;  %vm2303_vm11 = vcmask 474112  }
 0x29c   : > { %2217 = vst [vmem:[#allocation2 + $0xb8] sm:$0xff] %v2215_v15  ;;  %v2242_v27 = vrot.slane %v2240_v26, 4  ;;  %v6841_v52 = vpop.f32.mrf.mxu0  ;;  %v2316_v54 = vrot.slane %v6836_v24, 4 }
 0x29d   : > { %2809 = vrot.lane.b32.xlu0 %v6741_v48, %s5857_s28  ;;  %s5860_s28 = smov 23  }
 0x29f   : > { %v2238_v43 = vpop.permute.xlu0 %2237  ;;  %2841 = vrot.lane.b32.xlu2 %v2836_v29, %s5858_s9  ;;  %v2940_v29 = vld [vmem:[%s6100_s20 + $0xc] sm:$0xf] }
 0x2a0   : > { %v2241_v50 = vrot.slane %v2238_v43, 4  ;;  %2839 = vrot.lane.b32.xlu1 %v6741_v48, %s5858_s9  ;;  %s5861_s9 = smov 21  }
 0x2a2   : > { %v2243_v13 = vsel %vm406_vm2, %v2241_v50, %v2242_v27 }
 0x2a3   : > { %v2245_v23 = vsel %vm2244_vm13, %v2238_v43, %v2243_v13  ;;  %v6846_v35 = vpop.permute.xlu2 %2600  ;;  %v2268_v40 = vpop.permute.xlu1 %2267  ;;  %vm2333_vm13 = vcmask 457728  }
 0x2a4   : > { %2247 = vst [vmem:[#allocation2 + $0xc8] sm:$0xff] %v2245_v23  ;;  %v2271_v12 = vrot.slane %v2268_v40, 4  ;;  %v1841_v31 = vpop.f32.mrf.mxu0  ;;  %v2604_v2 = vrot.slane %v6846_v35, 4 }
 0x2a5   : > { %2826 = vrot.lane.b32.xlu0 %v2821_v30, %s5856_s17  ;;  %s5859_s17 = smov 22   ;;  %v6892_v30 = vld [vmem:[%s6113_s7 + $0x10] sm:$0xff] }
 0x2a6   : > { %v2273_v56 = vsel %vm406_vm2, %v2271_v12, %v2272_v14 }
 0x2a7   : > { %v2255_v61 = vpop.permute.xlu0 %2254  ;;  %v2274_v47 = vsel %vm1222_vm14, %v2268_v40, %v2273_v56  ;;  %2869 = vrot.lane.b32.xlu2 %v6741_v48, %s5859_s17  ;;  %vm2288_vm14 = vcmask 482304  }
 0x2a8   : > { %v2257_v28 = vrot.slane %v2255_v61, 4  ;;  %2276 = vst [vmem:[#allocation2 + $0xd8] sm:$0xff] %v2274_v47  ;;  %2856 = vrot.lane.b32.xlu1 %v2851_v44, %s5860_s28 }
 0x2aa   : > { %v2258_v45 = vsel %vm406_vm2, %v2256_v33, %v2257_v28 }
 0x2ab   : > { %v2260_v58 = vsel %vm2259_vm0, %v6810_v41, %v2258_v45  ;;  %v6858_v49 = vpop.permute.xlu2 %2617  ;;  %v2284_v34 = vpop.permute.xlu1 %2283 }
 0x2ac   : > { %2262 = vst [vmem:[#allocation2 + $0xd0] sm:$0xff] %v2260_v58  ;;  %v2286_v0 = vrot.slane %v2284_v34, 4  ;;  %v2620_v20 = vrot.slane %v6858_v49, 4 }
 0x2ad   : > { %2854 = vrot.lane.b32.xlu0 %v6741_v48, %s5860_s28  ;;  %s5863_s28 = smov 3  }
 0x2af   : > { %v2282_v51 = vpop.permute.xlu0 %2281  ;;  %2886 = vrot.lane.b32.xlu2 %v2881_v55, %s5861_s9 }
 0x2b0   : > { %v2285_v53 = vrot.slane %v2282_v51, 4  ;;  %2884 = vrot.lane.b32.xlu1 %v6741_v48, %s5861_s9  ;;  %s5865_s9 = smov 2  }
 0x2b2   : > { %v2287_v41 = vsel %vm406_vm2, %v2285_v53, %v2286_v0 }
 0x2b3   : > { %v2289_v38 = vsel %vm2288_vm14, %v2282_v51, %v2287_v41  ;;  %v6866_v21 = vpop.permute.xlu2 %2645  ;;  %v2312_v22 = vpop.permute.xlu1 %2311  ;;  %vm2622_vm14 = vcmask 441344   ;;  %v6909_v41 = vld [vmem:[%s6100_s20 + $0x8] sm:$0xff] }
 0x2b4   : > { %2291 = vst [vmem:[#allocation2 + $0xe0] sm:$0xff] %v2289_v38  ;;  %v2315_v60 = vrot.slane %v2312_v22, 4  ;;  %v4792_v38 = vld [vmem:[#allocation2 + $0xd8] sm:$0xf0] }
 0x2b5   : > { %2871 = vrot.lane.b32.xlu0 %v2866_v18, %s5859_s17  ;;  %s5862_s17 = smov 20   ;;  %v2972_v18 = vld [vmem:[%s6100_s20 + $0x10] sm:$0xf] }
 0x2b6   : > { %v2317_v3 = vsel %vm406_vm2, %v2315_v60, %v2316_v54  ;;  %v5201_v60 = vld [vmem:[#allocation2 + $0xd4] sm:$0xf] }
 0x2b7   : > { %v2299_v32 = vpop.permute.xlu0 %2298  ;;  %v2319_v4 = vsel %vm2318_vm15, %v2312_v22, %v2317_v3  ;;  %2914 = vrot.lane.b32.xlu2 %v6741_v48, %s5814_s5  ;;  %vm2607_vm15 = vcmask 449536   ;;  %v4790_v22 = vld [vmem:[#allocation2 + $0xd0] sm:$0xf]  ;;  %v4795_v3 = vor.u32 %v5201_v60, %v4792_v38 }
 0x2b8   : > { %v2301_v62 = vrot.slane %v2299_v32, 4  ;;  %2321 = vst [vmem:[#allocation2 + $0xf0] sm:$0xff] %v2319_v4  ;;  %2901 = vrot.lane.b32.xlu1 %v2896_v1, %s5862_s17 }
 0x2ba   : > { %v2302_v6 = vsel %vm406_vm2, %v2300_v59, %v2301_v62  ;;  %v2955_v59 = vld [vmem:[%s6100_s20 + $0xc] sm:$0xf] }
 0x2bb   : > { %v2304_v7 = vsel %vm2303_vm11, %v6828_v11, %v2302_v6  ;;  %v6875_v8 = vpop.permute.xlu2 %2662  ;;  %v2329_v39 = vpop.permute.xlu1 %2328  ;;  %vm2637_vm11 = vcmask 433152   ;;  %v4798_v0 = vld [vmem:[#allocation2 + $0xe0] sm:$0xf]  ;;  %v5203_v51 = vld [vmem:[#allocation2 + $0xe4] sm:$0xf] }
 0x2bc   : > { %2306 = vst [vmem:[#allocation2 + $0xe8] sm:$0xff] %v2304_v7  ;;  %v2331_v36 = vrot.slane %v2329_v39, 4  ;;  %v2665_v4 = vrot.slane %v6875_v8, 4  ;;  %v5200_v6 = vld [vmem:[#allocation2 + $0xc4] sm:$0xf0]  ;;  %v2649_v39 = vrot.slane %v6866_v21, 4 }
 0x2bd   : > { %2899 = vrot.lane.b32.xlu0 %v6741_v48, %s5862_s17  ;;  %v4784_v7 = vld [vmem:[#allocation2 + $0xc8] sm:$0xf0]  ;;  %v2986_v8 = vld [vmem:[%s6100_s20 + $0x10] sm:$0xf]  ;;  %s5874_s17 = smov 74  }
 0x2bf   : > { %v2327_v10 = vpop.permute.xlu0 %2326  ;;  %2930 = vrot.lane.b32.xlu2 %v2925_v9, %s5863_s28  ;;  %v4806_v33 = vld [vmem:[#allocation2 + $0xf0] sm:$0xf]  ;;  %v5205_v40 = vld [vmem:[#allocation2 + $0xf4] sm:$0xf] }
 0x2c0   : > { %v2330_v25 = vrot.slane %v2327_v10, 4  ;;  %2928 = vrot.lane.b32.xlu1 %v6741_v48, %s5863_s28  ;;  %s7545_s28 = smov 38  }
 0x2c2   : > { %v2332_v5 = vsel %vm406_vm2, %v2330_v25, %v2331_v36 }
 0x2c3   : > { %v1852_v11 = vpop.f32.mrf.mxu1  ;;  %v2334_v19 = vsel %vm2333_vm13, %v2327_v10, %v2332_v5  ;;  %v6888_v15 = vpop.permute.xlu2 %2690  ;;  %v5204_v31 = vld [vmem:[#allocation2 + $0xe4] sm:$0xf0]  ;;  %v4800_v58 = vld [vmem:[#allocation2 + $0xe8] sm:$0xf0]  ;;  %vm2667_vm13 = vcmask 416768  }
 0x2c4   : > { %v1853_v37 = vadd.f32 %v1852_v11, %v6841_v52  ;;  %2336 = vst [vmem:[#allocation2 + $0xf8] sm:$0xff] %v2334_v19  ;;  %v2616_v24 = vpop.permute.xlu1 %2615  ;;  %v4799_v55 = vor.u32 %v5204_v31, %v4798_v0  ;;  %v4803_v63 = vor.u32 %v5203_v51, %v4800_v58  ;;  %v5199_v5 = vld [vmem:[#allocation2 + $0xc4] sm:$0xf]  ;;  %v5194_v31 = vld [vmem:[#allocation2 + $0x94] sm:$0xf0]  ;;  %v2694_v38 = vrot.slane %v6888_v15, 4 }
 0x2c5   : > { %2916 = vrot.lane.b32.xlu0 %v2911_v17, %s5814_s5  ;;  %v2619_v26 = vrot.slane %v2616_v24, 4  ;;  %s5864_s5 = smov 1   ;;  %v4782_v17 = vld [vmem:[#allocation2 + $0xc0] sm:$0xf]  ;;  %v4760_v58 = vld [vmem:[#allocation2 + $0x98] sm:$0xf0] }
 0x2c6   : > { %v6885_v16 = vadd.f32 %v1853_v37, %v6667_v42  ;;  %v2374_v42 = vunpack.c.l.b16 %v6892_v30  ;;  %v4783_v19 = vor.u32 %v5200_v6, %v4782_v17  ;;  %v4787_v37 = vor.u32 %v5199_v5, %v4784_v7  ;;  %v5193_v0 = vld [vmem:[#allocation2 + $0x94] sm:$0xf] }
 0x2c7   : > { %v2603_v27 = vpop.permute.xlu0 %2602  ;;  %v2621_v13 = vsel %vm406_vm2, %v2619_v26, %v2620_v20  ;;  %2958 = vrot.lane.b32.xlu2 %v6741_v48, %s5864_s5 }
 0x2c8   : > { %v2605_v43 = vrot.slane %v2603_v27, 4  ;;  %v1826_v50 = vpop.f32.mrf.mxu3  ;;  %v2623_v23 = vsel %vm2622_vm14, %v2616_v24, %v2621_v13  ;;  %2945 = vrot.lane.b32.xlu1 %v2940_v29, %s5865_s9  ;;  %v2376_v56 = vpack.c.b16 %v2374_v42, %v2374_v42  ;;  %vm2652_vm14 = vcmask 424960   ;;  %v4776_v24 = vld [vmem:[#allocation2 + $0xb8] sm:$0xf0]  ;;  %v5197_v29 = vld [vmem:[#allocation2 + $0xb4] sm:$0xf] }
 0x2c9   : > { %v1827_v52 = vadd.f32 %v1826_v50, %v6849_v46  ;;  %2625 = vst [vmem:[#allocation2 + $0x108] sm:$0xff] %v2623_v23  ;;  %v4774_v50 = vld [vmem:[#allocation2 + $0xb0] sm:$0xf]  ;;  %v5196_v42 = vld [vmem:[#allocation2 + $0xa4] sm:$0xf0] }
 0x2ca   : > { %v2606_v14 = vsel %vm406_vm2, %v2604_v2, %v2605_v43  ;;  %2548 = vmatmul.bf16.vlgmr.msra.gmra.mxu2 %v2376_v56  ;;  %2574 = vmatmul.bf16.vlgmr.msrb.gmra.mxu0 %v2376_v56  ;;  %v5198_v2 = vld [vmem:[#allocation2 + $0xb4] sm:$0xf0]  ;;  %v4766_v23 = vld [vmem:[#allocation2 + $0xa0] sm:$0xf] }
 0x2cb   : > { %v1854_v12 = vpop.f32.mrf.mxu1  ;;  %v2608_v61 = vsel %vm2607_vm15, %v6846_v35, %v2606_v14  ;;  %v6900_v28 = vadd.f32 %v1827_v52, %v6680_v57  ;;  %v5206_v44 = vld [vmem:[#allocation2 + $0xf4] sm:$0xf0]  ;;  %v4808_v46 = vld [vmem:[#allocation2 + $0xf8] sm:$0xf0]  ;;  %v6905_v57 = vpop.permute.xlu2 %2707  ;;  %v4775_v13 = vor.u32 %v5198_v2, %v4774_v50  ;;  %v4779_v52 = vor.u32 %v5197_v29, %v4776_v24  ;;  %v5195_v14 = vld [vmem:[#allocation2 + $0xa4] sm:$0xf] }
 0x2cc   : > { %2610 = vst [vmem:[#allocation2 + $0x100] sm:$0xff] %v2608_v61  ;;  %v4807_v47 = vor.u32 %v5206_v44, %v4806_v33  ;;  %v4811_v45 = vor.u32 %v5205_v40, %v4808_v46  ;;  %v2633_v35 = vpop.permute.xlu1 %2632  ;;  %v4768_v33 = vld [vmem:[#allocation2 + $0xa8] sm:$0xf0]  ;;  %vm2682_vm15 = vcmask 408576   ;;  %v4767_v46 = vor.u32 %v5196_v42, %v4766_v23  ;;  %v3514_v29 = vld [vmem:[%s6100_s20 + $0x10] sm:$0xf] }
 0x2cd   : > { %2943 = vrot.lane.b32.xlu0 %v6741_v48, %s5865_s9  ;;  %v2635_v49 = vrot.slane %v2633_v35, 4  ;;  %v5202_v48 = vld [vmem:[#allocation2 + $0xd4] sm:$0xf0]  ;;  %v4771_v56 = vor.u32 %v5195_v14, %v4768_v33  ;;  %s7548_s9 = smov 40  }
 0x2ce   : > { %2553 = vmatpush.bf16.msra.mxu3 %v4807_v47  ;;  %2579 = vmatpush.bf16.msrb.mxu1 %v4811_v45  ;;  %v4791_v1 = vor.u32 %v5202_v48, %v4790_v22  ;;  %v3014_v47 = vld [vmem:[%s6100_s20 + $0x10] sm:$0xf]  ;;  %v4763_v48 = vor.u32 %v5193_v0, %v4760_v58 }
 0x2cf   : > { %v2631_v34 = vpop.permute.xlu0 %2630  ;;  %2977 = vrot.lane.b32.xlu2 %v2972_v18, %s5752_s14  ;;  %v3000_v45 = vld [vmem:[%s6100_s20 + $0x10] sm:$0xf]  ;;  %v2375_v18 = vunpack.c.h.b16 %v6892_v30 }
 0x2d0   : > { %v2634_v53 = vrot.slane %v2631_v34, 4  ;;  %v1828_v54 = vpop.f32.mrf.mxu3  ;;  %2975 = vrot.lane.b32.xlu1 %v6909_v41, %s5752_s14  ;;  %v3742_v0 = vld [vmem:[%s6100_s20 + $0x10] sm:$0xf]  ;;  %s5867_s14 = smov 45  }
 0x2d1   : > { %v2377_v30 = vpack.c.b16 %v2375_v18, %v2375_v18 }
 0x2d2   : > { %v2636_v32 = vsel %vm406_vm2, %v2634_v53, %v2635_v49  ;;  %2554 = vmatpush.bf16.msra.mxu3 %v4799_v55  ;;  %2580 = vmatpush.bf16.msrb.mxu1 %v4803_v63  ;;  %v2710_v53 = vrot.slane %v6905_v57, 4  ;;  %v5192_v55 = vld [vmem:[#allocation2 + $0x84] sm:$0xf0]  ;;  %v4752_v63 = vld [vmem:[#allocation2 + $0x88] sm:$0xf0] }
 0x2d3   : > { %v2638_v62 = vsel %vm2637_vm11, %v2631_v34, %v2636_v32  ;;  %v6920_v36 = vpop.permute.xlu2 %2734  ;;  %v4758_v34 = vld [vmem:[#allocation2 + $0x90] sm:$0xf]  ;;  %vm2712_vm11 = vcmask 392192   ;;  %v4750_v32 = vld [vmem:[#allocation2 + $0x80] sm:$0xf] }
 0x2d4   : > { %2640 = vst [vmem:[#allocation2 + $0x110] sm:$0xff] %v2638_v62  ;;  %v2661_v10 = vpop.permute.xlu1 %2660  ;;  %v4759_v51 = vor.u32 %v5194_v31, %v4758_v34  ;;  %v5191_v62 = vld [vmem:[#allocation2 + $0x84] sm:$0xf]  ;;  %v4751_v57 = vor.u32 %v5192_v55, %v4750_v32  ;;  %v2738_v2 = vrot.slane %v6920_v36, 4 }
 0x2d5   : > { %2960 = vrot.lane.b32.xlu0 %v2955_v59, %s5864_s5  ;;  %v2664_v25 = vrot.slane %v2661_v10, 4  ;;  %s7547_s5 = smov 37  }
 0x2d6   : > { %2555 = vmatpush.bf16.msra.mxu3 %v4791_v1  ;;  %2581 = vmatpush.bf16.msrb.mxu1 %v4795_v3  ;;  %v4755_v3 = vor.u32 %v5191_v62, %v4752_v63 }
 0x2d7   : > { %v2648_v9 = vpop.permute.xlu0 %2647  ;;  %v2666_v20 = vsel %vm406_vm2, %v2664_v25, %v2665_v4  ;;  %3003 = vrot.lane.b32.xlu2 %v6909_v41, %s5753_s6  ;;  %v3028_v4 = vld [vmem:[%s6100_s20 + $0x10] sm:$0xf] }
 0x2d8   : > { %v2650_v11 = vrot.slane %v2648_v9, 4  ;;  %v2668_v26 = vsel %vm2667_vm13, %v2661_v10, %v2666_v20  ;;  %2991 = vrot.lane.b32.xlu1 %v2986_v8, %s5751_s13  ;;  %vm2697_vm13 = vcmask 400384  }
 0x2d9   : > { %2670 = vst [vmem:[#allocation2 + $0x120] sm:$0xff] %v2668_v26 }
 0x2da   : > { %v2651_v27 = vsel %vm406_vm2, %v2649_v39, %v2650_v11  ;;  %2556 = vmatpush.bf16.msra.mxu3 %v4783_v19  ;;  %2582 = vmatpush.bf16.msrb.mxu1 %v4787_v37  ;;  %v3315_v19 = vld [vmem:[%s6100_s20 + $0x10] sm:$0xf] }
 0x2db   : > { %v2653_v43 = vsel %vm2652_vm14, %v6866_v21, %v2651_v27  ;;  %v6931_v21 = vpop.permute.xlu2 %2751  ;;  %v3042_v37 = vld [vmem:[%s6100_s20 + $0x10] sm:$0xf]  ;;  %vm2756_vm14 = vcmask 244736  }
 0x2dc   : > { %2655 = vst [vmem:[#allocation2 + $0x118] sm:$0xff] %v2653_v43  ;;  %v2678_v40 = vpop.permute.xlu1 %2677  ;;  %v2754_v20 = vrot.slane %v6931_v21, 4 }
 0x2dd   : > { %2989 = vrot.lane.b32.xlu0 %v6909_v41, %s5751_s13  ;;  %v2680_v12 = vrot.slane %v2678_v40, 4  ;;  %s5866_s13 = smov 46  }
 0x2de   : > { %2557 = vmatpush.bf16.msra.mxu3 %v4775_v13  ;;  %2583 = vmatpush.bf16.msrb.mxu1 %v4779_v52 }
 0x2df   : > { %v2676_v61 = vpop.permute.xlu0 %2675  ;;  %3019 = vrot.lane.b32.xlu2 %v3014_v47, %s5754_s25 }
 0x2e0   : > { %v2679_v44 = vrot.slane %v2676_v61, 4  ;;  %3017 = vrot.lane.b32.xlu1 %v6909_v41, %s5754_s25  ;;  %s7529_s25 = smov 67  }
 0x2e2   : > { %v2681_v35 = vsel %vm406_vm2, %v2679_v44, %v2680_v12  ;;  %2558 = vmatpush.bf16.msra.mxu3 %v4767_v46  ;;  %2584 = vmatpush.bf16.msrb.mxu1 %v4771_v56 }
 0x2e3   : > { %v2683_v49 = vsel %vm2682_vm15, %v2676_v61, %v2681_v35  ;;  %v6943_v54 = vpop.permute.xlu2 %2779  ;;  %vm2741_vm15 = vcmask 252928   ;;  %v3528_v61 = vld [vmem:[%s6100_s20 + $0x10] sm:$0xf] }
 0x2e4   : > { %2685 = vst [vmem:[#allocation2 + $0x128] sm:$0xff] %v2683_v49  ;;  %v2706_v59 = vpop.permute.xlu1 %2705  ;;  %v2783_v56 = vrot.slane %v6943_v54, 4  ;;  %v3757_v49 = vld [vmem:[%s6100_s20 + $0x10] sm:$0xf] }
 0x2e5   : > { %3005 = vrot.lane.b32.xlu0 %v3000_v45, %s5753_s6  ;;  %v2709_v22 = vrot.slane %v2706_v59, 4  ;;  %s5868_s6 = smov 47  }
 0x2e6   : > { %2559 = vmatpush.bf16.msra.mxu3 %v4759_v51  ;;  %2585 = vmatpush.bf16.msrb.mxu1 %v4763_v48 }
 0x2e7   : > { %v2693_v60 = vpop.permute.xlu0 %2692  ;;  %v2711_v6 = vsel %vm406_vm2, %v2709_v22, %v2710_v53  ;;  %3045 = vrot.lane.b32.xlu2 %v6909_v41, %s5755_s21  ;;  %v3486_v22 = vld [vmem:[%s6100_s20 + $0x10] sm:$0xf] }
 0x2e8   : > { %v2695_v1 = vrot.slane %v2693_v60, 4  ;;  %v2713_v7 = vsel %vm2712_vm11, %v2706_v59, %v2711_v6  ;;  %3033 = vrot.lane.b32.xlu1 %v3028_v4, %s5756_s18 }
 0x2e9   : > { %2715 = vst [vmem:[#allocation2 + $0x138] sm:$0xff] %v2713_v7 }
 0x2ea   : > { %v2696_v39 = vsel %vm406_vm2, %v2694_v38, %v2695_v1  ;;  %2560 = vmatpush.bf16.msra.mxu3 %v4751_v57  ;;  %2586 = vmatpush.bf16.msrb.mxu1 %v4755_v3 }
 0x2eb   : > { %v2698_v10 = vsel %vm2697_vm13, %v6888_v15, %v2696_v39  ;;  %v2797_v25 = vpop.permute.xlu2 %2796  ;;  %vm2801_vm13 = vcmask 220160   ;;  %v3500_v39 = vld [vmem:[%s6100_s20 + $0x10] sm:$0xf] }
 0x2ec   : > { %2700 = vst [vmem:[#allocation2 + $0x130] sm:$0xff] %v2698_v10  ;;  %v2723_v9 = vpop.permute.xlu1 %2722  ;;  %v2799_v46 = vrot.slane %v2797_v25, 4 }
 0x2ed   : > { %3031 = vrot.lane.b32.xlu0 %v6909_v41, %s5756_s18  ;;  %2561 = vmatmul.bf16.vlgmr.msra.gmra.mxu3 %v2377_v30  ;;  %v2725_v17 = vrot.slane %v2723_v9, 4  ;;  %s7531_s18 = smov 66  }
 0x2ee   : > { %2587 = vmatmul.bf16.vlgmr.msrb.gmra.mxu1 %v2377_v30  ;;  %v3713_v30 = vld [vmem:[%s6100_s20 + $0x10] sm:$0xf] }
 0x2ef   : > { %v2721_v5 = vpop.permute.xlu0 %2720  ;;  %3320 = vrot.lane.b32.xlu2 %v3315_v19, %s5757_s15 }
 0x2f0   : > { %v2724_v11 = vrot.slane %v2721_v5, 4  ;;  %3318 = vrot.lane.b32.xlu1 %v6909_v41, %s5757_s15  ;;  %s7532_s15 = smov 99  }
 0x2f2   : > { %v2726_v15 = vsel %vm406_vm2, %v2724_v11, %v2725_v17 }
 0x2f3   : > { %v2727_v8 = vsel %vm1417_vm10, %v2721_v5, %v2726_v15  ;;  %v6965_v24 = vpop.permute.xlu2 %2824  ;;  %vm2771_vm10 = vcmask 236544   ;;  %v3727_v15 = vld [vmem:[%s6100_s20 + $0x10] sm:$0xf] }
 0x2f4   : > { %2729 = vst [vmem:[#allocation2 + $0x140] sm:$0xff] %v2727_v8  ;;  %v2750_v26 = vpop.permute.xlu1 %2749  ;;  %v2828_v62 = vrot.slane %v6965_v24, 4 }
 0x2f5   : > { %3047 = vrot.lane.b32.xlu0 %v3042_v37, %s5755_s21  ;;  %v2753_v27 = vrot.slane %v2750_v26, 4  ;;  %s7530_s21 = smov 97  }
 0x2f7   : > { %v2737_v43 = vpop.permute.xlu0 %2736  ;;  %v2755_v13 = vsel %vm406_vm2, %v2753_v27, %v2754_v20  ;;  %3519 = vrot.lane.b32.xlu2 %v3514_v29, %s5770_s16 }
 0x2f8   : > { %v2739_v50 = vrot.slane %v2737_v43, 4  ;;  %v2757_v52 = vsel %vm2756_vm14, %v2750_v26, %v2755_v13  ;;  %3517 = vrot.lane.b32.xlu1 %v6909_v41, %s5770_s16  ;;  %vm2786_vm14 = vcmask 228352   ;;  %s5870_s16 = smov 101  }
 0x2f9   : > { %2759 = vst [vmem:[#allocation2 + $0x150] sm:$0xff] %v2757_v52 }
 0x2fa   : > { %v2740_v42 = vsel %vm406_vm2, %v2738_v2, %v2739_v50 }
 0x2fb   : > { %v2742_v23 = vsel %vm2741_vm15, %v6920_v36, %v2740_v42  ;;  %v2842_v14 = vpop.permute.xlu2 %2841  ;;  %vm2816_vm15 = vcmask 211968  }
 0x2fc   : > { %2744 = vst [vmem:[#allocation2 + $0x148] sm:$0xff] %v2742_v23  ;;  %v2767_v33 = vpop.permute.xlu1 %2766 }
 0x2fd   : > { %3332 = vrot.lane.b32.xlu0 %v6909_v41, %s5759_s8  ;;  %v2769_v21 = vrot.slane %v2767_v33, 4 }
 0x2ff   : > { %v2765_v40 = vpop.permute.xlu0 %2764  ;;  %3745 = vrot.lane.b32.xlu2 %v6909_v41, %s5866_s13 }
 0x300   : > { %v2768_v12 = vrot.slane %v2765_v40, 4  ;;  %3533 = vrot.lane.b32.xlu1 %v3528_v61, %s5837_s3 }
 0x302   : > { %v2770_v44 = vsel %vm406_vm2, %v2768_v12, %v2769_v21 }
 0x303   : > { %v2772_v36 = vsel %vm2771_vm10, %v2765_v40, %v2770_v44  ;;  %v6983_v47 = vpop.permute.xlu2 %2869  ;;  %vm2846_vm10 = vcmask 195584  }
 0x304   : > { %2774 = vst [vmem:[#allocation2 + $0x158] sm:$0xff] %v2772_v36  ;;  %v2795_v45 = vpop.permute.xlu1 %2794 }
 0x305   : > { %3531 = vrot.lane.b32.xlu0 %v6909_v41, %s5837_s3  ;;  %v2798_v31 = vrot.slane %v2795_v45, 4  ;;  %s7540_s3 = smov 72  }
 0x307   : > { %v2782_v58 = vpop.permute.xlu0 %2781  ;;  %v2800_v34 = vsel %vm406_vm2, %v2798_v31, %v2799_v46  ;;  %3762 = vrot.lane.b32.xlu2 %v3757_v49, %s5867_s14  ;;  %v3472_v46 = vld [vmem:[%s6100_s20 + $0x10] sm:$0xf] }
 0x308   : > { %v2784_v35 = vrot.slane %v2782_v58, 4  ;;  %v2802_v51 = vsel %vm2801_vm13, %v2795_v45, %v2800_v34  ;;  %3760 = vrot.lane.b32.xlu1 %v6909_v41, %s5867_s14  ;;  %vm2831_vm13 = vcmask 203776   ;;  %v3458_v45 = vld [vmem:[%s6100_s20 + $0x10] sm:$0xf]  ;;  %s7553_s14 = smov 42  }
 0x309   : > { %2804 = vst [vmem:[#allocation2 + $0x168] sm:$0xff] %v2802_v51  ;;  %v5217_v51 = vld [vmem:[#allocation2 + $0x154] sm:$0xf] }
 0x30a   : > { %v2785_v48 = vsel %vm406_vm2, %v2783_v56, %v2784_v35 }
 0x30b   : > { %v2787_v53 = vsel %vm2786_vm14, %v6943_v54, %v2785_v48  ;;  %v6991_v55 = vpop.permute.xlu2 %2886  ;;  %v2844_v54 = vrot.slane %v2842_v14, 4  ;;  %vm2861_vm14 = vcmask 187392   ;;  %v2873_v14 = vrot.slane %v6983_v47, 4  ;;  %v5218_v31 = vld [vmem:[#allocation2 + $0x154] sm:$0xf0] }
 0x30c   : > { %2789 = vst [vmem:[#allocation2 + $0x160] sm:$0xff] %v2787_v53  ;;  %v2812_v63 = vpop.permute.xlu1 %2811  ;;  %v2889_v43 = vrot.slane %v6991_v55, 4  ;;  %v4857_v58 = vld [vmem:[#allocation2 + $0x158] sm:$0xf0]  ;;  %v5216_v55 = vld [vmem:[#allocation2 + $0x144] sm:$0xf0] }
 0x30d   : > { %3747 = vrot.lane.b32.xlu0 %v3742_v0, %s5866_s13  ;;  %v2814_v18 = vrot.slane %v2812_v63, 4  ;;  %v4855_v0 = vld [vmem:[#allocation2 + $0x150] sm:$0xf]  ;;  %v4860_v53 = vor.u32 %v5217_v51, %v4857_v58  ;;  %v4849_v63 = vld [vmem:[#allocation2 + $0x148] sm:$0xf0]  ;;  %s7551_s13 = smov 39  }
 0x30e   : > { %v4856_v48 = vor.u32 %v5218_v31, %v4855_v0  ;;  %v3444_v0 = vld [vmem:[%s6100_s20 + $0x10] sm:$0xf] }
 0x30f   : > { %v2810_v38 = vpop.permute.xlu0 %2809  ;;  %3503 = vrot.lane.b32.xlu2 %v6909_v41, %s5771_s10 }
 0x310   : > { %v2813_v59 = vrot.slane %v2810_v38, 4  ;;  %3491 = vrot.lane.b32.xlu1 %v3486_v22, %s5769_s12  ;;  %v5220_v13 = vld [vmem:[#allocation2 + $0x164] sm:$0xf0]  ;;  %v4865_v23 = vld [vmem:[#allocation2 + $0x168] sm:$0xf0] }
 0x311   : > { %v4847_v22 = vld [vmem:[#allocation2 + $0x140] sm:$0xf] }
 0x312   : > { %v2815_v60 = vsel %vm406_vm2, %v2813_v59, %v2814_v18 }
 0x313   : > { %v2817_v32 = vsel %vm2816_vm15, %v2810_v38, %v2815_v60  ;;  %v7001_v1 = vpop.permute.xlu2 %2914  ;;  %v4863_v52 = vld [vmem:[#allocation2 + $0x160] sm:$0xf]  ;;  %v5219_v42 = vld [vmem:[#allocation2 + $0x164] sm:$0xf]  ;;  %vm2891_vm15 = vcmask 171008  }
 0x314   : > { %2819 = vst [vmem:[#allocation2 + $0x170] sm:$0xff] %v2817_v32  ;;  %v2840_v57 = vpop.permute.xlu1 %2839  ;;  %v4864_v44 = vor.u32 %v5220_v13, %v4863_v52  ;;  %v4868_v36 = vor.u32 %v5219_v42, %v4865_v23  ;;  %v5215_v60 = vld [vmem:[#allocation2 + $0x144] sm:$0xf]  ;;  %v5210_v13 = vld [vmem:[#allocation2 + $0x114] sm:$0xf0] }
 0x315   : > { %3489 = vrot.lane.b32.xlu0 %v6909_v41, %s5769_s12  ;;  %v2843_v3 = vrot.slane %v2840_v57, 4  ;;  %v4825_v52 = vld [vmem:[#allocation2 + $0x118] sm:$0xf0]  ;;  %s7535_s12 = smov 68  }
 0x317   : > { %v2827_v4 = vpop.permute.xlu0 %2826  ;;  %v2845_v7 = vsel %vm406_vm2, %v2843_v3, %v2844_v54  ;;  %3718 = vrot.lane.b32.xlu2 %v3713_v30, %s5850_s24  ;;  %v4848_v54 = vor.u32 %v5216_v55, %v4847_v22  ;;  %v5214_v3 = vld [vmem:[#allocation2 + $0x134] sm:$0xf0]  ;;  %v4841_v30 = vld [vmem:[#allocation2 + $0x138] sm:$0xf0] }
 0x318   : > { %v2829_v6 = vrot.slane %v2827_v4, 4  ;;  %v2847_v10 = vsel %vm2846_vm10, %v2840_v57, %v2845_v7  ;;  %3716 = vrot.lane.b32.xlu1 %v6909_v41, %s5850_s24  ;;  %vm2876_vm10 = vcmask 179200   ;;  %v3685_v57 = vld [vmem:[%s6100_s20 + $0x10] sm:$0xf]  ;;  %s7542_s24 = smov 36  }
 0x319   : > { %2849 = vst [vmem:[#allocation2 + $0x180] sm:$0xff] %v2847_v10  ;;  %v4839_v4 = vld [vmem:[#allocation2 + $0x130] sm:$0xf] }
 0x31a   : > { %v2830_v25 = vsel %vm406_vm2, %v2828_v62, %v2829_v6  ;;  %v4852_v62 = vor.u32 %v5215_v60, %v4849_v63  ;;  %v5213_v6 = vld [vmem:[#allocation2 + $0x134] sm:$0xf]  ;;  %v4840_v10 = vor.u32 %v5214_v3, %v4839_v4  ;;  %v3671_v60 = vld [vmem:[%s6100_s20 + $0x10] sm:$0xf] }
 0x31b   : > { %v2832_v9 = vsel %vm2831_vm13, %v6965_v24, %v2830_v25  ;;  %v7012_v17 = vpop.permute.xlu2 %2930  ;;  %v4871_v20 = vld [vmem:[#allocation2 + $0x170] sm:$0xf]  ;;  %v5221_v26 = vld [vmem:[#allocation2 + $0x174] sm:$0xf]  ;;  %vm2906_vm13 = vcmask 162816   ;;  %v4844_v25 = vor.u32 %v5213_v6, %v4841_v30 }
 0x31c   : > { %2834 = vst [vmem:[#allocation2 + $0x178] sm:$0xff] %v2832_v9  ;;  %v2857_v5 = vpop.permute.xlu1 %2856  ;;  %v2933_v9 = vrot.slane %v7012_v17, 4  ;;  %v3430_v17 = vld [vmem:[%s6100_s20 + $0x10] sm:$0xf] }
 0x31d   : > { %3505 = vrot.lane.b32.xlu0 %v3500_v39, %s5771_s10  ;;  %v2859_v11 = vrot.slane %v2857_v5, 4  ;;  %v5212_v5 = vld [vmem:[#allocation2 + $0x124] sm:$0xf0]  ;;  %s7537_s10 = smov 70  }
 0x31f   : > { %v2855_v19 = vpop.permute.xlu0 %2854  ;;  %3461 = vrot.lane.b32.xlu2 %v6909_v41, %s5768_s29 }
 0x320   : > { %v2858_v37 = vrot.slane %v2855_v19, 4  ;;  %3732 = vrot.lane.b32.xlu1 %v3727_v15, %s5868_s6 }
 0x322   : > { %v2860_v8 = vsel %vm406_vm2, %v2858_v37, %v2859_v11  ;;  %v4833_v11 = vld [vmem:[#allocation2 + $0x128] sm:$0xf0] }
 0x323   : > { %v2862_v2 = vsel %vm2861_vm14, %v2855_v19, %v2860_v8  ;;  %v5222_v24 = vld [vmem:[#allocation2 + $0x174] sm:$0xf0]  ;;  %v4873_v27 = vld [vmem:[#allocation2 + $0x178] sm:$0xf0]  ;;  %v7021_v33 = vpop.permute.xlu2 %2958  ;;  %v2918_v19 = vrot.slane %v7001_v1, 4  ;;  %vm2935_vm14 = vcmask 23552  }
 0x324   : > { %2864 = vst [vmem:[#allocation2 + $0x188] sm:$0xff] %v2862_v2  ;;  %v4872_v50 = vor.u32 %v5222_v24, %v4871_v20  ;;  %v4876_v29 = vor.u32 %v5221_v26, %v4873_v27  ;;  %v2885_v21 = vpop.permute.xlu1 %2884  ;;  %v4831_v2 = vld [vmem:[#allocation2 + $0x120] sm:$0xf]  ;;  %v5211_v24 = vld [vmem:[#allocation2 + $0x124] sm:$0xf]  ;;  %v2962_v55 = vrot.slane %v7021_v33, 4 }
 0x325   : > { %3730 = vrot.lane.b32.xlu0 %v6909_v41, %s5868_s6  ;;  %v2888_v40 = vrot.slane %v2885_v21, 4  ;;  %v4832_v27 = vor.u32 %v5212_v5, %v4831_v2  ;;  %s7554_s6 = smov 41  }
 0x326   : > { %3258 = vmatpush.bf16.msrb.mxu2 %v4872_v50  ;;  %3284 = vmatpush.bf16.msra.mxu0 %v4876_v29  ;;  %v3699_v29 = vld [vmem:[%s6100_s20 + $0x10] sm:$0xf] }
 0x327   : > { %v2872_v12 = vpop.permute.xlu0 %2871  ;;  %v2890_v56 = vsel %vm406_vm2, %v2888_v40, %v2889_v43  ;;  %3477 = vrot.lane.b32.xlu2 %v3472_v46, %s5767_s30  ;;  %v4836_v43 = vor.u32 %v5211_v24, %v4833_v11  ;;  %v5209_v40 = vld [vmem:[#allocation2 + $0x114] sm:$0xf]  ;;  %v5207_v46 = vld [vmem:[#allocation2 + $0x104] sm:$0xf] }
 0x328   : > { %v2874_v61 = vrot.slane %v2872_v12, 4  ;;  %v2892_v35 = vsel %vm2891_vm15, %v2885_v21, %v2890_v56  ;;  %3475 = vrot.lane.b32.xlu1 %v6909_v41, %s5767_s30  ;;  %v4823_v21 = vld [vmem:[#allocation2 + $0x110] sm:$0xf]  ;;  %v4817_v56 = vld [vmem:[#allocation2 + $0x108] sm:$0xf0]  ;;  %vm2965_vm15 = vcmask 7168  }
 0x329   : > { %2894 = vst [vmem:[#allocation2 + $0x198] sm:$0xff] %v2892_v35  ;;  %v4824_v12 = vor.u32 %v5210_v13, %v4823_v21  ;;  %s7534_s30 = smov 69  }
 0x32a   : > { %v2875_v49 = vsel %vm406_vm2, %v2873_v14, %v2874_v61  ;;  %3259 = vmatpush.bf16.msrb.mxu2 %v4864_v44  ;;  %3285 = vmatpush.bf16.msra.mxu0 %v4868_v36  ;;  %v4828_v61 = vor.u32 %v5209_v40, %v4825_v52  ;;  %v5208_v44 = vld [vmem:[#allocation2 + $0x104] sm:$0xf0]  ;;  %v4815_v36 = vld [vmem:[#allocation2 + $0x100] sm:$0xf]  ;;  %v3643_v40 = vld [vmem:[%s6100_s20 + $0x10] sm:$0xf] }
 0x32b   : > { %v2877_v34 = vsel %vm2876_vm10, %v6983_v47, %v2875_v49  ;;  %v7032_v18 = vpop.permute.xlu2 %2977  ;;  %v4816_v49 = vor.u32 %v5208_v44, %v4815_v36  ;;  %vm7549_vm10 = vcmask 801792  }
 0x32c   : > { %2879 = vst [vmem:[#allocation2 + $0x190] sm:$0xff] %v2877_v34  ;;  %v2902_v47 = vpop.permute.xlu1 %2901  ;;  %v4820_v34 = vor.u32 %v5207_v46, %v4817_v56 }
 0x32d   : > { %3463 = vrot.lane.b32.xlu0 %v3458_v45, %s5768_s29  ;;  %v2904_v38 = vrot.slane %v2902_v47, 4  ;;  %s5869_s29 = smov 102  }
 0x32e   : > { %3260 = vmatpush.bf16.msrb.mxu2 %v4856_v48  ;;  %3286 = vmatpush.bf16.msra.mxu0 %v4860_v53  ;;  %v2980_v53 = vrot.slane %v7032_v18, 4 }
 0x32f   : > { %v2900_v59 = vpop.permute.xlu0 %2899  ;;  %3702 = vrot.lane.b32.xlu2 %v6909_v41, %s5784_s11 }
 0x330   : > { %v2903_v32 = vrot.slane %v2900_v59, 4  ;;  %3690 = vrot.lane.b32.xlu1 %v3685_v57, %s5782_s23 }
 0x332   : > { %v2905_v7 = vsel %vm406_vm2, %v2903_v32, %v2904_v38  ;;  %3261 = vmatpush.bf16.msrb.mxu2 %v4848_v54  ;;  %3287 = vmatpush.bf16.msra.mxu0 %v4852_v62  ;;  %v3657_v54 = vld [vmem:[%s6100_s20 + $0x10] sm:$0xf] }
 0x333   : > { %v2907_v39 = vsel %vm2906_vm13, %v2900_v59, %v2905_v7  ;;  %v7043_v37 = vpop.permute.xlu2 %3003  ;;  %vm7550_vm13 = vcmask 523264  }
 0x334   : > { %2909 = vst [vmem:[#allocation2 + $0x1a0] sm:$0xff] %v2907_v39  ;;  %v2929_v15 = vpop.permute.xlu1 %2928 }
 0x335   : > { %3688 = vrot.lane.b32.xlu0 %v6909_v41, %s5782_s23  ;;  %v2932_v8 = vrot.slane %v2929_v15, 4  ;;  %s5871_s23 = smov 73  }
 0x336   : > { %3262 = vmatpush.bf16.msrb.mxu2 %v4840_v10  ;;  %3288 = vmatpush.bf16.msra.mxu0 %v4844_v25  ;;  %v3402_v10 = vld [vmem:[%s6100_s20 + $0x10] sm:$0xf] }
 0x337   : > { %v2917_v20 = vpop.permute.xlu0 %2916  ;;  %v2934_v50 = vsel %vm406_vm2, %v2932_v8, %v2933_v9  ;;  %3435 = vrot.lane.b32.xlu2 %v3430_v17, %s5764_s26  ;;  %v3416_v17 = vld [vmem:[%s6100_s20 + $0x10] sm:$0xf] }
 0x338   : > { %v2919_v26 = vrot.slane %v2917_v20, 4  ;;  %v2936_v42 = vsel %vm2935_vm14, %v2929_v15, %v2934_v50  ;;  %3433 = vrot.lane.b32.xlu1 %v6909_v41, %s5764_s26  ;;  %s7533_s26 = smov 100   ;;  %vm7552_vm14 = vcmask 793600  }
 0x339   : > { %2938 = vst [vmem:[#allocation2 + $0x1b0] sm:$0xff] %v2936_v42 }
 0x33a   : > { %v2920_v23 = vsel %vm406_vm2, %v2918_v19, %v2919_v26  ;;  %3263 = vmatpush.bf16.msrb.mxu2 %v4832_v27  ;;  %3289 = vmatpush.bf16.msra.mxu0 %v4836_v43  ;;  %v3007_v19 = vrot.slane %v7043_v37, 4  ;;  %v3629_v26 = vld [vmem:[%s6100_s20 + $0x10] sm:$0xf] }
 0x33b   : > { %v2921_v14 = vsel %vm357_vm1, %v7001_v1, %v2920_v23  ;;  %v3020_v1 = vpop.permute.xlu2 %3019  ;;  %vm2950_vm1 = vcmask 15360  }
 0x33c   : > { %2923 = vst [vmem:[#allocation2 + $0x1a8] sm:$0xff] %v2921_v14  ;;  %v2946_v45 = vpop.permute.xlu1 %2945  ;;  %v3022_v11 = vrot.slane %v3020_v1, 4 }
 0x33d   : > { %3704 = vrot.lane.b32.xlu0 %v3699_v29, %s5784_s11  ;;  %v2948_v31 = vrot.slane %v2946_v45, 4  ;;  %s7538_s11 = smov 71  }
 0x33e   : > { %3264 = vmatpush.bf16.msrb.mxu2 %v4824_v12  ;;  %3290 = vmatpush.bf16.msra.mxu0 %v4828_v61 }
 0x33f   : > { %v2944_v58 = vpop.permute.xlu0 %2943  ;;  %3660 = vrot.lane.b32.xlu2 %v6909_v41, %s7529_s25 }
 0x340   : > { %v2947_v35 = vrot.slane %v2944_v58, 4  ;;  %3449 = vrot.lane.b32.xlu1 %v3444_v0, %s7530_s21 }
 0x342   : > { %v2949_v51 = vsel %vm406_vm2, %v2947_v35, %v2948_v31  ;;  %3265 = vmatpush.bf16.msrb.mxu2 %v4816_v49  ;;  %3291 = vmatpush.bf16.msra.mxu0 %v4820_v34  ;;  %v3387_v31 = vld [vmem:[%s6100_s20 + $0x10] sm:$0xf] }
 0x343   : > { %v2951_v48 = vsel %vm2950_vm1, %v2944_v58, %v2949_v51  ;;  %v7064_v63 = vpop.permute.xlu2 %3045  ;;  %v3372_v35 = vld [vmem:[%s6100_s20 + $0x10] sm:$0xf]  ;;  %vm7555_vm1 = vcmask 539648  }
 0x344   : > { %2953 = vst [vmem:[#allocation2 + $0x1b8] sm:$0xff] %v2951_v48  ;;  %v2976_v47 = vpop.permute.xlu1 %2975  ;;  %v3049_v44 = vrot.slane %v7064_v63, 4 }
 0x345   : > { %3447 = vrot.lane.b32.xlu0 %v6909_v41, %s7530_s21  ;;  %v2979_v38 = vrot.slane %v2976_v47, 4  ;;  %s7559_s21 = smov 43  }
 0x347   : > { %v2961_v59 = vpop.permute.xlu0 %2960  ;;  %v2981_v32 = vsel %vm406_vm2, %v2979_v38, %v2980_v53  ;;  %v7071_v3 = vpop.f32.mrf.mxu0  ;;  %3676 = vrot.lane.b32.xlu2 %v3671_v60, %s7531_s18  ;;  %v3601_v60 = vld [vmem:[%s6100_s20 + $0x10] sm:$0xf] }
 0x348   : > { %v2963_v22 = vrot.slane %v2961_v59, 4  ;;  %v2982_v62 = vsel %vm408_vm4, %v2976_v47, %v2981_v32  ;;  %3674 = vrot.lane.b32.xlu1 %v6909_v41, %s7531_s18  ;;  %vm3767_vm4 = vcmask 367616   ;;  %s7578_s18 = sld [smem:[#allocation19_spill]] }
 0x349   : > { %2984 = vst [vmem:[#allocation2 + $0x1d0] sm:$0xff] %v2982_v62  ;;  %v7132_v62 = vld [vmem:[%s6113_s7 + $0x18] sm:$0xff] }
 0x34a   : > { %v2964_v57 = vsel %vm406_vm2, %v2962_v55, %v2963_v22 }
 0x34b   : > { %v2966_v18 = vsel %vm2965_vm15, %v7021_v33, %v2964_v57  ;;  %v3321_v4 = vpop.permute.xlu2 %3320  ;;  %vm7556_vm15 = vcmask 547840  }
 0x34c   : > { %2968 = vst [vmem:[#allocation2 + $0x1c0] sm:$0xff] %v2966_v18  ;;  %v2992_v6 = vpop.permute.xlu1 %2991  ;;  %v3323_v61 = vrot.slane %v3321_v4, 4 }
 0x34d   : > { %3662 = vrot.lane.b32.xlu0 %v3657_v54, %s7529_s25  ;;  %v2994_v30 = vrot.slane %v2992_v6, 4  ;;  %v7079_v25 = vpop.f32.mrf.mxu2  ;;  %s7557_s25 = smov 44  }
 0x34f   : > { %v2990_v7 = vpop.permute.xlu0 %2989  ;;  %v2577_v33 = vpop.f32.mrf.mxu0  ;;  %3419 = vrot.lane.b32.xlu2 %v6909_v41, %s7532_s15 }
 0x350   : > { %v2993_v39 = vrot.slane %v2990_v7, 4  ;;  %3407 = vrot.lane.b32.xlu1 %v3402_v10, %s7533_s26 }
 0x352   : > { %v2995_v9 = vsel %vm406_vm2, %v2993_v39, %v2994_v30 }
 0x353   : > { %v2996_v5 = vsel %vm423_vm3, %v2990_v7, %v2995_v9  ;;  %v3520_v15 = vpop.permute.xlu2 %3519  ;;  %vm7536_vm3 = vcmask 752640  }
 0x354   : > { %2998 = vst [vmem:[#allocation2 + $0x1d8] sm:$0xff] %v2996_v5  ;;  %v3018_v8 = vpop.permute.xlu1 %3017  ;;  %v3522_v53 = vrot.slane %v3520_v15, 4 }
 0x355   : > { %3405 = vrot.lane.b32.xlu0 %v6909_v41, %s7533_s26  ;;  %v3021_v20 = vrot.slane %v3018_v8, 4  ;;  %v2551_v27 = vpop.f32.mrf.mxu2 }
 0x357   : > { %v3006_v2 = vpop.permute.xlu0 %3005  ;;  %v3023_v43 = vsel %vm406_vm2, %v3021_v20, %v3022_v11  ;;  %3634 = vrot.lane.b32.xlu2 %v3629_v26, %s7534_s30  ;;  %v7148_v26 = vld [vmem:[%s6100_s20 + $0x8] sm:$0xff] }
 0x358   : > { %v3008_v24 = vrot.slane %v3006_v2, 4  ;;  %v3024_v50 = vsel %vm453_vm5, %v3018_v8, %v3023_v43  ;;  %3632 = vrot.lane.b32.xlu1 %v6909_v41, %s7534_s30  ;;  %v3615_v43 = vld [vmem:[%s6100_s20 + $0x10] sm:$0xf]  ;;  %vm3752_vm5 = vcmask 375808  }
 0x359   : > { %3026 = vst [vmem:[#allocation2 + $0x1e8] sm:$0xff] %v3024_v50 }
 0x35a   : > { %v3009_v29 = vsel %vm406_vm2, %v3007_v19, %v3008_v24  ;;  %v3343_v24 = vld [vmem:[%s6100_s20 + $0x10] sm:$0xf] }
 0x35b   : > { %v3010_v13 = vsel %vm438_vm6, %v7043_v37, %v3009_v29  ;;  %v7100_v52 = vpop.permute.xlu2 %3745  ;;  %v4921_v50 = vld [vmem:[#allocation2 + $0x1d8] sm:$0xf0]  ;;  %vm7539_vm6 = vcmask 769024  }
 0x35c   : > { %3012 = vst [vmem:[#allocation2 + $0x1e0] sm:$0xff] %v3010_v13  ;;  %v3034_v42 = vpop.permute.xlu1 %3033 }
 0x35d   : > { %3421 = vrot.lane.b32.xlu0 %v3416_v17, %s7532_s15  ;;  %v3036_v23 = vrot.slane %v3034_v42, 4  ;;  %v5234_v17 = vld [vmem:[#allocation2 + $0x1d4] sm:$0xf0]  ;;  %v4919_v42 = vld [vmem:[#allocation2 + $0x1d0] sm:$0xf]  ;;  %s5107_s15 = sshll.u32 %s7578_s18, 2 }
 0x35f   : > { %v3032_v14 = vpop.permute.xlu0 %3031  ;;  %3375 = vrot.lane.b32.xlu2 %v6909_v41, %s5869_s29 }
 0x360   : > { %v3035_v21 = vrot.slane %v3032_v14, 4  ;;  %3648 = vrot.lane.b32.xlu1 %v3643_v40, %s7535_s12  ;;  %v5232_v40 = vld [vmem:[#allocation2 + $0x1c4] sm:$0xf0] }
 0x362   : > { %v3037_v12 = vsel %vm406_vm2, %v3035_v21, %v3036_v23  ;;  %v5233_v23 = vld [vmem:[#allocation2 + $0x1d4] sm:$0xf] }
 0x363   : > { %v3038_v37 = vsel %vm468_vm7, %v3032_v14, %v3037_v12  ;;  %v7110_v36 = vpop.permute.xlu2 %3762  ;;  %v4927_v33 = vld [vmem:[#allocation2 + $0x1e0] sm:$0xf]  ;;  %v5235_v5 = vld [vmem:[#allocation2 + $0x1e4] sm:$0xf]  ;;  %v4920_v14 = vor.u32 %v5234_v17, %v4919_v42  ;;  %v4924_v21 = vor.u32 %v5233_v23, %v4921_v50  ;;  %v4913_v12 = vld [vmem:[#allocation2 + $0x1c8] sm:$0xf0] }
 0x364   : > { %3040 = vst [vmem:[#allocation2 + $0x1f0] sm:$0xff] %v3038_v37  ;;  %v3319_v46 = vpop.permute.xlu1 %3318  ;;  %v3765_v37 = vrot.slane %v7110_v36, 4  ;;  %v4881_v23 = vld [vmem:[#allocation2 + $0x188] sm:$0xf0]  ;;  %vm7541_vm7 = vcmask 760832  }
 0x365   : > { %3646 = vrot.lane.b32.xlu0 %v6909_v41, %s7535_s12  ;;  %v3322_v56 = vrot.slane %v3319_v46, 4 }
 0x367   : > { %v3048_v1 = vpop.permute.xlu0 %3047  ;;  %v3324_v58 = vsel %vm406_vm2, %v3322_v56, %v3323_v61  ;;  %3392 = vrot.lane.b32.xlu2 %v3387_v31, %s5870_s16  ;;  %v4911_v61 = vld [vmem:[#allocation2 + $0x1c0] sm:$0xf] }
 0x368   : > { %v3050_v45 = vrot.slane %v3048_v1, 4  ;;  %v3325_v49 = vsel %vm498_vm8, %v3319_v46, %v3324_v58  ;;  %3390 = vrot.lane.b32.xlu1 %v6909_v41, %s5870_s16  ;;  %v3749_v46 = vrot.slane %v7100_v52, 4  ;;  %vm3737_vm8 = vcmask 384000  }
 0x369   : > { %3327 = vst [vmem:[#allocation2] sm:$0xff] %v3325_v49 }
 0x36a   : > { %v3051_v34 = vsel %vm406_vm2, %v3049_v44, %v3050_v45  ;;  %v5231_v44 = vld [vmem:[#allocation2 + $0x1c4] sm:$0xf] }
 0x36b   : > { %v2588_v0 = vpop.f32.mrf.mxu1  ;;  %v3052_v51 = vsel %vm483_vm9, %v7064_v63, %v3051_v34  ;;  %v7124_v47 = vpop.permute.xlu2 %3503  ;;  %v5237_v18 = vld [vmem:[#allocation2 + $0x1f4] sm:$0xf]  ;;  %v4916_v49 = vor.u32 %v5231_v44, %v4913_v12  ;;  %v3357_v34 = vld [vmem:[%s6100_s20 + $0x10] sm:$0xf]  ;;  %vm7543_vm9 = vcmask 777216  }
 0x36c   : > { %v2589_v48 = vadd.f32 %v2588_v0, %v7071_v3  ;;  %3054 = vst [vmem:[#allocation2 + $0x1f8] sm:$0xff] %v3052_v51  ;;  %v3518_v38 = vpop.permute.xlu1 %3517  ;;  %v4935_v3 = vld [vmem:[#allocation2 + $0x1f0] sm:$0xf]  ;;  %v5230_v0 = vld [vmem:[#allocation2 + $0x1b4] sm:$0xf0] }
 0x36d   : > { %3377 = vrot.lane.b32.xlu0 %v3372_v35, %s5869_s29  ;;  %v3521_v59 = vrot.slane %v3518_v38, 4  ;;  %v4912_v35 = vor.u32 %v5232_v40, %v4911_v61  ;;  %v4903_v51 = vld [vmem:[#allocation2 + $0x1b0] sm:$0xf]  ;;  %s4423_s29 = sshll.u32 %s6096_s1, 4 }
 0x36e   : > { %v7122_v55 = vadd.f32 %v2589_v48, %v6885_v16  ;;  %v3092_v16 = vunpack.c.l.b16 %v7132_v62  ;;  %v4905_v48 = vld [vmem:[#allocation2 + $0x1b8] sm:$0xf0] }
 0x36f   : > { %v7126_v22 = vpop.permute.xlu0 %3332  ;;  %v3523_v32 = vsel %vm406_vm2, %v3521_v59, %v3522_v53  ;;  %3618 = vrot.lane.b32.xlu2 %v6909_v41, %s7537_s10  ;;  %v5229_v59 = vld [vmem:[#allocation2 + $0x1b4] sm:$0xf] }
 0x370   : > { %v2562_v63 = vpop.f32.mrf.mxu3  ;;  %v3524_v57 = vsel %vm7536_vm3, %v3518_v38, %v3523_v32  ;;  %3606 = vrot.lane.b32.xlu1 %v3601_v60, %s7538_s11  ;;  %v3094_v9 = vpack.c.b16 %v3092_v16, %v3092_v16  ;;  %vm7558_vm3 = vcmask 818176  }
 0x371   : > { %v2563_v54 = vadd.f32 %v2562_v63, %v7079_v25  ;;  %3526 = vst [vmem:[#allocation2 + $0x70] sm:$0xff] %v3524_v57  ;;  %v5236_v25 = vld [vmem:[#allocation2 + $0x1e4] sm:$0xf0] }
 0x372   : > { %3266 = vmatmul.bf16.vlgmr.msrb.gmra.mxu2 %v3094_v9  ;;  %3292 = vmatmul.bf16.vlgmr.msra.gmra.mxu0 %v3094_v9  ;;  %v4928_v20 = vor.u32 %v5236_v25, %v4927_v33  ;;  %v4895_v9 = vld [vmem:[#allocation2 + $0x1a0] sm:$0xf]  ;;  %v5227_v33 = vld [vmem:[#allocation2 + $0x1a4] sm:$0xf] }
 0x373   : > { %v2590_v4 = vpop.f32.mrf.mxu1  ;;  %v7137_v6 = vadd.f32 %v2563_v54, %v6900_v28  ;;  %v5238_v30 = vld [vmem:[#allocation2 + $0x1f4] sm:$0xf0]  ;;  %v4937_v7 = vld [vmem:[#allocation2 + $0x1f8] sm:$0xf0]  ;;  %v4929_v28 = vld [vmem:[#allocation2 + $0x1e8] sm:$0xf0]  ;;  %v7144_v11 = vpop.permute.xlu2 %3718  ;;  %v4904_v54 = vor.u32 %v5230_v0, %v4903_v51 }
 0x374   : > { %v4936_v39 = vor.u32 %v5238_v30, %v4935_v3  ;;  %v4940_v10 = vor.u32 %v5237_v18, %v4937_v7  ;;  %v3534_v19 = vpop.permute.xlu1 %3533  ;;  %v4932_v2 = vor.u32 %v5235_v5, %v4929_v28  ;;  %v4908_v18 = vor.u32 %v5229_v59, %v4905_v48  ;;  %v5228_v30 = vld [vmem:[#allocation2 + $0x1a4] sm:$0xf0]  ;;  %v4897_v7 = vld [vmem:[#allocation2 + $0x1a8] sm:$0xf0]  ;;  %v5226_v5 = vld [vmem:[#allocation2 + $0x194] sm:$0xf0] }
 0x375   : > { %3604 = vrot.lane.b32.xlu0 %v6909_v41, %s7538_s11  ;;  %v3536_v15 = vrot.slane %v3534_v19, 4  ;;  %v4896_v19 = vor.u32 %v5228_v30, %v4895_v9  ;;  %v3721_v42 = vrot.slane %v7144_v11, 4  ;;  %v3329_v0 = vld [vmem:[%s6100_s20 + $0x10] sm:$0xf] }
 0x376   : > { %3271 = vmatpush.bf16.msrb.mxu3 %v4936_v39  ;;  %3297 = vmatpush.bf16.msra.mxu1 %v4940_v10 }
 0x377   : > { %v3532_v8 = vpop.permute.xlu0 %3531  ;;  %3348 = vrot.lane.b32.xlu2 %v3343_v24, %s5826_s4  ;;  %v5225_v24 = vld [vmem:[#allocation2 + $0x194] sm:$0xf] }
 0x378   : > { %v3535_v41 = vrot.slane %v3532_v8, 4  ;;  %v2564_v27 = vpop.f32.mrf.mxu3  ;;  %3346 = vrot.lane.b32.xlu1 %v7148_v26, %s5826_s4  ;;  %v5000_v63 = vld [vmem:[#allocation2 + $0x70] sm:$0xf]  ;;  %v5253_v60 = vld [vmem:[#allocation2 + $0x74] sm:$0xf]  ;;  %s5872_s4 = smov 103  }
 0x37a   : > { %v3537_v29 = vsel %vm406_vm2, %v3535_v41, %v3536_v15  ;;  %3272 = vmatpush.bf16.msrb.mxu3 %v4928_v20  ;;  %3298 = vmatpush.bf16.msra.mxu1 %v4932_v2  ;;  %v4900_v15 = vor.u32 %v5227_v33, %v4897_v7  ;;  %v4889_v41 = vld [vmem:[#allocation2 + $0x198] sm:$0xf0]  ;;  %v3572_v20 = vld [vmem:[%s6100_s20 + $0x10] sm:$0xf] }
 0x37b   : > { %v3538_v13 = vsel %vm2259_vm0, %v3532_v8, %v3537_v29  ;;  %v7159_v56 = vpop.permute.xlu2 %3461  ;;  %v3587_v8 = vld [vmem:[%s6100_s20 + $0x10] sm:$0xf]  ;;  %v4892_v50 = vor.u32 %v5225_v24, %v4889_v41  ;;  %v5224_v29 = vld [vmem:[#allocation2 + $0x184] sm:$0xf0]  ;;  %vm7544_vm0 = vcmask 785408  }
 0x37c   : > { %3540 = vst [vmem:[#allocation2 + $0x78] sm:$0xff] %v3538_v13  ;;  %v3761_v1 = vpop.permute.xlu1 %3760  ;;  %v4887_v2 = vld [vmem:[#allocation2 + $0x190] sm:$0xf]  ;;  %v3507_v13 = vrot.slane %v7124_v47, 4 }
 0x37d   : > { %3620 = vrot.lane.b32.xlu0 %v3615_v43, %s7537_s10  ;;  %v3764_v45 = vrot.slane %v3761_v1, 4  ;;  %v4888_v17 = vor.u32 %v5226_v5, %v4887_v2  ;;  %s7580_s10 = sld [smem:[#allocation31_spill]] }
 0x37e   : > { %3273 = vmatpush.bf16.msrb.mxu3 %v4920_v14  ;;  %3299 = vmatpush.bf16.msra.mxu1 %v4924_v21  ;;  %v3093_v21 = vunpack.c.h.b16 %v7132_v62 }
 0x37f   : > { %v3748_v31 = vpop.permute.xlu0 %3747  ;;  %v3766_v36 = vsel %vm406_vm2, %v3764_v45, %v3765_v37  ;;  %3575 = vrot.lane.b32.xlu2 %v7148_v26, %s5871_s23  ;;  %v4879_v45 = vld [vmem:[#allocation2 + $0x180] sm:$0xf] }
 0x380   : > { %v3750_v58 = vrot.slane %v3748_v31, 4  ;;  %v3768_v53 = vsel %vm3767_vm4, %v3761_v1, %v3766_v36  ;;  %3362 = vrot.lane.b32.xlu1 %v3357_v34, %s5872_s4  ;;  %v5223_v31 = vld [vmem:[#allocation2 + $0x184] sm:$0xf]  ;;  %v4880_v11 = vor.u32 %v5224_v29, %v4879_v45  ;;  %v3095_v51 = vpack.c.b16 %v3093_v21, %v3093_v21 }
 0x381   : > { %3770 = vst [vmem:[#allocation2 + $0xf8] sm:$0xff] %v3768_v53  ;;  %v4143_v36 = vld [vmem:[%s6100_s20 + $0x10] sm:$0xf]  ;;  %vm7560_vm4 = vcmask 564224  }
 0x382   : > { %v3751_v38 = vsel %vm406_vm2, %v3749_v46, %v3750_v58  ;;  %3274 = vmatpush.bf16.msrb.mxu3 %v4912_v35  ;;  %3300 = vmatpush.bf16.msra.mxu1 %v4916_v49  ;;  %v4884_v35 = vor.u32 %v5223_v31, %v4881_v23  ;;  %v4129_v21 = vld [vmem:[%s6100_s20 + $0x10] sm:$0xf] }
 0x383   : > { %v3753_v32 = vsel %vm3752_vm5, %v7100_v52, %v3751_v38  ;;  %v5254_v57 = vld [vmem:[#allocation2 + $0x74] sm:$0xf0]  ;;  %v5002_v3 = vld [vmem:[#allocation2 + $0x78] sm:$0xf0]  ;;  %v7169_v52 = vpop.permute.xlu2 %3477  ;;  %vm7561_vm5 = vcmask 809984  }
 0x384   : > { %3755 = vst [vmem:[#allocation2 + $0xf0] sm:$0xff] %v3753_v32  ;;  %v5001_v16 = vor.u32 %v5254_v57, %v5000_v63  ;;  %v5005_v4 = vor.u32 %v5253_v60, %v5002_v3  ;;  %v3492_v39 = vpop.permute.xlu1 %3491 }
 0x385   : > { %3360 = vrot.lane.b32.xlu0 %v7148_v26, %s5872_s4  ;;  %v3494_v10 = vrot.slane %v3492_v39, 4 }
 0x386   : > { %3275 = vmatpush.bf16.msrb.mxu3 %v4904_v54  ;;  %3301 = vmatpush.bf16.msra.mxu1 %v4908_v18 }
 0x387   : > { %3974 = vmatpush.bf16.msra.mxu2 %v5001_v16  ;;  %4000 = vmatpush.bf16.msrb.mxu0 %v5005_v4  ;;  %v3490_v25 = vpop.permute.xlu0 %3489 }
 0x388   : > { %v3493_v28 = vrot.slane %v3490_v25, 4  ;;  %3592 = vrot.lane.b32.xlu2 %v3587_v8, %s7540_s3  ;;  %3590 = vrot.lane.b32.xlu1 %v7148_v26, %s7540_s3  ;;  %v5270_v14 = vld [vmem:[#allocation2 + $0xf4] sm:$0xf0]  ;;  %v5066_v44 = vld [vmem:[#allocation2 + $0xf8] sm:$0xf0] }
 0x389   : > { %v4115_v8 = vld [vmem:[%s6100_s20 + $0x10] sm:$0xf] }
 0x38a   : > { %v3495_v27 = vsel %vm406_vm2, %v3493_v28, %v3494_v10  ;;  %3276 = vmatpush.bf16.msrb.mxu3 %v4896_v19  ;;  %3302 = vmatpush.bf16.msra.mxu1 %v4900_v15  ;;  %v3480_v10 = vrot.slane %v7169_v52, 4  ;;  %v3557_v52 = vld [vmem:[%s6100_s20 + $0x10] sm:$0xf] }
 0x38b   : > { %v3496_v43 = vsel %vm7539_vm6, %v3490_v25, %v3495_v27  ;;  %v7182_v40 = vpop.permute.xlu2 %3702  ;;  %v5064_v37 = vld [vmem:[#allocation2 + $0xf0] sm:$0xf]  ;;  %v5269_v61 = vld [vmem:[#allocation2 + $0xf4] sm:$0xf]  ;;  %v3465_v25 = vrot.slane %v7159_v56, 4  ;;  %vm7562_vm6 = vcmask 556032  }
 0x38c   : > { %3498 = vst [vmem:[#allocation2 + $0x60] sm:$0xff] %v3496_v43  ;;  %v3717_v12 = vpop.permute.xlu1 %3716  ;;  %v5065_v62 = vor.u32 %v5270_v14, %v5064_v37  ;;  %v5069_v34 = vor.u32 %v5269_v61, %v5066_v44 }
 0x38d   : > { %3577 = vrot.lane.b32.xlu0 %v3572_v20, %s5871_s23  ;;  %v3720_v46 = vrot.slane %v3717_v12, 4  ;;  %s343_s23 = scalar_lea.vmem [#allocation10], %s4423_s29 }
 0x38e   : > { %3277 = vmatpush.bf16.msrb.mxu3 %v4888_v17  ;;  %3303 = vmatpush.bf16.msra.mxu1 %v4892_v50  ;;  %s4275_s3 = sshll.u32 %s343_s23, 4  ;;  %s4276_s3 = int_to_ptr.vmem [resolvable:$true] %s4275_s3 }
 0x38f   : > { %v3506_v1 = vpop.permute.xlu0 %3505  ;;  %v3722_v49 = vsel %vm406_vm2, %v3720_v46, %v3721_v42 }
 0x390   : > { %v3508_v58 = vrot.slane %v3506_v1, 4  ;;  %v3723_v48 = vsel %vm2712_vm11, %v3717_v12, %v3722_v49  ;;  %3334 = vrot.lane.b32.xlu2 %v3329_v0, %s5759_s8  ;;  %4148 = vrot.lane.b32.xlu1 %v4143_v36, %s7542_s24  ;;  %s5873_s8 = smov 75   ;;  %vm7546_vm11 = vcmask 531456  }
 0x391   : > { %3725 = vst [vmem:[#allocation2 + $0xe0] sm:$0xff] %v3723_v48 }
 0x392   : > { %v3509_v53 = vsel %vm406_vm2, %v3507_v13, %v3508_v58  ;;  %3278 = vmatpush.bf16.msrb.mxu3 %v4880_v11  ;;  %3304 = vmatpush.bf16.msra.mxu1 %v4884_v35  ;;  %v3706_v11 = vrot.slane %v7182_v40, 4 }
 0x393   : > { %v3510_v38 = vsel %vm7541_vm7, %v7124_v47, %v3509_v53  ;;  %v7195_v59 = vpop.permute.xlu2 %3435  ;;  %v3542_v47 = vld [vmem:[%s6100_s20 + $0x10] sm:$0xf]  ;;  %v4992_v3 = vld [vmem:[#allocation2 + $0x60] sm:$0xf]  ;;  %vm3397_vm7 = vcmask 826368  }
 0x394   : > { %3512 = vst [vmem:[#allocation2 + $0x68] sm:$0xff] %v3510_v38  ;;  %v3733_v63 = vpop.permute.xlu1 %3732  ;;  %v5251_v4 = vld [vmem:[#allocation2 + $0x64] sm:$0xf]  ;;  %v3438_v58 = vrot.slane %v7195_v59, 4 }
 0x395   : > { %4146 = vrot.lane.b32.xlu0 %v7148_v26, %s7542_s24  ;;  %3279 = vmatmul.bf16.vlgmr.msrb.gmra.mxu3 %v3095_v51  ;;  %v3735_v60 = vrot.slane %v3733_v63, 4  ;;  %v4087_v38 = vld [vmem:[%s6100_s20 + $0x10] sm:$0xf] }
 0x396   : > { %3987 = vmatpush.bf16.msra.mxu3 %v5065_v62  ;;  %4013 = vmatpush.bf16.msrb.mxu1 %v5069_v34 }
 0x397   : > { %3305 = vmatmul.bf16.vlgmr.msra.gmra.mxu1 %v3095_v51  ;;  %v3731_v32 = vpop.permute.xlu0 %3730  ;;  %v4101_v51 = vld [vmem:[%s6100_s20 + $0x10] sm:$0xf] }
 0x398   : > { %v3734_v54 = vrot.slane %v3731_v32, 4  ;;  %3547 = vrot.lane.b32.xlu1 %v3542_v47, %s5873_s8  ;;  %3560 = vrot.lane.b32.xlu2 %v7148_v26, %s5874_s17  ;;  %v5056_v2 = vld [vmem:[#allocation2 + $0xe0] sm:$0xf]  ;;  %v5267_v24 = vld [vmem:[#allocation2 + $0xe4] sm:$0xf] }
 0x39a   : > { %v3736_v57 = vsel %vm406_vm2, %v3734_v54, %v3735_v60 }
 0x39b   : > { %v3738_v18 = vsel %vm3737_vm8, %v3731_v32, %v3736_v57  ;;  %v5252_v16 = vld [vmem:[#allocation2 + $0x64] sm:$0xf0]  ;;  %v4994_v30 = vld [vmem:[#allocation2 + $0x68] sm:$0xf0]  ;;  %v7203_v9 = vpop.permute.xlu2 %3660  ;;  %v4059_v57 = vld [vmem:[%s6100_s20 + $0x10] sm:$0xf] }
 0x39c   : > { %3740 = vst [vmem:[#allocation2 + $0xe8] sm:$0xff] %v3738_v18  ;;  %v4993_v7 = vor.u32 %v5252_v16, %v4992_v3  ;;  %v4997_v39 = vor.u32 %v5251_v4, %v4994_v30  ;;  %v3476_v33 = vpop.permute.xlu1 %3475  ;;  %vm3382_vm8 = vcmask 834560  }
 0x39d   : > { %3545 = vrot.lane.b32.xlu0 %v7148_v26, %s5873_s8  ;;  %v3479_v5 = vrot.slane %v3476_v33, 4  ;;  %s4260_s8 = scalar_lea.sflag [#allocation6], %s6096_s1 }
 0x39e   : > { %3975 = vmatpush.bf16.msra.mxu2 %v4993_v7  ;;  %4001 = vmatpush.bf16.msrb.mxu0 %v4997_v39 }
 0x39f   : > { %v3464_v28 = vpop.permute.xlu0 %3463  ;;  %v3481_v15 = vsel %vm406_vm2, %v3479_v5, %v3480_v10 }
 0x3a0   : > { %v3466_v19 = vrot.slane %v3464_v28, 4  ;;  %v3482_v41 = vsel %vm7543_vm9, %v3476_v33, %v3481_v15  ;;  %4118 = vrot.lane.b32.xlu1 %v7148_v26, %s7545_s28  ;;  %4120 = vrot.lane.b32.xlu2 %v4115_v8, %s7545_s28  ;;  %vm7563_vm9 = vcmask 580608  }
 0x3a1   : > { %3484 = vst [vmem:[#allocation2 + $0x58] sm:$0xff] %v3482_v41  ;;  %v4031_v41 = vld [vmem:[%s6100_s20 + $0x10] sm:$0xf] }
 0x3a2   : > { %v3467_v20 = vsel %vm406_vm2, %v3465_v25, %v3466_v19  ;;  %v3664_v25 = vrot.slane %v7203_v9, 4 }
 0x3a3   : > { %v3468_v27 = vsel %vm7544_vm0, %v7159_v56, %v3467_v20  ;;  %v5268_v43 = vld [vmem:[#allocation2 + $0xe4] sm:$0xf0]  ;;  %v5058_v17 = vld [vmem:[#allocation2 + $0xe8] sm:$0xf0]  ;;  %v7215_v13 = vpop.permute.xlu2 %3676  ;;  %vm7564_vm0 = vcmask 982016  }
 0x3a4   : > { %3470 = vst [vmem:[#allocation2 + $0x50] sm:$0xff] %v3468_v27  ;;  %v5057_v50 = vor.u32 %v5268_v43, %v5056_v2  ;;  %v5061_v29 = vor.u32 %v5267_v24, %v5058_v17  ;;  %v3691_v42 = vpop.permute.xlu1 %3690  ;;  %v3679_v10 = vrot.slane %v7215_v13, 4  ;;  %v4073_v2 = vld [vmem:[%s6100_s20 + $0x10] sm:$0xf] }
 0x3a5   : > { %3562 = vrot.lane.b32.xlu0 %v3557_v52, %s5874_s17  ;;  %v3693_v23 = vrot.slane %v3691_v42, 4 }
 0x3a6   : > { %3988 = vmatpush.bf16.msra.mxu3 %v5057_v50  ;;  %4014 = vmatpush.bf16.msrb.mxu1 %v5061_v29 }
 0x3a7   : > { %v3689_v14 = vpop.permute.xlu0 %3688 }
 0x3a8   : > { %v3692_v56 = vrot.slane %v3689_v14, 4  ;;  %v5250_v37 = vld [vmem:[#allocation2 + $0x54] sm:$0xf0]  ;;  %v4986_v61 = vld [vmem:[#allocation2 + $0x58] sm:$0xf0]  ;;  %4134 = vrot.lane.b32.xlu1 %v4129_v21, %s7547_s5  ;;  %4090 = vrot.lane.b32.xlu2 %v7148_v26, %s7548_s9 }
 0x3a9   : > { %v4045_v21 = vld [vmem:[%s6100_s20 + $0x10] sm:$0xf]  ;;  %s7576_s20 = sld [smem:[#allocation18_spill]] }
 0x3aa   : > { %v3694_v12 = vsel %vm406_vm2, %v3692_v56, %v3693_v23 }
 0x3ab   : > { %v3695_v44 = vsel %vm7546_vm11, %v3689_v14, %v3694_v12  ;;  %v4984_v46 = vld [vmem:[#allocation2 + $0x50] sm:$0xf]  ;;  %v5249_v1 = vld [vmem:[#allocation2 + $0x54] sm:$0xf]  ;;  %v7227_v35 = vpop.permute.xlu2 %3419  ;;  %vm7565_vm11 = vcmask 572416  }
 0x3ac   : > { %3697 = vst [vmem:[#allocation2 + $0xd0] sm:$0xff] %v3695_v44  ;;  %v4985_v45 = vor.u32 %v5250_v37, %v4984_v46  ;;  %v4989_v31 = vor.u32 %v5249_v1, %v4986_v61  ;;  %v3434_v49 = vpop.permute.xlu1 %3433 }
 0x3ad   : > { %4132 = vrot.lane.b32.xlu0 %v7148_v26, %s7547_s5  ;;  %v3437_v62 = vrot.slane %v3434_v49, 4 }
 0x3ae   : > { %3976 = vmatpush.bf16.msra.mxu2 %v4985_v45  ;;  %4002 = vmatpush.bf16.msrb.mxu0 %v4989_v31 }
 0x3af   : > { %v3705_v34 = vpop.permute.xlu0 %3704  ;;  %v3439_v36 = vsel %vm406_vm2, %v3437_v62, %v3438_v58 }
 0x3b0   : > { %v3707_v0 = vrot.slane %v3705_v34, 4  ;;  %v3440_v48 = vsel %vm7549_vm10, %v3434_v49, %v3439_v36  ;;  %4104 = vrot.lane.b32.xlu1 %v7148_v26, %s7551_s13  ;;  %4106 = vrot.lane.b32.xlu2 %v4101_v51, %s7551_s13  ;;  %vm3367_vm10 = vcmask 842752   ;;  %s5636_s13 = scalar_lea.hbm %s7580_s10, 64 }
 0x3b1   : > { %3442 = vst [vmem:[#allocation2 + $0x40] sm:$0xff] %v3440_v48 }
 0x3b2   : > { %v3708_v53 = vsel %vm406_vm2, %v3706_v11, %v3707_v0  ;;  %v3423_v11 = vrot.slane %v7227_v35, 4 }
 0x3b3   : > { %v3709_v59 = vsel %vm7550_vm13, %v7182_v40, %v3708_v53  ;;  %v7240_v63 = vpop.permute.xlu2 %3634  ;;  %v5048_v18 = vld [vmem:[#allocation2 + $0xd0] sm:$0xf]  ;;  %v5265_v4 = vld [vmem:[#allocation2 + $0xd4] sm:$0xf]  ;;  %vm7566_vm13 = vcmask 588800  }
 0x3b4   : > { %3711 = vst [vmem:[#allocation2 + $0xd8] sm:$0xff] %v3709_v59  ;;  %v3450_v60 = vpop.permute.xlu1 %3449  ;;  %v3637_v58 = vrot.slane %v7240_v63, 4 }
 0x3b5   : > { %4092 = vrot.lane.b32.xlu0 %v4087_v38, %s7548_s9  ;;  %v3452_v32 = vrot.slane %v3450_v60, 4 }
 0x3b7   : > { %v3448_v54 = vpop.permute.xlu0 %3447 }
 0x3b8   : > { %v3451_v47 = vrot.slane %v3448_v54, 4  ;;  %4064 = vrot.lane.b32.xlu1 %v4059_v57, %s7553_s14  ;;  %4076 = vrot.lane.b32.xlu2 %v7148_v26, %s7554_s6  ;;  %v4976_v24 = vld [vmem:[#allocation2 + $0x40] sm:$0xf]  ;;  %v5247_v27 = vld [vmem:[#allocation2 + $0x44] sm:$0xf] }
 0x3ba   : > { %v3453_v3 = vsel %vm406_vm2, %v3451_v47, %v3452_v32 }
 0x3bb   : > { %v3454_v40 = vsel %vm7552_vm14, %v3448_v54, %v3453_v3  ;;  %v5266_v16 = vld [vmem:[#allocation2 + $0xd4] sm:$0xf0]  ;;  %v5050_v30 = vld [vmem:[#allocation2 + $0xd8] sm:$0xf0]  ;;  %v7252_v33 = vpop.permute.xlu2 %3375  ;;  %vm7567_vm14 = vcmask 293888  }
 0x3bc   : > { %3456 = vst [vmem:[#allocation2 + $0x48] sm:$0xff] %v3454_v40  ;;  %v5049_v7 = vor.u32 %v5266_v16, %v5048_v18  ;;  %v5053_v39 = vor.u32 %v5265_v4, %v5050_v30  ;;  %v3675_v5 = vpop.permute.xlu1 %3674 }
 0x3bd   : > { %4062 = vrot.lane.b32.xlu0 %v7148_v26, %s7553_s14  ;;  %v3678_v28 = vrot.slane %v3675_v5, 4 }
 0x3be   : > { %3989 = vmatpush.bf16.msra.mxu3 %v5049_v7  ;;  %4015 = vmatpush.bf16.msrb.mxu1 %v5053_v39 }
 0x3bf   : > { %v3663_v19 = vpop.permute.xlu0 %3662  ;;  %v3680_v8 = vsel %vm406_vm2, %v3678_v28, %v3679_v10 }
 0x3c0   : > { %v3665_v15 = vrot.slane %v3663_v19, 4  ;;  %v3681_v20 = vsel %vm7555_vm1, %v3675_v5, %v3680_v8  ;;  %4034 = vrot.lane.b32.xlu1 %v7148_v26, %s7557_s25  ;;  %4036 = vrot.lane.b32.xlu2 %v4031_v41, %s7557_s25  ;;  %vm3552_vm1 = vcmask 613376  }
 0x3c1   : > { %3683 = vst [vmem:[#allocation2 + $0xc8] sm:$0xff] %v3681_v20 }
 0x3c2   : > { %v3666_v52 = vsel %vm406_vm2, %v3664_v25, %v3665_v15 }
 0x3c3   : > { %v3667_v43 = vsel %vm7556_vm15, %v7203_v9, %v3666_v52  ;;  %v5248_v17 = vld [vmem:[#allocation2 + $0x44] sm:$0xf0]  ;;  %v4978_v50 = vld [vmem:[#allocation2 + $0x48] sm:$0xf0]  ;;  %v3393_v42 = vpop.permute.xlu2 %3392  ;;  %vm3567_vm15 = vcmask 605184  }
 0x3c4   : > { %3669 = vst [vmem:[#allocation2 + $0xc0] sm:$0xff] %v3667_v43  ;;  %v4977_v29 = vor.u32 %v5248_v17, %v4976_v24  ;;  %v4981_v13 = vor.u32 %v5247_v27, %v4978_v50  ;;  %v3408_v23 = vpop.permute.xlu1 %3407  ;;  %v3395_v30 = vrot.slane %v3393_v42, 4 }
 0x3c5   : > { %4078 = vrot.lane.b32.xlu0 %v4073_v2, %s7554_s6  ;;  %v3410_v14 = vrot.slane %v3408_v23, 4 }
 0x3c6   : > { %3977 = vmatpush.bf16.msra.mxu2 %v4977_v29  ;;  %4003 = vmatpush.bf16.msrb.mxu0 %v4981_v13 }
 0x3c7   : > { %v3406_v56 = vpop.permute.xlu0 %3405 }
 0x3c8   : > { %v3409_v9 = vrot.slane %v3406_v56, 4  ;;  %v5264_v37 = vld [vmem:[#allocation2 + $0xc4] sm:$0xf0]  ;;  %v5042_v61 = vld [vmem:[#allocation2 + $0xc8] sm:$0xf0]  ;;  %4050 = vrot.lane.b32.xlu1 %v4045_v21, %s7559_s21 }
 0x3ca   : > { %v3411_v12 = vsel %vm406_vm2, %v3409_v9, %v3410_v14 }
 0x3cb   : > { %v3412_v44 = vsel %vm7558_vm3, %v3406_v56, %v3411_v12  ;;  %v5040_v46 = vld [vmem:[#allocation2 + $0xc0] sm:$0xf]  ;;  %v5263_v1 = vld [vmem:[#allocation2 + $0xc4] sm:$0xf]  ;;  %v7273_v49 = vpop.permute.xlu2 %3618  ;;  %vm7568_vm3 = vcmask 310272  }
 0x3cc   : > { %3414 = vst [vmem:[#allocation2 + $0x30] sm:$0xff] %v3412_v44  ;;  %v5041_v45 = vor.u32 %v5264_v37, %v5040_v46  ;;  %v5045_v31 = vor.u32 %v5263_v1, %v5042_v61  ;;  %v3633_v62 = vpop.permute.xlu1 %3632  ;;  %v3622_v61 = vrot.slane %v7273_v49, 4  ;;  %v3336_v1 = vrot.slane %v7126_v22, 4 }
 0x3cd   : > { %4048 = vrot.lane.b32.xlu0 %v7148_v26, %s7559_s21  ;;  %v3636_v34 = vrot.slane %v3633_v62, 4 }
 0x3ce   : > { %3990 = vmatpush.bf16.msra.mxu3 %v5041_v45  ;;  %4016 = vmatpush.bf16.msrb.mxu1 %v5045_v31 }
 0x3cf   : > { %v3422_v0 = vpop.permute.xlu0 %3421  ;;  %v3638_v51 = vsel %vm406_vm2, %v3636_v34, %v3637_v58 }
 0x3d0   : > { %v3424_v36 = vrot.slane %v3422_v0, 4  ;;  %v3639_v48 = vsel %vm7560_vm4, %v3633_v62, %v3638_v51  ;;  %vm7569_vm4 = vcmask 302080  }
 0x3d1   : > { %3641 = vst [vmem:[#allocation2 + $0xb0] sm:$0xff] %v3639_v48 }
 0x3d2   : > { %v3425_v53 = vsel %vm406_vm2, %v3423_v11, %v3424_v36 }
 0x3d3   : > { %v3426_v26 = vsel %vm7561_vm5, %v7227_v35, %v3425_v53  ;;  %v7280_v38 = vpop.permute.xlu2 %3348  ;;  %v4968_v47 = vld [vmem:[#allocation2 + $0x30] sm:$0xf]  ;;  %v5245_v18 = vld [vmem:[#allocation2 + $0x34] sm:$0xf]  ;;  %v3379_v35 = vrot.slane %v7252_v33, 4  ;;  %vm7570_vm5 = vcmask 318464  }
 0x3d4   : > { %3428 = vst [vmem:[#allocation2 + $0x38] sm:$0xff] %v3426_v26  ;;  %v3649_v59 = vpop.permute.xlu1 %3648  ;;  %v3351_v37 = vrot.slane %v7280_v38, 4 }
 0x3d5   : > { %v3651_v63 = vrot.slane %v3649_v59, 4 }
 0x3d7   : > { %v3647_v60 = vpop.permute.xlu0 %3646 }
 0x3d8   : > { %v3650_v32 = vrot.slane %v3647_v60, 4  ;;  %v5032_v8 = vld [vmem:[#allocation2 + $0xb0] sm:$0xf]  ;;  %v5261_v41 = vld [vmem:[#allocation2 + $0xb4] sm:$0xf] }
 0x3da   : > { %v3652_v54 = vsel %vm406_vm2, %v3650_v32, %v3651_v63 }
 0x3db   : > { %v3653_v57 = vsel %vm7562_vm6, %v3647_v60, %v3652_v54  ;;  %v5246_v3 = vld [vmem:[#allocation2 + $0x34] sm:$0xf0]  ;;  %v4970_v40 = vld [vmem:[#allocation2 + $0x38] sm:$0xf0]  ;;  %v7285_v7 = vpop.permute.xlu2 %3575  ;;  %vm7571_vm6 = vcmask 326656  }
 0x3dc   : > { %3655 = vst [vmem:[#allocation2 + $0xb8] sm:$0xff] %v3653_v57  ;;  %v4969_v16 = vor.u32 %v5246_v3, %v4968_v47  ;;  %v4973_v4 = vor.u32 %v5245_v18, %v4970_v40  ;;  %v3391_v39 = vpop.permute.xlu1 %3390 }
 0x3dd   : > { %v3394_v10 = vrot.slane %v3391_v39, 4 }
 0x3de   : > { %3978 = vmatpush.bf16.msra.mxu2 %v4969_v16  ;;  %4004 = vmatpush.bf16.msrb.mxu0 %v4973_v4  ;;  %v3579_v4 = vrot.slane %v7285_v7, 4 }
 0x3df   : > { %v3378_v25 = vpop.permute.xlu0 %3377  ;;  %v3396_v28 = vsel %vm406_vm2, %v3394_v10, %v3395_v30 }
 0x3e0   : > { %v3380_v5 = vrot.slane %v3378_v25, 4  ;;  %v3398_v19 = vsel %vm3397_vm7, %v3391_v39, %v3396_v28  ;;  %vm7572_vm7 = vcmask 343040  }
 0x3e1   : > { %3400 = vst [vmem:[#allocation2 + $0x28] sm:$0xff] %v3398_v19 }
 0x3e2   : > { %v3381_v15 = vsel %vm406_vm2, %v3379_v35, %v3380_v5 }
 0x3e3   : > { %v3383_v20 = vsel %vm3382_vm8, %v7252_v33, %v3381_v15  ;;  %v5262_v52 = vld [vmem:[#allocation2 + $0xb4] sm:$0xf0]  ;;  %v5034_v2 = vld [vmem:[#allocation2 + $0xb8] sm:$0xf0]  ;;  %v7290_v43 = vpop.permute.xlu2 %3592  ;;  %vm7573_vm8 = vcmask 359424  }
 0x3e4   : > { %3385 = vst [vmem:[#allocation2 + $0x20] sm:$0xff] %v3383_v20  ;;  %v5033_v24 = vor.u32 %v5262_v52, %v5032_v8  ;;  %v5037_v27 = vor.u32 %v5261_v41, %v5034_v2  ;;  %v3607_v17 = vpop.permute.xlu1 %3606  ;;  %v3595_v18 = vrot.slane %v7290_v43, 4 }
 0x3e5   : > { %v3609_v50 = vrot.slane %v3607_v17, 4 }
 0x3e6   : > { %3991 = vmatpush.bf16.msra.mxu3 %v5033_v24  ;;  %4017 = vmatpush.bf16.msrb.mxu1 %v5037_v27 }
 0x3e7   : > { %v3605_v29 = vpop.permute.xlu0 %3604 }
 0x3e8   : > { %v3608_v13 = vrot.slane %v3605_v29, 4  ;;  %v5244_v23 = vld [vmem:[#allocation2 + $0x24] sm:$0xf0]  ;;  %v4962_v14 = vld [vmem:[#allocation2 + $0x28] sm:$0xf0] }
 0x3ea   : > { %v3610_v42 = vsel %vm406_vm2, %v3608_v13, %v3609_v50  ;;  %v7319_v50 = vld [vmem:[%s6113_s7 + $0x20] sm:$0xff] }
 0x3eb   : > { %v3611_v56 = vsel %vm7563_vm9, %v3605_v29, %v3610_v42  ;;  %v4960_v33 = vld [vmem:[#allocation2 + $0x20] sm:$0xf]  ;;  %v5243_v9 = vld [vmem:[#allocation2 + $0x24] sm:$0xf]  ;;  %v3335_v44 = vpop.permute.xlu2 %3334  ;;  %v3808_v13 = vunpack.c.l.b16 %v7319_v50  ;;  %vm7574_vm9 = vcmask 334848  }
 0x3ec   : > { %3613 = vst [vmem:[#allocation2 + $0xa0] sm:$0xff] %v3611_v56  ;;  %v4961_v21 = vor.u32 %v5244_v23, %v4960_v33  ;;  %v4965_v12 = vor.u32 %v5243_v9, %v4962_v14  ;;  %v3347_v46 = vpop.permute.xlu1 %3346  ;;  %v3337_v45 = vrot.slane %v3335_v44, 4  ;;  %v4944_v14 = vld [vmem:[#allocation2] sm:$0xf]  ;;  %v5239_v56 = vld [vmem:[#allocation2 + $0x4] sm:$0xf] }
 0x3ed   : > { %v3350_v31 = vrot.slane %v3347_v46, 4 }
 0x3ee   : > { %3979 = vmatpush.bf16.msra.mxu2 %v4961_v21  ;;  %4005 = vmatpush.bf16.msrb.mxu0 %v4965_v12  ;;  %v3338_v62 = vsel %vm406_vm2, %v3336_v1, %v3337_v45  ;;  %v3810_v21 = vpack.c.b16 %v3808_v13, %v3808_v13 }
 0x3ef   : > { %v3621_v58 = vpop.permute.xlu0 %3620  ;;  %v3352_v34 = vsel %vm406_vm2, %v3350_v31, %v3351_v37  ;;  %v3339_v0 = vsel %vm7564_vm0, %v7126_v22, %v3338_v62  ;;  %v7305_v53 = vpop.f32.mrf.mxu0  ;;  %vm7575_vm0 = vcmask 351232  }
 0x3f0   : > { %v3623_v11 = vrot.slane %v3621_v58, 4  ;;  %v3353_v36 = vsel %vm2065_vm12, %v3347_v46, %v3352_v34  ;;  %3341 = vst [vmem:[#allocation2 + $0x8] sm:$0xff] %v3339_v0  ;;  %vm3582_vm12 = vcmask 596992  }
 0x3f1   : > { %3355 = vst [vmem:[#allocation2 + $0x10] sm:$0xff] %v3353_v36 }
 0x3f2   : > { %v3624_v51 = vsel %vm406_vm2, %v3622_v61, %v3623_v11 }
 0x3f3   : > { %v3625_v48 = vsel %vm7565_vm11, %v7273_v49, %v3624_v51  ;;  %v5024_v54 = vld [vmem:[#allocation2 + $0xa0] sm:$0xf]  ;;  %v5259_v47 = vld [vmem:[#allocation2 + $0xa4] sm:$0xf]  ;;  %v7312_v25 = vpop.permute.xlu2 %3560 }
 0x3f4   : > { %3627 = vst [vmem:[#allocation2 + $0xa8] sm:$0xff] %v3625_v48  ;;  %v3363_v26 = vpop.permute.xlu1 %3362 }
 0x3f5   : > { %v3365_v38 = vrot.slane %v3363_v26, 4  ;;  %v7308_v22 = vpop.f32.mrf.mxu2 }
 0x3f7   : > { %v3361_v59 = vpop.permute.xlu0 %3360  ;;  %v3295_v49 = vpop.f32.mrf.mxu0  ;;  %v5240_v43 = vld [vmem:[#allocation2 + $0x4] sm:$0xf0]  ;;  %v4946_v17 = vld [vmem:[#allocation2 + $0x8] sm:$0xf0] }
 0x3f8   : > { %v3364_v63 = vrot.slane %v3361_v59, 4  ;;  %v4952_v15 = vld [vmem:[#allocation2 + $0x10] sm:$0xf]  ;;  %v5241_v8 = vld [vmem:[#allocation2 + $0x14] sm:$0xf]  ;;  %v4949_v9 = vor.u32 %v5239_v56, %v4946_v17 }
 0x3fa   : > { %v3366_v60 = vsel %vm406_vm2, %v3364_v63, %v3365_v38 }
 0x3fb   : > { %v3368_v32 = vsel %vm3367_vm10, %v3361_v59, %v3366_v60  ;;  %v5260_v57 = vld [vmem:[#allocation2 + $0xa4] sm:$0xf0]  ;;  %v5026_v3 = vld [vmem:[#allocation2 + $0xa8] sm:$0xf0]  ;;  %v4121_v44 = vpop.permute.xlu2 %4120 }
 0x3fc   : > { %3370 = vst [vmem:[#allocation2 + $0x18] sm:$0xff] %v3368_v32  ;;  %v5025_v40 = vor.u32 %v5260_v57, %v5024_v54  ;;  %v5029_v16 = vor.u32 %v5259_v47, %v5026_v3  ;;  %v3591_v30 = vpop.permute.xlu1 %3590  ;;  %v4123_v32 = vrot.slane %v4121_v44, 4  ;;  %v3564_v54 = vrot.slane %v7312_v25, 4 }
 0x3fd   : > { %v3594_v35 = vrot.slane %v3591_v30, 4  ;;  %v3269_v41 = vpop.f32.mrf.mxu2 }
 0x3fe   : > { %3992 = vmatpush.bf16.msra.mxu3 %v5025_v40  ;;  %4018 = vmatpush.bf16.msrb.mxu1 %v5029_v16 }
 0x3ff   : > { %v3578_v39 = vpop.permute.xlu0 %3577  ;;  %v3596_v5 = vsel %vm406_vm2, %v3594_v35, %v3595_v18 }
 0x400   : > { %v3580_v10 = vrot.slane %v3578_v39, 4  ;;  %v3597_v28 = vsel %vm7566_vm13, %v3591_v30, %v3596_v5 }
 0x401   : > { %3599 = vst [vmem:[#allocation2 + $0x98] sm:$0xff] %v3597_v28 }
 0x402   : > { %v3581_v19 = vsel %vm406_vm2, %v3579_v4, %v3580_v10 }
 0x403   : > { %v3583_v20 = vsel %vm3582_vm12, %v7285_v7, %v3581_v19  ;;  %v5242_v52 = vld [vmem:[#allocation2 + $0x14] sm:$0xf0]  ;;  %v4954_v2 = vld [vmem:[#allocation2 + $0x18] sm:$0xf0]  ;;  %v4945_v7 = vor.u32 %v5240_v43, %v4944_v14  ;;  %v4091_v60 = vpop.permute.xlu2 %4090 }
 0x404   : > { %3585 = vst [vmem:[#allocation2 + $0x90] sm:$0xff] %v3583_v20  ;;  %v4953_v24 = vor.u32 %v5242_v52, %v4952_v15  ;;  %v4957_v27 = vor.u32 %v5241_v8, %v4954_v2  ;;  %v4149_v29 = vpop.permute.xlu1 %4148 }
 0x405   : > { %v4151_v42 = vrot.slane %v4149_v29, 4 }
 0x406   : > { %3980 = vmatpush.bf16.msra.mxu2 %v4953_v24  ;;  %4006 = vmatpush.bf16.msrb.mxu0 %v4957_v27 }
 0x407   : > { %v4147_v23 = vpop.permute.xlu0 %4146 }
 0x408   : > { %v4150_v33 = vrot.slane %v4147_v23, 4  ;;  %v5258_v37 = vld [vmem:[#allocation2 + $0x94] sm:$0xf0]  ;;  %v5018_v61 = vld [vmem:[#allocation2 + $0x98] sm:$0xf0] }
 0x40a   : > { %v4152_v12 = vsel %vm406_vm2, %v4150_v33, %v4151_v42  ;;  %3981 = vmatpush.bf16.msra.mxu2 %v4945_v7  ;;  %4007 = vmatpush.bf16.msrb.mxu0 %v4949_v9  ;;  %v4094_v42 = vrot.slane %v4091_v60, 4 }
 0x40b   : > { %v4153_v46 = vsel %vm7567_vm14, %v4147_v23, %v4152_v12  ;;  %v5016_v1 = vld [vmem:[#allocation2 + $0x90] sm:$0xf]  ;;  %v5257_v45 = vld [vmem:[#allocation2 + $0x94] sm:$0xf]  ;;  %v4107_v5 = vpop.permute.xlu2 %4106 }
 0x40c   : > { %4155 = vst [vmem:[#allocation2 + $0x140] sm:$0xff] %v4153_v46  ;;  %v5017_v31 = vor.u32 %v5258_v37, %v5016_v1  ;;  %v5021_v58 = vor.u32 %v5257_v45, %v5018_v61  ;;  %v4194_v11 = vunpack.c.l.b16 %v4153_v46  ;;  %v3548_v62 = vpop.permute.xlu1 %3547  ;;  %v4195_v28 = vunpack.c.h.b16 %v4153_v46 }
 0x40d   : > { %3982 = vmatmul.bf16.vlgmr.msra.gmra.mxu2 %v3810_v21  ;;  %4008 = vmatmul.bf16.vlgmr.msrb.gmra.mxu0 %v3810_v21  ;;  %v3550_v0 = vrot.slane %v3548_v62, 4  ;;  %v4109_v29 = vrot.slane %v4107_v5, 4 }
 0x40e   : > { %3993 = vmatpush.bf16.msra.mxu3 %v5017_v31  ;;  %4019 = vmatpush.bf16.msrb.mxu1 %v5021_v58  ;;  %v4204_v34 = vpack.c.b16 %v4194_v11, %v4194_v11  ;;  %v4205_v2 = vpack.c.b16 %v4195_v28, %v4195_v28 }
 0x40f   : > { %v3546_v36 = vpop.permute.xlu0 %3545 }
 0x410   : > { %v3549_v51 = vrot.slane %v3546_v36, 4  ;;  %v4220_v48 = vsel %vm406_vm2, %v4204_v34, 0 }
 0x411   : > { %4228 = vmatpush.bf16.msrb.mxu2 %v4220_v48 }
 0x412   : > { %v3551_v26 = vsel %vm406_vm2, %v3549_v51, %v3550_v0 }
 0x413   : > { %v3553_v38 = vsel %vm3552_vm1, %v3546_v36, %v3551_v26  ;;  %v4077_v7 = vpop.permute.xlu2 %4076 }
 0x414   : > { %v3306_v59 = vpop.f32.mrf.mxu1  ;;  %3555 = vst [vmem:[#allocation2 + $0x80] sm:$0xff] %v3553_v38  ;;  %v4119_v57 = vpop.permute.xlu1 %4118 }
 0x415   : > { %v3307_v63 = vadd.f32 %v3306_v59, %v7305_v53  ;;  %v4122_v3 = vrot.slane %v4119_v57, 4 }
 0x417   : > { %v7329_v47 = vadd.f32 %v3307_v63, %v7122_v55  ;;  %v3563_v49 = vpop.permute.xlu0 %3562  ;;  %v4124_v16 = vsel %vm406_vm2, %v4122_v3, %v4123_v32 }
 0x418   : > { %v3565_v18 = vrot.slane %v3563_v49, 4  ;;  %v3280_v40 = vpop.f32.mrf.mxu3  ;;  %v4125_v30 = vsel %vm7568_vm3, %v4119_v57, %v4124_v16 }
 0x419   : > { %v3281_v4 = vadd.f32 %v3280_v40, %v7308_v22  ;;  %4127 = vst [vmem:[#allocation2 + $0x130] sm:$0xff] %v4125_v30  ;;  %v3809_v22 = vunpack.c.h.b16 %v7319_v50  ;;  %v4223_v50 = vsel %vm406_vm2, %v4205_v2, 0 }
 0x41a   : > { %v3566_v53 = vsel %vm406_vm2, %v3564_v54, %v3565_v18  ;;  %v4080_v54 = vrot.slane %v4077_v7, 4 }
 0x41b   : > { %v3568_v35 = vsel %vm3567_vm15, %v7312_v25, %v3566_v53  ;;  %v7337_v55 = vadd.f32 %v3281_v4, %v7137_v6  ;;  %v5008_v52 = vld [vmem:[#allocation2 + $0x80] sm:$0xf]  ;;  %v5255_v6 = vld [vmem:[#allocation2 + $0x84] sm:$0xf]  ;;  %v3811_v13 = vpack.c.b16 %v3809_v22, %v3809_v22  ;;  %v4037_v48 = vpop.permute.xlu2 %4036 }
 0x41c   : > { %v3308_v39 = vpop.f32.mrf.mxu1  ;;  %3570 = vst [vmem:[#allocation2 + $0x88] sm:$0xff] %v3568_v35  ;;  %v4135_v10 = vpop.permute.xlu1 %4134  ;;  %v4039_v32 = vrot.slane %v4037_v48, 4 }
 0x41d   : > { %v4137_v19 = vrot.slane %v4135_v10, 4 }
 0x41f   : > { %v4133_v15 = vpop.permute.xlu0 %4132 }
 0x420   : > { %v4136_v8 = vrot.slane %v4133_v15, 4  ;;  %v3282_v41 = vpop.f32.mrf.mxu3  ;;  %v5097_v37 = vld [vmem:[#allocation2 + $0x130] sm:$0xf]  ;;  %v5277_v61 = vld [vmem:[#allocation2 + $0x134] sm:$0xf] }
 0x422   : > { %v4138_v20 = vsel %vm406_vm2, %v4136_v8, %v4137_v19 }
 0x423   : > { %v4139_v25 = vsel %vm7569_vm4, %v4133_v15, %v4138_v20  ;;  %v5256_v24 = vld [vmem:[#allocation2 + $0x84] sm:$0xf0]  ;;  %v5010_v27 = vld [vmem:[#allocation2 + $0x88] sm:$0xf0] }
 0x424   : > { %4141 = vst [vmem:[#allocation2 + $0x138] sm:$0xff] %v4139_v25  ;;  %v5009_v43 = vor.u32 %v5256_v24, %v5008_v52  ;;  %v5013_v17 = vor.u32 %v5255_v6, %v5010_v27  ;;  %v4105_v23 = vpop.permute.xlu1 %4104 }
 0x425   : > { %v4108_v14 = vrot.slane %v4105_v23, 4 }
 0x426   : > { %3994 = vmatpush.bf16.msra.mxu3 %v5009_v43  ;;  %4020 = vmatpush.bf16.msrb.mxu1 %v5013_v17  ;;  %v5070_v43 = vld [vmem:[%s6113_s7 + $0x28] sm:$0xf]  ;;  %s5106_s7 = sshll.u32 %s7576_s20, 1 }
 0x427   : > { %v4093_v56 = vpop.permute.xlu0 %4092  ;;  %v4110_v9 = vsel %vm406_vm2, %v4108_v14, %v4109_v29  ;;  %s4271_s26 = sadd.s32 %s5107_s15, %s5106_s7 }
 0x428   : > { %v4095_v33 = vrot.slane %v4093_v56, 4  ;;  %v4111_v21 = vsel %vm7570_vm5, %v4105_v23, %v4110_v9  ;;  %s5108_s30 = sshll.u32 %s4271_s26, 3 }
 0x429   : > { %3995 = vmatmul.bf16.vlgmr.msra.gmra.mxu3 %v3811_v13  ;;  %4021 = vmatmul.bf16.vlgmr.msrb.gmra.mxu1 %v3811_v13  ;;  %4113 = vst [vmem:[#allocation2 + $0x128] sm:$0xff] %v4111_v21  ;;  %s4273_s11 = scalar_lea.hbm %s7580_s10, %s5108_s30 }
 0x42a   : > { %4241 = vmatpush.bf16.msrb.mxu3 %v4223_v50  ;;  %v4096_v12 = vsel %vm406_vm2, %v4094_v42, %v4095_v33  ;;  %s4277_s24 = sshll.u32 %s4273_s11, 4  ;;  %s4278_s24 = int_to_ptr.hbm [resolvable:$true] %s4277_s24 }
 0x42b   : > { %v4097_v44 = vsel %vm7571_vm6, %v4091_v60, %v4096_v12  ;;  %v5278_v46 = vld [vmem:[#allocation2 + $0x134] sm:$0xf0]  ;;  %v5099_v1 = vld [vmem:[#allocation2 + $0x138] sm:$0xf0]  ;;  %s5630_s17 = sshra.s32 %s4278_s24, 4  ;;  %s5631_s17 = int_to_ptr.hbm [resolvable:$true] %s5630_s17 }
 0x42c   : > { %4099 = vst [vmem:[#allocation2 + $0x120] sm:$0xff] %v4097_v44  ;;  %v5098_v45 = vor.u32 %v5278_v46, %v5097_v37  ;;  %v5102_v31 = vor.u32 %v5277_v61, %v5099_v1  ;;  %v4065_v58 = vpop.permute.xlu1 %4064  ;;  %s5632_s28 = scalar_lea.hbm %s5631_s17, 16  ;;  %p5637_p0 = scmp.lt.s32.totalorder %s5631_s17, %s7580_s10 }
 0x42d   : > { %v4067_v11 = vrot.slane %v4065_v58, 4  ;;  %p5633_p7 = scmp.ne.s32.totalorder %s5631_s17, %s5632_s28  ;;  %p5638_p4 = scmp.lt.s32.totalorder %s5636_s13, %s5632_s28 }
 0x42e   : > { %4229 = vmatpush.bf16.msrb.mxu2 %v5098_v45  ;;  %4242 = vmatpush.bf16.msrb.mxu3 %v5102_v31 }
 0x42f   : > { %v4063_v62 = vpop.permute.xlu0 %4062  ;;  %p5634_p12 = pnand %p5633_p7, %p6027_p5  ;;  %p5639_p2 = por %p5638_p4, %p5637_p0 }
 0x430   : > { %v4066_v34 = vrot.slane %v4063_v62, 4  ;;  %v5276_v36 = vld [vmem:[#allocation2 + $0x124] sm:$0xf0]  ;;  %v5091_v51 = vld [vmem:[#allocation2 + $0x128] sm:$0xf0] }
 0x431   : > { %p5635_p13 = pneg %p5634_p12 }
 0x432   : > { %v4068_v0 = vsel %vm406_vm2, %v4066_v34, %v4067_v11 }
 0x433   : > { %v4069_v26 = vsel %vm7572_vm7, %v4063_v62, %v4068_v0  ;;  %v5089_v38 = vld [vmem:[#allocation2 + $0x120] sm:$0xf]  ;;  %v5275_v59 = vld [vmem:[#allocation2 + $0x124] sm:$0xf]  ;;  %p5640_p8 = pnand %p5639_p2, %p5635_p13 }
 0x434   : > { %4071 = vst [vmem:[#allocation2 + $0x110] sm:$0xff] %v4069_v26  ;;  %v5090_v63 = vor.u32 %v5276_v36, %v5089_v38  ;;  %v5094_v60 = vor.u32 %v5275_v59, %v5091_v51  ;;  %v4035_v57 = vpop.permute.xlu1 %4034 }
 0x435   : > { %v4038_v3 = vrot.slane %v4035_v57, 4 }
 0x436   : > { %4230 = vmatpush.bf16.msrb.mxu2 %v5090_v63  ;;  %4243 = vmatpush.bf16.msrb.mxu3 %v5094_v60 }
 0x437   : > { %v4079_v49 = vpop.permute.xlu0 %4078  ;;  %v4040_v40 = vsel %vm406_vm2, %v4038_v3, %v4039_v32 }
 0x438   : > { %v4081_v18 = vrot.slane %v4079_v49, 4  ;;  %v4041_v16 = vsel %vm7573_vm8, %v4035_v57, %v4040_v40 }
 0x439   : > { %4043 = vst [vmem:[#allocation2 + $0x100] sm:$0xff] %v4041_v16 }
 0x43a   : > { %v4082_v4 = vsel %vm406_vm2, %v4080_v54, %v4081_v18 }
 0x43b   : > { %v4083_v30 = vsel %vm7574_vm9, %v4077_v7, %v4082_v4  ;;  %v5081_v28 = vld [vmem:[#allocation2 + $0x110] sm:$0xf]  ;;  %v5273_v8 = vld [vmem:[#allocation2 + $0x114] sm:$0xf] }
 0x43c   : > { %4085 = vst [vmem:[#allocation2 + $0x118] sm:$0xff] %v4083_v30  ;;  %v4051_v53 = vpop.permute.xlu1 %4050 }
 0x43d   : > { %v4053_v35 = vrot.slane %v4051_v53, 4 }
 0x43f   : > { %v4049_v39 = vpop.permute.xlu0 %4048 }
 0x440   : > { %v4052_v10 = vrot.slane %v4049_v39, 4  ;;  %v5073_v52 = vld [vmem:[#allocation2 + $0x100] sm:$0xf]  ;;  %v5271_v25 = vld [vmem:[#allocation2 + $0x104] sm:$0xf] }
 0x442   : > { %v4054_v5 = vsel %vm406_vm2, %v4052_v10, %v4053_v35  ;;  %vm7577_vm2 = vmmov %vm7566_vm13 }
 0x443   : > { %v4055_v19 = vsel %vm7575_vm0, %v4049_v39, %v4054_v5  ;;  %v5274_v15 = vld [vmem:[#allocation2 + $0x114] sm:$0xf0]  ;;  %v5083_v41 = vld [vmem:[#allocation2 + $0x118] sm:$0xf0]  ;;  %vm7579_vm11 = vmmov %vm7577_vm2 }
 0x444   : > { %4057 = vst [vmem:[#allocation2 + $0x108] sm:$0xff] %v4055_v19  ;;  %v5082_v22 = vor.u32 %v5274_v15, %v5081_v28  ;;  %v5086_v20 = vor.u32 %v5273_v8, %v5083_v41 }
 0x446   : > { %4231 = vmatpush.bf16.msrb.mxu2 %v5082_v22  ;;  %4244 = vmatpush.bf16.msrb.mxu3 %v5086_v20 }
 0x44b   : > { %v5272_v2 = vld [vmem:[#allocation2 + $0x104] sm:$0xf0]  ;;  %v5075_v24 = vld [vmem:[#allocation2 + $0x108] sm:$0xf0] }
 0x44c   : > { %v5074_v6 = vor.u32 %v5272_v2, %v5073_v52  ;;  %v5078_v27 = vor.u32 %v5271_v25, %v5075_v24 }
 0x44e   : > { %4232 = vmatpush.bf16.msrb.mxu2 %v5074_v6  ;;  %4245 = vmatpush.bf16.msrb.mxu3 %v5078_v27 }
 0x451   : > { %5103 = vmatmul.msk.bf16.vlgmr.msrb.gmra.mxu2 %vm7577_vm2, %v5070_v43  ;;  %5104 = vmatmul.msk.bf16.vlgmr.msrb.gmra.mxu3 %vm7579_vm11, %v5070_v43 }
 0x48a   : > { %v4009_v17 = vpop.f32.mrf.mxu0 }
 0x490   : > { %v3983_v29 = vpop.f32.mrf.mxu2 }
 0x492   : > { %v4011_v13 = vpop.f32.mrf.mxu0 }
 0x498   : > { %v3985_v42 = vpop.f32.mrf.mxu2 }
 0x4a6   : > { %v4022_v23 = vpop.f32.mrf.mxu1 }
 0x4a7   : > { %v4023_v50 = vadd.f32 %v4022_v23, %v4009_v17 }
 0x4a9   : > { %v4027_v14 = vadd.f32 %v4023_v50, %v7329_v47 }
 0x4ac   : > { %v3996_v56 = vpop.f32.mrf.mxu3 }
 0x4ad   : > { %v3997_v33 = vadd.f32 %v3996_v56, %v3983_v29 }
 0x4ae   : > { %v4024_v7 = vpop.f32.mrf.mxu1 }
 0x4af   : > { %v4026_v9 = vadd.f32 %v3997_v33, %v7337_v55 }
 0x4b4   : > { %v3998_v21 = vpop.f32.mrf.mxu3 }
 0x4d4   : > { %v4234_v47 = vpop.f32.mrf.mxu2  ;;  %v4247_v12 = vpop.f32.mrf.mxu3 }
 0x4d5   : > { %v4251_v37 = vadd.f32 %v4234_v47, %v4026_v9  ;;  %v4252_v61 = vadd.f32 %v4247_v12, %v4027_v14 }
 0x4d7   : > { %4257 = vst [vmem:[%s343_s23] sm:$0xff] %v4251_v37 }
 0x4d8   : > { %4258 = vst [vmem:[%s343_s23 + $0x8] sm:$0xff] %v4252_v61 }
 0x4d9   : > { %5643 = shalt.err (!%p5640_p8)
}
 0x4da   : > { %5292 = dma.vmem_to_hbm [thread:$0]  (%p6027_p5), %s4276_s3, 256, %s4278_s24, %s4260_s8  }
 0x4dc   : > { %v4236_v55 = vpop.f32.mrf.mxu2  ;;  %v4249_v44 = vpop.f32.mrf.mxu3 }
 0x4dd PF: > { %s7582_s1 = sld [smem:[#allocation21_spill]] }
 0x4de   : > { %s7583_s25 = sld [smem:[#allocation16_spill]] }
 0x4e3   : > { %p5309_p6 = scmp.ge.s32.totalorder %s7582_s1, 2 }
 0x4e4   : > { %s4289_s20 = sand.u32 1, %s7583_s25  }
 0x4e5   : > { %p5305_p1 = pnand %p5309_p6, %p6035_p10  ;;  %s4290_s18 = scalar_lea.sflag [#allocation6], %s4289_s20 }
 0x4e7   : > { %p5306_p3 = pneg %p5305_p1 }
 0x4e9   : > { %5701 = dma.done.wait (%p5306_p3), %s4290_s18, 256  }
 0x4ea   : > { %5703 = vsyncadd (%p5306_p3), %s4290_s18, 4294967040  ;;  %s24_s28 = sadd.s32 1, %s7582_s1   ;;  %s7585_s7 = sld [smem:[#allocation15_spill]] }
 0x4eb   : > { %p21_p9 = scmp.ge.s32.totalorder %s24_s28, 6   ;;  %s7586_s20 = sld [smem:[#allocation24_spill]] }
 0x4ec   : > { %s7587_s15 = sld [smem:[#allocation17_spill]]  ;;  %s7592_s18 = smov %s5710_s19 }
 0x4ed   : > { %s7588_s23 = sld [smem:[#allocation25_spill]]  ;;  %s7594_s21 = smov %s5722_s22 }
 0x4ee   : > { %s7589_s24 = sld [smem:[#allocation20_spill]]  ;;  %s7596_s25 = smov %s5742_s27 }
 0x4ef   : > { %s7590_s26 = sld [smem:[#allocation22_spill]] }
 0x4f0   : > { %s7591_s30 = sld [smem:[#allocation23_spill]]  ;;  %s7593_s19 = smov %s7585_s7 }
 0x4f2   : > { %s7595_s22 = smov %s7587_s15  ;;  %23 = sbr.rel (!%p21_p9) target bundleno = 16 (0x10), region = 115 }
 0x4f6   : > { %s7597_s27 = smov %s7591_s30 }
 0x4f7   :  { %4296 = vsyncpa [#allocation5], 1 }
 0x4f8   :  { %4298 = vsyncpa [#allocation5 + $0x1], 1 }
 0x4f9   :  { %4299 = vsyncpa [#allocation8], 1 }
 0x4fa   :  { %4301 = vsyncpa [#allocation8 + $0x1], 1 }
 0x4fb   :  { %4302 = vsyncpa [#allocation6], 1 }
 0x4fc   :  { %4304 = vsyncpa [#allocation6 + $0x1], 1 }

</bundles_post_ra>
